<compile_context>
chip_gen: v6e
topology: v6e:2x2x1
jax: 0.10.0
libtpu: 0.0.40
codegen_flags: <defaults>
</compile_context>

<pallas_src>
import functools
import math

import numpy as np

import jax
import jax.numpy as jnp
from jax.experimental import pallas as pl
from jax.experimental.pallas import tpu as pltpu


# ---------------------------------------------------------------------------
# small helpers (layout plumbing, trace-time only)
# ---------------------------------------------------------------------------
def _as_matrix(w):
    """PyTorch OIHW conv weight -> (Cin*kh*kw, Cout) GEMM matrix
    (column order c-major, then ky, kx -- matches w.reshape(Cout, -1))."""
    return w.reshape(w.shape[0], -1).T


def _stack_w(w):
    """PyTorch OIHW conv weight -> (kh*kw, Cin, Cout) per-kernel-position."""
    co, ci, kh, kw = w.shape
    return jnp.transpose(w, (2, 3, 1, 0)).reshape(kh * kw, ci, co)


def _im2col_k2s2p1(a, b, h, w):
    """a: (B*H*W, C) channels-last. 2x2 conv, stride 2, padding 1.
    Column order (c, ky, kx) to match torch weight.reshape(Cout, -1)."""
    c = a.shape[1]
    oh, ow = h // 2 + 1, w // 2 + 1
    x = a.reshape(b, h, w, c)
    x = jnp.pad(x, ((0, 0), (1, 2 * oh - h - 1), (1, 2 * ow - w - 1), (0, 0)))
    x = x.reshape(b, oh, 2, ow, 2, c)
    patches = x.transpose(0, 1, 3, 5, 2, 4).reshape(b * oh * ow, c * 4)
    return patches, oh, ow


def _sel_mats_k2s2p1(b, h, w):
    """Constant 0/1 selection matrices for a 2x2/stride-2/pad-1 conv:
    P[k] @ act_flat gathers the (ky,kx)=k patch rows (zeros for padding).
    act_flat rows are ordered (batch, y, x); block-diagonal over batch."""
    oh, ow = h // 2 + 1, w // 2 + 1
    p = np.zeros((4, b * oh * ow, b * h * w), np.float32)
    for ky in range(2):
        for kx in range(2):
            k = ky * 2 + kx
            for bb in range(b):
                for oy in range(oh):
                    iy = 2 * oy + ky - 1
                    if not 0 <= iy < h:
                        continue
                    for ox in range(ow):
                        ix = 2 * ox + kx - 1
                        if not 0 <= ix < w:
                            continue
                        p[k, bb * oh * ow + oy * ow + ox,
                          bb * h * w + iy * w + ix] = 1.0
    return p, oh, ow


def _sel_mats_valid(b, h, w, kh, kw):
    """Constant 0/1 selection matrices for a kh x kw / stride-1 / valid conv."""
    oh, ow = h - kh + 1, w - kw + 1
    p = np.zeros((kh * kw, b * oh * ow, b * h * w), np.float32)
    for ky in range(kh):
        for kx in range(kw):
            k = ky * kw + kx
            for bb in range(b):
                for oy in range(oh):
                    for ox in range(ow):
                        p[k, bb * oh * ow + oy * ow + ox,
                          bb * h * w + (oy + ky) * w + (ox + kx)] = 1.0
    return p, oh, ow


# ---------------------------------------------------------------------------
# the single fused Pallas kernel (all activations live in VMEM / vregs)
# ---------------------------------------------------------------------------
def _fused_netE_kernel(p1_ref, w1_ref,
                       p2_ref, w2_ref, g2_ref, b2_ref,
                       p3_ref, w3_ref, g3_ref, b3_ref,
                       p4_ref, w4_ref, g4_ref, b4_ref,
                       pz_ref, wz_ref,
                       out_ref, *, eps):
    def conv_sel(act, p_ref, w_ref):
        """sum_k (P_k @ act) @ W_k  -- conv as per-kernel-position matmuls."""
        kk = p_ref.shape[0]
        acc = None
        for k in range(kk):                       # unrolled at trace time
            patches = jnp.dot(p_ref[k].astype(jnp.float32), act,
                              preferred_element_type=jnp.float32)
            term = jnp.dot(patches, w_ref[k],
                           preferred_element_type=jnp.float32)
            acc = term if acc is None else acc + term
        return acc

    def bn_relu(y, g_ref, b_ref):
        """Train-mode BatchNorm (biased batch stats) + ReLU, fully in-kernel."""
        mean = jnp.mean(y, axis=0, keepdims=True)
        var = jnp.mean((y - mean) ** 2, axis=0, keepdims=True)
        scale = g_ref[...] * jax.lax.rsqrt(var + eps)
        return jnp.maximum((y - mean) * scale + b_ref[...], 0.0)

    # layer 1: conv (im2col patches precomputed in wrapper) + ReLU
    a = jnp.maximum(
        jnp.dot(p1_ref[...], w1_ref[...], preferred_element_type=jnp.float32),
        0.0)
    # layers 2-4: conv + BatchNorm + ReLU, all VMEM-resident
    a = bn_relu(conv_sel(a, p2_ref, w2_ref), g2_ref, b2_ref)
    a = bn_relu(conv_sel(a, p3_ref, w3_ref), g3_ref, b3_ref)
    a = bn_relu(conv_sel(a, p4_ref, w4_ref), g4_ref, b4_ref)
    # model_z: valid conv, no activation
    out_ref[...] = conv_sel(a, pz_ref, wz_ref).astype(out_ref.dtype)


# ---------------------------------------------------------------------------
# _netE forward (default config)
# ---------------------------------------------------------------------------
def netE_forward(x, params, *, img_height, img_width, eps=1e-5):
    """x: (B, nc, H, W) f32 -> (B, nz, H//16, W//16) f32."""
    b, c, h, w = x.shape
    a = x.transpose(0, 2, 3, 1).reshape(b * h * w, c)     # channels-last rows

    # layer-1 patches (cheap, single XLA pass over a tiny input)
    p1, sh, sw = _im2col_k2s2p1(a, b, h, w)

    # constant selection matrices for the in-kernel im2col of layers 2..z
    p2_np, sh, sw = _sel_mats_k2s2p1(b, sh, sw)
    p3_np, sh, sw = _sel_mats_k2s2p1(b, sh, sw)
    p4_np, sh, sw = _sel_mats_k2s2p1(b, sh, sw)
    kh, kw = img_height // 16, img_width // 16
    pz_np, ohz, owz = _sel_mats_valid(b, sh, sw, kh, kw)

    nz = params["wz"].shape[0]
    args = (
        p1, _as_matrix(params["w1"]),
        jnp.asarray(p2_np, jnp.bfloat16), _stack_w(params["w2"]),
        params["gamma2"].reshape(1, -1), params["beta2"].reshape(1, -1),
        jnp.asarray(p3_np, jnp.bfloat16), _stack_w(params["w3"]),
        params["gamma3"].reshape(1, -1), params["beta3"].reshape(1, -1),
        jnp.asarray(p4_np, jnp.bfloat16), _stack_w(params["w4"]),
        params["gamma4"].reshape(1, -1), params["beta4"].reshape(1, -1),
        jnp.asarray(pz_np, jnp.bfloat16), _stack_w(params["wz"]),
    )

    out = pl.pallas_call(
        functools.partial(_fused_netE_kernel, eps=eps),
        out_shape=jax.ShapeDtypeStruct((b * ohz * owz, nz), jnp.float32),
        in_specs=[pl.BlockSpec(memory_space=pltpu.MemorySpace.VMEM)
                  for _ in args],
        out_specs=pl.BlockSpec(memory_space=pltpu.MemorySpace.VMEM),
    )(*args)

    return out.reshape(b, ohz, owz, nz).transpose(0, 3, 1, 2)


# ---------------------------------------------------------------------------
# params + pure-JAX reference
# ---------------------------------------------------------------------------
def init_params(key, nc, ngf, nz, kh, kw):
    shapes = {
        "w1": (ngf, nc, 2, 2),
        "w2": (ngf * 2, ngf, 2, 2),
        "w3": (ngf * 4, ngf * 2, 2, 2),
        "w4": (ngf * 8, ngf * 4, 2, 2),
        "wz": (nz, ngf * 8, kh, kw),
    }
    params = {}
    for name, shp in shapes.items():
        key, sub = jax.random.split(key)
        bound = 1.0 / math.sqrt(shp[1] * shp[2] * shp[3])
        params[name] = jax.random.uniform(sub, shp, jnp.float32,
                                          minval=-bound, maxval=bound)
    for idx, ch in ((2, ngf * 2), (3, ngf * 4), (4, ngf * 8)):
        key, kg, kb = jax.random.split(key, 3)
        params[f"gamma{idx}"] = 1.0 + 0.1 * jax.random.normal(kg, (ch,), jnp.float32)
        params[f"beta{idx}"] = 0.1 * jax.random.normal(kb, (ch,), jnp.float32)
    return params


def ref_forward(x, params, *, eps=1e-5):
    def conv(h, w, stride, pad):
        return jax.lax.conv_general_dilated(
            h, w, (stride, stride), [(pad, pad), (pad, pad)],
            dimension_numbers=("NCHW", "OIHW", "NCHW"),
            precision=jax.lax.Precision.HIGHEST)

    def bn(h, g, b2):
        mean = jnp.mean(h, axis=(0, 2, 3), keepdims=True)
        var = jnp.mean((h - mean) ** 2, axis=(0, 2, 3), keepdims=True)
        return ((h - mean) / jnp.sqrt(var + eps) * g.reshape(1, -1, 1, 1)
                + b2.reshape(1, -1, 1, 1))

    h = jax.nn.relu(conv(x, params["w1"], 2, 1))
    h = jax.nn.relu(bn(conv(h, params["w2"], 2, 1), params["gamma2"], params["beta2"]))
    h = jax.nn.relu(bn(conv(h, params["w3"], 2, 1), params["gamma3"], params["beta3"]))
    h = jax.nn.relu(bn(conv(h, params["w4"], 2, 1), params["gamma4"], params["beta4"]))
    return conv(h, params["wz"], 1, 0)


# ---------------------------------------------------------------------------
if __name__ == "__main__":
    # Small shapes consistent with the module: batch=2, nc=3, ngf=8, nz=16, 32x32 images.
    B, NC, NGF, NZ, IMG = 2, 3, 8, 16, 32

    key = jax.random.PRNGKey(0)
    key, kx, kp = jax.random.split(key, 3)
    x = jax.random.normal(kx, (B, NC, IMG, IMG), jnp.float32)
    params = init_params(kp, NC, NGF, NZ, IMG // 16, IMG // 16)

    fwd = jax.jit(functools.partial(netE_forward, img_height=IMG, img_width=IMG))
    out = jax.block_until_ready(fwd(x, params))
    assert out.shape == (B, NZ, 2, 2), out.shape

    ref = jax.block_until_ready(ref_forward(x, params))
    assert ref.shape == out.shape
    # loose tolerance: in-kernel MXU f32 matmuls and the HIGHEST-precision
    # reference conv may use different internal pass counts.
    assert jnp.allclose(out, ref, atol=3e-2, rtol=3e-2), \
        float(jnp.max(jnp.abs(out - ref)))

    print("KERNEL_OK")
</pallas_src>

<mosaic_0001>
module attributes {stable_mosaic.version = 11 : i64} {
  func.func @_fused_netE_kernel(%arg0: memref<578x12xf32, #tpu.memory_space<vmem>>, %arg1: memref<12x8xf32, #tpu.memory_space<vmem>>, %arg2: memref<4x162x578xbf16, #tpu.memory_space<vmem>>, %arg3: memref<4x8x16xf32, #tpu.memory_space<vmem>>, %arg4: memref<1x16xf32, #tpu.memory_space<vmem>>, %arg5: memref<1x16xf32, #tpu.memory_space<vmem>>, %arg6: memref<4x50x162xbf16, #tpu.memory_space<vmem>>, %arg7: memref<4x16x32xf32, #tpu.memory_space<vmem>>, %arg8: memref<1x32xf32, #tpu.memory_space<vmem>>, %arg9: memref<1x32xf32, #tpu.memory_space<vmem>>, %arg10: memref<4x18x50xbf16, #tpu.memory_space<vmem>>, %arg11: memref<4x32x64xf32, #tpu.memory_space<vmem>>, %arg12: memref<1x64xf32, #tpu.memory_space<vmem>>, %arg13: memref<1x64xf32, #tpu.memory_space<vmem>>, %arg14: memref<4x8x18xbf16, #tpu.memory_space<vmem>>, %arg15: memref<4x64x16xf32, #tpu.memory_space<vmem>>, %arg16: memref<8x16xf32, #tpu.memory_space<vmem>>) attributes {dimension_semantics = [], scalar_prefetch = 0 : i64, scratch_operands = 0 : i64, tpu.core_type = #tpu.core_type<tc>} {
    %c0 = arith.constant 0 : index
    %c0_0 = arith.constant 0 : index
    %0 = vector.load %arg0[%c0, %c0_0] : memref<578x12xf32, #tpu.memory_space<vmem>>, vector<578x12xf32>
    %c0_1 = arith.constant 0 : index
    %c0_2 = arith.constant 0 : index
    %1 = vector.load %arg1[%c0_1, %c0_2] : memref<12x8xf32, #tpu.memory_space<vmem>>, vector<12x8xf32>
    %cst = arith.constant dense<0.000000e+00> : vector<578x8xf32>
    %2 = tpu.matmul %0, %1, %cst {dimension_numbers = #tpu.dot_dimension_numbers<[1], [0], [0], [1], [0, 0, 1, 1], [], []>} : vector<578x12xf32>, vector<12x8xf32>, vector<578x8xf32> -> vector<578x8xf32>
    %cst_3 = arith.constant 0.000000e+00 : f32
    %3 = vector.broadcast %cst_3 : f32 to vector<578x8xf32>
    %4 = arith.maximumf %2, %3 : vector<578x8xf32>
    %c0_4 = arith.constant 0 : index
    %c0_5 = arith.constant 0 : index
    %c0_6 = arith.constant 0 : index
    %5 = vector.load %arg2[%c0_4, %c0_5, %c0_6] : memref<4x162x578xbf16, #tpu.memory_space<vmem>>, vector<1x162x578xbf16>
    %6 = vector.shape_cast %5 : vector<1x162x578xbf16> to vector<162x578xbf16>
    %7 = arith.extf %6 : vector<162x578xbf16> to vector<162x578xf32>
    %cst_7 = arith.constant dense<0.000000e+00> : vector<162x8xf32>
    %8 = tpu.matmul %7, %4, %cst_7 {dimension_numbers = #tpu.dot_dimension_numbers<[1], [0], [0], [1], [0, 0, 1, 1], [], []>} : vector<162x578xf32>, vector<578x8xf32>, vector<162x8xf32> -> vector<162x8xf32>
    %c0_8 = arith.constant 0 : index
    %c0_9 = arith.constant 0 : index
    %c0_10 = arith.constant 0 : index
    %9 = vector.load %arg3[%c0_8, %c0_9, %c0_10] : memref<4x8x16xf32, #tpu.memory_space<vmem>>, vector<1x8x16xf32>
    %10 = vector.shape_cast %9 : vector<1x8x16xf32> to vector<8x16xf32>
    %cst_11 = arith.constant dense<0.000000e+00> : vector<162x16xf32>
    %11 = tpu.matmul %8, %10, %cst_11 {dimension_numbers = #tpu.dot_dimension_numbers<[1], [0], [0], [1], [0, 0, 1, 1], [], []>} : vector<162x8xf32>, vector<8x16xf32>, vector<162x16xf32> -> vector<162x16xf32>
    %c1 = arith.constant 1 : index
    %c0_12 = arith.constant 0 : index
    %c0_13 = arith.constant 0 : index
    %12 = vector.load %arg2[%c1, %c0_12, %c0_13] : memref<4x162x578xbf16, #tpu.memory_space<vmem>>, vector<1x162x578xbf16>
    %13 = vector.shape_cast %12 : vector<1x162x578xbf16> to vector<162x578xbf16>
    %14 = arith.extf %13 : vector<162x578xbf16> to vector<162x578xf32>
    %cst_14 = arith.constant dense<0.000000e+00> : vector<162x8xf32>
    %15 = tpu.matmul %14, %4, %cst_14 {dimension_numbers = #tpu.dot_dimension_numbers<[1], [0], [0], [1], [0, 0, 1, 1], [], []>} : vector<162x578xf32>, vector<578x8xf32>, vector<162x8xf32> -> vector<162x8xf32>
    %c1_15 = arith.constant 1 : index
    %c0_16 = arith.constant 0 : index
    %c0_17 = arith.constant 0 : index
    %16 = vector.load %arg3[%c1_15, %c0_16, %c0_17] : memref<4x8x16xf32, #tpu.memory_space<vmem>>, vector<1x8x16xf32>
    %17 = vector.shape_cast %16 : vector<1x8x16xf32> to vector<8x16xf32>
    %cst_18 = arith.constant dense<0.000000e+00> : vector<162x16xf32>
    %18 = tpu.matmul %15, %17, %cst_18 {dimension_numbers = #tpu.dot_dimension_numbers<[1], [0], [0], [1], [0, 0, 1, 1], [], []>} : vector<162x8xf32>, vector<8x16xf32>, vector<162x16xf32> -> vector<162x16xf32>
    %19 = arith.addf %11, %18 : vector<162x16xf32>
    %c2 = arith.constant 2 : index
    %c0_19 = arith.constant 0 : index
    %c0_20 = arith.constant 0 : index
    %20 = vector.load %arg2[%c2, %c0_19, %c0_20] : memref<4x162x578xbf16, #tpu.memory_space<vmem>>, vector<1x162x578xbf16>
    %21 = vector.shape_cast %20 : vector<1x162x578xbf16> to vector<162x578xbf16>
    %22 = arith.extf %21 : vector<162x578xbf16> to vector<162x578xf32>
    %cst_21 = arith.constant dense<0.000000e+00> : vector<162x8xf32>
    %23 = tpu.matmul %22, %4, %cst_21 {dimension_numbers = #tpu.dot_dimension_numbers<[1], [0], [0], [1], [0, 0, 1, 1], [], []>} : vector<162x578xf32>, vector<578x8xf32>, vector<162x8xf32> -> vector<162x8xf32>
    %c2_22 = arith.constant 2 : index
    %c0_23 = arith.constant 0 : index
    %c0_24 = arith.constant 0 : index
    %24 = vector.load %arg3[%c2_22, %c0_23, %c0_24] : memref<4x8x16xf32, #tpu.memory_space<vmem>>, vector<1x8x16xf32>
    %25 = vector.shape_cast %24 : vector<1x8x16xf32> to vector<8x16xf32>
    %cst_25 = arith.constant dense<0.000000e+00> : vector<162x16xf32>
    %26 = tpu.matmul %23, %25, %cst_25 {dimension_numbers = #tpu.dot_dimension_numbers<[1], [0], [0], [1], [0, 0, 1, 1], [], []>} : vector<162x8xf32>, vector<8x16xf32>, vector<162x16xf32> -> vector<162x16xf32>
    %27 = arith.addf %19, %26 : vector<162x16xf32>
    %c3 = arith.constant 3 : index
    %c0_26 = arith.constant 0 : index
    %c0_27 = arith.constant 0 : index
    %28 = vector.load %arg2[%c3, %c0_26, %c0_27] : memref<4x162x578xbf16, #tpu.memory_space<vmem>>, vector<1x162x578xbf16>
    %29 = vector.shape_cast %28 : vector<1x162x578xbf16> to vector<162x578xbf16>
    %30 = arith.extf %29 : vector<162x578xbf16> to vector<162x578xf32>
    %cst_28 = arith.constant dense<0.000000e+00> : vector<162x8xf32>
    %31 = tpu.matmul %30, %4, %cst_28 {dimension_numbers = #tpu.dot_dimension_numbers<[1], [0], [0], [1], [0, 0, 1, 1], [], []>} : vector<162x578xf32>, vector<578x8xf32>, vector<162x8xf32> -> vector<162x8xf32>
    %c3_29 = arith.constant 3 : index
    %c0_30 = arith.constant 0 : index
    %c0_31 = arith.constant 0 : index
    %32 = vector.load %arg3[%c3_29, %c0_30, %c0_31] : memref<4x8x16xf32, #tpu.memory_space<vmem>>, vector<1x8x16xf32>
    %33 = vector.shape_cast %32 : vector<1x8x16xf32> to vector<8x16xf32>
    %cst_32 = arith.constant dense<0.000000e+00> : vector<162x16xf32>
    %34 = tpu.matmul %31, %33, %cst_32 {dimension_numbers = #tpu.dot_dimension_numbers<[1], [0], [0], [1], [0, 0, 1, 1], [], []>} : vector<162x8xf32>, vector<8x16xf32>, vector<162x16xf32> -> vector<162x16xf32>
    %35 = arith.addf %27, %34 : vector<162x16xf32>
    %cst_33 = arith.constant dense<0.000000e+00> : vector<16xf32>
    %36 = vector.multi_reduction <add>, %35, %cst_33 [0] : vector<162x16xf32> to vector<16xf32>
    %37 = vector.shape_cast %36 : vector<16xf32> to vector<1x16xf32>
    %cst_34 = arith.constant 1.620000e+02 : f32
    %38 = vector.broadcast %cst_34 : f32 to vector<1x16xf32>
    %39 = arith.divf %37, %38 : vector<1x16xf32>
    %40 = vector.broadcast %39 : vector<1x16xf32> to vector<162x16xf32>
    %41 = arith.subf %35, %40 : vector<162x16xf32>
    %42 = arith.mulf %41, %41 : vector<162x16xf32>
    %cst_35 = arith.constant dense<0.000000e+00> : vector<16xf32>
    %43 = vector.multi_reduction <add>, %42, %cst_35 [0] : vector<162x16xf32> to vector<16xf32>
    %44 = vector.shape_cast %43 : vector<16xf32> to vector<1x16xf32>
    %cst_36 = arith.constant 1.620000e+02 : f32
    %45 = vector.broadcast %cst_36 : f32 to vector<1x16xf32>
    %46 = arith.divf %44, %45 : vector<1x16xf32>
    %c0_37 = arith.constant 0 : index
    %c0_38 = arith.constant 0 : index
    %47 = vector.load %arg4[%c0_37, %c0_38] : memref<1x16xf32, #tpu.memory_space<vmem>>, vector<1x16xf32>
    %cst_39 = arith.constant 9.99999974E-6 : f32
    %48 = vector.broadcast %cst_39 : f32 to vector<1x16xf32>
    %49 = arith.addf %46, %48 : vector<1x16xf32>
    %50 = math.rsqrt %49 : vector<1x16xf32>
    %51 = arith.mulf %47, %50 : vector<1x16xf32>
    %52 = vector.broadcast %39 : vector<1x16xf32> to vector<162x16xf32>
    %53 = arith.subf %35, %52 : vector<162x16xf32>
    %54 = vector.broadcast %51 : vector<1x16xf32> to vector<162x16xf32>
    %55 = arith.mulf %53, %54 : vector<162x16xf32>
    %c0_40 = arith.constant 0 : index
    %c0_41 = arith.constant 0 : index
    %56 = vector.load %arg5[%c0_40, %c0_41] : memref<1x16xf32, #tpu.memory_space<vmem>>, vector<1x16xf32>
    %57 = vector.broadcast %56 : vector<1x16xf32> to vector<162x16xf32>
    %58 = arith.addf %55, %57 : vector<162x16xf32>
    %cst_42 = arith.constant 0.000000e+00 : f32
    %59 = vector.broadcast %cst_42 : f32 to vector<162x16xf32>
    %60 = arith.maximumf %58, %59 : vector<162x16xf32>
    %c0_43 = arith.constant 0 : index
    %c0_44 = arith.constant 0 : index
    %c0_45 = arith.constant 0 : index
    %61 = vector.load %arg6[%c0_43, %c0_44, %c0_45] : memref<4x50x162xbf16, #tpu.memory_space<vmem>>, vector<1x50x162xbf16>
    %62 = vector.shape_cast %61 : vector<1x50x162xbf16> to vector<50x162xbf16>
    %63 = arith.extf %62 : vector<50x162xbf16> to vector<50x162xf32>
    %cst_46 = arith.constant dense<0.000000e+00> : vector<50x16xf32>
    %64 = tpu.matmul %63, %60, %cst_46 {dimension_numbers = #tpu.dot_dimension_numbers<[1], [0], [0], [1], [0, 0, 1, 1], [], []>} : vector<50x162xf32>, vector<162x16xf32>, vector<50x16xf32> -> vector<50x16xf32>
    %c0_47 = arith.constant 0 : index
    %c0_48 = arith.constant 0 : index
    %c0_49 = arith.constant 0 : index
    %65 = vector.load %arg7[%c0_47, %c0_48, %c0_49] : memref<4x16x32xf32, #tpu.memory_space<vmem>>, vector<1x16x32xf32>
    %66 = vector.shape_cast %65 : vector<1x16x32xf32> to vector<16x32xf32>
    %cst_50 = arith.constant dense<0.000000e+00> : vector<50x32xf32>
    %67 = tpu.matmul %64, %66, %cst_50 {dimension_numbers = #tpu.dot_dimension_numbers<[1], [0], [0], [1], [0, 0, 1, 1], [], []>} : vector<50x16xf32>, vector<16x32xf32>, vector<50x32xf32> -> vector<50x32xf32>
    %c1_51 = arith.constant 1 : index
    %c0_52 = arith.constant 0 : index
    %c0_53 = arith.constant 0 : index
    %68 = vector.load %arg6[%c1_51, %c0_52, %c0_53] : memref<4x50x162xbf16, #tpu.memory_space<vmem>>, vector<1x50x162xbf16>
    %69 = vector.shape_cast %68 : vector<1x50x162xbf16> to vector<50x162xbf16>
    %70 = arith.extf %69 : vector<50x162xbf16> to vector<50x162xf32>
    %cst_54 = arith.constant dense<0.000000e+00> : vector<50x16xf32>
    %71 = tpu.matmul %70, %60, %cst_54 {dimension_numbers = #tpu.dot_dimension_numbers<[1], [0], [0], [1], [0, 0, 1, 1], [], []>} : vector<50x162xf32>, vector<162x16xf32>, vector<50x16xf32> -> vector<50x16xf32>
    %c1_55 = arith.constant 1 : index
    %c0_56 = arith.constant 0 : index
    %c0_57 = arith.constant 0 : index
    %72 = vector.load %arg7[%c1_55, %c0_56, %c0_57] : memref<4x16x32xf32, #tpu.memory_space<vmem>>, vector<1x16x32xf32>
    %73 = vector.shape_cast %72 : vector<1x16x32xf32> to vector<16x32xf32>
    %cst_58 = arith.constant dense<0.000000e+00> : vector<50x32xf32>
    %74 = tpu.matmul %71, %73, %cst_58 {dimension_numbers = #tpu.dot_dimension_numbers<[1], [0], [0], [1], [0, 0, 1, 1], [], []>} : vector<50x16xf32>, vector<16x32xf32>, vector<50x32xf32> -> vector<50x32xf32>
    %75 = arith.addf %67, %74 : vector<50x32xf32>
    %c2_59 = arith.constant 2 : index
    %c0_60 = arith.constant 0 : index
    %c0_61 = arith.constant 0 : index
    %76 = vector.load %arg6[%c2_59, %c0_60, %c0_61] : memref<4x50x162xbf16, #tpu.memory_space<vmem>>, vector<1x50x162xbf16>
    %77 = vector.shape_cast %76 : vector<1x50x162xbf16> to vector<50x162xbf16>
    %78 = arith.extf %77 : vector<50x162xbf16> to vector<50x162xf32>
    %cst_62 = arith.constant dense<0.000000e+00> : vector<50x16xf32>
    %79 = tpu.matmul %78, %60, %cst_62 {dimension_numbers = #tpu.dot_dimension_numbers<[1], [0], [0], [1], [0, 0, 1, 1], [], []>} : vector<50x162xf32>, vector<162x16xf32>, vector<50x16xf32> -> vector<50x16xf32>
    %c2_63 = arith.constant 2 : index
    %c0_64 = arith.constant 0 : index
    %c0_65 = arith.constant 0 : index
    %80 = vector.load %arg7[%c2_63, %c0_64, %c0_65] : memref<4x16x32xf32, #tpu.memory_space<vmem>>, vector<1x16x32xf32>
    %81 = vector.shape_cast %80 : vector<1x16x32xf32> to vector<16x32xf32>
    %cst_66 = arith.constant dense<0.000000e+00> : vector<50x32xf32>
    %82 = tpu.matmul %79, %81, %cst_66 {dimension_numbers = #tpu.dot_dimension_numbers<[1], [0], [0], [1], [0, 0, 1, 1], [], []>} : vector<50x16xf32>, vector<16x32xf32>, vector<50x32xf32> -> vector<50x32xf32>
    %83 = arith.addf %75, %82 : vector<50x32xf32>
    %c3_67 = arith.constant 3 : index
    %c0_68 = arith.constant 0 : index
    %c0_69 = arith.constant 0 : index
    %84 = vector.load %arg6[%c3_67, %c0_68, %c0_69] : memref<4x50x162xbf16, #tpu.memory_space<vmem>>, vector<1x50x162xbf16>
    %85 = vector.shape_cast %84 : vector<1x50x162xbf16> to vector<50x162xbf16>
    %86 = arith.extf %85 : vector<50x162xbf16> to vector<50x162xf32>
    %cst_70 = arith.constant dense<0.000000e+00> : vector<50x16xf32>
    %87 = tpu.matmul %86, %60, %cst_70 {dimension_numbers = #tpu.dot_dimension_numbers<[1], [0], [0], [1], [0, 0, 1, 1], [], []>} : vector<50x162xf32>, vector<162x16xf32>, vector<50x16xf32> -> vector<50x16xf32>
    %c3_71 = arith.constant 3 : index
    %c0_72 = arith.constant 0 : index
    %c0_73 = arith.constant 0 : index
    %88 = vector.load %arg7[%c3_71, %c0_72, %c0_73] : memref<4x16x32xf32, #tpu.memory_space<vmem>>, vector<1x16x32xf32>
    %89 = vector.shape_cast %88 : vector<1x16x32xf32> to vector<16x32xf32>
    %cst_74 = arith.constant dense<0.000000e+00> : vector<50x32xf32>
    %90 = tpu.matmul %87, %89, %cst_74 {dimension_numbers = #tpu.dot_dimension_numbers<[1], [0], [0], [1], [0, 0, 1, 1], [], []>} : vector<50x16xf32>, vector<16x32xf32>, vector<50x32xf32> -> vector<50x32xf32>
    %91 = arith.addf %83, %90 : vector<50x32xf32>
    %cst_75 = arith.constant dense<0.000000e+00> : vector<32xf32>
    %92 = vector.multi_reduction <add>, %91, %cst_75 [0] : vector<50x32xf32> to vector<32xf32>
    %93 = vector.shape_cast %92 : vector<32xf32> to vector<1x32xf32>
    %cst_76 = arith.constant 5.000000e+01 : f32
    %94 = vector.broadcast %cst_76 : f32 to vector<1x32xf32>
    %95 = arith.divf %93, %94 : vector<1x32xf32>
    %96 = vector.broadcast %95 : vector<1x32xf32> to vector<50x32xf32>
    %97 = arith.subf %91, %96 : vector<50x32xf32>
    %98 = arith.mulf %97, %97 : vector<50x32xf32>
    %cst_77 = arith.constant dense<0.000000e+00> : vector<32xf32>
    %99 = vector.multi_reduction <add>, %98, %cst_77 [0] : vector<50x32xf32> to vector<32xf32>
    %100 = vector.shape_cast %99 : vector<32xf32> to vector<1x32xf32>
    %cst_78 = arith.constant 5.000000e+01 : f32
    %101 = vector.broadcast %cst_78 : f32 to vector<1x32xf32>
    %102 = arith.divf %100, %101 : vector<1x32xf32>
    %c0_79 = arith.constant 0 : index
    %c0_80 = arith.constant 0 : index
    %103 = vector.load %arg8[%c0_79, %c0_80] : memref<1x32xf32, #tpu.memory_space<vmem>>, vector<1x32xf32>
    %cst_81 = arith.constant 9.99999974E-6 : f32
    %104 = vector.broadcast %cst_81 : f32 to vector<1x32xf32>
    %105 = arith.addf %102, %104 : vector<1x32xf32>
    %106 = math.rsqrt %105 : vector<1x32xf32>
    %107 = arith.mulf %103, %106 : vector<1x32xf32>
    %108 = vector.broadcast %95 : vector<1x32xf32> to vector<50x32xf32>
    %109 = arith.subf %91, %108 : vector<50x32xf32>
    %110 = vector.broadcast %107 : vector<1x32xf32> to vector<50x32xf32>
    %111 = arith.mulf %109, %110 : vector<50x32xf32>
    %c0_82 = arith.constant 0 : index
    %c0_83 = arith.constant 0 : index
    %112 = vector.load %arg9[%c0_82, %c0_83] : memref<1x32xf32, #tpu.memory_space<vmem>>, vector<1x32xf32>
    %113 = vector.broadcast %112 : vector<1x32xf32> to vector<50x32xf32>
    %114 = arith.addf %111, %113 : vector<50x32xf32>
    %cst_84 = arith.constant 0.000000e+00 : f32
    %115 = vector.broadcast %cst_84 : f32 to vector<50x32xf32>
    %116 = arith.maximumf %114, %115 : vector<50x32xf32>
    %c0_85 = arith.constant 0 : index
    %c0_86 = arith.constant 0 : index
    %c0_87 = arith.constant 0 : index
    %117 = vector.load %arg10[%c0_85, %c0_86, %c0_87] : memref<4x18x50xbf16, #tpu.memory_space<vmem>>, vector<1x18x50xbf16>
    %118 = vector.shape_cast %117 : vector<1x18x50xbf16> to vector<18x50xbf16>
    %119 = arith.extf %118 : vector<18x50xbf16> to vector<18x50xf32>
    %cst_88 = arith.constant dense<0.000000e+00> : vector<18x32xf32>
    %120 = tpu.matmul %119, %116, %cst_88 {dimension_numbers = #tpu.dot_dimension_numbers<[1], [0], [0], [1], [0, 0, 1, 1], [], []>} : vector<18x50xf32>, vector<50x32xf32>, vector<18x32xf32> -> vector<18x32xf32>
    %c0_89 = arith.constant 0 : index
    %c0_90 = arith.constant 0 : index
    %c0_91 = arith.constant 0 : index
    %121 = vector.load %arg11[%c0_89, %c0_90, %c0_91] : memref<4x32x64xf32, #tpu.memory_space<vmem>>, vector<1x32x64xf32>
    %122 = vector.shape_cast %121 : vector<1x32x64xf32> to vector<32x64xf32>
    %cst_92 = arith.constant dense<0.000000e+00> : vector<18x64xf32>
    %123 = tpu.matmul %120, %122, %cst_92 {dimension_numbers = #tpu.dot_dimension_numbers<[1], [0], [0], [1], [0, 0, 1, 1], [], []>} : vector<18x32xf32>, vector<32x64xf32>, vector<18x64xf32> -> vector<18x64xf32>
    %c1_93 = arith.constant 1 : index
    %c0_94 = arith.constant 0 : index
    %c0_95 = arith.constant 0 : index
    %124 = vector.load %arg10[%c1_93, %c0_94, %c0_95] : memref<4x18x50xbf16, #tpu.memory_space<vmem>>, vector<1x18x50xbf16>
    %125 = vector.shape_cast %124 : vector<1x18x50xbf16> to vector<18x50xbf16>
    %126 = arith.extf %125 : vector<18x50xbf16> to vector<18x50xf32>
    %cst_96 = arith.constant dense<0.000000e+00> : vector<18x32xf32>
    %127 = tpu.matmul %126, %116, %cst_96 {dimension_numbers = #tpu.dot_dimension_numbers<[1], [0], [0], [1], [0, 0, 1, 1], [], []>} : vector<18x50xf32>, vector<50x32xf32>, vector<18x32xf32> -> vector<18x32xf32>
    %c1_97 = arith.constant 1 : index
    %c0_98 = arith.constant 0 : index
    %c0_99 = arith.constant 0 : index
    %128 = vector.load %arg11[%c1_97, %c0_98, %c0_99] : memref<4x32x64xf32, #tpu.memory_space<vmem>>, vector<1x32x64xf32>
    %129 = vector.shape_cast %128 : vector<1x32x64xf32> to vector<32x64xf32>
    %cst_100 = arith.constant dense<0.000000e+00> : vector<18x64xf32>
    %130 = tpu.matmul %127, %129, %cst_100 {dimension_numbers = #tpu.dot_dimension_numbers<[1], [0], [0], [1], [0, 0, 1, 1], [], []>} : vector<18x32xf32>, vector<32x64xf32>, vector<18x64xf32> -> vector<18x64xf32>
    %131 = arith.addf %123, %130 : vector<18x64xf32>
    %c2_101 = arith.constant 2 : index
    %c0_102 = arith.constant 0 : index
    %c0_103 = arith.constant 0 : index
    %132 = vector.load %arg10[%c2_101, %c0_102, %c0_103] : memref<4x18x50xbf16, #tpu.memory_space<vmem>>, vector<1x18x50xbf16>
    %133 = vector.shape_cast %132 : vector<1x18x50xbf16> to vector<18x50xbf16>
    %134 = arith.extf %133 : vector<18x50xbf16> to vector<18x50xf32>
    %cst_104 = arith.constant dense<0.000000e+00> : vector<18x32xf32>
    %135 = tpu.matmul %134, %116, %cst_104 {dimension_numbers = #tpu.dot_dimension_numbers<[1], [0], [0], [1], [0, 0, 1, 1], [], []>} : vector<18x50xf32>, vector<50x32xf32>, vector<18x32xf32> -> vector<18x32xf32>
    %c2_105 = arith.constant 2 : index
    %c0_106 = arith.constant 0 : index
    %c0_107 = arith.constant 0 : index
    %136 = vector.load %arg11[%c2_105, %c0_106, %c0_107] : memref<4x32x64xf32, #tpu.memory_space<vmem>>, vector<1x32x64xf32>
    %137 = vector.shape_cast %136 : vector<1x32x64xf32> to vector<32x64xf32>
    %cst_108 = arith.constant dense<0.000000e+00> : vector<18x64xf32>
    %138 = tpu.matmul %135, %137, %cst_108 {dimension_numbers = #tpu.dot_dimension_numbers<[1], [0], [0], [1], [0, 0, 1, 1], [], []>} : vector<18x32xf32>, vector<32x64xf32>, vector<18x64xf32> -> vector<18x64xf32>
    %139 = arith.addf %131, %138 : vector<18x64xf32>
    %c3_109 = arith.constant 3 : index
    %c0_110 = arith.constant 0 : index
    %c0_111 = arith.constant 0 : index
    %140 = vector.load %arg10[%c3_109, %c0_110, %c0_111] : memref<4x18x50xbf16, #tpu.memory_space<vmem>>, vector<1x18x50xbf16>
    %141 = vector.shape_cast %140 : vector<1x18x50xbf16> to vector<18x50xbf16>
    %142 = arith.extf %141 : vector<18x50xbf16> to vector<18x50xf32>
    %cst_112 = arith.constant dense<0.000000e+00> : vector<18x32xf32>
    %143 = tpu.matmul %142, %116, %cst_112 {dimension_numbers = #tpu.dot_dimension_numbers<[1], [0], [0], [1], [0, 0, 1, 1], [], []>} : vector<18x50xf32>, vector<50x32xf32>, vector<18x32xf32> -> vector<18x32xf32>
    %c3_113 = arith.constant 3 : index
    %c0_114 = arith.constant 0 : index
    %c0_115 = arith.constant 0 : index
    %144 = vector.load %arg11[%c3_113, %c0_114, %c0_115] : memref<4x32x64xf32, #tpu.memory_space<vmem>>, vector<1x32x64xf32>
    %145 = vector.shape_cast %144 : vector<1x32x64xf32> to vector<32x64xf32>
    %cst_116 = arith.constant dense<0.000000e+00> : vector<18x64xf32>
    %146 = tpu.matmul %143, %145, %cst_116 {dimension_numbers = #tpu.dot_dimension_numbers<[1], [0], [0], [1], [0, 0, 1, 1], [], []>} : vector<18x32xf32>, vector<32x64xf32>, vector<18x64xf32> -> vector<18x64xf32>
    %147 = arith.addf %139, %146 : vector<18x64xf32>
    %cst_117 = arith.constant dense<0.000000e+00> : vector<64xf32>
    %148 = vector.multi_reduction <add>, %147, %cst_117 [0] : vector<18x64xf32> to vector<64xf32>
    %149 = vector.shape_cast %148 : vector<64xf32> to vector<1x64xf32>
    %cst_118 = arith.constant 1.800000e+01 : f32
    %150 = vector.broadcast %cst_118 : f32 to vector<1x64xf32>
    %151 = arith.divf %149, %150 : vector<1x64xf32>
    %152 = vector.broadcast %151 : vector<1x64xf32> to vector<18x64xf32>
    %153 = arith.subf %147, %152 : vector<18x64xf32>
    %154 = arith.mulf %153, %153 : vector<18x64xf32>
    %cst_119 = arith.constant dense<0.000000e+00> : vector<64xf32>
    %155 = vector.multi_reduction <add>, %154, %cst_119 [0] : vector<18x64xf32> to vector<64xf32>
    %156 = vector.shape_cast %155 : vector<64xf32> to vector<1x64xf32>
    %cst_120 = arith.constant 1.800000e+01 : f32
    %157 = vector.broadcast %cst_120 : f32 to vector<1x64xf32>
    %158 = arith.divf %156, %157 : vector<1x64xf32>
    %c0_121 = arith.constant 0 : index
    %c0_122 = arith.constant 0 : index
    %159 = vector.load %arg12[%c0_121, %c0_122] : memref<1x64xf32, #tpu.memory_space<vmem>>, vector<1x64xf32>
    %cst_123 = arith.constant 9.99999974E-6 : f32
    %160 = vector.broadcast %cst_123 : f32 to vector<1x64xf32>
    %161 = arith.addf %158, %160 : vector<1x64xf32>
    %162 = math.rsqrt %161 : vector<1x64xf32>
    %163 = arith.mulf %159, %162 : vector<1x64xf32>
    %164 = vector.broadcast %151 : vector<1x64xf32> to vector<18x64xf32>
    %165 = arith.subf %147, %164 : vector<18x64xf32>
    %166 = vector.broadcast %163 : vector<1x64xf32> to vector<18x64xf32>
    %167 = arith.mulf %165, %166 : vector<18x64xf32>
    %c0_124 = arith.constant 0 : index
    %c0_125 = arith.constant 0 : index
    %168 = vector.load %arg13[%c0_124, %c0_125] : memref<1x64xf32, #tpu.memory_space<vmem>>, vector<1x64xf32>
    %169 = vector.broadcast %168 : vector<1x64xf32> to vector<18x64xf32>
    %170 = arith.addf %167, %169 : vector<18x64xf32>
    %cst_126 = arith.constant 0.000000e+00 : f32
    %171 = vector.broadcast %cst_126 : f32 to vector<18x64xf32>
    %172 = arith.maximumf %170, %171 : vector<18x64xf32>
    %c0_127 = arith.constant 0 : index
    %c0_128 = arith.constant 0 : index
    %c0_129 = arith.constant 0 : index
    %173 = vector.load %arg14[%c0_127, %c0_128, %c0_129] : memref<4x8x18xbf16, #tpu.memory_space<vmem>>, vector<1x8x18xbf16>
    %174 = vector.shape_cast %173 : vector<1x8x18xbf16> to vector<8x18xbf16>
    %175 = arith.extf %174 : vector<8x18xbf16> to vector<8x18xf32>
    %cst_130 = arith.constant dense<0.000000e+00> : vector<8x64xf32>
    %176 = tpu.matmul %175, %172, %cst_130 {dimension_numbers = #tpu.dot_dimension_numbers<[1], [0], [0], [1], [0, 0, 1, 1], [], []>} : vector<8x18xf32>, vector<18x64xf32>, vector<8x64xf32> -> vector<8x64xf32>
    %c0_131 = arith.constant 0 : index
    %c0_132 = arith.constant 0 : index
    %c0_133 = arith.constant 0 : index
    %177 = vector.load %arg15[%c0_131, %c0_132, %c0_133] : memref<4x64x16xf32, #tpu.memory_space<vmem>>, vector<1x64x16xf32>
    %178 = vector.shape_cast %177 : vector<1x64x16xf32> to vector<64x16xf32>
    %cst_134 = arith.constant dense<0.000000e+00> : vector<8x16xf32>
    %179 = tpu.matmul %176, %178, %cst_134 {dimension_numbers = #tpu.dot_dimension_numbers<[1], [0], [0], [1], [0, 0, 1, 1], [], []>} : vector<8x64xf32>, vector<64x16xf32>, vector<8x16xf32> -> vector<8x16xf32>
    %c1_135 = arith.constant 1 : index
    %c0_136 = arith.constant 0 : index
    %c0_137 = arith.constant 0 : index
    %180 = vector.load %arg14[%c1_135, %c0_136, %c0_137] : memref<4x8x18xbf16, #tpu.memory_space<vmem>>, vector<1x8x18xbf16>
    %181 = vector.shape_cast %180 : vector<1x8x18xbf16> to vector<8x18xbf16>
    %182 = arith.extf %181 : vector<8x18xbf16> to vector<8x18xf32>
    %cst_138 = arith.constant dense<0.000000e+00> : vector<8x64xf32>
    %183 = tpu.matmul %182, %172, %cst_138 {dimension_numbers = #tpu.dot_dimension_numbers<[1], [0], [0], [1], [0, 0, 1, 1], [], []>} : vector<8x18xf32>, vector<18x64xf32>, vector<8x64xf32> -> vector<8x64xf32>
    %c1_139 = arith.constant 1 : index
    %c0_140 = arith.constant 0 : index
    %c0_141 = arith.constant 0 : index
    %184 = vector.load %arg15[%c1_139, %c0_140, %c0_141] : memref<4x64x16xf32, #tpu.memory_space<vmem>>, vector<1x64x16xf32>
    %185 = vector.shape_cast %184 : vector<1x64x16xf32> to vector<64x16xf32>
    %cst_142 = arith.constant dense<0.000000e+00> : vector<8x16xf32>
    %186 = tpu.matmul %183, %185, %cst_142 {dimension_numbers = #tpu.dot_dimension_numbers<[1], [0], [0], [1], [0, 0, 1, 1], [], []>} : vector<8x64xf32>, vector<64x16xf32>, vector<8x16xf32> -> vector<8x16xf32>
    %187 = arith.addf %179, %186 : vector<8x16xf32>
    %c2_143 = arith.constant 2 : index
    %c0_144 = arith.constant 0 : index
    %c0_145 = arith.constant 0 : index
    %188 = vector.load %arg14[%c2_143, %c0_144, %c0_145] : memref<4x8x18xbf16, #tpu.memory_space<vmem>>, vector<1x8x18xbf16>
    %189 = vector.shape_cast %188 : vector<1x8x18xbf16> to vector<8x18xbf16>
    %190 = arith.extf %189 : vector<8x18xbf16> to vector<8x18xf32>
    %cst_146 = arith.constant dense<0.000000e+00> : vector<8x64xf32>
    %191 = tpu.matmul %190, %172, %cst_146 {dimension_numbers = #tpu.dot_dimension_numbers<[1], [0], [0], [1], [0, 0, 1, 1], [], []>} : vector<8x18xf32>, vector<18x64xf32>, vector<8x64xf32> -> vector<8x64xf32>
    %c2_147 = arith.constant 2 : index
    %c0_148 = arith.constant 0 : index
    %c0_149 = arith.constant 0 : index
    %192 = vector.load %arg15[%c2_147, %c0_148, %c0_149] : memref<4x64x16xf32, #tpu.memory_space<vmem>>, vector<1x64x16xf32>
    %193 = vector.shape_cast %192 : vector<1x64x16xf32> to vector<64x16xf32>
    %cst_150 = arith.constant dense<0.000000e+00> : vector<8x16xf32>
    %194 = tpu.matmul %191, %193, %cst_150 {dimension_numbers = #tpu.dot_dimension_numbers<[1], [0], [0], [1], [0, 0, 1, 1], [], []>} : vector<8x64xf32>, vector<64x16xf32>, vector<8x16xf32> -> vector<8x16xf32>
    %195 = arith.addf %187, %194 : vector<8x16xf32>
    %c3_151 = arith.constant 3 : index
    %c0_152 = arith.constant 0 : index
    %c0_153 = arith.constant 0 : index
    %196 = vector.load %arg14[%c3_151, %c0_152, %c0_153] : memref<4x8x18xbf16, #tpu.memory_space<vmem>>, vector<1x8x18xbf16>
    %197 = vector.shape_cast %196 : vector<1x8x18xbf16> to vector<8x18xbf16>
    %198 = arith.extf %197 : vector<8x18xbf16> to vector<8x18xf32>
    %cst_154 = arith.constant dense<0.000000e+00> : vector<8x64xf32>
    %199 = tpu.matmul %198, %172, %cst_154 {dimension_numbers = #tpu.dot_dimension_numbers<[1], [0], [0], [1], [0, 0, 1, 1], [], []>} : vector<8x18xf32>, vector<18x64xf32>, vector<8x64xf32> -> vector<8x64xf32>
    %c3_155 = arith.constant 3 : index
    %c0_156 = arith.constant 0 : index
    %c0_157 = arith.constant 0 : index
    %200 = vector.load %arg15[%c3_155, %c0_156, %c0_157] : memref<4x64x16xf32, #tpu.memory_space<vmem>>, vector<1x64x16xf32>
    %201 = vector.shape_cast %200 : vector<1x64x16xf32> to vector<64x16xf32>
    %cst_158 = arith.constant dense<0.000000e+00> : vector<8x16xf32>
    %202 = tpu.matmul %199, %201, %cst_158 {dimension_numbers = #tpu.dot_dimension_numbers<[1], [0], [0], [1], [0, 0, 1, 1], [], []>} : vector<8x64xf32>, vector<64x16xf32>, vector<8x16xf32> -> vector<8x16xf32>
    %203 = arith.addf %195, %202 : vector<8x16xf32>
    %c0_159 = arith.constant 0 : index
    %c0_160 = arith.constant 0 : index
    %204 = vector.load %arg16[%c0_159, %c0_160] : memref<8x16xf32, #tpu.memory_space<vmem>>, vector<8x16xf32>
    tpu.vector_store %arg16[%c0_159, %c0_160], %203 {strides = array<i32>} : memref<8x16xf32, #tpu.memory_space<vmem>>, vector<8x16xf32>,
    return
  }
}

</mosaic_0001>

<bundles_post_ra>
// kernel: netE_forward.1
= control target key start
LH: loop header
LB: loop body
LE: loop exit
PB: predicated region body
PF: predicated region fallthrough
CT: control target
= control target key end

     0   :  { %s14450_s0 = inlined_call_operand.vmem [shape: f32[578,12], index: 0, kind: input, shape index: {}]   ;;  %s14451_s1 = inlined_call_operand.vmem [shape: f32[12,8], index: 1, kind: input, shape index: {}]   ;;  %s14452_s2 = inlined_call_operand.vmem [shape: bf16[4,162,578], index: 2, kind: input, shape index: {}]   ;;  %s14453_s3 = inlined_call_operand.vmem [shape: f32[4,8,16], index: 3, kind: input, shape index: {}]   ;;  %s14454_s4 = inlined_call_operand.vmem [shape: f32[1,16], index: 4, kind: input, shape index: {}]   ;;  %s14455_s5 = inlined_call_operand.vmem [shape: f32[1,16], index: 5, kind: input, shape index: {}]   ;;  %s14456_s6 = inlined_call_operand.vmem [shape: bf16[4,50,162], index: 6, kind: input, shape index: {}]   ;;  %s14457_s7 = inlined_call_operand.vmem [shape: f32[4,16,32], index: 7, kind: input, shape index: {}]   ;;  %s14458_s8 = inlined_call_operand.vmem [shape: f32[1,32], index: 8, kind: input, shape index: {}]   ;;  %s14459_s9 = inlined_call_operand.vmem [shape: f32[1,32], index: 9, kind: input, shape index: {}]   ;;  %s14460_s10 = inlined_call_operand.vmem [shape: bf16[4,18,50], index: 10, kind: input, shape index: {}]   ;;  %s14461_s11 = inlined_call_operand.vmem [shape: f32[4,32,64], index: 11, kind: input, shape index: {}]   ;;  %s14462_s12 = inlined_call_operand.vmem [shape: f32[1,64], index: 12, kind: input, shape index: {}]   ;;  %s14463_s13 = inlined_call_operand.vmem [shape: f32[1,64], index: 13, kind: input, shape index: {}]   ;;  %s14464_s14 = inlined_call_operand.vmem [shape: bf16[4,8,18], index: 14, kind: input, shape index: {}]   ;;  %s14465_s15 = inlined_call_operand.vmem [shape: f32[4,64,16], index: 15, kind: input, shape index: {}]   ;;  %s14466_s16 = inlined_call_operand.hbm [shape: f32[8,16], index: 16, kind: output, shape index: {}]  }
   0x1   :  { %14586 = sst [smem:[#allocation107_spill]] %s14450_s0 }
   0x2   :  { %v128_v0 = vld [vmem:[%s14451_s1 + $0x8] sm:$0xf]  ;;  %vm349_vm0 = vcmask 1043456   ;;  %v14480_v1 = vmov 0.0   ;;  %v127_v2 = vld [vmem:[%s14451_s1] sm:$0xff]  ;;  %vm9981_vm1 = vmmov 0  }
   0x3   :  { %8752 = vmatprep.subr.mxu0 %v14480_v1  ;;  %8756 = vmatprep.mubr.msk.f32.mxu0 %vm9981_vm1, %v14480_v1  ;;  %s14587_s27 = sld [smem:[#allocation107_spill]]  ;;  %vm129_vm2 = vcmask 97280  }
   0x4   :  { %8753 = vmatpush3.msk.msra.mxu0 %vm349_vm0, %v128_v0  ;;  %1092 = vmatprep.subr.mxu1 %v14480_v1 }
   0x5   :  { %8754 = vmatprep.subr.mxu0 %v14480_v1 }
   0x6   :  { %8755 = vmatpush3.msra.mxu0 %v127_v2 }
   0x7   :  { %1835 = vmatprep.subr.mxu0 %v14480_v1 }
   0x9   :  { %v54_v3 = vld [vmem:[%s14587_s27] sm:$0xff]  ;;  %v55_v4 = vld [vmem:[%s14587_s27 + $0x8] sm:$0xff]  ;;  %v56_v5 = vld [vmem:[%s14587_s27 + $0x10] sm:$0xff] }
   0xa   :  { %8757 = vmatmul.mubr.msk.f32.vlgmr.msra.gmra.mxu0 %vm129_vm2, %v54_v3 }
   0xb   :  { %8759 = vmatprep.mubr.msk.f32.mxu0 %vm9981_vm1, %v14480_v1 }
   0xe   :  { %8760 = vmatmul.mubr.msk.f32.gmra.mxu0 %vm129_vm2, %v55_v4 }
   0xf   :  { %8762 = vmatprep.mubr.msk.f32.mxu0 %vm9981_vm1, %v14480_v1 }
  0x10   :  { %21 = vsyncpa [#allocation3], 0  ;;  %v57_v6 = vld [vmem:[%s14587_s27 + $0x18] sm:$0xff]  ;;  %v58_v7 = vld [vmem:[%s14587_s27 + $0x20] sm:$0xff]  ;;  %vm1088_vm3 = vcmask 1041408   ;;  %vm1024_vm4 = vcmask 539648  }
  0x11   :  { %v59_v8 = vld [vmem:[%s14587_s27 + $0x28] sm:$0xff]  ;;  %v60_v9 = vld [vmem:[%s14587_s27 + $0x30] sm:$0xff]  ;;  %v61_v10 = vld [vmem:[%s14587_s27 + $0x38] sm:$0xff]  ;;  %vm2347_vm5 = vcmask 64512   ;;  %vm4810_vm6 = vcmask 130048   ;;  %vm4850_vm7 = vcmask 123904  }
  0x12   :  { %8763 = vmatmul.mubr.msk.f32.gmra.mxu0 %vm129_vm2, %v56_v5  ;;  %v62_v11 = vld [vmem:[%s14587_s27 + $0x40] sm:$0xff]  ;;  %v63_v12 = vld [vmem:[%s14587_s27 + $0x48] sm:$0xff]  ;;  %v64_v13 = vld [vmem:[%s14587_s27 + $0x50] sm:$0xff]  ;;  %vm5052_vm8 = vcmask 277504   ;;  %vm6115_vm9 = vcmask 261120   ;;  %vm6127_vm10 = vcmask 254976  }
  0x13   :  { %8765 = vmatprep.mubr.msk.f32.mxu0 %vm9981_vm1, %v14480_v1  ;;  %v65_v14 = vld [vmem:[%s14587_s27 + $0x58] sm:$0xff]  ;;  %v66_v15 = vld [vmem:[%s14587_s27 + $0x60] sm:$0xff]  ;;  %v67_v16 = vld [vmem:[%s14587_s27 + $0x68] sm:$0xff]  ;;  %vm6216_vm11 = vcmask 408576   ;;  %vm6978_vm12 = vcmask 523264   ;;  %vm6982_vm13 = vcmask 517120  }
  0x14   :  { %v68_v17 = vld [vmem:[%s14587_s27 + $0x70] sm:$0xff]  ;;  %v69_v18 = vld [vmem:[%s14587_s27 + $0x78] sm:$0xff]  ;;  %v70_v19 = vld [vmem:[%s14587_s27 + $0x80] sm:$0xff]  ;;  %vm7039_vm14 = vcmask 146432  }
  0x15   :  { %v71_v20 = vld [vmem:[%s14587_s27 + $0x88] sm:$0xff]  ;;  %v72_v21 = vld [vmem:[%s14587_s27 + $0x90] sm:$0xff]  ;;  %v73_v22 = vld [vmem:[%s14587_s27 + $0x98] sm:$0xff] }
  0x16   :  { %8766 = vmatmul.mubr.msk.f32.gmra.mxu0 %vm129_vm2, %v57_v6  ;;  %v74_v23 = vld [vmem:[%s14587_s27 + $0xa0] sm:$0xff]  ;;  %v75_v24 = vld [vmem:[%s14587_s27 + $0xa8] sm:$0xff]  ;;  %v76_v25 = vld [vmem:[%s14587_s27 + $0xb0] sm:$0xff] }
  0x17   :  { %8768 = vmatprep.mubr.msk.f32.mxu0 %vm9981_vm1, %v14480_v1  ;;  %v77_v26 = vld [vmem:[%s14587_s27 + $0xb8] sm:$0xff]  ;;  %v78_v27 = vld [vmem:[%s14587_s27 + $0xc0] sm:$0xff]  ;;  %v79_v28 = vld [vmem:[%s14587_s27 + $0xc8] sm:$0xff] }
  0x18   :  { %v80_v29 = vld [vmem:[%s14587_s27 + $0xd0] sm:$0xff]  ;;  %v81_v30 = vld [vmem:[%s14587_s27 + $0xd8] sm:$0xff]  ;;  %v82_v31 = vld [vmem:[%s14587_s27 + $0xe0] sm:$0xff] }
  0x19   :  { %v83_v32 = vld [vmem:[%s14587_s27 + $0xe8] sm:$0xff]  ;;  %v84_v33 = vld [vmem:[%s14587_s27 + $0xf0] sm:$0xff]  ;;  %v85_v34 = vld [vmem:[%s14587_s27 + $0xf8] sm:$0xff] }
  0x1a   :  { %8769 = vmatmul.mubr.msk.f32.gmra.mxu0 %vm129_vm2, %v58_v7  ;;  %v86_v35 = vld [vmem:[%s14587_s27 + $0x100] sm:$0xff]  ;;  %v87_v36 = vld [vmem:[%s14587_s27 + $0x108] sm:$0xff]  ;;  %v88_v37 = vld [vmem:[%s14587_s27 + $0x110] sm:$0xff] }
  0x1b   :  { %8771 = vmatprep.mubr.msk.f32.mxu0 %vm9981_vm1, %v14480_v1  ;;  %v89_v38 = vld [vmem:[%s14587_s27 + $0x118] sm:$0xff]  ;;  %v90_v39 = vld [vmem:[%s14587_s27 + $0x120] sm:$0xff]  ;;  %v91_v40 = vld [vmem:[%s14587_s27 + $0x128] sm:$0xff] }
  0x1c   :  { %v92_v41 = vld [vmem:[%s14587_s27 + $0x130] sm:$0xff]  ;;  %v93_v42 = vld [vmem:[%s14587_s27 + $0x138] sm:$0xff]  ;;  %v94_v43 = vld [vmem:[%s14587_s27 + $0x140] sm:$0xff] }
  0x1d   :  { %v95_v44 = vld [vmem:[%s14587_s27 + $0x148] sm:$0xff]  ;;  %v96_v45 = vld [vmem:[%s14587_s27 + $0x150] sm:$0xff]  ;;  %v97_v46 = vld [vmem:[%s14587_s27 + $0x158] sm:$0xff] }
  0x1e   :  { %8772 = vmatmul.mubr.msk.f32.gmra.mxu0 %vm129_vm2, %v59_v8  ;;  %v98_v47 = vld [vmem:[%s14587_s27 + $0x160] sm:$0xff]  ;;  %v99_v48 = vld [vmem:[%s14587_s27 + $0x168] sm:$0xff]  ;;  %v100_v49 = vld [vmem:[%s14587_s27 + $0x170] sm:$0xff] }
  0x1f   :  { %8774 = vmatprep.mubr.msk.f32.mxu0 %vm9981_vm1, %v14480_v1  ;;  %v101_v50 = vld [vmem:[%s14587_s27 + $0x178] sm:$0xff]  ;;  %v102_v51 = vld [vmem:[%s14587_s27 + $0x180] sm:$0xff]  ;;  %v103_v53 = vld [vmem:[%s14587_s27 + $0x188] sm:$0xff] }
  0x20   :  { %v104_v56 = vld [vmem:[%s14587_s27 + $0x190] sm:$0xff]  ;;  %v105_v59 = vld [vmem:[%s14587_s27 + $0x198] sm:$0xff]  ;;  %v106_v62 = vld [vmem:[%s14587_s27 + $0x1a0] sm:$0xff] }
  0x21   :  { %v107_v2 = vld [vmem:[%s14587_s27 + $0x1a8] sm:$0xff]  ;;  %v108_v5 = vld [vmem:[%s14587_s27 + $0x1b0] sm:$0xff]  ;;  %v109_v8 = vld [vmem:[%s14587_s27 + $0x1b8] sm:$0xff] }
  0x22   :  { %8775 = vmatmul.mubr.msk.f32.gmra.mxu0 %vm129_vm2, %v60_v9 }
  0x23   :  { %8777 = vmatprep.mubr.msk.f32.mxu0 %vm9981_vm1, %v14480_v1 }
  0x26   :  { %8778 = vmatmul.mubr.msk.f32.gmra.mxu0 %vm129_vm2, %v61_v10 }
  0x27   :  { %8780 = vmatprep.mubr.msk.f32.mxu0 %vm9981_vm1, %v14480_v1 }
  0x2a   :  { %8781 = vmatmul.mubr.msk.f32.gmra.mxu0 %vm129_vm2, %v62_v11  ;;  %v110_v11 = vld [vmem:[%s14587_s27 + $0x1c0] sm:$0xff] }
  0x2b   :  { %8783 = vmatprep.mubr.msk.f32.mxu0 %vm9981_vm1, %v14480_v1 }
  0x2e   :  { %8784 = vmatmul.mubr.msk.f32.gmra.mxu0 %vm129_vm2, %v63_v12 }
  0x2f   :  { %8786 = vmatprep.mubr.msk.f32.mxu0 %vm9981_vm1, %v14480_v1 }
  0x32   :  { %8787 = vmatmul.mubr.msk.f32.gmra.mxu0 %vm129_vm2, %v64_v13 }
  0x33   :  { %8789 = vmatprep.mubr.msk.f32.mxu0 %vm9981_vm1, %v14480_v1 }
  0x36   :  { %8790 = vmatmul.mubr.msk.f32.gmra.mxu0 %vm129_vm2, %v65_v14  ;;  %v111_v14 = vld [vmem:[%s14587_s27 + $0x1c8] sm:$0xff] }
  0x37   :  { %8792 = vmatprep.mubr.msk.f32.mxu0 %vm9981_vm1, %v14480_v1 }
  0x3a   :  { %8793 = vmatmul.mubr.msk.f32.gmra.mxu0 %vm129_vm2, %v66_v15 }
  0x3b   :  { %8795 = vmatprep.mubr.msk.f32.mxu0 %vm9981_vm1, %v14480_v1 }
  0x3e   :  { %8796 = vmatmul.mubr.msk.f32.gmra.mxu0 %vm129_vm2, %v67_v16 }
  0x3f   :  { %8798 = vmatprep.mubr.msk.f32.mxu0 %vm9981_vm1, %v14480_v1 }
  0x42   :  { %8799 = vmatmul.mubr.msk.f32.gmra.mxu0 %vm129_vm2, %v68_v17  ;;  %v112_v17 = vld [vmem:[%s14587_s27 + $0x1d0] sm:$0xff] }
  0x43   :  { %8801 = vmatprep.mubr.msk.f32.mxu0 %vm9981_vm1, %v14480_v1 }
  0x46   :  { %8802 = vmatmul.mubr.msk.f32.gmra.mxu0 %vm129_vm2, %v69_v18 }
  0x47   :  { %8804 = vmatprep.mubr.msk.f32.mxu0 %vm9981_vm1, %v14480_v1 }
  0x4a   :  { %8805 = vmatmul.mubr.msk.f32.gmra.mxu0 %vm129_vm2, %v70_v19 }
  0x4b   :  { %8807 = vmatprep.mubr.msk.f32.mxu0 %vm9981_vm1, %v14480_v1 }
  0x4e   :  { %8808 = vmatmul.mubr.msk.f32.gmra.mxu0 %vm129_vm2, %v71_v20  ;;  %v113_v20 = vld [vmem:[%s14587_s27 + $0x1d8] sm:$0xff] }
  0x4f   :  { %8810 = vmatprep.mubr.msk.f32.mxu0 %vm9981_vm1, %v14480_v1 }
  0x52   :  { %8811 = vmatmul.mubr.msk.f32.gmra.mxu0 %vm129_vm2, %v72_v21 }
  0x53   :  { %8813 = vmatprep.mubr.msk.f32.mxu0 %vm9981_vm1, %v14480_v1 }
  0x56   :  { %8814 = vmatmul.mubr.msk.f32.gmra.mxu0 %vm129_vm2, %v73_v22 }
  0x57   :  { %8816 = vmatprep.mubr.msk.f32.mxu0 %vm9981_vm1, %v14480_v1 }
  0x5a   :  { %8817 = vmatmul.mubr.msk.f32.gmra.mxu0 %vm129_vm2, %v74_v23  ;;  %v114_v23 = vld [vmem:[%s14587_s27 + $0x1e0] sm:$0xff] }
  0x5b   :  { %8819 = vmatprep.mubr.msk.f32.mxu0 %vm9981_vm1, %v14480_v1 }
  0x5e   :  { %8820 = vmatmul.mubr.msk.f32.gmra.mxu0 %vm129_vm2, %v75_v24 }
  0x5f   :  { %8822 = vmatprep.mubr.msk.f32.mxu0 %vm9981_vm1, %v14480_v1 }
  0x62   :  { %8823 = vmatmul.mubr.msk.f32.gmra.mxu0 %vm129_vm2, %v76_v25 }
  0x63   :  { %8825 = vmatprep.mubr.msk.f32.mxu0 %vm9981_vm1, %v14480_v1 }
  0x66   :  { %8826 = vmatmul.mubr.msk.f32.gmra.mxu0 %vm129_vm2, %v77_v26  ;;  %v115_v26 = vld [vmem:[%s14587_s27 + $0x1e8] sm:$0xff] }
  0x67   :  { %8828 = vmatprep.mubr.msk.f32.mxu0 %vm9981_vm1, %v14480_v1 }
  0x6a   :  { %8829 = vmatmul.mubr.msk.f32.gmra.mxu0 %vm129_vm2, %v78_v27 }
  0x6b   :  { %8831 = vmatprep.mubr.msk.f32.mxu0 %vm9981_vm1, %v14480_v1 }
  0x6e   :  { %8832 = vmatmul.mubr.msk.f32.gmra.mxu0 %vm129_vm2, %v79_v28 }
  0x6f   :  { %8834 = vmatprep.mubr.msk.f32.mxu0 %vm9981_vm1, %v14480_v1 }
  0x72   :  { %8835 = vmatmul.mubr.msk.f32.gmra.mxu0 %vm129_vm2, %v80_v29  ;;  %v116_v29 = vld [vmem:[%s14587_s27 + $0x1f0] sm:$0xff] }
  0x73   :  { %8837 = vmatprep.mubr.msk.f32.mxu0 %vm9981_vm1, %v14480_v1 }
  0x76   :  { %8838 = vmatmul.mubr.msk.f32.gmra.mxu0 %vm129_vm2, %v81_v30 }
  0x77   :  { %8840 = vmatprep.mubr.msk.f32.mxu0 %vm9981_vm1, %v14480_v1 }
  0x7a   :  { %8841 = vmatmul.mubr.msk.f32.gmra.mxu0 %vm129_vm2, %v82_v31 }
  0x7b   :  { %8843 = vmatprep.mubr.msk.f32.mxu0 %vm9981_vm1, %v14480_v1 }
  0x7e   :  { %8844 = vmatmul.mubr.msk.f32.gmra.mxu0 %vm129_vm2, %v83_v32  ;;  %v117_v32 = vld [vmem:[%s14587_s27 + $0x1f8] sm:$0xff] }
  0x7f   :  { %8846 = vmatprep.mubr.msk.f32.mxu0 %vm9981_vm1, %v14480_v1 }
  0x82   :  { %8847 = vmatmul.mubr.msk.f32.gmra.mxu0 %vm129_vm2, %v84_v33 }
  0x83   :  { %8849 = vmatprep.mubr.msk.f32.mxu0 %vm9981_vm1, %v14480_v1 }
  0x86   :  { %8850 = vmatmul.mubr.msk.f32.gmra.mxu0 %vm129_vm2, %v85_v34 }
  0x87   :  { %8852 = vmatprep.mubr.msk.f32.mxu0 %vm9981_vm1, %v14480_v1 }
  0x8a   :  { %8853 = vmatmul.mubr.msk.f32.gmra.mxu0 %vm129_vm2, %v86_v35 }
  0x8b   :  { %8855 = vmatprep.mubr.msk.f32.mxu0 %vm9981_vm1, %v14480_v1 }
  0x8e   :  { %8856 = vmatmul.mubr.msk.f32.gmra.mxu0 %vm129_vm2, %v87_v36  ;;  %v118_v36 = vld [vmem:[%s14587_s27 + $0x200] sm:$0xff] }
  0x8f   :  { %8858 = vmatprep.mubr.msk.f32.mxu0 %vm9981_vm1, %v14480_v1 }
  0x92   :  { %8859 = vmatmul.mubr.msk.f32.gmra.mxu0 %vm129_vm2, %v88_v37 }
  0x93   :  { %8861 = vmatprep.mubr.msk.f32.mxu0 %vm9981_vm1, %v14480_v1 }
  0x96   :  { %8862 = vmatmul.mubr.msk.f32.gmra.mxu0 %vm129_vm2, %v89_v38 }
  0x97   :  { %8864 = vmatprep.mubr.msk.f32.mxu0 %vm9981_vm1, %v14480_v1 }
  0x9a   :  { %8865 = vmatmul.mubr.msk.f32.gmra.mxu0 %vm129_vm2, %v90_v39 }
  0x9b   :  { %8867 = vmatprep.mubr.msk.f32.mxu0 %vm9981_vm1, %v14480_v1 }
  0x9e   :  { %8868 = vmatmul.mubr.msk.f32.gmra.mxu0 %vm129_vm2, %v91_v40 }
  0x9f   :  { %8870 = vmatprep.mubr.msk.f32.mxu0 %vm9981_vm1, %v14480_v1 }
  0xa2   :  { %8871 = vmatmul.mubr.msk.f32.gmra.mxu0 %vm129_vm2, %v92_v41 }
  0xa3   :  { %8873 = vmatprep.mubr.msk.f32.mxu0 %vm9981_vm1, %v14480_v1 }
  0xa6   :  { %8874 = vmatmul.mubr.msk.f32.gmra.mxu0 %vm129_vm2, %v93_v42  ;;  %v119_v42 = vld [vmem:[%s14587_s27 + $0x208] sm:$0xff] }
  0xa7   :  { %8876 = vmatprep.mubr.msk.f32.mxu0 %vm9981_vm1, %v14480_v1 }
  0xaa   :  { %8877 = vmatmul.mubr.msk.f32.gmra.mxu0 %vm129_vm2, %v94_v43 }
  0xab   :  { %8879 = vmatprep.mubr.msk.f32.mxu0 %vm9981_vm1, %v14480_v1 }
  0xae   :  { %8880 = vmatmul.mubr.msk.f32.gmra.mxu0 %vm129_vm2, %v95_v44 }
  0xaf   :  { %8882 = vmatprep.mubr.msk.f32.mxu0 %vm9981_vm1, %v14480_v1 }
  0xb2   :  { %8883 = vmatmul.mubr.msk.f32.gmra.mxu0 %vm129_vm2, %v96_v45 }
  0xb3   :  { %8885 = vmatprep.mubr.msk.f32.mxu0 %vm9981_vm1, %v14480_v1 }
  0xb6   :  { %8886 = vmatmul.mubr.msk.f32.gmra.mxu0 %vm129_vm2, %v97_v46 }
  0xb7   :  { %8888 = vmatprep.mubr.msk.f32.mxu0 %vm9981_vm1, %v14480_v1 }
  0xba   :  { %8889 = vmatmul.mubr.msk.f32.gmra.mxu0 %vm129_vm2, %v98_v47  ;;  %v120_v47 = vld [vmem:[%s14587_s27 + $0x210] sm:$0xff] }
  0xbb   :  { %8891 = vmatprep.mubr.msk.f32.mxu0 %vm9981_vm1, %v14480_v1 }
  0xbe   :  { %8892 = vmatmul.mubr.msk.f32.gmra.mxu0 %vm129_vm2, %v99_v48 }
  0xbf   :  { %8894 = vmatprep.mubr.msk.f32.mxu0 %vm9981_vm1, %v14480_v1 }
  0xc2   :  { %8895 = vmatmul.mubr.msk.f32.gmra.mxu0 %vm129_vm2, %v100_v49 }
  0xc3   :  { %8897 = vmatprep.mubr.msk.f32.mxu0 %vm9981_vm1, %v14480_v1 }
  0xc6   :  { %8898 = vmatmul.mubr.msk.f32.gmra.mxu0 %vm129_vm2, %v101_v50 }
  0xc7   :  { %8900 = vmatprep.mubr.msk.f32.mxu0 %vm9981_vm1, %v14480_v1 }
  0xca   :  { %v10371_v52 = vpop.f32.mrf.mxu0  ;;  %8901 = vmatmul.mubr.msk.f32.gmra.mxu0 %vm129_vm2, %v102_v51 }
  0xcb   :  { %8903 = vmatprep.mubr.msk.f32.mxu0 %vm9981_vm1, %v14480_v1 }
  0xcc   :  { %v8758_v54 = vpop.f32.mrf.mxu0 }
  0xcd   :  { %v121_v54 = vld [vmem:[%s14587_s27 + $0x218] sm:$0xff] }
  0xce   :  { %v10379_v55 = vpop.f32.mrf.mxu0  ;;  %8904 = vmatmul.mubr.msk.f32.gmra.mxu0 %vm129_vm2, %v103_v53 }
  0xcf   :  { %8906 = vmatprep.mubr.msk.f32.mxu0 %vm9981_vm1, %v14480_v1 }
  0xd0   :  { %v8761_v57 = vpop.f32.mrf.mxu0 }
  0xd2   :  { %v10387_v58 = vpop.f32.mrf.mxu0  ;;  %8907 = vmatmul.mubr.msk.f32.gmra.mxu0 %vm129_vm2, %v104_v56 }
  0xd3   :  { %8909 = vmatprep.mubr.msk.f32.mxu0 %vm9981_vm1, %v14480_v1 }
  0xd4   :  { %v8764_v60 = vpop.f32.mrf.mxu0 }
  0xd6   :  { %v10395_v61 = vpop.f32.mrf.mxu0  ;;  %8910 = vmatmul.mubr.msk.f32.gmra.mxu0 %vm129_vm2, %v105_v59 }
  0xd7   :  { %8912 = vmatprep.mubr.msk.f32.mxu0 %vm9981_vm1, %v14480_v1 }
  0xd8   :  { %v8767_v63 = vpop.f32.mrf.mxu0 }
  0xda   :  { %v10403_v0 = vpop.f32.mrf.mxu0  ;;  %8913 = vmatmul.mubr.msk.f32.gmra.mxu0 %vm129_vm2, %v106_v62  ;;  %v122_v62 = vld [vmem:[%s14587_s27 + $0x220] sm:$0xff] }
  0xdb   :  { %8915 = vmatprep.mubr.msk.f32.mxu0 %vm9981_vm1, %v14480_v1 }
  0xdc   :  { %v8770_v3 = vpop.f32.mrf.mxu0 }
  0xde   :  { %v10411_v4 = vpop.f32.mrf.mxu0  ;;  %8916 = vmatmul.mubr.msk.f32.gmra.mxu0 %vm129_vm2, %v107_v2 }
  0xdf   :  { %8918 = vmatprep.mubr.msk.f32.mxu0 %vm9981_vm1, %v14480_v1 }
  0xe0   :  { %v8773_v6 = vpop.f32.mrf.mxu0 }
  0xe1   :  { %v123_v6 = vld [vmem:[%s14587_s27 + $0x228] sm:$0xff] }
  0xe2   :  { %v10419_v7 = vpop.f32.mrf.mxu0  ;;  %8919 = vmatmul.mubr.msk.f32.gmra.mxu0 %vm129_vm2, %v108_v5  ;;  %v10586_v5 = vmax.f32 %v10411_v4, 0.0 }
  0xe3   :  { %8921 = vmatprep.mubr.msk.f32.mxu0 %vm9981_vm1, %v14480_v1  ;;  %v10575_v2 = vmax.f32 %v10419_v7, 0.0 }
  0xe4   :  { %v8776_v9 = vpop.f32.mrf.mxu0  ;;  %14598 = vst [vmem:[#allocation15_spill] sm:$0xff] %v10586_v5 }
  0xe5   :  { %14597 = vst [vmem:[#allocation14_spill] sm:$0xff] %v10575_v2 }
  0xe6   :  { %v10427_v10 = vpop.f32.mrf.mxu0  ;;  %8922 = vmatmul.mubr.msk.f32.gmra.mxu0 %vm129_vm2, %v109_v8  ;;  %v10597_v8 = vmax.f32 %v10403_v0, 0.0  ;;  %v124_v0 = vld [vmem:[%s14587_s27 + $0x230] sm:$0xff] }
  0xe7   :  { %8924 = vmatprep.mubr.msk.f32.mxu0 %vm9981_vm1, %v14480_v1  ;;  %v10564_v60 = vmax.f32 %v10427_v10, 0.0  ;;  %v10608_v10 = vmax.f32 %v10395_v61, 0.0 }
  0xe8   :  { %v8779_v12 = vpop.f32.mrf.mxu0  ;;  %14599 = vst [vmem:[#allocation16_spill] sm:$0xff] %v10597_v8 }
  0xe9   :  { %14596 = vst [vmem:[#allocation13_spill] sm:$0xff] %v10564_v60  ;;  %14600 = vst [vmem:[#allocation17_spill] sm:$0xff] %v10608_v10  ;;  %v10621_v12 = vmax.f32 %v10387_v58, 0.0  ;;  %v125_v58 = vld [vmem:[%s14587_s27 + $0x238] sm:$0xff] }
  0xea   :  { %v10435_v13 = vpop.f32.mrf.mxu0  ;;  %8925 = vmatmul.mubr.msk.f32.gmra.mxu0 %vm129_vm2, %v110_v11 }
  0xeb   :  { %8927 = vmatprep.mubr.msk.f32.mxu0 %vm9981_vm1, %v14480_v1  ;;  %v10553_v56 = vmax.f32 %v10435_v13, 0.0  ;;  %14601 = vst [vmem:[#allocation18_spill] sm:$0xff] %v10621_v12  ;;  %v10630_v13 = vmax.f32 %v10379_v55, 0.0  ;;  %v10648_v55 = vmax.f32 %v10371_v52, 0.0  ;;  %v126_v52 = vld [vmem:[%s14587_s27 + $0x240] sm:$0x3] }
  0xec   :  { %v8782_v15 = vpop.f32.mrf.mxu0  ;;  %s9982_s27 = smov [#allocation2]  }
  0xed   :  { %14595 = vst [vmem:[#allocation12_spill] sm:$0xff] %v10553_v56  ;;  %14602 = vst [vmem:[#allocation19_spill] sm:$0xff] %v10630_v13  ;;  %v10642_v15 = vld [vmem:[%s14452_s2] sm:$0xff]  ;;  %s7680_s23 = sshll.u32 %s9982_s27, 4  ;;  %s7681_s23 = int_to_ptr.vmem [resolvable:$true] %s7680_s23 }
  0xee   :  { %v10443_v16 = vpop.f32.mrf.mxu0  ;;  %8928 = vmatmul.mubr.msk.f32.gmra.mxu0 %vm129_vm2, %v111_v14  ;;  %14603 = vst [vmem:[#allocation20_spill] sm:$0xff] %v10648_v55  ;;  %p9963_p1 = scmp.lt.s32.totalorder %s7681_s23, %s7681_s23 }
  0xef   :  { %8930 = vmatprep.mubr.msk.f32.mxu0 %vm9981_vm1, %v14480_v1  ;;  %v10540_v51 = vmax.f32 %v10443_v16, 0.0 }
  0xf0   :  { %v8785_v18 = vpop.f32.mrf.mxu0 }
  0xf1   :  { %14594 = vst [vmem:[#allocation11_spill] sm:$0xff] %v10540_v51 }
  0xf2   :  { %v469_v19 = vpop.f32.mrf.mxu0  ;;  %8931 = vmatmul.mubr.msk.f32.gmra.mxu0 %vm129_vm2, %v112_v17  ;;  %v920_v17 = vunpack.c.h.bf16 %v10642_v15 }
  0xf3   :  { %8933 = vmatprep.mubr.msk.f32.mxu0 %vm9981_vm1, %v14480_v1  ;;  %v10531_v49 = vmax.f32 %v469_v19, 0.0 }
  0xf4   :  { %v8788_v21 = vpop.f32.mrf.mxu0  ;;  %1156 = vmatprep.mubr.f32.mxu1 %v920_v17 }
  0xf5   :  { %14593 = vst [vmem:[#allocation10_spill] sm:$0xff] %v10531_v49 }
  0xf6   :  { %v474_v22 = vpop.f32.mrf.mxu0  ;;  %8934 = vmatmul.mubr.msk.f32.gmra.mxu0 %vm129_vm2, %v113_v20 }
  0xf7   :  { %8936 = vmatprep.mubr.msk.f32.mxu0 %vm9981_vm1, %v14480_v1  ;;  %v10519_v46 = vmax.f32 %v474_v22, 0.0 }
  0xf8   :  { %v8791_v24 = vpop.f32.mrf.mxu0 }
  0xf9   :  { %14592 = vst [vmem:[#allocation9_spill] sm:$0xff] %v10519_v46 }
  0xfa   :  { %v479_v25 = vpop.f32.mrf.mxu0  ;;  %8937 = vmatmul.mubr.msk.f32.gmra.mxu0 %vm129_vm2, %v114_v23 }
  0xfb   :  { %8939 = vmatprep.mubr.msk.f32.mxu0 %vm9981_vm1, %v14480_v1  ;;  %v10509_v43 = vmax.f32 %v479_v25, 0.0 }
  0xfc   :  { %v8794_v27 = vpop.f32.mrf.mxu0 }
  0xfd   :  { %14591 = vst [vmem:[#allocation8_spill] sm:$0xff] %v10509_v43 }
  0xfe   :  { %v484_v28 = vpop.f32.mrf.mxu0  ;;  %8940 = vmatmul.mubr.msk.f32.gmra.mxu0 %vm129_vm2, %v115_v26 }
  0xff   :  { %8942 = vmatprep.mubr.msk.f32.mxu0 %vm9981_vm1, %v14480_v1  ;;  %v10499_v40 = vmax.f32 %v484_v28, 0.0 }
 0x100   :  { %v8797_v30 = vpop.f32.mrf.mxu0 }
 0x101   :  { %14590 = vst [vmem:[#allocation7_spill] sm:$0xff] %v10499_v40 }
 0x102   :  { %v489_v31 = vpop.f32.mrf.mxu0  ;;  %8943 = vmatmul.mubr.msk.f32.gmra.mxu0 %vm129_vm2, %v116_v29 }
 0x103   :  { %8945 = vmatprep.mubr.msk.f32.mxu0 %vm9981_vm1, %v14480_v1  ;;  %v10489_v38 = vmax.f32 %v489_v31, 0.0 }
 0x104   :  { %v8800_v33 = vpop.f32.mrf.mxu0 }
 0x105   :  { %14589 = vst [vmem:[#allocation6_spill] sm:$0xff] %v10489_v38 }
 0x106   :  { %v494_v34 = vpop.f32.mrf.mxu0  ;;  %8946 = vmatmul.mubr.msk.f32.gmra.mxu0 %vm129_vm2, %v117_v32 }
 0x107   :  { %v10482_v35 = vmax.f32 %v494_v34, 0.0  ;;  %8948 = vmatprep.mubr.msk.f32.mxu0 %vm9981_vm1, %v14480_v1 }
 0x108   :  { %v8803_v37 = vpop.f32.mrf.mxu0 }
 0x109   :  { %14588 = vst [vmem:[#allocation5_spill] sm:$0xff] %v10482_v35  ;;  %1093 = vmatpush1.msra.mxu1 %v10482_v35  ;;  %1836 = vmatpush1.msra.mxu0 %v10482_v35 }
 0x10a   :  { %v10493_v39 = vpop.f32.mrf.mxu0  ;;  %8949 = vmatmul.mubr.msk.f32.gmra.mxu0 %vm129_vm2, %v118_v36  ;;  %1094 = vmatprep.subr.mxu1 %v14480_v1 }
 0x10b   :  { %1837 = vmatprep.subr.mxu0 %v14480_v1  ;;  %1095 = vmatpush1.msra.mxu1 %v10489_v38 }
 0x10c   :  { %1838 = vmatpush1.msra.mxu0 %v10489_v38  ;;  %v8806_v41 = vpop.f32.mrf.mxu0  ;;  %1096 = vmatprep.subr.mxu1 %v14480_v1 }
 0x10d   :  { %1839 = vmatprep.subr.mxu0 %v14480_v1  ;;  %8951 = vmatprep.mubr.msk.f32.mxu0 %vm9981_vm1, %v14480_v1 }
 0x10e   :  { %1097 = vmatpush1.msra.mxu1 %v10499_v40  ;;  %1840 = vmatpush1.msra.mxu0 %v10499_v40  ;;  %v10513_v44 = vpop.f32.mrf.mxu0 }
 0x10f   :  { %8952 = vmatmul.mubr.msk.f32.gmra.mxu0 %vm129_vm2, %v119_v42  ;;  %1098 = vmatprep.subr.mxu1 %v14480_v1 }
 0x110   :  { %1841 = vmatprep.subr.mxu0 %v14480_v1  ;;  %1099 = vmatpush1.msra.mxu1 %v10509_v43  ;;  %v8809_v45 = vpop.f32.mrf.mxu0 }
 0x111   :  { %1842 = vmatpush1.msra.mxu0 %v10509_v43  ;;  %1100 = vmatprep.subr.mxu1 %v14480_v1 }
 0x112   :  { %1843 = vmatprep.subr.mxu0 %v14480_v1  ;;  %8954 = vmatprep.mubr.msk.f32.mxu0 %vm9981_vm1, %v14480_v1  ;;  %v10529_v48 = vpop.f32.mrf.mxu0 }
 0x113   :  { %1101 = vmatpush1.msra.mxu1 %v10519_v46  ;;  %1844 = vmatpush1.msra.mxu0 %v10519_v46 }
 0x114   :  { %8955 = vmatmul.mubr.msk.f32.gmra.mxu0 %vm129_vm2, %v120_v47  ;;  %1102 = vmatprep.subr.mxu1 %v14480_v1  ;;  %v8812_v50 = vpop.f32.mrf.mxu0 }
 0x115   :  { %1845 = vmatprep.subr.mxu0 %v14480_v1  ;;  %1103 = vmatpush1.msra.mxu1 %v10531_v49 }
 0x116   :  { %1846 = vmatpush1.msra.mxu0 %v10531_v49  ;;  %1104 = vmatprep.subr.mxu1 %v14480_v1  ;;  %v10544_v53 = vpop.f32.mrf.mxu0 }
 0x117   :  { %1847 = vmatprep.subr.mxu0 %v14480_v1  ;;  %8957 = vmatprep.mubr.msk.f32.mxu0 %vm9981_vm1, %v14480_v1 }
 0x118   :  { %1105 = vmatpush1.msra.mxu1 %v10540_v51  ;;  %1848 = vmatpush1.msra.mxu0 %v10540_v51  ;;  %v8815_v57 = vpop.f32.mrf.mxu0 }
 0x119   :  { %8958 = vmatmul.mubr.msk.f32.gmra.mxu0 %vm129_vm2, %v121_v54  ;;  %1106 = vmatprep.subr.mxu1 %v14480_v1 }
 0x11a   :  { %1849 = vmatprep.subr.mxu0 %v14480_v1  ;;  %1107 = vmatpush1.msra.mxu1 %v10553_v56  ;;  %v10561_v59 = vpop.f32.mrf.mxu0 }
 0x11b   :  { %1850 = vmatpush1.msra.mxu0 %v10553_v56  ;;  %1108 = vmatprep.subr.mxu1 %v14480_v1 }
 0x11c   :  { %1851 = vmatprep.subr.mxu0 %v14480_v1  ;;  %8960 = vmatprep.mubr.msk.f32.mxu0 %vm9981_vm1, %v14480_v1  ;;  %v8818_v63 = vpop.f32.mrf.mxu0 }
 0x11d   :  { %1109 = vmatpush1.msra.mxu1 %v10564_v60  ;;  %1852 = vmatpush1.msra.mxu0 %v10564_v60  ;;  %v7826_v60 = vld [vmem:[%s14452_s2 + $0x2bc] sm:$0xff] }
 0x11e   :  { %8961 = vmatmul.mubr.msk.f32.gmra.mxu0 %vm129_vm2, %v122_v62  ;;  %1110 = vmatprep.subr.mxu1 %v14480_v1  ;;  %v10581_v3 = vpop.f32.mrf.mxu0 }
 0x11f   :  { %1853 = vmatprep.subr.mxu0 %v14480_v1  ;;  %1111 = vmatpush1.msra.mxu1 %v10575_v2 }
 0x120   :  { %1854 = vmatpush1.msra.mxu0 %v10575_v2  ;;  %1112 = vmatprep.subr.mxu1 %v14480_v1  ;;  %v8821_v7 = vpop.f32.mrf.mxu0 }
 0x121   :  { %1855 = vmatprep.subr.mxu0 %v14480_v1  ;;  %8963 = vmatprep.mubr.msk.f32.mxu0 %vm9981_vm1, %v14480_v1 }
 0x122   :  { %1113 = vmatpush1.msra.mxu1 %v10586_v5  ;;  %1856 = vmatpush1.msra.mxu0 %v10586_v5  ;;  %v10601_v4 = vpop.f32.mrf.mxu0 }
 0x123   :  { %8964 = vmatmul.mubr.msk.f32.gmra.mxu0 %vm129_vm2, %v123_v6  ;;  %1114 = vmatprep.subr.mxu1 %v14480_v1 }
 0x124   :  { %1857 = vmatprep.subr.mxu0 %v14480_v1  ;;  %1115 = vmatpush1.msra.mxu1 %v10597_v8  ;;  %v8824_v9 = vpop.f32.mrf.mxu0 }
 0x125   :  { %1858 = vmatpush1.msra.mxu0 %v10597_v8  ;;  %1116 = vmatprep.subr.mxu1 %v14480_v1 }
 0x126   :  { %1859 = vmatprep.subr.mxu0 %v14480_v1  ;;  %8966 = vmatprep.mubr.msk.f32.mxu0 %vm9981_vm1, %v14480_v1  ;;  %v10618_v11 = vpop.f32.mrf.mxu0 }
 0x127   :  { %1117 = vmatpush1.msra.mxu1 %v10608_v10  ;;  %1860 = vmatpush1.msra.mxu0 %v10608_v10  ;;  %v10720_v7 = vmax.f32 %v10618_v11, 0.0  ;;  %v10736_v11 = vmax.f32 %v10581_v3, 0.0  ;;  %v10752_v3 = vmax.f32 %v10544_v53, 0.0  ;;  %v859_v53 = vld [vmem:[%s14452_s2 + $0x14] sm:$0xff] }
 0x128   :  { %8967 = vmatmul.mubr.msk.f32.gmra.mxu0 %vm129_vm2, %v124_v0  ;;  %1118 = vmatprep.subr.mxu1 %v14480_v1  ;;  %v8827_v61 = vpop.f32.mrf.mxu0  ;;  %v10727_v0 = vmax.f32 %v10601_v4, 0.0  ;;  %v10743_v4 = vmax.f32 %v10561_v59, 0.0  ;;  %v10759_v59 = vmax.f32 %v10529_v48, 0.0 }
 0x129   :  { %1861 = vmatprep.subr.mxu0 %v14480_v1  ;;  %1119 = vmatpush1.msra.mxu1 %v10621_v12  ;;  %14612 = vst [vmem:[#allocation29_spill] sm:$0xff] %v10720_v7  ;;  %14614 = vst [vmem:[#allocation31_spill] sm:$0xff] %v10736_v11 }
 0x12a   :  { %1862 = vmatpush1.msra.mxu0 %v10621_v12  ;;  %1120 = vmatprep.subr.mxu1 %v14480_v1  ;;  %v10637_v14 = vpop.f32.mrf.mxu0  ;;  %14613 = vst [vmem:[#allocation30_spill] sm:$0xff] %v10727_v0  ;;  %14615 = vst [vmem:[#allocation32_spill] sm:$0xff] %v10743_v4 }
 0x12b   :  { %1863 = vmatprep.subr.mxu0 %v14480_v1  ;;  %8969 = vmatprep.mubr.msk.f32.mxu0 %vm9981_vm1, %v14480_v1  ;;  %v10711_v63 = vmax.f32 %v10637_v14, 0.0  ;;  %14616 = vst [vmem:[#allocation33_spill] sm:$0xff] %v10752_v3  ;;  %14617 = vst [vmem:[#allocation34_spill] sm:$0xff] %v10759_v59 }
 0x12c   :  { %1121 = vmatpush1.msra.mxu1 %v10630_v13  ;;  %1864 = vmatpush1.msra.mxu0 %v10630_v13  ;;  %v8830_v16 = vpop.f32.mrf.mxu0 }
 0x12d   :  { %8970 = vmatmul.mubr.msk.f32.gmra.mxu0 %vm129_vm2, %v125_v58  ;;  %1122 = vmatprep.subr.mxu1 %v14480_v1  ;;  %14611 = vst [vmem:[#allocation28_spill] sm:$0xff] %v10711_v63 }
 0x12e   :  { %1865 = vmatprep.subr.mxu0 %v14480_v1  ;;  %1123 = vmatpush1.msra.mxu1 %v10648_v55  ;;  %v544_v18 = vpop.f32.mrf.mxu0 }
 0x12f   :  { %1866 = vmatpush1.msra.mxu0 %v10648_v55  ;;  %8972 = vmatprep.mubr.msk.f32.mxu0 %vm9981_vm1, %v14480_v1  ;;  %v10704_v57 = vmax.f32 %v544_v18, 0.0  ;;  %v919_v18 = vunpack.c.l.bf16 %v10642_v15  ;;  %v924_v15 = vunpack.c.l.bf16 %v859_v53 }
 0x130   :  { %v8833_v19 = vpop.f32.mrf.mxu0  ;;  %1124 = vmatprep.subr.mxu1 %v14480_v1  ;;  %1867 = vmatprep.subr.mxu0 %v14480_v1 }
 0x131   :  { %8973 = vmatmul.mubr.msk.f32.gmra.mxu0 %vm129_vm2, %v126_v52  ;;  %14610 = vst [vmem:[#allocation27_spill] sm:$0xff] %v10704_v57  ;;  %v10771_v52 = vmax.f32 %v10513_v44, 0.0  ;;  %v10779_v19 = vmax.f32 %v10493_v39, 0.0  ;;  %v925_v44 = vunpack.c.h.bf16 %v859_v53 }
 0x132   :  { %v549_v20 = vpop.f32.mrf.mxu0 }
 0x133   :  { %v10696_v50 = vmax.f32 %v549_v20, 0.0  ;;  %14618 = vst [vmem:[#allocation35_spill] sm:$0xff] %v10771_v52  ;;  %14619 = vst [vmem:[#allocation36_spill] sm:$0xff] %v10779_v19 }
 0x134   :  { %v8836_v21 = vpop.f32.mrf.mxu0 }
 0x135   :  { %14609 = vst [vmem:[#allocation26_spill] sm:$0xff] %v10696_v50  ;;  %v862_v21 = vld [vmem:[%s14452_s2 + $0x28] sm:$0xff] }
 0x136   :  { %v554_v22 = vpop.f32.mrf.mxu0 }
 0x137   :  { %v10690_v45 = vmax.f32 %v554_v22, 0.0  ;;  %v930_v22 = vunpack.c.h.bf16 %v862_v21 }
 0x138   :  { %v8839_v23 = vpop.f32.mrf.mxu0 }
 0x139   :  { %14608 = vst [vmem:[#allocation25_spill] sm:$0xff] %v10690_v45 }
 0x13a   :  { %v559_v24 = vpop.f32.mrf.mxu0 }
 0x13b   :  { %v10682_v41 = vmax.f32 %v559_v24, 0.0  ;;  %v865_v24 = vld [vmem:[%s14452_s2 + $0x3c] sm:$0xff] }
 0x13c   :  { %v8842_v25 = vpop.f32.mrf.mxu0 }
 0x13d   :  { %14607 = vst [vmem:[#allocation24_spill] sm:$0xff] %v10682_v41 }
 0x13e   :  { %v564_v26 = vpop.f32.mrf.mxu0 }
 0x13f   :  { %v10676_v36 = vmax.f32 %v564_v26, 0.0  ;;  %v929_v26 = vunpack.c.l.bf16 %v862_v21  ;;  %v874_v21 = vld [vmem:[%s14452_s2 + $0x78] sm:$0xff] }
 0x140   :  { %v8845_v27 = vpop.f32.mrf.mxu0 }
 0x141   :  { %14606 = vst [vmem:[#allocation23_spill] sm:$0xff] %v10676_v36  ;;  %v935_v27 = vunpack.c.h.bf16 %v865_v24 }
 0x142   :  { %v569_v28 = vpop.f32.mrf.mxu0 }
 0x143   :  { %v10668_v33 = vmax.f32 %v569_v28, 0.0 }
 0x144   :  { %v8848_v29 = vpop.f32.mrf.mxu0 }
 0x145   :  { %14605 = vst [vmem:[#allocation22_spill] sm:$0xff] %v10668_v33  ;;  %v868_v29 = vld [vmem:[%s14452_s2 + $0x50] sm:$0xff] }
 0x146   :  { %v574_v30 = vpop.f32.mrf.mxu0 }
 0x147   :  { %v10666_v31 = vmax.f32 %v574_v30, 0.0 }
 0x148   :  { %v8851_v32 = vpop.f32.mrf.mxu0 }
 0x149   :  { %14604 = vst [vmem:[#allocation21_spill] sm:$0xff] %v10666_v31  ;;  %1125 = vmatpush2.msra.mxu1 %v10666_v31  ;;  %1868 = vmatpush2.msra.mxu0 %v10666_v31  ;;  %v934_v32 = vunpack.c.l.bf16 %v865_v24 }
 0x14a   :  { %v10672_v34 = vpop.f32.mrf.mxu0  ;;  %1126 = vmatprep.subr.mxu1 %v14480_v1  ;;  %1869 = vmatprep.subr.mxu0 %v14480_v1 }
 0x14b   :  { %1127 = vmatpush2.msra.mxu1 %v10668_v33  ;;  %1870 = vmatpush2.msra.mxu0 %v10668_v33  ;;  %v7808_v33 = vld [vmem:[%s14452_s2 + $0x244] sm:$0xff] }
 0x14c   :  { %v8854_v37 = vpop.f32.mrf.mxu0  ;;  %1128 = vmatprep.subr.mxu1 %v14480_v1  ;;  %1871 = vmatprep.subr.mxu0 %v14480_v1  ;;  %v1708_v55 = vunpack.c.h.bf16 %v7808_v33 }
 0x14d   :  { %1129 = vmatpush2.msra.mxu1 %v10676_v36  ;;  %1872 = vmatpush2.msra.mxu0 %v10676_v36  ;;  %v940_v37 = vunpack.c.h.bf16 %v868_v29 }
 0x14e   :  { %v10686_v42 = vpop.f32.mrf.mxu0  ;;  %1130 = vmatprep.subr.mxu1 %v14480_v1  ;;  %1873 = vmatprep.subr.mxu0 %v14480_v1 }
 0x14f   :  { %1131 = vmatpush2.msra.mxu1 %v10682_v41  ;;  %1874 = vmatpush2.msra.mxu0 %v10682_v41 }
 0x150   :  { %v8857_v47 = vpop.f32.mrf.mxu0  ;;  %1132 = vmatprep.subr.mxu1 %v14480_v1  ;;  %1875 = vmatprep.subr.mxu0 %v14480_v1 }
 0x151   :  { %1133 = vmatpush2.msra.mxu1 %v10690_v45  ;;  %1876 = vmatpush2.msra.mxu0 %v10690_v45 }
 0x152   :  { %v10700_v54 = vpop.f32.mrf.mxu0  ;;  %1134 = vmatprep.subr.mxu1 %v14480_v1  ;;  %1877 = vmatprep.subr.mxu0 %v14480_v1 }
 0x153   :  { %1135 = vmatpush2.msra.mxu1 %v10696_v50  ;;  %1878 = vmatpush2.msra.mxu0 %v10696_v50 }
 0x154   :  { %v8860_v62 = vpop.f32.mrf.mxu0  ;;  %1136 = vmatprep.subr.mxu1 %v14480_v1  ;;  %1879 = vmatprep.subr.mxu0 %v14480_v1 }
 0x155   :  { %1137 = vmatpush2.msra.mxu1 %v10704_v57  ;;  %1880 = vmatpush2.msra.mxu0 %v10704_v57  ;;  %v871_v62 = vld [vmem:[%s14452_s2 + $0x64] sm:$0xff] }
 0x156   :  { %v10715_v6 = vpop.f32.mrf.mxu0  ;;  %1138 = vmatprep.subr.mxu1 %v14480_v1  ;;  %1881 = vmatprep.subr.mxu0 %v14480_v1 }
 0x157   :  { %1139 = vmatpush2.msra.mxu1 %v10711_v63  ;;  %1882 = vmatpush2.msra.mxu0 %v10711_v63 }
 0x158   :  { %v8863_v9 = vpop.f32.mrf.mxu0  ;;  %1140 = vmatprep.subr.mxu1 %v14480_v1  ;;  %1883 = vmatprep.subr.mxu0 %v14480_v1 }
 0x159   :  { %1141 = vmatpush2.msra.mxu1 %v10720_v7  ;;  %1884 = vmatpush2.msra.mxu0 %v10720_v7  ;;  %v7784_v9 = vld [vmem:[%s14452_s2 + $0x1a4] sm:$0xff] }
 0x15a   :  { %v10731_v61 = vpop.f32.mrf.mxu0  ;;  %1142 = vmatprep.subr.mxu1 %v14480_v1  ;;  %1885 = vmatprep.subr.mxu0 %v14480_v1 }
 0x15b   :  { %1143 = vmatpush2.msra.mxu1 %v10727_v0  ;;  %1886 = vmatpush2.msra.mxu0 %v10727_v0  ;;  %v10953_v0 = vld [vmem:[%s14452_s2 + $0x8] sm:$0xff] }
 0x15c   :  { %v8866_v58 = vpop.f32.mrf.mxu0  ;;  %1144 = vmatprep.subr.mxu1 %v14480_v1  ;;  %1887 = vmatprep.subr.mxu0 %v14480_v1 }
 0x15d   :  { %1145 = vmatpush2.msra.mxu1 %v10736_v11  ;;  %1888 = vmatpush2.msra.mxu0 %v10736_v11  ;;  %v1667_v58 = vunpack.c.l.bf16 %v7784_v9 }
 0x15e   :  { %v10747_v14 = vpop.f32.mrf.mxu0  ;;  %1146 = vmatprep.subr.mxu1 %v14480_v1  ;;  %1889 = vmatprep.subr.mxu0 %v14480_v1 }
 0x15f   :  { %1147 = vmatpush2.msra.mxu1 %v10743_v4  ;;  %1890 = vmatpush2.msra.mxu0 %v10743_v4 }
 0x160   :  { %v8869_v16 = vpop.f32.mrf.mxu0  ;;  %1148 = vmatprep.subr.mxu1 %v14480_v1  ;;  %1891 = vmatprep.subr.mxu0 %v14480_v1 }
 0x161   :  { %1149 = vmatpush2.msra.mxu1 %v10752_v3  ;;  %1892 = vmatpush2.msra.mxu0 %v10752_v3  ;;  %v1668_v16 = vunpack.c.h.bf16 %v7784_v9 }
 0x162   :  { %v10763_v17 = vpop.f32.mrf.mxu0  ;;  %1150 = vmatprep.subr.mxu1 %v14480_v1  ;;  %1893 = vmatprep.subr.mxu0 %v14480_v1 }
 0x163   :  { %1151 = vmatpush2.msra.mxu1 %v10759_v59  ;;  %1894 = vmatpush2.msra.mxu0 %v10759_v59 }
 0x164   :  { %v8872_v48 = vpop.f32.mrf.mxu0  ;;  %1152 = vmatprep.subr.mxu1 %v14480_v1  ;;  %1895 = vmatprep.subr.mxu0 %v14480_v1 }
 0x165   :  { %1153 = vmatpush2.msra.mxu1 %v10771_v52  ;;  %1896 = vmatpush2.msra.mxu0 %v10771_v52  ;;  %v939_v48 = vunpack.c.l.bf16 %v868_v29 }
 0x166   :  { %v10783_v20 = vpop.f32.mrf.mxu0  ;;  %1154 = vmatprep.subr.mxu1 %v14480_v1  ;;  %1897 = vmatprep.subr.mxu0 %v14480_v1 }
 0x167   :  { %1155 = vmatpush2.msra.mxu1 %v10779_v19  ;;  %1898 = vmatpush2.msra.mxu0 %v10779_v19 }
 0x168   :  { %v8875_v39 = vpop.f32.mrf.mxu0  ;;  %1262 = vmatprep.subr.mxu1 %v14480_v1  ;;  %1157 = vmatmul.mubr.f32.vlgmr.msra.gmra.mxu1 %v919_v18  ;;  %v945_v18 = vunpack.c.h.bf16 %v871_v62 }
 0x169   :  { %1161 = vmatprep.mubr.f32.mxu1 %v925_v44  ;;  %9056 = vmatprep.subr.mxu0 %v14480_v1 }
 0x16a   :  { %v10794_v23 = vpop.f32.mrf.mxu0  ;;  %1899 = vmatprep.mubr.f32.mxu0 %v1668_v16  ;;  %v883_v16 = vld [vmem:[%s14452_s2 + $0xb4] sm:$0xff] }
 0x16b   :  { %1900 = vmatmul.mubr.f32.vlgmr.msra.gmra.mxu0 %v1667_v58 }
 0x16c   :  { %v8878_v25 = vpop.f32.mrf.mxu0  ;;  %1162 = vmatmul.mubr.f32.gmra.mxu1 %v924_v15  ;;  %v944_v15 = vunpack.c.l.bf16 %v871_v62 }
 0x16d   :  { %1166 = vmatprep.mubr.f32.mxu1 %v930_v22  ;;  %v950_v22 = vunpack.c.h.bf16 %v874_v21  ;;  %v877_v25 = vld [vmem:[%s14452_s2 + $0x8c] sm:$0xff] }
 0x16e   :  { %v10799_v28 = vpop.f32.mrf.mxu0  ;;  %v955_v29 = vunpack.c.h.bf16 %v877_v25  ;;  %v954_v62 = vunpack.c.l.bf16 %v877_v25  ;;  %v964_v25 = vunpack.c.l.bf16 %v883_v16 }
 0x170   :  { %v8881_v30 = vpop.f32.mrf.mxu0  ;;  %1167 = vmatmul.mubr.f32.gmra.mxu1 %v929_v26 }
 0x171   :  { %1171 = vmatprep.mubr.f32.mxu1 %v935_v27  ;;  %v949_v27 = vunpack.c.l.bf16 %v874_v21 }
 0x172   :  { %v10804_v47 = vpop.f32.mrf.mxu0 }
 0x174   :  { %v8884_v53 = vpop.f32.mrf.mxu0  ;;  %1172 = vmatmul.mubr.f32.gmra.mxu1 %v934_v32  ;;  %v880_v32 = vld [vmem:[%s14452_s2 + $0xa0] sm:$0xff] }
 0x175   :  { %1176 = vmatprep.mubr.f32.mxu1 %v940_v37  ;;  %v960_v9 = vunpack.c.h.bf16 %v880_v32 }
 0x176   :  { %v634_v44 = vpop.f32.mrf.mxu0 }
 0x178   :  { %v8887_v39 = vpop.f32.mrf.mxu0  ;;  %1177 = vmatmul.mubr.f32.gmra.mxu1 %v939_v48  ;;  %v959_v48 = vunpack.c.l.bf16 %v880_v32  ;;  %v889_v32 = vld [vmem:[%s14452_s2 + $0xdc] sm:$0xff] }
 0x179   :  { %1181 = vmatprep.mubr.f32.mxu1 %v945_v18  ;;  %v965_v18 = vunpack.c.h.bf16 %v883_v16  ;;  %v886_v39 = vld [vmem:[%s14452_s2 + $0xc8] sm:$0xff]  ;;  %v975_v16 = vunpack.c.h.bf16 %v889_v32 }
 0x17a   :  { %v639_v24 = vpop.f32.mrf.mxu0 }
 0x17c   :  { %v8890_v26 = vpop.f32.mrf.mxu0  ;;  %1182 = vmatmul.mubr.f32.gmra.mxu1 %v944_v15 }
 0x17d   :  { %1186 = vmatprep.mubr.f32.mxu1 %v950_v22 }
 0x17e   :  { %v644_v30 = vpop.f32.mrf.mxu0 }
 0x180   :  { %v8893_v37 = vpop.f32.mrf.mxu0  ;;  %1187 = vmatmul.mubr.f32.gmra.mxu1 %v949_v27  ;;  %v970_v27 = vunpack.c.h.bf16 %v886_v39 }
 0x181   :  { %1191 = vmatprep.mubr.f32.mxu1 %v955_v29  ;;  %v10838_v37 = vmax.f32 %v644_v30, 0.0  ;;  %v892_v30 = vld [vmem:[%s14452_s2 + $0xf0] sm:$0xff] }
 0x182   :  { %v649_v58 = vpop.f32.mrf.mxu0 }
 0x183   :  { %v10829_v26 = vmax.f32 %v649_v58, 0.0  ;;  %v10842_v58 = vmax.f32 %v639_v24, 0.0  ;;  %v974_v24 = vunpack.c.l.bf16 %v889_v32  ;;  %v10871_v32 = vmax.f32 %v10794_v23, 0.0 }
 0x184   :  { %v8896_v53 = vpop.f32.mrf.mxu0  ;;  %1192 = vmatmul.mubr.f32.gmra.mxu1 %v954_v62 }
 0x185   :  { %1196 = vmatprep.mubr.f32.mxu1 %v960_v9  ;;  %v969_v9 = vunpack.c.l.bf16 %v886_v39  ;;  %v980_v39 = vunpack.c.h.bf16 %v892_v30 }
 0x186   :  { %v654_v21 = vpop.f32.mrf.mxu0 }
 0x187   :  { %v10827_v15 = vmax.f32 %v654_v21, 0.0  ;;  %v10856_v21 = vmax.f32 %v10804_v47, 0.0  ;;  %v979_v47 = vunpack.c.l.bf16 %v892_v30 }
 0x188   :  { %v8899_v22 = vpop.f32.mrf.mxu0  ;;  %1197 = vmatmul.mubr.f32.gmra.mxu1 %v959_v48  ;;  %v10851_v48 = vmax.f32 %v634_v44, 0.0  ;;  %v895_v44 = vld [vmem:[%s14452_s2 + $0x104] sm:$0xff] }
 0x189   :  { %1263 = vmatpush1.msra.mxu1 %v10827_v15  ;;  %1201 = vmatprep.mubr.f32.mxu1 %v965_v18  ;;  %v984_v23 = vunpack.c.l.bf16 %v895_v44 }
 0x18a   :  { %v10832_v29 = vpop.f32.mrf.mxu0  ;;  %1264 = vmatprep.subr.mxu1 %v14480_v1 }
 0x18b   :  { %1265 = vmatpush1.msra.mxu1 %v10829_v26  ;;  %v11061_v31 = vmax.f32 %v10832_v29, 0.0  ;;  %v7811_v29 = vld [vmem:[%s14452_s2 + $0x258] sm:$0xff] }
 0x18c   :  { %v8902_v62 = vpop.f32.mrf.mxu0  ;;  %1266 = vmatprep.subr.mxu1 %v14480_v1  ;;  %1202 = vmatmul.mubr.f32.gmra.mxu1 %v964_v25  ;;  %v10866_v25 = vmax.f32 %v10799_v28, 0.0  ;;  %v898_v28 = vld [vmem:[%s14452_s2 + $0x118] sm:$0xff]  ;;  %v1713_v12 = vunpack.c.h.bf16 %v7811_v29  ;;  %v1712_v8 = vunpack.c.l.bf16 %v7811_v29 }
 0x18d   :  { %1267 = vmatpush1.msra.mxu1 %v10838_v37  ;;  %1206 = vmatprep.mubr.f32.mxu1 %v970_v27  ;;  %v985_v62 = vunpack.c.h.bf16 %v895_v44  ;;  %14644 = vst [vmem:[#allocation60_spill] sm:$0xff] %v11061_v31 }
 0x18e   :  { %v10845_v53 = vpop.f32.mrf.mxu0  ;;  %1268 = vmatprep.subr.mxu1 %v14480_v1 }
 0x18f   :  { %1269 = vmatpush1.msra.mxu1 %v10842_v58 }
 0x190   :  { %v8905_v18 = vpop.f32.mrf.mxu0  ;;  %1270 = vmatprep.subr.mxu1 %v14480_v1  ;;  %1207 = vmatmul.mubr.f32.gmra.mxu1 %v969_v9 }
 0x191   :  { %1271 = vmatpush1.msra.mxu1 %v10851_v48  ;;  %1211 = vmatprep.mubr.f32.mxu1 %v975_v16  ;;  %v10881_v16 = vmax.f32 %v10783_v20, 0.0  ;;  %v10886_v18 = vmax.f32 %v10763_v17, 0.0  ;;  %v901_v20 = vld [vmem:[%s14452_s2 + $0x12c] sm:$0xff]  ;;  %v989_v17 = vunpack.c.l.bf16 %v898_v28 }
 0x192   :  { %v10859_v22 = vpop.f32.mrf.mxu0  ;;  %1272 = vmatprep.subr.mxu1 %v14480_v1 }
 0x193   :  { %1273 = vmatpush1.msra.mxu1 %v10856_v21  ;;  %14620 = vst [vmem:[#allocation37_spill] sm:$0xff] %v10881_v16  ;;  %14621 = vst [vmem:[#allocation38_spill] sm:$0xff] %v10886_v18 }
 0x194   :  { %v8908_v27 = vpop.f32.mrf.mxu0  ;;  %1274 = vmatprep.subr.mxu1 %v14480_v1  ;;  %1212 = vmatmul.mubr.f32.gmra.mxu1 %v974_v24  ;;  %v990_v24 = vunpack.c.h.bf16 %v898_v28 }
 0x195   :  { %1275 = vmatpush1.msra.mxu1 %v10866_v25  ;;  %1216 = vmatprep.mubr.f32.mxu1 %v980_v39  ;;  %v10896_v27 = vmax.f32 %v10747_v14, 0.0  ;;  %v904_v14 = vld [vmem:[%s14452_s2 + $0x140] sm:$0xff] }
 0x196   :  { %v10874_v9 = vpop.f32.mrf.mxu0  ;;  %1276 = vmatprep.subr.mxu1 %v14480_v1 }
 0x197   :  { %1277 = vmatpush1.msra.mxu1 %v10871_v32  ;;  %14622 = vst [vmem:[#allocation39_spill] sm:$0xff] %v10896_v27 }
 0x198   :  { %v8911_v30 = vpop.f32.mrf.mxu0  ;;  %1278 = vmatprep.subr.mxu1 %v14480_v1  ;;  %1217 = vmatmul.mubr.f32.gmra.mxu1 %v979_v47  ;;  %v10901_v47 = vmax.f32 %v10731_v61, 0.0  ;;  %v994_v61 = vunpack.c.l.bf16 %v901_v20 }
 0x199   :  { %1279 = vmatpush1.msra.mxu1 %v10881_v16  ;;  %1221 = vmatprep.mubr.f32.mxu1 %v985_v62  ;;  %v995_v62 = vunpack.c.h.bf16 %v901_v20 }
 0x19a   :  { %v10889_v39 = vpop.f32.mrf.mxu0  ;;  %1280 = vmatprep.subr.mxu1 %v14480_v1  ;;  %14623 = vst [vmem:[#allocation40_spill] sm:$0xff] %v10901_v47 }
 0x19b   :  { %1281 = vmatpush1.msra.mxu1 %v10886_v18 }
 0x19c   :  { %v8914_v44 = vpop.f32.mrf.mxu0  ;;  %1282 = vmatprep.subr.mxu1 %v14480_v1  ;;  %1222 = vmatmul.mubr.f32.gmra.mxu1 %v984_v23  ;;  %v10916_v23 = vmax.f32 %v10700_v54, 0.0  ;;  %v999_v54 = vunpack.c.l.bf16 %v904_v14 }
 0x19d   :  { %1283 = vmatpush1.msra.mxu1 %v10896_v27  ;;  %1226 = vmatprep.mubr.f32.mxu1 %v990_v24  ;;  %v10911_v44 = vmax.f32 %v10715_v6, 0.0  ;;  %v1000_v24 = vunpack.c.h.bf16 %v904_v14  ;;  %v907_v6 = vld [vmem:[%s14452_s2 + $0x154] sm:$0xff] }
 0x19e   :  { %v10904_v30 = vpop.f32.mrf.mxu0  ;;  %1284 = vmatprep.subr.mxu1 %v14480_v1  ;;  %14625 = vst [vmem:[#allocation42_spill] sm:$0xff] %v10916_v23 }
 0x19f   :  { %14624 = vst [vmem:[#allocation41_spill] sm:$0xff] %v10911_v44  ;;  %1285 = vmatpush1.msra.mxu1 %v10901_v47 }
 0x1a0   :  { %v8917_v28 = vpop.f32.mrf.mxu0  ;;  %1286 = vmatprep.subr.mxu1 %v14480_v1  ;;  %1227 = vmatmul.mubr.f32.gmra.mxu1 %v989_v17  ;;  %v10931_v17 = vmax.f32 %v10672_v34, 0.0  ;;  %v1004_v34 = vunpack.c.l.bf16 %v907_v6 }
 0x1a1   :  { %1287 = vmatpush1.msra.mxu1 %v10911_v44  ;;  %1231 = vmatprep.mubr.f32.mxu1 %v995_v62  ;;  %v10926_v28 = vmax.f32 %v10686_v42, 0.0  ;;  %v1005_v62 = vunpack.c.h.bf16 %v907_v6  ;;  %v910_v42 = vld [vmem:[%s14452_s2 + $0x168] sm:$0xff] }
 0x1a2   :  { %v10919_v19 = vpop.f32.mrf.mxu0  ;;  %1288 = vmatprep.subr.mxu1 %v14480_v1  ;;  %14627 = vst [vmem:[#allocation44_spill] sm:$0xff] %v10931_v17  ;;  %v1010_v14 = vunpack.c.h.bf16 %v910_v42  ;;  %v1009_v3 = vunpack.c.l.bf16 %v910_v42 }
 0x1a3   :  { %14626 = vst [vmem:[#allocation43_spill] sm:$0xff] %v10926_v28  ;;  %1289 = vmatpush1.msra.mxu1 %v10916_v23 }
 0x1a4   :  { %v8920_v20 = vpop.f32.mrf.mxu0  ;;  %1290 = vmatprep.subr.mxu1 %v14480_v1  ;;  %1232 = vmatmul.mubr.f32.gmra.mxu1 %v994_v61 }
 0x1a5   :  { %1291 = vmatpush1.msra.mxu1 %v10926_v28  ;;  %1236 = vmatprep.mubr.f32.mxu1 %v1000_v24  ;;  %v913_v24 = vld [vmem:[%s14452_s2 + $0x17c] sm:$0xff] }
 0x1a6   :  { %v10934_v52 = vpop.f32.mrf.mxu0  ;;  %1292 = vmatprep.subr.mxu1 %v14480_v1  ;;  %v1015_v4 = vunpack.c.h.bf16 %v913_v24  ;;  %v1014_v6 = vunpack.c.l.bf16 %v913_v24 }
 0x1a7   :  { %1293 = vmatpush1.msra.mxu1 %v10931_v17 }
 0x1a8   :  { %v8923_v20 = vpop.f32.mrf.mxu0  ;;  %1294 = vmatprep.subr.mxu1 %v14480_v1  ;;  %1237 = vmatmul.mubr.f32.gmra.mxu1 %v999_v54 }
 0x1a9   :  { %1241 = vmatprep.mubr.f32.mxu1 %v1005_v62  ;;  %v916_v20 = vld [vmem:[%s14452_s2 + $0x190] sm:$0x11] }
 0x1aa   :  { %v10942_v61 = vpop.f32.mrf.mxu0  ;;  %v1020_v62 = vunpack.c.h.bf16 %v916_v20  ;;  %v1019_v42 = vunpack.c.l.bf16 %v916_v20  ;;  %v7787_v20 = vld [vmem:[%s14452_s2 + $0x1b8] sm:$0xff] }
 0x1ac   :  { %v8926_v59 = vpop.f32.mrf.mxu0  ;;  %1242 = vmatmul.mubr.f32.gmra.mxu1 %v1004_v34  ;;  %v922_v34 = vunpack.c.h.bf16 %v10953_v0 }
 0x1ad   :  { %1246 = vmatprep.mubr.f32.mxu1 %v1010_v14 }
 0x1ae   :  { %v704_v11 = vpop.f32.mrf.mxu0 }
 0x1b0   :  { %v8929_v54 = vpop.f32.mrf.mxu0  ;;  %1247 = vmatmul.mubr.f32.gmra.mxu1 %v1009_v3 }
 0x1b1   :  { %1251 = vmatprep.mubr.f32.mxu1 %v1015_v4 }
 0x1b2   :  { %v709_v1 = vpop.f32.mrf.mxu0 }
 0x1b4   :  { %v8932_v59 = vpop.f32.mrf.mxu0  ;;  %1252 = vmatmul.mubr.f32.gmra.mxu1 %v1014_v6 }
 0x1b5   :  { %1256 = vmatprep.mubr.f32.mxu1 %v1020_v62  ;;  %v14630_v59 = vmov 0.0  }
 0x1b6   :  { %v714_v14 = vpop.f32.mrf.mxu0 }
 0x1b8   :  { %v8935_v7 = vpop.f32.mrf.mxu0  ;;  %1257 = vmatmul.mubr.f32.gmra.mxu1 %v1019_v42  ;;  %v1672_v42 = vunpack.c.l.bf16 %v7787_v20 }
 0x1b9   :  { %1326 = vmatprep.mubr.f32.mxu1 %v922_v34  ;;  %v1673_v7 = vunpack.c.h.bf16 %v7787_v20  ;;  %v10987_v20 = vmax.f32 %v709_v1, 0.0  ;;  %v7796_v1 = vld [vmem:[%s14452_s2 + $0x1f4] sm:$0xff] }
 0x1ba   :  { %v719_v3 = vpop.f32.mrf.mxu0 }
 0x1bb   :  { %1904 = vmatprep.mubr.f32.mxu0 %v1673_v7  ;;  %14634 = vst [vmem:[#allocation50_spill] sm:$0xff] %v10987_v20 }
 0x1bc   :  { %v8938_v24 = vpop.f32.mrf.mxu0  ;;  %1905 = vmatmul.mubr.f32.gmra.mxu0 %v1672_v42 }
 0x1be   :  { %v724_v4 = vpop.f32.mrf.mxu0 }
 0x1bf   :  { %v10967_v34 = vmax.f32 %v724_v4, 0.0  ;;  %v10978_v4 = vmax.f32 %v714_v14, 0.0 }
 0x1c0   :  { %v8941_v54 = vpop.f32.mrf.mxu0 }
 0x1c1   :  { %14631 = vst [vmem:[#allocation47_spill] sm:$0xff] %v10967_v34  ;;  %14633 = vst [vmem:[#allocation49_spill] sm:$0xff] %v10978_v4 }
 0x1c2   :  { %v729_v63 = vpop.f32.mrf.mxu0 }
 0x1c3   :  { %v10961_v6 = vmax.f32 %v729_v63, 0.0 }
 0x1c4   :  { %v8944_v57 = vpop.f32.mrf.mxu0 }
 0x1c5   :  { %14629 = vst [vmem:[#allocation46_spill] sm:$0xff] %v10961_v6  ;;  %v10974_v57 = vmax.f32 %v719_v3, 0.0  ;;  %v7793_v3 = vld [vmem:[%s14452_s2 + $0x1e0] sm:$0xff] }
 0x1c6   :  { %v734_v50 = vpop.f32.mrf.mxu0  ;;  %v1683_v42 = vunpack.c.h.bf16 %v7793_v3  ;;  %v1682_v14 = vunpack.c.l.bf16 %v7793_v3  ;;  %v1687_v3 = vunpack.c.l.bf16 %v7796_v1 }
 0x1c7   :  { %v10956_v45 = vmax.f32 %v734_v50, 0.0  ;;  %v7790_v50 = vld [vmem:[%s14452_s2 + $0x1cc] sm:$0xff]  ;;  %14632 = vst [vmem:[#allocation48_spill] sm:$0xff] %v10974_v57 }
 0x1c8   :  { %v8947_v41 = vpop.f32.mrf.mxu0  ;;  %v1678_v63 = vunpack.c.h.bf16 %v7790_v50  ;;  %v1677_v24 = vunpack.c.l.bf16 %v7790_v50 }
 0x1c9   :  { %14628 = vst [vmem:[#allocation45_spill] sm:$0xff] %v10956_v45  ;;  %1295 = vmatpush2.msra.mxu1 %v10956_v45 }
 0x1ca   :  { %v10964_v62 = vpop.f32.mrf.mxu0  ;;  %1296 = vmatprep.subr.mxu1 %v14630_v59  ;;  %1909 = vmatprep.mubr.f32.mxu0 %v1678_v63  ;;  %v11001_v63 = vmax.f32 %v10942_v61, 0.0  ;;  %v7799_v61 = vld [vmem:[%s14452_s2 + $0x208] sm:$0xff] }
 0x1cb   :  { %1297 = vmatpush2.msra.mxu1 %v10961_v6  ;;  %1910 = vmatmul.mubr.f32.gmra.mxu0 %v1677_v24  ;;  %v1688_v24 = vunpack.c.h.bf16 %v7796_v1  ;;  %v1693_v1 = vunpack.c.h.bf16 %v7799_v61 }
 0x1cc   :  { %v8950_v41 = vpop.f32.mrf.mxu0  ;;  %1298 = vmatprep.subr.mxu1 %v14630_v59  ;;  %1914 = vmatprep.mubr.f32.mxu0 %v1683_v42  ;;  %14636 = vst [vmem:[#allocation52_spill] sm:$0xff] %v11001_v63  ;;  %v11014_v42 = vmax.f32 %v10919_v19, 0.0  ;;  %v7802_v19 = vld [vmem:[%s14452_s2 + $0x21c] sm:$0xff] }
 0x1cd   :  { %1299 = vmatpush2.msra.mxu1 %v10967_v34  ;;  %v10991_v41 = vmax.f32 %v704_v11, 0.0 }
 0x1ce   :  { %1300 = vmatprep.subr.mxu1 %v14630_v59  ;;  %14638 = vst [vmem:[#allocation54_spill] sm:$0xff] %v11014_v42 }
 0x1cf   :  { %v10980_v54 = vpop.f32.mrf.mxu0  ;;  %1301 = vmatpush2.msra.mxu1 %v10974_v57  ;;  %14635 = vst [vmem:[#allocation51_spill] sm:$0xff] %v10991_v41  ;;  %1915 = vmatmul.mubr.f32.gmra.mxu0 %v1682_v14 }
 0x1d0   :  { %1302 = vmatprep.subr.mxu1 %v14630_v59  ;;  %1919 = vmatprep.mubr.f32.mxu0 %v1688_v24  ;;  %v11021_v24 = vmax.f32 %v10904_v30, 0.0  ;;  %v1697_v30 = vunpack.c.l.bf16 %v7802_v19 }
 0x1d1   :  { %v8953_v7 = vpop.f32.mrf.mxu0  ;;  %1303 = vmatpush2.msra.mxu1 %v10978_v4 }
 0x1d2   :  { %1304 = vmatprep.subr.mxu1 %v14630_v59  ;;  %v11006_v7 = vmax.f32 %v10934_v52, 0.0  ;;  %v1692_v52 = vunpack.c.l.bf16 %v7799_v61  ;;  %14639 = vst [vmem:[#allocation55_spill] sm:$0xff] %v11021_v24  ;;  %v1698_v61 = vunpack.c.h.bf16 %v7802_v19 }
 0x1d3   :  { %1305 = vmatpush2.msra.mxu1 %v10987_v20  ;;  %1920 = vmatmul.mubr.f32.gmra.mxu0 %v1687_v3  ;;  %v11029_v3 = vmax.f32 %v10889_v39, 0.0  ;;  %v7805_v39 = vld [vmem:[%s14452_s2 + $0x230] sm:$0xff] }
 0x1d4   :  { %v10994_v50 = vpop.f32.mrf.mxu0  ;;  %1306 = vmatprep.subr.mxu1 %v14630_v59  ;;  %14637 = vst [vmem:[#allocation53_spill] sm:$0xff] %v11006_v7  ;;  %1924 = vmatprep.mubr.f32.mxu0 %v1693_v1  ;;  %v11036_v1 = vmax.f32 %v10874_v9, 0.0  ;;  %v1703_v19 = vunpack.c.h.bf16 %v7805_v39  ;;  %v860_v9 = vld [vmem:[%s14452_s2 + $0x1c] sm:$0xff] }
 0x1d5   :  { %1307 = vmatpush2.msra.mxu1 %v10991_v41  ;;  %14640 = vst [vmem:[#allocation56_spill] sm:$0xff] %v11029_v3  ;;  %v926_v13 = vunpack.c.l.bf16 %v860_v9 }
 0x1d6   :  { %v8956_v11 = vpop.f32.mrf.mxu0  ;;  %1308 = vmatprep.subr.mxu1 %v14630_v59  ;;  %14641 = vst [vmem:[#allocation57_spill] sm:$0xff] %v11036_v1 }
 0x1d7   :  { %1309 = vmatpush2.msra.mxu1 %v11001_v63  ;;  %1925 = vmatmul.mubr.f32.gmra.mxu0 %v1692_v52 }
 0x1d8   :  { %1310 = vmatprep.subr.mxu1 %v14630_v59  ;;  %1929 = vmatprep.mubr.f32.mxu0 %v1698_v61  ;;  %v1702_v61 = vunpack.c.l.bf16 %v7805_v39 }
 0x1d9   :  { %v11016_v14 = vpop.f32.mrf.mxu0  ;;  %1311 = vmatpush2.msra.mxu1 %v11006_v7 }
 0x1da   :  { %1312 = vmatprep.subr.mxu1 %v14630_v59 }
 0x1db   :  { %v8959_v11 = vpop.f32.mrf.mxu0  ;;  %1313 = vmatpush2.msra.mxu1 %v11014_v42  ;;  %1930 = vmatmul.mubr.f32.gmra.mxu0 %v1697_v30 }
 0x1dc   :  { %1314 = vmatprep.subr.mxu1 %v14630_v59  ;;  %v11044_v11 = vmax.f32 %v10859_v22, 0.0  ;;  %1934 = vmatprep.mubr.f32.mxu0 %v1703_v19  ;;  %v921_v22 = vunpack.c.l.bf16 %v10953_v0  ;;  %v863_v19 = vld [vmem:[%s14452_s2 + $0x30] sm:$0xff]  ;;  %v1707_v0 = vunpack.c.l.bf16 %v7808_v33  ;;  %v866_v33 = vld [vmem:[%s14452_s2 + $0x44] sm:$0xff] }
 0x1dd   :  { %1315 = vmatpush2.msra.mxu1 %v11021_v24  ;;  %v937_v5 = vunpack.c.h.bf16 %v866_v33 }
 0x1de   :  { %v11032_v36 = vpop.f32.mrf.mxu0  ;;  %1316 = vmatprep.subr.mxu1 %v14630_v59  ;;  %14642 = vst [vmem:[#allocation58_spill] sm:$0xff] %v11044_v11 }
 0x1df   :  { %1317 = vmatpush2.msra.mxu1 %v11029_v3  ;;  %1935 = vmatmul.mubr.f32.gmra.mxu0 %v1702_v61 }
 0x1e0   :  { %v8962_v52 = vpop.f32.mrf.mxu0  ;;  %1318 = vmatprep.subr.mxu1 %v14630_v59  ;;  %1939 = vmatprep.mubr.f32.mxu0 %v1708_v55  ;;  %v931_v55 = vunpack.c.l.bf16 %v863_v19 }
 0x1e1   :  { %1319 = vmatpush2.msra.mxu1 %v11036_v1  ;;  %v11052_v52 = vmax.f32 %v10845_v53, 0.0  ;;  %v927_v53 = vunpack.c.h.bf16 %v860_v9  ;;  %v7814_v9 = vld [vmem:[%s14452_s2 + $0x26c] sm:$0xff] }
 0x1e2   :  { %1320 = vmatprep.subr.mxu1 %v14630_v59 }
 0x1e3   :  { %14643 = vst [vmem:[#allocation59_spill] sm:$0xff] %v11052_v52  ;;  %v764_v30 = vpop.f32.mrf.mxu0  ;;  %1321 = vmatpush2.msra.mxu1 %v11044_v11  ;;  %1940 = vmatmul.mubr.f32.gmra.mxu0 %v1707_v0  ;;  %v1717_v0 = vunpack.c.l.bf16 %v7814_v9 }
 0x1e4   :  { %1322 = vmatprep.subr.mxu1 %v14630_v59  ;;  %1944 = vmatprep.mubr.f32.mxu0 %v1713_v12 }
 0x1e5   :  { %v8965_v39 = vpop.f32.mrf.mxu0  ;;  %1323 = vmatpush2.msra.mxu1 %v11052_v52 }
 0x1e6   :  { %1324 = vmatprep.subr.mxu1 %v14630_v59  ;;  %v932_v39 = vunpack.c.h.bf16 %v863_v19 }
 0x1e7   :  { %1325 = vmatpush2.msra.mxu1 %v11061_v31  ;;  %1945 = vmatmul.mubr.f32.gmra.mxu0 %v1712_v8 }
 0x1e8   :  { %v769_v61 = vpop.f32.mrf.mxu0  ;;  %1327 = vmatmul.mubr.f32.vlgmr.msra.gmra.mxu1 %v921_v22  ;;  %8975 = vmatprep.subr.mxu1 %v14630_v59 }
 0x1e9   :  { %1331 = vmatprep.mubr.f32.mxu1 %v927_v53  ;;  %v1718_v53 = vunpack.c.h.bf16 %v7814_v9  ;;  %v872_v9 = vld [vmem:[%s14452_s2 + $0x6c] sm:$0xff] }
 0x1ea   :  { %v8968_v10 = vpop.f32.mrf.mxu0 }
 0x1eb   :  { %1949 = vmatprep.mubr.f32.mxu0 %v1718_v53  ;;  %v11082_v10 = vld [vmem:[%s14452_s2 + $0x280] sm:$0xff]  ;;  %v11133_v53 = vmax.f32 %v10980_v54, 0.0  ;;  %v7820_v54 = vld [vmem:[%s14452_s2 + $0x294] sm:$0xff] }
 0x1ec   :  { %1332 = vmatmul.mubr.f32.gmra.mxu1 %v926_v13  ;;  %1950 = vmatmul.mubr.f32.gmra.mxu0 %v1717_v0  ;;  %v1723_v13 = vunpack.c.h.bf16 %v11082_v10  ;;  %v946_v0 = vunpack.c.l.bf16 %v872_v9 }
 0x1ed   :  { %v774_v22 = vpop.f32.mrf.mxu0  ;;  %1336 = vmatprep.mubr.f32.mxu1 %v932_v39  ;;  %v869_v39 = vld [vmem:[%s14452_s2 + $0x58] sm:$0xff]  ;;  %14652 = vst [vmem:[#allocation68_spill] sm:$0xff] %v11133_v53 }
 0x1ee   :  { %v11085_v19 = vmax.f32 %v774_v22, 0.0  ;;  %1954 = vmatprep.mubr.f32.mxu0 %v1723_v13  ;;  %v11125_v22 = vmax.f32 %v10994_v50, 0.0  ;;  %v875_v50 = vld [vmem:[%s14452_s2 + $0x80] sm:$0xff] }
 0x1ef   :  { %v8971_v2 = vpop.f32.mrf.mxu0  ;;  %v952_v13 = vunpack.c.h.bf16 %v875_v50 }
 0x1f0   :  { %1337 = vmatmul.mubr.f32.gmra.mxu1 %v931_v55  ;;  %14645 = vst [vmem:[#allocation61_spill] sm:$0xff] %v11085_v19  ;;  %v11089_v2 = vmax.f32 %v769_v61, 0.0  ;;  %v936_v61 = vunpack.c.l.bf16 %v866_v33  ;;  %v11107_v55 = vmax.f32 %v11032_v36, 0.0  ;;  %v11116_v33 = vmax.f32 %v11016_v14, 0.0  ;;  %14651 = vst [vmem:[#allocation67_spill] sm:$0xff] %v11125_v22 }
 0x1f1   :  { %v779_v12 = vpop.f32.mrf.mxu0  ;;  %1341 = vmatprep.mubr.f32.mxu1 %v937_v5  ;;  %v11097_v5 = vmax.f32 %v764_v30, 0.0  ;;  %v942_v30 = vunpack.c.h.bf16 %v869_v39  ;;  %v941_v36 = vunpack.c.l.bf16 %v869_v39  ;;  %v947_v14 = vunpack.c.h.bf16 %v872_v9 }
 0x1f2   :  { %v11087_v29 = vmax.f32 %v779_v12, 0.0  ;;  %14647 = vst [vmem:[#allocation63_spill] sm:$0xff] %v11089_v2  ;;  %14649 = vst [vmem:[#allocation65_spill] sm:$0xff] %v11107_v55  ;;  %v11142_v12 = vmax.f32 %v10964_v62, 0.0  ;;  %v1722_v62 = vunpack.c.l.bf16 %v11082_v10  ;;  %v1728_v39 = vunpack.c.h.bf16 %v7820_v54  ;;  %v881_v10 = vld [vmem:[%s14452_s2 + $0xa8] sm:$0xff] }
 0x1f3   :  { %v8974_v8 = vpop.f32.mrf.mxu0  ;;  %14648 = vst [vmem:[#allocation64_spill] sm:$0xff] %v11097_v5  ;;  %14650 = vst [vmem:[#allocation66_spill] sm:$0xff] %v11116_v33  ;;  %v1727_v9 = vunpack.c.l.bf16 %v7820_v54  ;;  %v961_v54 = vunpack.c.l.bf16 %v881_v10 }
 0x1f4   :  { %14646 = vst [vmem:[#allocation62_spill] sm:$0xff] %v11087_v29  ;;  %8976 = vmatpush3.msk.msra.mxu1 %vm1088_vm3, %v11087_v29  ;;  %9057 = vmatpush3.msk.msra.mxu0 %vm1088_vm3, %v11087_v29  ;;  %14653 = vst [vmem:[#allocation69_spill] sm:$0xff] %v11142_v12  ;;  %v878_v8 = vld [vmem:[%s14452_s2 + $0x94] sm:$0xff] }
 0x1f5   :  { %8977 = vmatprep.subr.mxu1 %v14630_v59  ;;  %9058 = vmatprep.subr.mxu0 %v14630_v59 }
 0x1f6   :  { %8978 = vmatpush3.msra.mxu1 %v11085_v19  ;;  %9059 = vmatpush3.msra.mxu0 %v11085_v19 }
 0x1f7   :  { %8979 = vmatprep.subr.mxu1 %v14630_v59  ;;  %9060 = vmatprep.subr.mxu0 %v14630_v59 }
 0x1f8   :  { %8980 = vmatpush3.msra.mxu1 %v11089_v2  ;;  %9061 = vmatpush3.msra.mxu0 %v11089_v2 }
 0x1f9   :  { %8981 = vmatprep.subr.mxu1 %v14630_v59  ;;  %9062 = vmatprep.subr.mxu0 %v14630_v59 }
 0x1fa   :  { %8982 = vmatpush3.msra.mxu1 %v11097_v5  ;;  %9063 = vmatpush3.msra.mxu0 %v11097_v5 }
 0x1fb   :  { %1342 = vmatmul.mubr.f32.gmra.mxu1 %v936_v61  ;;  %8983 = vmatprep.subr.mxu1 %v14630_v59  ;;  %v951_v61 = vunpack.c.l.bf16 %v875_v50 }
 0x1fc   :  { %9064 = vmatprep.subr.mxu0 %v14630_v59  ;;  %8984 = vmatpush3.msra.mxu1 %v11107_v55 }
 0x1fd   :  { %9065 = vmatpush3.msra.mxu0 %v11107_v55  ;;  %8985 = vmatprep.subr.mxu1 %v14630_v59 }
 0x1fe   :  { %9066 = vmatprep.subr.mxu0 %v14630_v59  ;;  %1346 = vmatprep.mubr.f32.mxu1 %v942_v30  ;;  %v957_v30 = vunpack.c.h.bf16 %v878_v8 }
 0x1ff   :  { %8986 = vmatpush3.msra.mxu1 %v11116_v33  ;;  %9067 = vmatpush3.msra.mxu0 %v11116_v33 }
 0x200   :  { %1347 = vmatmul.mubr.f32.gmra.mxu1 %v941_v36  ;;  %8987 = vmatprep.subr.mxu1 %v14630_v59  ;;  %v7823_v36 = vld [vmem:[%s14452_s2 + $0x2a8] sm:$0xff] }
 0x201   :  { %9068 = vmatprep.subr.mxu0 %v14630_v59  ;;  %8988 = vmatpush3.msra.mxu1 %v11125_v22  ;;  %v1733_v50 = vunpack.c.h.bf16 %v7823_v36  ;;  %v1732_v56 = vunpack.c.l.bf16 %v7823_v36 }
 0x202   :  { %9069 = vmatpush3.msra.mxu0 %v11125_v22  ;;  %8989 = vmatprep.subr.mxu1 %v14630_v59 }
 0x203   :  { %9070 = vmatprep.subr.mxu0 %v14630_v59  ;;  %1351 = vmatprep.mubr.f32.mxu1 %v947_v14  ;;  %v956_v14 = vunpack.c.l.bf16 %v878_v8  ;;  %v1738_v8 = vunpack.c.h.bf16 %v7826_v60 }
 0x204   :  { %8990 = vmatpush3.msra.mxu1 %v11133_v53  ;;  %9071 = vmatpush3.msra.mxu0 %v11133_v53 }
 0x205   :  { %1352 = vmatmul.mubr.f32.gmra.mxu1 %v946_v0  ;;  %8991 = vmatprep.subr.mxu1 %v14630_v59  ;;  %v962_v0 = vunpack.c.h.bf16 %v881_v10 }
 0x206   :  { %9072 = vmatprep.subr.mxu0 %v14630_v59  ;;  %8992 = vmatpush3.msra.mxu1 %v11142_v12 }
 0x207   :  { %9073 = vmatpush3.msra.mxu0 %v11142_v12  ;;  %1356 = vmatprep.mubr.f32.mxu1 %v952_v13  ;;  %v884_v13 = vld [vmem:[%s14452_s2 + $0xbc] sm:$0xff] }
 0x208   :  { %2005 = vmatprep.subr.mxu1 %v14630_v59  ;;  %1955 = vmatmul.mubr.f32.gmra.mxu0 %v1722_v62  ;;  %v967_v62 = vunpack.c.h.bf16 %v884_v13  ;;  %v966_v51 = vunpack.c.l.bf16 %v884_v13  ;;  %v7835_v13 = vld [vmem:[%s14452_s2 + $0x2f8] sm:$0xff] }
 0x209   :  { %1357 = vmatmul.mubr.f32.gmra.mxu1 %v951_v61  ;;  %1959 = vmatprep.mubr.f32.mxu0 %v1728_v39  ;;  %v7829_v61 = vld [vmem:[%s14452_s2 + $0x2d0] sm:$0xff] }
 0x20a   :  { %1361 = vmatprep.mubr.f32.mxu1 %v957_v30  ;;  %9202 = vmatprep.subr.mxu0 %v14630_v59  ;;  %v887_v39 = vld [vmem:[%s14452_s2 + $0xd0] sm:$0xff]  ;;  %v1737_v30 = vunpack.c.l.bf16 %v7826_v60  ;;  %v1743_v36 = vunpack.c.h.bf16 %v7829_v61 }
 0x20b   :  { %v972_v10 = vunpack.c.h.bf16 %v887_v39 }
 0x20c   :  { %1960 = vmatmul.mubr.f32.gmra.mxu0 %v1727_v9  ;;  %v7832_v9 = vld [vmem:[%s14452_s2 + $0x2e4] sm:$0xff] }
 0x20d   :  { %1362 = vmatmul.mubr.f32.gmra.mxu1 %v956_v14  ;;  %1964 = vmatprep.mubr.f32.mxu0 %v1733_v50  ;;  %v890_v14 = vld [vmem:[%s14452_s2 + $0xe4] sm:$0xff]  ;;  %v1742_v50 = vunpack.c.l.bf16 %v7829_v61  ;;  %v1753_v61 = vunpack.c.h.bf16 %v7835_v13 }
 0x20e   :  { %1366 = vmatprep.mubr.f32.mxu1 %v962_v0  ;;  %v971_v0 = vunpack.c.l.bf16 %v887_v39  ;;  %v977_v60 = vunpack.c.h.bf16 %v890_v14  ;;  %v7838_v39 = vld [vmem:[%s14452_s2 + $0x30c] sm:$0xff] }
 0x210   :  { %1965 = vmatmul.mubr.f32.gmra.mxu0 %v1732_v56  ;;  %v1748_v56 = vunpack.c.h.bf16 %v7832_v9 }
 0x211   :  { %1367 = vmatmul.mubr.f32.gmra.mxu1 %v961_v54  ;;  %1969 = vmatprep.mubr.f32.mxu0 %v1738_v8  ;;  %v893_v54 = vld [vmem:[%s14452_s2 + $0xf8] sm:$0xff]  ;;  %v1747_v8 = vunpack.c.l.bf16 %v7832_v9  ;;  %v1758_v9 = vunpack.c.h.bf16 %v7838_v39 }
 0x212   :  { %1371 = vmatprep.mubr.f32.mxu1 %v967_v62  ;;  %v976_v62 = vunpack.c.l.bf16 %v890_v14 }
 0x214   :  { %1970 = vmatmul.mubr.f32.gmra.mxu0 %v1737_v30  ;;  %v896_v30 = vld [vmem:[%s14452_s2 + $0x10c] sm:$0xff] }
 0x215   :  { %1372 = vmatmul.mubr.f32.gmra.mxu1 %v966_v51  ;;  %1974 = vmatprep.mubr.f32.mxu0 %v1743_v36  ;;  %v982_v51 = vunpack.c.h.bf16 %v893_v54  ;;  %v1752_v36 = vunpack.c.l.bf16 %v7835_v13  ;;  %v987_v14 = vunpack.c.h.bf16 %v896_v30 }
 0x216   :  { %1376 = vmatprep.mubr.f32.mxu1 %v972_v10  ;;  %v981_v10 = vunpack.c.l.bf16 %v893_v54 }
 0x218   :  { %1975 = vmatmul.mubr.f32.gmra.mxu0 %v1742_v50  ;;  %v7841_v50 = vld [vmem:[%s14452_s2 + $0x320] sm:$0xff] }
 0x219   :  { %1377 = vmatmul.mubr.f32.gmra.mxu1 %v971_v0  ;;  %1979 = vmatprep.mubr.f32.mxu0 %v1748_v56  ;;  %v899_v0 = vld [vmem:[%s14452_s2 + $0x120] sm:$0xff]  ;;  %v1757_v56 = vunpack.c.l.bf16 %v7838_v39  ;;  %v1763_v13 = vunpack.c.h.bf16 %v7841_v50 }
 0x21a   :  { %1381 = vmatprep.mubr.f32.mxu1 %v977_v60  ;;  %v986_v60 = vunpack.c.l.bf16 %v896_v30  ;;  %v992_v54 = vunpack.c.h.bf16 %v899_v0 }
 0x21c   :  { %1980 = vmatmul.mubr.f32.gmra.mxu0 %v1747_v8  ;;  %v7844_v8 = vld [vmem:[%s14452_s2 + $0x334] sm:$0x11] }
 0x21d   :  { %1382 = vmatmul.mubr.f32.gmra.mxu1 %v976_v62  ;;  %1984 = vmatprep.mubr.f32.mxu0 %v1753_v61  ;;  %v902_v62 = vld [vmem:[%s14452_s2 + $0x134] sm:$0xff]  ;;  %v1762_v61 = vunpack.c.l.bf16 %v7841_v50  ;;  %v1768_v39 = vunpack.c.h.bf16 %v7844_v8 }
 0x21e   :  { %1386 = vmatprep.mubr.f32.mxu1 %v982_v51  ;;  %v991_v51 = vunpack.c.l.bf16 %v899_v0  ;;  %v997_v30 = vunpack.c.h.bf16 %v902_v62  ;;  %v7786_v50 = vld [vmem:[%s14452_s2 + $0x1b4] ss:$20 sps:$4 sm:$0xff]  }
 0x220   :  { %1985 = vmatmul.mubr.f32.gmra.mxu0 %v1752_v36  ;;  %v905_v36 = vld [vmem:[%s14452_s2 + $0x148] sm:$0xff] }
 0x221   :  { %1387 = vmatmul.mubr.f32.gmra.mxu1 %v981_v10  ;;  %1989 = vmatprep.mubr.f32.mxu0 %v1758_v9  ;;  %v1767_v9 = vunpack.c.l.bf16 %v7844_v8  ;;  %v1002_v0 = vunpack.c.h.bf16 %v905_v36  ;;  %v1001_v8 = vunpack.c.l.bf16 %v905_v36  ;;  %v7792_v36 = vld [vmem:[%s14452_s2 + $0x1dc] ss:$20 sps:$4 sm:$0xff]  }
 0x222   :  { %1391 = vmatprep.mubr.f32.mxu1 %v987_v14  ;;  %v996_v14 = vunpack.c.l.bf16 %v902_v62  ;;  %v1686_v49 = vunpack.c.h.bf16 %v7792_v36 }
 0x224   :  { %1990 = vmatmul.mubr.f32.gmra.mxu0 %v1757_v56 }
 0x225   :  { %1392 = vmatmul.mubr.f32.gmra.mxu1 %v986_v60  ;;  %1994 = vmatprep.mubr.f32.mxu0 %v1763_v13  ;;  %v908_v60 = vld [vmem:[%s14452_s2 + $0x15c] sm:$0xff] }
 0x226   :  { %1396 = vmatprep.mubr.f32.mxu1 %v992_v54  ;;  %v1671_v54 = vunpack.c.l.bf16 %v7786_v50  ;;  %v1007_v62 = vunpack.c.h.bf16 %v908_v60 }
 0x228   :  { %v11213_v10 = vpop.f32.mrf.mxu1  ;;  %1995 = vmatmul.mubr.f32.gmra.mxu0 %v1762_v61 }
 0x229   :  { %1397 = vmatmul.mubr.f32.gmra.mxu1 %v991_v51  ;;  %1999 = vmatprep.mubr.f32.mxu0 %v1768_v39  ;;  %v911_v51 = vld [vmem:[%s14452_s2 + $0x170] sm:$0xff] }
 0x22a   :  { %1401 = vmatprep.mubr.f32.mxu1 %v997_v30  ;;  %v1160_v56 = vpop.f32.mrf.mxu1  ;;  %v1676_v30 = vunpack.c.h.bf16 %v7786_v50  ;;  %v1681_v50 = vunpack.c.l.bf16 %v7792_v36  ;;  %v858_v36 = vld [vmem:[%s14452_s2 + $0x10] ss:$20 sps:$4 sm:$0xff]  }
 0x22b   :  { %v914_v56 = vld [vmem:[%s14452_s2 + $0x184] sm:$0xff] }
 0x22c   :  { %v11221_v13 = vpop.f32.mrf.mxu1  ;;  %2000 = vmatmul.mubr.f32.gmra.mxu0 %v1767_v9  ;;  %v1006_v9 = vunpack.c.l.bf16 %v908_v60  ;;  %v1011_v60 = vunpack.c.l.bf16 %v911_v51 }
 0x22d   :  { %1402 = vmatmul.mubr.f32.gmra.mxu1 %v996_v14  ;;  %9074 = vmatprep.mubr.msk.f32.mxu0 %vm9981_vm1, %v14630_v59  ;;  %v1012_v14 = vunpack.c.h.bf16 %v911_v51  ;;  %v7798_v51 = vld [vmem:[%s14452_s2 + $0x204] ss:$20 sps:$4 sm:$0xff]  }
 0x22e   :  { %1406 = vmatprep.mubr.f32.mxu1 %v1002_v0  ;;  %v1165_v61 = vpop.f32.mrf.mxu1  ;;  %v1691_v46 = vunpack.c.l.bf16 %v7798_v51 }
 0x230   :  { %v11228_v39 = vpop.f32.mrf.mxu1  ;;  %9075 = vmatmul.mubr.msk.f32.vlgmr.msra.gmra.mxu0 %vm1024_vm4, %v1671_v54  ;;  %v1017_v54 = vunpack.c.h.bf16 %v914_v56 }
 0x231   :  { %1407 = vmatmul.mubr.f32.gmra.mxu1 %v1001_v8  ;;  %9077 = vmatprep.mubr.msk.f32.mxu0 %vm9981_vm1, %v14630_v59 }
 0x232   :  { %1411 = vmatprep.mubr.f32.mxu1 %v1007_v62  ;;  %v1170_v0 = vpop.f32.mrf.mxu1  ;;  %v917_v62 = vld [vmem:[%s14452_s2 + $0x198] sm:$0x11] }
 0x234   :  { %v11239_v61 = vpop.f32.mrf.mxu1  ;;  %9078 = vmatmul.mubr.msk.f32.gmra.mxu0 %vm1024_vm4, %v1676_v30  ;;  %v1016_v30 = vunpack.c.l.bf16 %v914_v56 }
 0x235   :  { %1412 = vmatmul.mubr.f32.gmra.mxu1 %v1006_v9  ;;  %9080 = vmatprep.mubr.msk.f32.mxu0 %vm9981_vm1, %v14630_v59  ;;  %v1022_v9 = vunpack.c.h.bf16 %v917_v62 }
 0x236   :  { %1416 = vmatprep.mubr.f32.mxu1 %v1012_v14  ;;  %v1175_v8 = vpop.f32.mrf.mxu1 }
 0x238   :  { %v11247_v0 = vpop.f32.mrf.mxu1  ;;  %9081 = vmatmul.mubr.msk.f32.gmra.mxu0 %vm1024_vm4, %v1681_v50  ;;  %v1021_v50 = vunpack.c.l.bf16 %v917_v62 }
 0x239   :  { %1417 = vmatmul.mubr.f32.gmra.mxu1 %v1011_v60  ;;  %9083 = vmatprep.mubr.msk.f32.mxu0 %vm9981_vm1, %v14630_v59 }
 0x23a   :  { %1421 = vmatprep.mubr.f32.mxu1 %v1017_v54  ;;  %v1180_v14 = vpop.f32.mrf.mxu1  ;;  %v1696_v54 = vunpack.c.h.bf16 %v7798_v51  ;;  %v864_v51 = vld [vmem:[%s14452_s2 + $0x38] ss:$20 sps:$4 sm:$0xff]  }
 0x23b   :  { %v923_v14 = vunpack.c.l.bf16 %v858_v36 }
 0x23c   :  { %v11255_v8 = vpop.f32.mrf.mxu1  ;;  %9084 = vmatmul.mubr.msk.f32.gmra.mxu0 %vm1024_vm4, %v1686_v49  ;;  %v7804_v49 = vld [vmem:[%s14452_s2 + $0x22c] ss:$20 sps:$4 sm:$0xff]  }
 0x23d   :  { %1422 = vmatmul.mubr.f32.gmra.mxu1 %v1016_v30  ;;  %9086 = vmatprep.mubr.msk.f32.mxu0 %vm9981_vm1, %v14630_v59 }
 0x23e   :  { %1426 = vmatprep.mubr.f32.mxu1 %v1022_v9  ;;  %v1185_v56 = vpop.f32.mrf.mxu1  ;;  %v1701_v9 = vunpack.c.l.bf16 %v7804_v49 }
 0x240   :  { %v11263_v60 = vpop.f32.mrf.mxu1  ;;  %9087 = vmatmul.mubr.msk.f32.gmra.mxu0 %vm1024_vm4, %v1691_v46  ;;  %v928_v46 = vunpack.c.h.bf16 %v858_v36  ;;  %v1706_v36 = vunpack.c.h.bf16 %v7804_v49 }
 0x241   :  { %1427 = vmatmul.mubr.f32.gmra.mxu1 %v1021_v50  ;;  %9089 = vmatprep.mubr.msk.f32.mxu0 %vm9981_vm1, %v14630_v59 }
 0x242   :  { %8993 = vmatprep.mubr.msk.f32.mxu1 %vm9981_vm1, %v14630_v59  ;;  %v1190_v62 = vpop.f32.mrf.mxu1 }
 0x244   :  { %v11273_v30 = vpop.f32.mrf.mxu1  ;;  %9090 = vmatmul.mubr.msk.f32.gmra.mxu0 %vm1024_vm4, %v1696_v54  ;;  %v933_v54 = vunpack.c.l.bf16 %v864_v51 }
 0x245   :  { %8994 = vmatmul.mubr.msk.f32.vlgmr.msra.gmra.mxu1 %vm1024_vm4, %v923_v14  ;;  %9092 = vmatprep.mubr.msk.f32.mxu0 %vm9981_vm1, %v14630_v59  ;;  %v7810_v14 = vld [vmem:[%s14452_s2 + $0x254] ss:$20 sps:$4 sm:$0xff]  }
 0x246   :  { %2006 = vmatpush1.msra.mxu1 %v10827_v15  ;;  %8996 = vmatprep.mubr.msk.f32.mxu1 %vm9981_vm1, %v14630_v59  ;;  %v1195_v50 = vpop.f32.mrf.mxu1 }
 0x247   :  { %2007 = vmatprep.subr.mxu1 %v14630_v59  ;;  %v870_v50 = vld [vmem:[%s14452_s2 + $0x60] ss:$20 sps:$4 sm:$0xff]  }
 0x248   :  { %2008 = vmatpush1.msra.mxu1 %v10829_v26  ;;  %v11287_v56 = vpop.f32.mrf.mxu1  ;;  %9093 = vmatmul.mubr.msk.f32.gmra.mxu0 %vm1024_vm4, %v1701_v9  ;;  %v1711_v9 = vunpack.c.l.bf16 %v7810_v14 }
 0x249   :  { %2009 = vmatprep.subr.mxu1 %v14630_v59  ;;  %8997 = vmatmul.mubr.msk.f32.gmra.mxu1 %vm1024_vm4, %v928_v46  ;;  %v938_v46 = vunpack.c.h.bf16 %v864_v51  ;;  %v1716_v51 = vunpack.c.h.bf16 %v7810_v14 }
 0x24a   :  { %2010 = vmatpush1.msra.mxu1 %v10838_v37  ;;  %8999 = vmatprep.mubr.msk.f32.mxu1 %vm9981_vm1, %v14630_v59  ;;  %v1200_v62 = vpop.f32.mrf.mxu1 }
 0x24b   :  { %2011 = vmatprep.subr.mxu1 %v14630_v59  ;;  %9095 = vmatprep.mubr.msk.f32.mxu0 %vm9981_vm1, %v14630_v59 }
 0x24c   :  { %2012 = vmatpush1.msra.mxu1 %v10842_v58  ;;  %v11302_v49 = vpop.f32.mrf.mxu1  ;;  %9096 = vmatmul.mubr.msk.f32.gmra.mxu0 %vm1024_vm4, %v1706_v36 }
 0x24d   :  { %2013 = vmatprep.subr.mxu1 %v14630_v59  ;;  %9000 = vmatmul.mubr.msk.f32.gmra.mxu1 %vm1024_vm4, %v933_v54  ;;  %v943_v54 = vunpack.c.l.bf16 %v870_v50 }
 0x24e   :  { %2014 = vmatpush1.msra.mxu1 %v10851_v48  ;;  %9002 = vmatprep.mubr.msk.f32.mxu1 %vm9981_vm1, %v14630_v59  ;;  %v1205_v62 = vpop.f32.mrf.mxu1 }
 0x24f   :  { %2015 = vmatprep.subr.mxu1 %v14630_v59  ;;  %9098 = vmatprep.mubr.msk.f32.mxu0 %vm9981_vm1, %v14630_v59  ;;  %v7816_v62 = vld [vmem:[%s14452_s2 + $0x27c] ss:$20 sps:$4 sm:$0xff]  }
 0x250   :  { %2016 = vmatpush1.msra.mxu1 %v10856_v21  ;;  %v11317_v36 = vpop.f32.mrf.mxu1  ;;  %9099 = vmatmul.mubr.msk.f32.gmra.mxu0 %vm1024_vm4, %v1711_v9  ;;  %v1721_v9 = vunpack.c.l.bf16 %v7816_v62 }
 0x251   :  { %2017 = vmatprep.subr.mxu1 %v14630_v59  ;;  %9003 = vmatmul.mubr.msk.f32.gmra.mxu1 %vm1024_vm4, %v938_v46  ;;  %v948_v46 = vunpack.c.h.bf16 %v870_v50  ;;  %v1726_v50 = vunpack.c.h.bf16 %v7816_v62 }
 0x252   :  { %2018 = vmatpush1.msra.mxu1 %v10866_v25  ;;  %9005 = vmatprep.mubr.msk.f32.mxu1 %vm9981_vm1, %v14630_v59  ;;  %v1210_v43 = vpop.f32.mrf.mxu1 }
 0x253   :  { %2019 = vmatprep.subr.mxu1 %v14630_v59  ;;  %9101 = vmatprep.mubr.msk.f32.mxu0 %vm9981_vm1, %v14630_v59  ;;  %v876_v43 = vld [vmem:[%s14452_s2 + $0x88] ss:$20 sps:$4 sm:$0xff]  }
 0x254   :  { %2020 = vmatpush1.msra.mxu1 %v10871_v32  ;;  %v11332_v14 = vpop.f32.mrf.mxu1  ;;  %9102 = vmatmul.mubr.msk.f32.gmra.mxu0 %vm1024_vm4, %v1716_v51 }
 0x255   :  { %2021 = vmatprep.subr.mxu1 %v14630_v59  ;;  %9006 = vmatmul.mubr.msk.f32.gmra.mxu1 %vm1024_vm4, %v943_v54  ;;  %v953_v54 = vunpack.c.l.bf16 %v876_v43 }
 0x256   :  { %2022 = vmatpush1.msra.mxu1 %v10881_v16  ;;  %9008 = vmatprep.mubr.msk.f32.mxu1 %vm9981_vm1, %v14630_v59  ;;  %v1215_v40 = vpop.f32.mrf.mxu1 }
 0x257   :  { %2023 = vmatprep.subr.mxu1 %v14630_v59  ;;  %9104 = vmatprep.mubr.msk.f32.mxu0 %vm9981_vm1, %v14630_v59  ;;  %v7822_v40 = vld [vmem:[%s14452_s2 + $0x2a4] ss:$20 sps:$4 sm:$0xff]  }
 0x258   :  { %2024 = vmatpush1.msra.mxu1 %v10886_v18  ;;  %v11347_v51 = vpop.f32.mrf.mxu1  ;;  %9105 = vmatmul.mubr.msk.f32.gmra.mxu0 %vm1024_vm4, %v1721_v9  ;;  %v1731_v9 = vunpack.c.l.bf16 %v7822_v40 }
 0x259   :  { %2025 = vmatprep.subr.mxu1 %v14630_v59  ;;  %9009 = vmatmul.mubr.msk.f32.gmra.mxu1 %vm1024_vm4, %v948_v46  ;;  %v958_v46 = vunpack.c.h.bf16 %v876_v43  ;;  %v1736_v43 = vunpack.c.h.bf16 %v7822_v40 }
 0x25a   :  { %2026 = vmatpush1.msra.mxu1 %v10896_v27  ;;  %9011 = vmatprep.mubr.msk.f32.mxu1 %vm9981_vm1, %v14630_v59  ;;  %v1220_v38 = vpop.f32.mrf.mxu1 }
 0x25b   :  { %2027 = vmatprep.subr.mxu1 %v14630_v59  ;;  %9107 = vmatprep.mubr.msk.f32.mxu0 %vm9981_vm1, %v14630_v59  ;;  %v882_v38 = vld [vmem:[%s14452_s2 + $0xb0] ss:$20 sps:$4 sm:$0xff]  }
 0x25c   :  { %2028 = vmatpush1.msra.mxu1 %v10901_v47  ;;  %v11362_v62 = vpop.f32.mrf.mxu1  ;;  %9108 = vmatmul.mubr.msk.f32.gmra.mxu0 %vm1024_vm4, %v1726_v50 }
 0x25d   :  { %14654 = vst [vmem:[#allocation70_spill] sm:$0xff] %v11362_v62  ;;  %2029 = vmatprep.subr.mxu1 %v14630_v59  ;;  %9012 = vmatmul.mubr.msk.f32.gmra.mxu1 %vm1024_vm4, %v953_v54  ;;  %v963_v54 = vunpack.c.l.bf16 %v882_v38 }
 0x25e   :  { %2030 = vmatpush1.msra.mxu1 %v10911_v44  ;;  %9014 = vmatprep.mubr.msk.f32.mxu1 %vm9981_vm1, %v14630_v59  ;;  %v1225_v35 = vpop.f32.mrf.mxu1 }
 0x25f   :  { %2031 = vmatprep.subr.mxu1 %v14630_v59  ;;  %9110 = vmatprep.mubr.msk.f32.mxu0 %vm9981_vm1, %v14630_v59  ;;  %v7828_v35 = vld [vmem:[%s14452_s2 + $0x2cc] ss:$20 sps:$4 sm:$0xff]  }
 0x260   :  { %2032 = vmatpush1.msra.mxu1 %v10916_v23  ;;  %v11377_v50 = vpop.f32.mrf.mxu1  ;;  %9111 = vmatmul.mubr.msk.f32.gmra.mxu0 %vm1024_vm4, %v1731_v9  ;;  %v1741_v9 = vunpack.c.l.bf16 %v7828_v35 }
 0x261   :  { %14655 = vst [vmem:[#allocation71_spill] sm:$0xff] %v11377_v50  ;;  %2033 = vmatprep.subr.mxu1 %v14630_v59  ;;  %9015 = vmatmul.mubr.msk.f32.gmra.mxu1 %vm1024_vm4, %v958_v46  ;;  %v968_v46 = vunpack.c.h.bf16 %v882_v38  ;;  %v1746_v38 = vunpack.c.h.bf16 %v7828_v35 }
 0x262   :  { %2034 = vmatpush1.msra.mxu1 %v10926_v28  ;;  %9017 = vmatprep.mubr.msk.f32.mxu1 %vm9981_vm1, %v14630_v59  ;;  %v1230_v62 = vpop.f32.mrf.mxu1 }
 0x263   :  { %2035 = vmatprep.subr.mxu1 %v14630_v59  ;;  %9113 = vmatprep.mubr.msk.f32.mxu0 %vm9981_vm1, %v14630_v59  ;;  %v888_v62 = vld [vmem:[%s14452_s2 + $0xd8] ss:$20 sps:$4 sm:$0xff]  }
 0x264   :  { %2036 = vmatpush1.msra.mxu1 %v10931_v17  ;;  %v11392_v40 = vpop.f32.mrf.mxu1  ;;  %9114 = vmatmul.mubr.msk.f32.gmra.mxu0 %vm1024_vm4, %v1736_v43 }
 0x265   :  { %14656 = vst [vmem:[#allocation72_spill] sm:$0xff] %v11392_v40  ;;  %2037 = vmatprep.subr.mxu1 %v14630_v59  ;;  %9018 = vmatmul.mubr.msk.f32.gmra.mxu1 %vm1024_vm4, %v963_v54  ;;  %v973_v54 = vunpack.c.l.bf16 %v888_v62 }
 0x266   :  { %2038 = vmatpush2.msra.mxu1 %v10956_v45  ;;  %9020 = vmatprep.mubr.msk.f32.mxu1 %vm9981_vm1, %v14630_v59  ;;  %v1235_v50 = vpop.f32.mrf.mxu1 }
 0x267   :  { %2039 = vmatprep.subr.mxu1 %v14630_v59  ;;  %9116 = vmatprep.mubr.msk.f32.mxu0 %vm9981_vm1, %v14630_v59  ;;  %v7834_v50 = vld [vmem:[%s14452_s2 + $0x2f4] ss:$20 sps:$4 sm:$0xff]  }
 0x268   :  { %2040 = vmatpush2.msra.mxu1 %v10961_v6  ;;  %v11407_v43 = vpop.f32.mrf.mxu1  ;;  %9117 = vmatmul.mubr.msk.f32.gmra.mxu0 %vm1024_vm4, %v1741_v9  ;;  %v1751_v9 = vunpack.c.l.bf16 %v7834_v50 }
 0x269   :  { %14657 = vst [vmem:[#allocation73_spill] sm:$0xff] %v11407_v43  ;;  %2041 = vmatprep.subr.mxu1 %v14630_v59  ;;  %9021 = vmatmul.mubr.msk.f32.gmra.mxu1 %vm1024_vm4, %v968_v46  ;;  %v978_v46 = vunpack.c.h.bf16 %v888_v62  ;;  %v1756_v62 = vunpack.c.h.bf16 %v7834_v50 }
 0x26a   :  { %2042 = vmatpush2.msra.mxu1 %v10967_v34  ;;  %9023 = vmatprep.mubr.msk.f32.mxu1 %vm9981_vm1, %v14630_v59  ;;  %v1240_v40 = vpop.f32.mrf.mxu1 }
 0x26b   :  { %2043 = vmatprep.subr.mxu1 %v14630_v59  ;;  %9119 = vmatprep.mubr.msk.f32.mxu0 %vm9981_vm1, %v14630_v59  ;;  %v894_v40 = vld [vmem:[%s14452_s2 + $0x100] ss:$20 sps:$4 sm:$0xff]  }
 0x26c   :  { %2044 = vmatpush2.msra.mxu1 %v10974_v57  ;;  %v11422_v35 = vpop.f32.mrf.mxu1  ;;  %9120 = vmatmul.mubr.msk.f32.gmra.mxu0 %vm1024_vm4, %v1746_v38 }
 0x26d   :  { %14658 = vst [vmem:[#allocation74_spill] sm:$0xff] %v11422_v35  ;;  %2045 = vmatprep.subr.mxu1 %v14630_v59  ;;  %9024 = vmatmul.mubr.msk.f32.gmra.mxu1 %vm1024_vm4, %v973_v54  ;;  %v983_v54 = vunpack.c.l.bf16 %v894_v40 }
 0x26e   :  { %2046 = vmatpush2.msra.mxu1 %v10978_v4  ;;  %9026 = vmatprep.mubr.msk.f32.mxu1 %vm9981_vm1, %v14630_v59  ;;  %v1245_v43 = vpop.f32.mrf.mxu1 }
 0x26f   :  { %2047 = vmatprep.subr.mxu1 %v14630_v59  ;;  %9122 = vmatprep.mubr.msk.f32.mxu0 %vm9981_vm1, %v14630_v59  ;;  %v7840_v43 = vld [vmem:[%s14452_s2 + $0x31c] ss:$20 sps:$4 sm:$0xff]  }
 0x270   :  { %2048 = vmatpush2.msra.mxu1 %v10987_v20  ;;  %v11437_v38 = vpop.f32.mrf.mxu1  ;;  %9123 = vmatmul.mubr.msk.f32.gmra.mxu0 %vm1024_vm4, %v1751_v9  ;;  %v1761_v9 = vunpack.c.l.bf16 %v7840_v43 }
 0x271   :  { %14659 = vst [vmem:[#allocation75_spill] sm:$0xff] %v11437_v38  ;;  %2049 = vmatprep.subr.mxu1 %v14630_v59  ;;  %9027 = vmatmul.mubr.msk.f32.gmra.mxu1 %vm1024_vm4, %v978_v46  ;;  %v988_v46 = vunpack.c.h.bf16 %v894_v40  ;;  %v1766_v40 = vunpack.c.h.bf16 %v7840_v43 }
 0x272   :  { %2050 = vmatpush2.msra.mxu1 %v10991_v41  ;;  %9029 = vmatprep.mubr.msk.f32.mxu1 %vm9981_vm1, %v14630_v59  ;;  %v1250_v35 = vpop.f32.mrf.mxu1 }
 0x273   :  { %2051 = vmatprep.subr.mxu1 %v14630_v59  ;;  %9125 = vmatprep.mubr.msk.f32.mxu0 %vm9981_vm1, %v14630_v59  ;;  %v900_v35 = vld [vmem:[%s14452_s2 + $0x128] ss:$20 sps:$4 sm:$0xff]  }
 0x274   :  { %2052 = vmatpush2.msra.mxu1 %v11001_v63  ;;  %v11452_v50 = vpop.f32.mrf.mxu1  ;;  %9126 = vmatmul.mubr.msk.f32.gmra.mxu0 %vm1024_vm4, %v1756_v62  ;;  %v998_v43 = vunpack.c.h.bf16 %v900_v35 }
 0x275   :  { %14660 = vst [vmem:[#allocation76_spill] sm:$0xff] %v11452_v50  ;;  %2053 = vmatprep.subr.mxu1 %v14630_v59  ;;  %9030 = vmatmul.mubr.msk.f32.gmra.mxu1 %vm1024_vm4, %v983_v54  ;;  %v993_v54 = vunpack.c.l.bf16 %v900_v35  ;;  %v7788_v50 = vld [vmem:[%s14452_s2 + $0x1c0] sm:$0xff] }
 0x276   :  { %2054 = vmatpush2.msra.mxu1 %v11006_v7  ;;  %9032 = vmatprep.mubr.msk.f32.mxu1 %vm9981_vm1, %v14630_v59  ;;  %v1255_v38 = vpop.f32.mrf.mxu1 }
 0x277   :  { %2055 = vmatprep.subr.mxu1 %v14630_v59  ;;  %9128 = vmatprep.mubr.msk.f32.mxu0 %vm9981_vm1, %v14630_v59 }
 0x278   :  { %2056 = vmatpush2.msra.mxu1 %v11014_v42  ;;  %v11467_v62 = vpop.f32.mrf.mxu1  ;;  %9129 = vmatmul.mubr.msk.f32.gmra.mxu0 %vm1024_vm4, %v1761_v9  ;;  %v906_v9 = vld [vmem:[%s14452_s2 + $0x150] ss:$20 sps:$4 sm:$0xff]  }
 0x279   :  { %14661 = vst [vmem:[#allocation77_spill] sm:$0xff] %v11467_v62  ;;  %2057 = vmatprep.subr.mxu1 %v14630_v59  ;;  %9033 = vmatmul.mubr.msk.f32.gmra.mxu1 %vm1024_vm4, %v988_v46  ;;  %v1003_v46 = vunpack.c.l.bf16 %v906_v9  ;;  %v1008_v35 = vunpack.c.h.bf16 %v906_v9 }
 0x27a   :  { %2058 = vmatpush2.msra.mxu1 %v11021_v24  ;;  %9035 = vmatprep.mubr.msk.f32.mxu1 %vm9981_vm1, %v14630_v59  ;;  %v1260_v38 = vpop.f32.mrf.mxu1 }
 0x27b   :  { %2059 = vmatprep.subr.mxu1 %v14630_v59  ;;  %9131 = vmatprep.mubr.msk.f32.mxu0 %vm9981_vm1, %v14630_v59  ;;  %v11509_v38 = vpop.f32.mrf.mxu0 }
 0x27c   :  { %2060 = vmatpush2.msra.mxu1 %v11029_v3  ;;  %9132 = vmatmul.mubr.msk.f32.gmra.mxu0 %vm1024_vm4, %v1766_v40  ;;  %v912_v40 = vld [vmem:[%s14452_s2 + $0x178] ss:$20 sps:$4 sm:$0xff]   ;;  %14662 = vst [vmem:[#allocation78_spill] sm:$0xff] %v11509_v38 }
 0x27d   :  { %2061 = vmatprep.subr.mxu1 %v14630_v59  ;;  %9036 = vmatmul.mubr.msk.f32.gmra.mxu1 %vm1024_vm4, %v993_v54  ;;  %v1602_v54 = vld [vmem:[%s14453_s3] sm:$0xff]  ;;  %v1903_v9 = vpop.f32.mrf.mxu0  ;;  %v1018_v62 = vunpack.c.h.bf16 %v912_v40 }
 0x27e   :  { %2062 = vmatpush2.msra.mxu1 %v11036_v1  ;;  %9038 = vmatprep.mubr.msk.f32.mxu1 %vm9981_vm1, %v14630_v59 }
 0x27f   :  { %2063 = vmatprep.subr.mxu1 %v14630_v59  ;;  %9204 = vmatprep.mubr.msk.f32.mxu0 %vm9981_vm1, %v14630_v59 }
 0x280   :  { %2064 = vmatpush2.msra.mxu1 %v11044_v11  ;;  %9203 = vmatpush3.msra.mxu0 %v1602_v54  ;;  %v918_v54 = vld [vmem:[%s14452_s2 + $0x1a0] sm:$0x1] }
 0x281   :  { %2065 = vmatprep.subr.mxu1 %v14630_v59  ;;  %9039 = vmatmul.mubr.msk.f32.gmra.mxu1 %vm1024_vm4, %v998_v43  ;;  %v1013_v43 = vunpack.c.l.bf16 %v912_v40 }
 0x282   :  { %2066 = vmatpush2.msra.mxu1 %v11052_v52  ;;  %9041 = vmatprep.mubr.msk.f32.mxu1 %vm9981_vm1, %v14630_v59  ;;  %v1675_v52 = vunpack.c.h.bf16 %v7788_v50 }
 0x283   :  { %2067 = vmatprep.subr.mxu1 %v14630_v59  ;;  %3216 = vmatprep.subr.mxu0 %v14630_v59 }
 0x284   :  { %2068 = vmatpush2.msra.mxu1 %v11061_v31 }
 0x285   :  { %9042 = vmatmul.mubr.msk.f32.gmra.mxu1 %vm1024_vm4, %v1003_v46  ;;  %9931 = vmatprep.subr.mxu1 %v14630_v59  ;;  %v11515_v46 = vpop.f32.mrf.mxu0 }
 0x286   :  { %9044 = vmatprep.mubr.msk.f32.mxu1 %vm9981_vm1, %v14630_v59  ;;  %14663 = vst [vmem:[#allocation79_spill] sm:$0xff] %v11515_v46  ;;  %v1023_v46 = vunpack.c.l.bf16 %v918_v54 }
 0x287   :  { %v1908_v38 = vpop.f32.mrf.mxu0 }
 0x289   :  { %9045 = vmatmul.mubr.msk.f32.gmra.mxu1 %vm1024_vm4, %v1008_v35  ;;  %v7785_v35 = vld [vmem:[%s14452_s2 + $0x1ac] sm:$0xff] }
 0x28a   :  { %9047 = vmatprep.mubr.msk.f32.mxu1 %vm9981_vm1, %v14630_v59  ;;  %v1670_v40 = vunpack.c.h.bf16 %v7785_v35  ;;  %v1669_v38 = vunpack.c.l.bf16 %v7785_v35 }
 0x28b   :  { %v11526_v9 = vpop.f32.mrf.mxu0 }
 0x28c   :  { %14664 = vst [vmem:[#allocation80_spill] sm:$0xff] %v11526_v9 }
 0x28d   :  { %9048 = vmatmul.mubr.msk.f32.gmra.mxu1 %vm1024_vm4, %v1013_v43  ;;  %v1913_v43 = vpop.f32.mrf.mxu0 }
 0x28e   :  { %9050 = vmatprep.mubr.msk.f32.mxu1 %vm9981_vm1, %v14630_v59  ;;  %v1674_v43 = vunpack.c.l.bf16 %v7788_v50 }
 0x28f   :  { %v11534_v31 = vpop.f32.mrf.mxu0 }
 0x290   :  { %14665 = vst [vmem:[#allocation81_spill] sm:$0xff] %v11534_v31 }
 0x291   :  { %9051 = vmatmul.mubr.msk.f32.gmra.mxu1 %vm1024_vm4, %v1018_v62  ;;  %v1918_v9 = vpop.f32.mrf.mxu0  ;;  %v7791_v62 = vld [vmem:[%s14452_s2 + $0x1d4] sm:$0xff] }
 0x292   :  { %9053 = vmatprep.mubr.msk.f32.mxu1 %vm9981_vm1, %v14630_v59  ;;  %v1680_v11 = vunpack.c.h.bf16 %v7791_v62  ;;  %v1679_v50 = vunpack.c.l.bf16 %v7791_v62 }
 0x293   :  { %v11540_v54 = vpop.f32.mrf.mxu0 }
 0x294   :  { %14666 = vst [vmem:[#allocation82_spill] sm:$0xff] %v11540_v54 }
 0x295   :  { %9054 = vmatmul.mubr.msk.f32.gmra.mxu1 %vm1024_vm4, %v1023_v46  ;;  %v1923_v31 = vpop.f32.mrf.mxu0  ;;  %v7794_v46 = vld [vmem:[%s14452_s2 + $0x1e8] sm:$0xff] }
 0x296   :  { %2069 = vmatprep.mubr.f32.mxu1 %v1670_v40  ;;  %v7797_v31 = vld [vmem:[%s14452_s2 + $0x1fc] sm:$0xff] }
 0x297   :  { %v11549_v35 = vpop.f32.mrf.mxu0 }
 0x298   :  { %14667 = vst [vmem:[#allocation83_spill] sm:$0xff] %v11549_v35 }
 0x299   :  { %2070 = vmatmul.mubr.f32.vlgmr.msra.gmra.mxu1 %v1669_v38  ;;  %v1928_v9 = vpop.f32.mrf.mxu0  ;;  %v1684_v38 = vunpack.c.l.bf16 %v7794_v46 }
 0x29a   :  { %9940 = vmatpush3.msk.msra.mxu1 %vm1088_vm3, %v11087_v29  ;;  %2074 = vmatprep.mubr.f32.mxu1 %v1675_v52  ;;  %v1685_v52 = vunpack.c.h.bf16 %v7794_v46 }
 0x29b   :  { %9932 = vmatprep.subr.mxu1 %v14630_v59  ;;  %v11558_v40 = vpop.f32.mrf.mxu0 }
 0x29c   :  { %9941 = vmatpush3.msra.mxu1 %v11085_v19  ;;  %14668 = vst [vmem:[#allocation84_spill] sm:$0xff] %v11558_v40 }
 0x29d   :  { %9933 = vmatprep.subr.mxu1 %v14630_v59  ;;  %2075 = vmatmul.mubr.f32.gmra.mxu1 %v1674_v43  ;;  %v1933_v62 = vpop.f32.mrf.mxu0  ;;  %v7800_v43 = vld [vmem:[%s14452_s2 + $0x210] sm:$0xff] }
 0x29e   :  { %9942 = vmatpush3.msra.mxu1 %v11089_v2  ;;  %2079 = vmatprep.mubr.f32.mxu1 %v1680_v11  ;;  %v1690_v11 = vunpack.c.h.bf16 %v7797_v31  ;;  %v1695_v46 = vunpack.c.h.bf16 %v7800_v43  ;;  %v7803_v62 = vld [vmem:[%s14452_s2 + $0x224] sm:$0xff] }
 0x29f   :  { %9934 = vmatprep.subr.mxu1 %v14630_v59  ;;  %v11567_v9 = vpop.f32.mrf.mxu0 }
 0x2a0   :  { %9943 = vmatpush3.msra.mxu1 %v11097_v5  ;;  %14669 = vst [vmem:[#allocation85_spill] sm:$0xff] %v11567_v9  ;;  %v1699_v5 = vunpack.c.l.bf16 %v7803_v62  ;;  %v7827_v9 = vld [vmem:[%s14452_s2 + $0x2c4] sm:$0xff] }
 0x2a1   :  { %9935 = vmatprep.subr.mxu1 %v14630_v59  ;;  %2080 = vmatmul.mubr.f32.gmra.mxu1 %v1679_v50  ;;  %v1689_v50 = vunpack.c.l.bf16 %v7797_v31 }
 0x2a2   :  { %9944 = vmatpush3.msra.mxu1 %v11107_v55  ;;  %2084 = vmatprep.mubr.f32.mxu1 %v1685_v52  ;;  %v1938_v52 = vpop.f32.mrf.mxu0 }
 0x2a3   :  { %9936 = vmatprep.subr.mxu1 %v14630_v59 }
 0x2a4   :  { %9945 = vmatpush3.msra.mxu1 %v11116_v33  ;;  %v11579_v31 = vpop.f32.mrf.mxu0 }
 0x2a5   :  { %9937 = vmatprep.subr.mxu1 %v14630_v59  ;;  %2085 = vmatmul.mubr.f32.gmra.mxu1 %v1684_v38  ;;  %v1694_v38 = vunpack.c.l.bf16 %v7800_v43  ;;  %14670 = vst [vmem:[#allocation86_spill] sm:$0xff] %v11579_v31  ;;  %v7824_v31 = vld [vmem:[%s14452_s2 + $0x2b0] sm:$0xff] }
 0x2a6   :  { %9946 = vmatpush3.msra.mxu1 %v11125_v22  ;;  %2089 = vmatprep.mubr.f32.mxu1 %v1690_v11  ;;  %v1700_v11 = vunpack.c.h.bf16 %v7803_v62  ;;  %v7806_v22 = vld [vmem:[%s14452_s2 + $0x238] sm:$0xff]  ;;  %v1943_v55 = vpop.f32.mrf.mxu0  ;;  %v7812_v62 = vld [vmem:[%s14452_s2 + $0x260] sm:$0xff] }
 0x2a7   :  { %9938 = vmatprep.subr.mxu1 %v14630_v59  ;;  %v1705_v43 = vunpack.c.h.bf16 %v7806_v22  ;;  %v1704_v55 = vunpack.c.l.bf16 %v7806_v22 }
 0x2a8   :  { %9947 = vmatpush3.msra.mxu1 %v11133_v53  ;;  %v11576_v33 = vpop.f32.mrf.mxu1 }
 0x2a9   :  { %9939 = vmatprep.subr.mxu1 %v14630_v59  ;;  %2090 = vmatmul.mubr.f32.gmra.mxu1 %v1689_v50  ;;  %v11588_v50 = vpop.f32.mrf.mxu0 }
 0x2aa   :  { %9948 = vmatpush3.msra.mxu1 %v11142_v12  ;;  %2094 = vmatprep.mubr.f32.mxu1 %v1695_v46  ;;  %v1330_v52 = vpop.f32.mrf.mxu1  ;;  %14671 = vst [vmem:[#allocation87_spill] sm:$0xff] %v11588_v50  ;;  %v7809_v46 = vld [vmem:[%s14452_s2 + $0x24c] sm:$0xff]  ;;  %v1715_v50 = vunpack.c.h.bf16 %v7812_v62 }
 0x2ab   :  { %9137 = vmatprep.subr.mxu1 %v14630_v59  ;;  %v1948_v52 = vpop.f32.mrf.mxu0  ;;  %v1710_v29 = vunpack.c.h.bf16 %v7809_v46 }
 0x2ac   :  { %v11586_v53 = vpop.f32.mrf.mxu1  ;;  %v7815_v52 = vld [vmem:[%s14452_s2 + $0x274] sm:$0xff] }
 0x2ad   :  { %2095 = vmatmul.mubr.f32.gmra.mxu1 %v1694_v38  ;;  %v11595_v19 = vpop.f32.mrf.mxu0  ;;  %v1720_v22 = vunpack.c.h.bf16 %v7815_v52 }
 0x2ae   :  { %2099 = vmatprep.mubr.f32.mxu1 %v1700_v11  ;;  %v1335_v2 = vpop.f32.mrf.mxu1  ;;  %14672 = vst [vmem:[#allocation88_spill] sm:$0xff] %v11595_v19 }
 0x2af   :  { %v1953_v11 = vpop.f32.mrf.mxu0  ;;  %v1709_v2 = vunpack.c.l.bf16 %v7809_v46  ;;  %v7821_v46 = vld [vmem:[%s14452_s2 + $0x29c] sm:$0xff] }
 0x2b0   :  { %v11593_v12 = vpop.f32.mrf.mxu1 }
 0x2b1   :  { %2100 = vmatmul.mubr.f32.gmra.mxu1 %v1699_v5  ;;  %v1714_v5 = vunpack.c.l.bf16 %v7812_v62 }
 0x2b2   :  { %2104 = vmatprep.mubr.f32.mxu1 %v1705_v43  ;;  %v1340_v38 = vpop.f32.mrf.mxu1 }
 0x2b3   :  { %v7818_v38 = vld [vmem:[%s14452_s2 + $0x288] sm:$0xff] }
 0x2b5   :  { %2105 = vmatmul.mubr.f32.gmra.mxu1 %v1704_v55  ;;  %v1719_v55 = vunpack.c.l.bf16 %v7815_v52  ;;  %v1729_v52 = vunpack.c.l.bf16 %v7821_v46 }
 0x2b6   :  { %2109 = vmatprep.mubr.f32.mxu1 %v1710_v29  ;;  %v1725_v29 = vunpack.c.h.bf16 %v7818_v38 }
 0x2b9   :  { %2110 = vmatmul.mubr.f32.gmra.mxu1 %v1709_v2  ;;  %v1730_v2 = vunpack.c.h.bf16 %v7821_v46  ;;  %v7830_v46 = vld [vmem:[%s14452_s2 + $0x2d8] sm:$0xff] }
 0x2ba   :  { %2114 = vmatprep.mubr.f32.mxu1 %v1715_v50  ;;  %v1724_v50 = vunpack.c.l.bf16 %v7818_v38 }
 0x2bb   :  { %v11603_v43 = vpop.f32.mrf.mxu1 }
 0x2bd   :  { %2115 = vmatmul.mubr.f32.gmra.mxu1 %v1714_v5  ;;  %v1345_v11 = vpop.f32.mrf.mxu1 }
 0x2be   :  { %2119 = vmatprep.mubr.f32.mxu1 %v1720_v22  ;;  %v1735_v22 = vunpack.c.h.bf16 %v7824_v31 }
 0x2c0   :  { %v11611_v19 = vpop.f32.mrf.mxu1 }
 0x2c1   :  { %2120 = vmatmul.mubr.f32.gmra.mxu1 %v1719_v55 }
 0x2c2   :  { %v1350_v62 = vpop.f32.mrf.mxu1  ;;  %2124 = vmatprep.mubr.f32.mxu1 %v1725_v29  ;;  %v1734_v29 = vunpack.c.l.bf16 %v7824_v31  ;;  %v7833_v31 = vld [vmem:[%s14452_s2 + $0x2ec] sm:$0xff] }
 0x2c3   :  { %v1740_v62 = vunpack.c.h.bf16 %v7827_v9 }
 0x2c5   :  { %v11616_v5 = vpop.f32.mrf.mxu1  ;;  %2125 = vmatmul.mubr.f32.gmra.mxu1 %v1724_v50 }
 0x2c6   :  { %2129 = vmatprep.mubr.f32.mxu1 %v1730_v2 }
 0x2c7   :  { %v1355_v11 = vpop.f32.mrf.mxu1 }
 0x2c8   :  { %v11621_v55 = vpop.f32.mrf.mxu0  ;;  %v1739_v11 = vunpack.c.l.bf16 %v7827_v9  ;;  %v7836_v9 = vld [vmem:[%s14452_s2 + $0x300] sm:$0xff] }
 0x2c9   :  { %14673 = vst [vmem:[#allocation89_spill] sm:$0xff] %v11621_v55  ;;  %v11623_v38 = vpop.f32.mrf.mxu1  ;;  %2130 = vmatmul.mubr.f32.gmra.mxu1 %v1729_v52  ;;  %v1745_v55 = vunpack.c.h.bf16 %v7830_v46  ;;  %v1744_v52 = vunpack.c.l.bf16 %v7830_v46 }
 0x2ca   :  { %2134 = vmatprep.mubr.f32.mxu1 %v1735_v22  ;;  %v1958_v40 = vpop.f32.mrf.mxu0  ;;  %v1750_v22 = vunpack.c.h.bf16 %v7833_v31 }
 0x2cb   :  { %v1360_v35 = vpop.f32.mrf.mxu1 }
 0x2cc   :  { %v11628_v50 = vpop.f32.mrf.mxu0 }
 0x2cd   :  { %14674 = vst [vmem:[#allocation90_spill] sm:$0xff] %v11628_v50  ;;  %v11630_v2 = vpop.f32.mrf.mxu1  ;;  %2135 = vmatmul.mubr.f32.gmra.mxu1 %v1734_v29  ;;  %v1749_v29 = vunpack.c.l.bf16 %v7833_v31  ;;  %v7842_v31 = vld [vmem:[%s14452_s2 + $0x328] sm:$0xff] }
 0x2ce   :  { %2139 = vmatprep.mubr.f32.mxu1 %v1740_v62  ;;  %v1963_v54 = vpop.f32.mrf.mxu0  ;;  %v1755_v62 = vunpack.c.h.bf16 %v7836_v9 }
 0x2cf   :  { %v1365_v1 = vpop.f32.mrf.mxu1 }
 0x2d0   :  { %v11635_v40 = vpop.f32.mrf.mxu0 }
 0x2d1   :  { %14675 = vst [vmem:[#allocation91_spill] sm:$0xff] %v11635_v40  ;;  %v11637_v35 = vpop.f32.mrf.mxu1  ;;  %2140 = vmatmul.mubr.f32.gmra.mxu1 %v1739_v11 }
 0x2d2   :  { %2144 = vmatprep.mubr.f32.mxu1 %v1745_v55  ;;  %v1968_v50 = vpop.f32.mrf.mxu0  ;;  %v7839_v55 = vld [vmem:[%s14452_s2 + $0x314] sm:$0xff] }
 0x2d3   :  { %v1370_v3 = vpop.f32.mrf.mxu1  ;;  %v1754_v50 = vunpack.c.l.bf16 %v7836_v9  ;;  %v1760_v11 = vunpack.c.h.bf16 %v7839_v55  ;;  %v7845_v9 = vld [vmem:[%s14452_s2 + $0x33c] sm:$0x11] }
 0x2d4   :  { %v11642_v54 = vpop.f32.mrf.mxu0 }
 0x2d5   :  { %14676 = vst [vmem:[#allocation92_spill] sm:$0xff] %v11642_v54  ;;  %v11644_v1 = vpop.f32.mrf.mxu1  ;;  %2145 = vmatmul.mubr.f32.gmra.mxu1 %v1744_v52  ;;  %v1759_v52 = vunpack.c.l.bf16 %v7839_v55 }
 0x2d6   :  { %2149 = vmatprep.mubr.f32.mxu1 %v1750_v22  ;;  %v1973_v40 = vpop.f32.mrf.mxu0  ;;  %v1765_v22 = vunpack.c.h.bf16 %v7842_v31 }
 0x2d7   :  { %v1375_v24 = vpop.f32.mrf.mxu1 }
 0x2d8   :  { %v11649_v46 = vpop.f32.mrf.mxu0 }
 0x2d9   :  { %14677 = vst [vmem:[#allocation93_spill] sm:$0xff] %v11649_v46  ;;  %v11651_v3 = vpop.f32.mrf.mxu1  ;;  %2150 = vmatmul.mubr.f32.gmra.mxu1 %v1749_v29  ;;  %v1764_v29 = vunpack.c.l.bf16 %v7842_v31 }
 0x2da   :  { %2154 = vmatprep.mubr.f32.mxu1 %v1755_v62  ;;  %v1978_v54 = vpop.f32.mrf.mxu0  ;;  %v1770_v62 = vunpack.c.h.bf16 %v7845_v9 }
 0x2db   :  { %v1380_v42 = vpop.f32.mrf.mxu1 }
 0x2dc   :  { %v11656_v40 = vpop.f32.mrf.mxu0 }
 0x2dd   :  { %14678 = vst [vmem:[#allocation94_spill] sm:$0xff] %v11656_v40  ;;  %v11658_v24 = vpop.f32.mrf.mxu1  ;;  %2155 = vmatmul.mubr.f32.gmra.mxu1 %v1754_v50 }
 0x2de   :  { %2159 = vmatprep.mubr.f32.mxu1 %v1760_v11  ;;  %v1983_v46 = vpop.f32.mrf.mxu0 }
 0x2df   :  { %v1385_v7 = vpop.f32.mrf.mxu1  ;;  %v7846_v46 = vld [vmem:[%s14452_s2 + $0x344] sm:$0x1] }
 0x2e0   :  { %v11663_v54 = vpop.f32.mrf.mxu0  ;;  %v1769_v7 = vunpack.c.l.bf16 %v7845_v9 }
 0x2e1   :  { %14679 = vst [vmem:[#allocation95_spill] sm:$0xff] %v11663_v54  ;;  %v11665_v42 = vpop.f32.mrf.mxu1  ;;  %2160 = vmatmul.mubr.f32.gmra.mxu1 %v1759_v52 }
 0x2e2   :  { %2164 = vmatprep.mubr.f32.mxu1 %v1765_v22  ;;  %v1988_v40 = vpop.f32.mrf.mxu0  ;;  %v7869_v22 = vld [vmem:[%s14453_s3 + $0x8] sm:$0xff] }
 0x2e3   :  { %v1390_v63 = vpop.f32.mrf.mxu1  ;;  %v1771_v40 = vunpack.c.l.bf16 %v7846_v46 }
 0x2e4   :  { %v11667_v50 = vpop.f32.mrf.mxu0 }
 0x2e5   :  { %14680 = vst [vmem:[#allocation96_spill] sm:$0xff] %v11667_v50  ;;  %v11669_v55 = vpop.f32.mrf.mxu1  ;;  %2165 = vmatmul.mubr.f32.gmra.mxu1 %v1764_v29 }
 0x2e6   :  { %2169 = vmatprep.mubr.f32.mxu1 %v1770_v62  ;;  %v1993_v11 = vpop.f32.mrf.mxu0 }
 0x2e7   :  { %v1395_v54 = vpop.f32.mrf.mxu1 }
 0x2e8   :  { %v11674_v41 = vpop.f32.mrf.mxu0 }
 0x2e9   :  { %14681 = vst [vmem:[#allocation97_spill] sm:$0xff] %v11674_v41  ;;  %v11676_v31 = vpop.f32.mrf.mxu1  ;;  %2170 = vmatmul.mubr.f32.gmra.mxu1 %v1769_v7 }
 0x2ea   :  { %14682 = vst [vmem:[#allocation98_spill] sm:$0xff] %v11676_v31  ;;  %9134 = vmatprep.mubr.msk.f32.mxu1 %vm9981_vm1, %v14630_v59  ;;  %v1998_v63 = vpop.f32.mrf.mxu0 }
 0x2eb   :  { %v1400_v52 = vpop.f32.mrf.mxu1 }
 0x2ec   :  { %v11683_v9 = vpop.f32.mrf.mxu0 }
 0x2ed   :  { %14683 = vst [vmem:[#allocation99_spill] sm:$0xff] %v11683_v9  ;;  %v11685_v29 = vpop.f32.mrf.mxu1  ;;  %9135 = vmatmul.mubr.msk.f32.vlgmr.msra.gmra.mxu1 %vm1024_vm4, %v1771_v40 }
 0x2ee   :  { %14684 = vst [vmem:[#allocation100_spill] sm:$0xff] %v11685_v29  ;;  %v2003_v54 = vpop.f32.mrf.mxu0  ;;  %9138 = vmatpush3.msra.mxu1 %v7869_v22  ;;  %9139 = vmatprep.mubr.msk.f32.mxu1 %vm9981_vm1, %v14630_v59 }
 0x2ef   :  { %v1405_v62 = vpop.f32.mrf.mxu1  ;;  %3046 = vmatprep.subr.mxu1 %v14630_v59 }
 0x2f0   :  { %v11691_v7 = vpop.f32.mrf.mxu0 }
 0x2f1   :  { %14685 = vst [vmem:[#allocation101_spill] sm:$0xff] %v11691_v7  ;;  %v11693_v46 = vpop.f32.mrf.mxu1 }
 0x2f2   :  { %14686 = vst [vmem:[#allocation102_spill] sm:$0xff] %v11693_v46  ;;  %v9076_v11 = vpop.f32.mrf.mxu0 }
 0x2f3   :  { %v1410_v63 = vpop.f32.mrf.mxu1 }
 0x2f4   :  { %v11695_v52 = vpop.f32.mrf.mxu0 }
 0x2f5   :  { %14687 = vst [vmem:[#allocation103_spill] sm:$0xff] %v11695_v52  ;;  %v11697_v9 = vpop.f32.mrf.mxu1 }
 0x2f6   :  { %14688 = vst [vmem:[#allocation104_spill] sm:$0xff] %v11697_v9  ;;  %v9079_v41 = vpop.f32.mrf.mxu0 }
 0x2f7   :  { %v1415_v40 = vpop.f32.mrf.mxu1  ;;  %v1329_v41 = vadd.f32 %v11576_v33, %v11213_v10 }
 0x2f8   :  { %v11699_v54 = vpop.f32.mrf.mxu0 }
 0x2f9   :  { %14689 = vst [vmem:[#allocation105_spill] sm:$0xff] %v11699_v54  ;;  %v11701_v22 = vpop.f32.mrf.mxu1 }
 0x2fa   :  { %v9082_v50 = vpop.f32.mrf.mxu0 }
 0x2fb   :  { %v1420_v62 = vpop.f32.mrf.mxu1 }
 0x2fc   :  { %v11703_v29 = vpop.f32.mrf.mxu0 }
 0x2fd   :  { %14690 = vst [vmem:[#allocation106_spill] sm:$0xff] %v11703_v29  ;;  %v11705_v31 = vpop.f32.mrf.mxu1 }
 0x2fe   :  { %v9085_v7 = vpop.f32.mrf.mxu0 }
 0x2ff   :  { %v1425_v46 = vpop.f32.mrf.mxu1  ;;  %v1334_v7 = vadd.f32 %v11586_v53, %v11221_v13  ;;  %v1339_v53 = vadd.f32 %v11593_v12, %v11228_v39  ;;  %v1344_v12 = vadd.f32 %v11603_v43, %v11239_v61  ;;  %v1349_v61 = vadd.f32 %v11611_v19, %v11247_v0 }
 0x300   :  { %v11707_v11 = vpop.f32.mrf.mxu0  ;;  %v1354_v19 = vadd.f32 %v11616_v5, %v11255_v8  ;;  %v1359_v8 = vadd.f32 %v11623_v38, %v11263_v60  ;;  %v1364_v60 = vadd.f32 %v11630_v2, %v11273_v30  ;;  %v1369_v30 = vadd.f32 %v11637_v35, %v11287_v56 }
 0x301   :  { %v11709_v63 = vpop.f32.mrf.mxu1  ;;  %v1374_v56 = vadd.f32 %v11644_v1, %v11302_v49  ;;  %v1379_v49 = vadd.f32 %v11651_v3, %v11317_v36  ;;  %v1384_v36 = vadd.f32 %v11658_v24, %v11332_v14  ;;  %v1389_v14 = vadd.f32 %v11665_v42, %v11347_v51  ;;  %v14693_v51 = vld [vmem:[#allocation70_spill] sm:$0xff] }
 0x302   :  { %v9088_v52 = vpop.f32.mrf.mxu0  ;;  %v1394_v42 = vadd.f32 %v11669_v55, %v14693_v51  ;;  %v14696_v55 = vld [vmem:[#allocation71_spill] sm:$0xff]  ;;  %v14702_v51 = vld [vmem:[#allocation57_spill] sm:$0xff] }
 0x303   :  { %v1430_v9 = vpop.f32.mrf.mxu1 }
 0x304   :  { %v11713_v40 = vpop.f32.mrf.mxu0 }
 0x305   :  { %v1498_v54 = vpop.f32.mrf.mxu1 }
 0x306   :  { %v1499_v50 = vadd.f32 %v1498_v54, %v1329_v41  ;;  %v9091_v62 = vpop.f32.mrf.mxu0 }
 0x307   :  { %v8995_v29 = vpop.f32.mrf.mxu1 }
 0x308   :  { %9205 = vmatmul.mubr.msk.f32.vlgmr.msra.gmra.mxu0 %vm2347_vm5, %v1499_v50  ;;  %v11718_v46 = vpop.f32.mrf.mxu0 }
 0x309   :  { %3217 = vmatpush1.msra.mxu0 %v10827_v15  ;;  %v1503_v9 = vpop.f32.mrf.mxu1  ;;  %9207 = vmatprep.mubr.msk.f32.mxu0 %vm9981_vm1, %v14630_v59 }
 0x30a   :  { %v1504_v33 = vadd.f32 %v1503_v9, %v1334_v7  ;;  %3218 = vmatprep.subr.mxu0 %v14630_v59  ;;  %v9094_v10 = vpop.f32.mrf.mxu0 }
 0x30b   :  { %3219 = vmatpush1.msra.mxu0 %v10829_v26  ;;  %v8998_v29 = vpop.f32.mrf.mxu1 }
 0x30c   :  { %3220 = vmatprep.subr.mxu0 %v14630_v59  ;;  %9208 = vmatmul.mubr.msk.f32.gmra.mxu0 %vm2347_vm5, %v1504_v33  ;;  %v11729_v13 = vpop.f32.mrf.mxu0 }
 0x30d   :  { %3221 = vmatpush1.msra.mxu0 %v10838_v37  ;;  %v1508_v52 = vpop.f32.mrf.mxu1  ;;  %9210 = vmatprep.mubr.msk.f32.mxu0 %vm9981_vm1, %v14630_v59 }
 0x30e   :  { %v1509_v54 = vadd.f32 %v1508_v52, %v1339_v53  ;;  %3222 = vmatprep.subr.mxu0 %v14630_v59  ;;  %v9097_v41 = vpop.f32.mrf.mxu0 }
 0x30f   :  { %3223 = vmatpush1.msra.mxu0 %v10842_v58  ;;  %v9001_v50 = vpop.f32.mrf.mxu1 }
 0x310   :  { %3224 = vmatprep.subr.mxu0 %v14630_v59  ;;  %9211 = vmatmul.mubr.msk.f32.gmra.mxu0 %vm2347_vm5, %v1509_v54  ;;  %v11740_v39 = vpop.f32.mrf.mxu0 }
 0x311   :  { %3225 = vmatpush1.msra.mxu0 %v10851_v48  ;;  %v1513_v62 = vpop.f32.mrf.mxu1  ;;  %9213 = vmatprep.mubr.msk.f32.mxu0 %vm9981_vm1, %v14630_v59 }
 0x312   :  { %v1514_v7 = vadd.f32 %v1513_v62, %v1344_v12  ;;  %3226 = vmatprep.subr.mxu0 %v14630_v59  ;;  %v9100_v9 = vpop.f32.mrf.mxu0 }
 0x313   :  { %3227 = vmatpush1.msra.mxu0 %v10856_v21  ;;  %v9004_v33 = vpop.f32.mrf.mxu1 }
 0x314   :  { %3228 = vmatprep.subr.mxu0 %v14630_v59  ;;  %9214 = vmatmul.mubr.msk.f32.gmra.mxu0 %vm2347_vm5, %v1514_v7  ;;  %v11751_v43 = vpop.f32.mrf.mxu0 }
 0x315   :  { %3229 = vmatpush1.msra.mxu0 %v10866_v25  ;;  %v1518_v10 = vpop.f32.mrf.mxu1  ;;  %9216 = vmatprep.mubr.msk.f32.mxu0 %vm9981_vm1, %v14630_v59 }
 0x316   :  { %v1519_v29 = vadd.f32 %v1518_v10, %v1349_v61  ;;  %3230 = vmatprep.subr.mxu0 %v14630_v59  ;;  %v9103_v53 = vpop.f32.mrf.mxu0 }
 0x317   :  { %3231 = vmatpush1.msra.mxu0 %v10871_v32  ;;  %v9007_v52 = vpop.f32.mrf.mxu1 }
 0x318   :  { %3232 = vmatprep.subr.mxu0 %v14630_v59  ;;  %9217 = vmatmul.mubr.msk.f32.gmra.mxu0 %vm2347_vm5, %v1519_v29  ;;  %v11762_v0 = vpop.f32.mrf.mxu0 }
 0x319   :  { %3233 = vmatpush1.msra.mxu0 %v10881_v16  ;;  %v1523_v54 = vpop.f32.mrf.mxu1  ;;  %9219 = vmatprep.mubr.msk.f32.mxu0 %vm9981_vm1, %v14630_v59 }
 0x31a   :  { %v1524_v41 = vadd.f32 %v1523_v54, %v1354_v19  ;;  %3234 = vmatprep.subr.mxu0 %v14630_v59  ;;  %v9106_v50 = vpop.f32.mrf.mxu0 }
 0x31b   :  { %3235 = vmatpush1.msra.mxu0 %v10886_v18  ;;  %v9010_v12 = vpop.f32.mrf.mxu1 }
 0x31c   :  { %3236 = vmatprep.subr.mxu0 %v14630_v59  ;;  %9220 = vmatmul.mubr.msk.f32.gmra.mxu0 %vm2347_vm5, %v1524_v41  ;;  %v11773_v5 = vpop.f32.mrf.mxu0 }
 0x31d   :  { %3237 = vmatpush1.msra.mxu0 %v10896_v27  ;;  %v1528_v62 = vpop.f32.mrf.mxu1  ;;  %9222 = vmatprep.mubr.msk.f32.mxu0 %vm9981_vm1, %v14630_v59 }
 0x31e   :  { %v1529_v7 = vadd.f32 %v1528_v62, %v1359_v8  ;;  %3238 = vmatprep.subr.mxu0 %v14630_v59  ;;  %v9109_v9 = vpop.f32.mrf.mxu0 }
 0x31f   :  { %3239 = vmatpush1.msra.mxu0 %v10901_v47  ;;  %v9013_v33 = vpop.f32.mrf.mxu1 }
 0x320   :  { %3240 = vmatprep.subr.mxu0 %v14630_v59  ;;  %9223 = vmatmul.mubr.msk.f32.gmra.mxu0 %vm2347_vm5, %v1529_v7  ;;  %v11784_v38 = vpop.f32.mrf.mxu0 }
 0x321   :  { %3241 = vmatpush1.msra.mxu0 %v10911_v44  ;;  %v1533_v61 = vpop.f32.mrf.mxu1  ;;  %9225 = vmatprep.mubr.msk.f32.mxu0 %vm9981_vm1, %v14630_v59 }
 0x322   :  { %v1534_v10 = vadd.f32 %v1533_v61, %v1364_v60  ;;  %3242 = vmatprep.subr.mxu0 %v14630_v59  ;;  %v9112_v29 = vpop.f32.mrf.mxu0 }
 0x323   :  { %3243 = vmatpush1.msra.mxu0 %v10916_v23  ;;  %v9016_v53 = vpop.f32.mrf.mxu1 }
 0x324   :  { %3244 = vmatprep.subr.mxu0 %v14630_v59  ;;  %9226 = vmatmul.mubr.msk.f32.gmra.mxu0 %vm2347_vm5, %v1534_v10  ;;  %v11795_v2 = vpop.f32.mrf.mxu0 }
 0x325   :  { %3245 = vmatpush1.msra.mxu0 %v10926_v28  ;;  %v1538_v52 = vpop.f32.mrf.mxu1  ;;  %9228 = vmatprep.mubr.msk.f32.mxu0 %vm9981_vm1, %v14630_v59 }
 0x326   :  { %v1539_v19 = vadd.f32 %v1538_v52, %v1369_v30  ;;  %3246 = vmatprep.subr.mxu0 %v14630_v59  ;;  %v9115_v54 = vpop.f32.mrf.mxu0  ;;  %v14691_v30 = vld [vmem:[#allocation51_spill] sm:$0xff] }
 0x327   :  { %3247 = vmatpush1.msra.mxu0 %v10931_v17  ;;  %v9019_v41 = vpop.f32.mrf.mxu1 }
 0x328   :  { %3248 = vmatprep.subr.mxu0 %v14630_v59  ;;  %9229 = vmatmul.mubr.msk.f32.gmra.mxu0 %vm2347_vm5, %v1539_v19  ;;  %v11806_v35 = vpop.f32.mrf.mxu0  ;;  %v14692_v41 = vld [vmem:[#allocation52_spill] sm:$0xff] }
 0x329   :  { %3249 = vmatpush2.msra.mxu0 %v10956_v45  ;;  %v1543_v50 = vpop.f32.mrf.mxu1  ;;  %9231 = vmatprep.mubr.msk.f32.mxu0 %vm9981_vm1, %v14630_v59 }
 0x32a   :  { %v1544_v12 = vadd.f32 %v1543_v50, %v1374_v56  ;;  %3250 = vmatprep.subr.mxu0 %v14630_v59  ;;  %v9118_v8 = vpop.f32.mrf.mxu0 }
 0x32b   :  { %3251 = vmatpush2.msra.mxu0 %v10961_v6  ;;  %v9022_v62 = vpop.f32.mrf.mxu1 }
 0x32c   :  { %3252 = vmatprep.subr.mxu0 %v14630_v59  ;;  %9232 = vmatmul.mubr.msk.f32.gmra.mxu0 %vm2347_vm5, %v1544_v12  ;;  %v11817_v1 = vpop.f32.mrf.mxu0  ;;  %v14694_v12 = vld [vmem:[#allocation53_spill] sm:$0xff] }
 0x32d   :  { %3253 = vmatpush2.msra.mxu0 %v10967_v34  ;;  %v1548_v7 = vpop.f32.mrf.mxu1  ;;  %9234 = vmatprep.mubr.msk.f32.mxu0 %vm9981_vm1, %v14630_v59 }
 0x32e   :  { %v1549_v9 = vadd.f32 %v1548_v7, %v1379_v49  ;;  %3254 = vmatprep.subr.mxu0 %v14630_v59  ;;  %v9121_v33 = vpop.f32.mrf.mxu0  ;;  %v14695_v7 = vld [vmem:[#allocation54_spill] sm:$0xff] }
 0x32f   :  { %3255 = vmatpush2.msra.mxu0 %v10974_v57  ;;  %v9025_v60 = vpop.f32.mrf.mxu1  ;;  %v14697_v33 = vld [vmem:[#allocation98_spill] sm:$0xff] }
 0x330   :  { %3256 = vmatprep.subr.mxu0 %v14630_v59  ;;  %9235 = vmatmul.mubr.msk.f32.gmra.mxu0 %vm2347_vm5, %v1549_v9  ;;  %v11828_v3 = vpop.f32.mrf.mxu0  ;;  %v1399_v60 = vadd.f32 %v14697_v33, %v14696_v55  ;;  %v14705_v55 = vld [vmem:[#allocation102_spill] sm:$0xff] }
 0x331   :  { %3257 = vmatpush2.msra.mxu0 %v10978_v4  ;;  %v1553_v61 = vpop.f32.mrf.mxu1  ;;  %9237 = vmatprep.mubr.msk.f32.mxu0 %vm9981_vm1, %v14630_v59 }
 0x332   :  { %v1554_v10 = vadd.f32 %v1553_v61, %v1384_v36  ;;  %3258 = vmatprep.subr.mxu0 %v14630_v59  ;;  %v9124_v29 = vpop.f32.mrf.mxu0  ;;  %v14698_v61 = vld [vmem:[#allocation55_spill] sm:$0xff] }
 0x333   :  { %3259 = vmatpush2.msra.mxu0 %v10987_v20  ;;  %v9028_v53 = vpop.f32.mrf.mxu1 }
 0x334   :  { %3260 = vmatprep.subr.mxu0 %v14630_v59  ;;  %9238 = vmatmul.mubr.msk.f32.gmra.mxu0 %vm2347_vm5, %v1554_v10  ;;  %v11839_v24 = vpop.f32.mrf.mxu0 }
 0x335   :  { %3261 = vmatpush2.msra.mxu0 %v14691_v30  ;;  %v1558_v52 = vpop.f32.mrf.mxu1  ;;  %9240 = vmatprep.mubr.msk.f32.mxu0 %vm9981_vm1, %v14630_v59 }
 0x336   :  { %v1559_v19 = vadd.f32 %v1558_v52, %v1389_v14  ;;  %3262 = vmatprep.subr.mxu0 %v14630_v59  ;;  %v9127_v54 = vpop.f32.mrf.mxu0  ;;  %v14699_v14 = vld [vmem:[#allocation56_spill] sm:$0xff] }
 0x337   :  { %3263 = vmatpush2.msra.mxu0 %v14692_v41  ;;  %v9031_v56 = vpop.f32.mrf.mxu1  ;;  %v14701_v54 = vld [vmem:[#allocation100_spill] sm:$0xff] }
 0x338   :  { %3264 = vmatprep.subr.mxu0 %v14630_v59  ;;  %9241 = vmatmul.mubr.msk.f32.gmra.mxu0 %vm2347_vm5, %v1559_v19  ;;  %v11850_v50 = vpop.f32.mrf.mxu0  ;;  %v14700_v19 = vld [vmem:[#allocation72_spill] sm:$0xff] }
 0x339   :  { %3265 = vmatpush2.msra.mxu0 %v14694_v12  ;;  %v1563_v8 = vpop.f32.mrf.mxu1  ;;  %9243 = vmatprep.mubr.msk.f32.mxu0 %vm9981_vm1, %v14630_v59  ;;  %v1404_v56 = vadd.f32 %v14701_v54, %v14700_v19  ;;  %v14708_v19 = vld [vmem:[#allocation74_spill] sm:$0xff]  ;;  %v14709_v54 = vld [vmem:[#allocation104_spill] sm:$0xff] }
 0x33a   :  { %v1564_v62 = vadd.f32 %v1563_v8, %v1394_v42  ;;  %3266 = vmatprep.subr.mxu0 %v14630_v59  ;;  %v9130_v49 = vpop.f32.mrf.mxu0 }
 0x33b   :  { %3267 = vmatpush2.msra.mxu0 %v14695_v7  ;;  %v9034_v9 = vpop.f32.mrf.mxu1 }
 0x33c   :  { %3268 = vmatprep.subr.mxu0 %v14630_v59  ;;  %9244 = vmatmul.mubr.msk.f32.gmra.mxu0 %vm2347_vm5, %v1564_v62  ;;  %v11861_v36 = vpop.f32.mrf.mxu0  ;;  %v14703_v62 = vld [vmem:[#allocation58_spill] sm:$0xff]  ;;  %v14704_v9 = vld [vmem:[#allocation73_spill] sm:$0xff] }
 0x33d   :  { %3269 = vmatpush2.msra.mxu0 %v14698_v61  ;;  %v1568_v10 = vpop.f32.mrf.mxu1  ;;  %9246 = vmatprep.mubr.msk.f32.mxu0 %vm9981_vm1, %v14630_v59  ;;  %v1409_v33 = vadd.f32 %v14705_v55, %v14704_v9  ;;  %v14710_v9 = vld [vmem:[#allocation75_spill] sm:$0xff] }
 0x33e   :  { %v1569_v29 = vadd.f32 %v1568_v10, %v1399_v60  ;;  %3270 = vmatprep.subr.mxu0 %v14630_v59  ;;  %v9133_v53 = vpop.f32.mrf.mxu0  ;;  %v14706_v60 = vld [vmem:[#allocation59_spill] sm:$0xff]  ;;  %v1419_v55 = vadd.f32 %v11701_v22, %v14710_v9  ;;  %v7913_v22 = vld [vmem:[%s14452_s2 + $0x350] sm:$0xff] }
 0x33f   :  { %3271 = vmatpush2.msra.mxu0 %v14699_v14  ;;  %v9037_v52 = vpop.f32.mrf.mxu1  ;;  %v14707_v53 = vld [vmem:[#allocation60_spill] sm:$0xff] }
 0x340   :  { %3272 = vmatprep.subr.mxu0 %v14630_v59  ;;  %9247 = vmatmul.mubr.msk.f32.gmra.mxu0 %vm2347_vm5, %v1569_v29 }
 0x341   :  { %3273 = vmatpush2.msra.mxu0 %v14702_v51  ;;  %v1573_v42 = vpop.f32.mrf.mxu1  ;;  %9249 = vmatprep.mubr.msk.f32.mxu0 %vm9981_vm1, %v14630_v59 }
 0x342   :  { %v1574_v8 = vadd.f32 %v1573_v42, %v1404_v56  ;;  %3274 = vmatprep.subr.mxu0 %v14630_v59  ;;  %v1414_v56 = vadd.f32 %v14709_v54, %v14708_v19 }
 0x343   :  { %3275 = vmatpush2.msra.mxu0 %v14703_v62  ;;  %v9040_v49 = vpop.f32.mrf.mxu1  ;;  %v14727_v62 = vld [vmem:[#allocation82_spill] sm:$0xff] }
 0x344   :  { %3276 = vmatprep.subr.mxu0 %v14630_v59  ;;  %9250 = vmatmul.mubr.msk.f32.gmra.mxu0 %vm2347_vm5, %v1574_v8 }
 0x345   :  { %3277 = vmatpush2.msra.mxu0 %v14706_v60  ;;  %v1578_v10 = vpop.f32.mrf.mxu1  ;;  %9252 = vmatprep.mubr.msk.f32.mxu0 %vm9981_vm1, %v14630_v59  ;;  %v14715_v60 = vld [vmem:[#allocation79_spill] sm:$0xff] }
 0x346   :  { %v1579_v29 = vadd.f32 %v1578_v10, %v1409_v33  ;;  %3278 = vmatprep.subr.mxu0 %v14630_v59 }
 0x347   :  { %3279 = vmatpush2.msra.mxu0 %v14707_v53  ;;  %v9043_v52 = vpop.f32.mrf.mxu1 }
 0x348   :  { %9253 = vmatmul.mubr.msk.f32.gmra.mxu0 %vm2347_vm5, %v1579_v29  ;;  %9348 = vmatprep.subr.mxu0 %v14630_v59  ;;  %v14711_v29 = vld [vmem:[#allocation76_spill] sm:$0xff] }
 0x349   :  { %v1583_v42 = vpop.f32.mrf.mxu1  ;;  %9255 = vmatprep.mubr.msk.f32.mxu0 %vm9981_vm1, %v14630_v59  ;;  %v1424_v19 = vadd.f32 %v11705_v31, %v14711_v29  ;;  %v2881_v31 = vunpack.c.h.bf16 %v7913_v22 }
 0x34a   :  { %v1584_v8 = vadd.f32 %v1583_v42, %v1414_v56 }
 0x34b   :  { %v9046_v49 = vpop.f32.mrf.mxu1 }
 0x34c   :  { %9256 = vmatmul.mubr.msk.f32.gmra.mxu0 %vm2347_vm5, %v1584_v8  ;;  %v14712_v8 = vld [vmem:[#allocation77_spill] sm:$0xff] }
 0x34d   :  { %v1588_v33 = vpop.f32.mrf.mxu1  ;;  %9258 = vmatprep.mubr.msk.f32.mxu0 %vm9981_vm1, %v14630_v59  ;;  %v1429_v49 = vadd.f32 %v11709_v63, %v14712_v8  ;;  %v14713_v63 = vld [vmem:[#allocation78_spill] sm:$0xff]  ;;  %v14714_v8 = vld [vmem:[#allocation101_spill] sm:$0xff] }
 0x34e   :  { %v1589_v10 = vadd.f32 %v1588_v33, %v1419_v55  ;;  %v7916_v33 = vld [vmem:[%s14452_s2 + $0x364] sm:$0xff] }
 0x34f   :  { %v9049_v52 = vpop.f32.mrf.mxu1 }
 0x350   :  { %9259 = vmatmul.mubr.msk.f32.gmra.mxu0 %vm2347_vm5, %v1589_v10  ;;  %v2880_v52 = vunpack.c.l.bf16 %v7913_v22  ;;  %v7922_v22 = vld [vmem:[%s14452_s2 + $0x38c] sm:$0xff] }
 0x351   :  { %v1593_v54 = vpop.f32.mrf.mxu1  ;;  %9261 = vmatprep.mubr.msk.f32.mxu0 %vm9981_vm1, %v14630_v59 }
 0x352   :  { %v1594_v56 = vadd.f32 %v1593_v54, %v1424_v19  ;;  %v2886_v19 = vunpack.c.h.bf16 %v7916_v33 }
 0x353   :  { %v9052_v42 = vpop.f32.mrf.mxu1 }
 0x354   :  { %9262 = vmatmul.mubr.msk.f32.gmra.mxu0 %vm2347_vm5, %v1594_v56  ;;  %v7919_v56 = vld [vmem:[%s14452_s2 + $0x378] sm:$0xff] }
 0x355   :  { %v1598_v9 = vpop.f32.mrf.mxu1  ;;  %9264 = vmatprep.mubr.msk.f32.mxu0 %vm9981_vm1, %v14630_v59 }
 0x356   :  { %v1599_v55 = vadd.f32 %v1598_v9, %v1429_v49  ;;  %v2885_v9 = vunpack.c.l.bf16 %v7916_v33  ;;  %v2890_v33 = vunpack.c.l.bf16 %v7919_v56 }
 0x357   :  { %v9055_v10 = vpop.f32.mrf.mxu1 }
 0x358   :  { %9265 = vmatmul.mubr.msk.f32.gmra.mxu0 %vm2347_vm5, %v1599_v55  ;;  %v2891_v10 = vunpack.c.h.bf16 %v7919_v56  ;;  %v14721_v56 = vld [vmem:[#allocation105_spill] sm:$0xff] }
 0x359   :  { %v2071_v29 = vpop.f32.mrf.mxu1  ;;  %3280 = vmatprep.mubr.f32.mxu0 %v2881_v31  ;;  %v14716_v31 = vld [vmem:[#allocation5_spill] sm:$0xff] }
 0x35a   :  { %v2072_v54 = vadd.f32 %v2071_v29, %v14713_v63  ;;  %v14717_v63 = vld [vmem:[#allocation103_spill] sm:$0xff] }
 0x35b   :  { %v2073_v42 = vpop.f32.mrf.mxu1 }
 0x35c   :  { %v2242_v49 = vadd.f32 %v14714_v8, %v2072_v54  ;;  %3281 = vmatmul.mubr.f32.vlgmr.msra.gmra.mxu0 %v2880_v52  ;;  %v14719_v54 = vld [vmem:[#allocation80_spill] sm:$0xff] }
 0x35d   :  { %v2076_v53 = vpop.f32.mrf.mxu1  ;;  %3285 = vmatprep.mubr.f32.mxu0 %v2886_v19  ;;  %v14718_v19 = vld [vmem:[#allocation6_spill] sm:$0xff]  ;;  %v7925_v8 = vld [vmem:[%s14452_s2 + $0x3a0] sm:$0xff] }
 0x35e   :  { %v2077_v55 = vadd.f32 %v2076_v53, %v14715_v60  ;;  %9140 = vmatmul.mubr.msk.f32.vlgmr.msra.gmra.mxu1 %vm2347_vm5, %v2242_v49  ;;  %v2896_v53 = vunpack.c.h.bf16 %v7922_v22  ;;  %v14720_v49 = vld [vmem:[#allocation7_spill] sm:$0xff] }
 0x35f   :  { %3047 = vmatpush1.msra.mxu1 %v14716_v31  ;;  %v2078_v29 = vpop.f32.mrf.mxu1  ;;  %9142 = vmatprep.mubr.msk.f32.mxu1 %vm9981_vm1, %v14630_v59 }
 0x360   :  { %v2247_v52 = vadd.f32 %v14717_v63, %v2077_v55  ;;  %3048 = vmatprep.subr.mxu1 %v14630_v59  ;;  %3286 = vmatmul.mubr.f32.gmra.mxu0 %v2885_v9  ;;  %v14722_v29 = vld [vmem:[#allocation8_spill] sm:$0xff] }
 0x361   :  { %3049 = vmatpush1.msra.mxu1 %v14718_v19  ;;  %v2081_v60 = vpop.f32.mrf.mxu1  ;;  %3290 = vmatprep.mubr.f32.mxu0 %v2891_v10  ;;  %v2895_v10 = vunpack.c.l.bf16 %v7922_v22  ;;  %v14725_v22 = vld [vmem:[#allocation106_spill] sm:$0xff] }
 0x362   :  { %v2082_v42 = vadd.f32 %v2081_v60, %v14719_v54  ;;  %3050 = vmatprep.subr.mxu1 %v14630_v59  ;;  %9143 = vmatmul.mubr.msk.f32.gmra.mxu1 %vm2347_vm5, %v2247_v52  ;;  %v2901_v52 = vunpack.c.h.bf16 %v7925_v8  ;;  %v14723_v60 = vld [vmem:[#allocation81_spill] sm:$0xff] }
 0x363   :  { %3051 = vmatpush1.msra.mxu1 %v14720_v49  ;;  %v2083_v55 = vpop.f32.mrf.mxu1  ;;  %9145 = vmatprep.mubr.msk.f32.mxu1 %vm9981_vm1, %v14630_v59 }
 0x364   :  { %v2252_v9 = vadd.f32 %v14721_v56, %v2082_v42  ;;  %3052 = vmatprep.subr.mxu1 %v14630_v59  ;;  %3291 = vmatmul.mubr.f32.gmra.mxu0 %v2890_v33  ;;  %v7928_v55 = vld [vmem:[%s14452_s2 + $0x3b4] sm:$0xff]  ;;  %v14724_v42 = vld [vmem:[#allocation9_spill] sm:$0xff] }
 0x365   :  { %3053 = vmatpush1.msra.mxu1 %v14722_v29  ;;  %v2086_v63 = vpop.f32.mrf.mxu1  ;;  %3295 = vmatprep.mubr.f32.mxu0 %v2896_v53  ;;  %v2900_v53 = vunpack.c.l.bf16 %v7925_v8 }
 0x366   :  { %v2087_v54 = vadd.f32 %v2086_v63, %v14723_v60  ;;  %3054 = vmatprep.subr.mxu1 %v14630_v59  ;;  %9146 = vmatmul.mubr.msk.f32.gmra.mxu1 %vm2347_vm5, %v2252_v9  ;;  %v14726_v63 = vld [vmem:[#allocation10_spill] sm:$0xff]  ;;  %v2906_v9 = vunpack.c.h.bf16 %v7928_v55 }
 0x367   :  { %3055 = vmatpush1.msra.mxu1 %v14724_v42  ;;  %v2088_v56 = vpop.f32.mrf.mxu1  ;;  %9148 = vmatprep.mubr.msk.f32.mxu1 %vm9981_vm1, %v14630_v59 }
 0x368   :  { %v2257_v33 = vadd.f32 %v14725_v22, %v2087_v54  ;;  %3056 = vmatprep.subr.mxu1 %v14630_v59  ;;  %3296 = vmatmul.mubr.f32.gmra.mxu0 %v2895_v10  ;;  %v7931_v56 = vld [vmem:[%s14452_s2 + $0x3c8] sm:$0xff]  ;;  %v14728_v54 = vld [vmem:[#allocation11_spill] sm:$0xff]  ;;  %v14729_v10 = vld [vmem:[#allocation12_spill] sm:$0xff] }
 0x369   :  { %3057 = vmatpush1.msra.mxu1 %v14726_v63  ;;  %v2091_v60 = vpop.f32.mrf.mxu1  ;;  %3300 = vmatprep.mubr.f32.mxu0 %v2901_v52 }
 0x36a   :  { %v2092_v51 = vadd.f32 %v2091_v60, %v14727_v62  ;;  %3058 = vmatprep.subr.mxu1 %v14630_v59  ;;  %9149 = vmatmul.mubr.msk.f32.gmra.mxu1 %vm2347_vm5, %v2257_v33  ;;  %v2905_v62 = vunpack.c.l.bf16 %v7928_v55  ;;  %v2911_v33 = vunpack.c.h.bf16 %v7931_v56  ;;  %v14730_v60 = vld [vmem:[#allocation83_spill] sm:$0xff] }
 0x36b   :  { %3059 = vmatpush1.msra.mxu1 %v14728_v54  ;;  %v2093_v22 = vpop.f32.mrf.mxu1  ;;  %9151 = vmatprep.mubr.msk.f32.mxu1 %vm9981_vm1, %v14630_v59 }
 0x36c   :  { %v2262_v8 = vadd.f32 %v11707_v11, %v2092_v51  ;;  %3060 = vmatprep.subr.mxu1 %v14630_v59  ;;  %3301 = vmatmul.mubr.f32.gmra.mxu0 %v2900_v53  ;;  %v7934_v22 = vld [vmem:[%s14452_s2 + $0x3dc] sm:$0xff]  ;;  %v14731_v11 = vld [vmem:[#allocation13_spill] sm:$0xff]  ;;  %v2910_v53 = vunpack.c.l.bf16 %v7931_v56 }
 0x36d   :  { %3061 = vmatpush1.msra.mxu1 %v14729_v10  ;;  %v2096_v52 = vpop.f32.mrf.mxu1  ;;  %3305 = vmatprep.mubr.f32.mxu0 %v2906_v9  ;;  %v14732_v9 = vld [vmem:[#allocation14_spill] sm:$0xff] }
 0x36e   :  { %v2097_v14 = vadd.f32 %v2096_v52, %v14730_v60  ;;  %3062 = vmatprep.subr.mxu1 %v14630_v59  ;;  %9152 = vmatmul.mubr.msk.f32.gmra.mxu1 %vm2347_vm5, %v2262_v8  ;;  %v2916_v8 = vunpack.c.h.bf16 %v7934_v22  ;;  %v14733_v60 = vld [vmem:[#allocation84_spill] sm:$0xff] }
 0x36f   :  { %3063 = vmatpush1.msra.mxu1 %v14731_v11  ;;  %v2098_v51 = vpop.f32.mrf.mxu1  ;;  %9154 = vmatprep.mubr.msk.f32.mxu1 %vm9981_vm1, %v14630_v59 }
 0x370   :  { %v2267_v55 = vadd.f32 %v11713_v40, %v2097_v14  ;;  %3064 = vmatprep.subr.mxu1 %v14630_v59  ;;  %3306 = vmatmul.mubr.f32.gmra.mxu0 %v2905_v62  ;;  %v7937_v51 = vld [vmem:[%s14452_s2 + $0x3f0] sm:$0xff]  ;;  %v14734_v40 = vld [vmem:[#allocation15_spill] sm:$0xff]  ;;  %v2915_v62 = vunpack.c.l.bf16 %v7934_v22 }
 0x371   :  { %3065 = vmatpush1.msra.mxu1 %v14732_v9  ;;  %v2101_v52 = vpop.f32.mrf.mxu1  ;;  %3310 = vmatprep.mubr.f32.mxu0 %v2911_v33  ;;  %v14735_v33 = vld [vmem:[#allocation16_spill] sm:$0xff] }
 0x372   :  { %v2102_v61 = vadd.f32 %v2101_v52, %v14733_v60  ;;  %3066 = vmatprep.subr.mxu1 %v14630_v59  ;;  %9155 = vmatmul.mubr.msk.f32.gmra.mxu1 %vm2347_vm5, %v2267_v55  ;;  %v2921_v55 = vunpack.c.h.bf16 %v7937_v51  ;;  %v14736_v60 = vld [vmem:[#allocation85_spill] sm:$0xff] }
 0x373   :  { %3067 = vmatpush1.msra.mxu1 %v14734_v40  ;;  %v2103_v14 = vpop.f32.mrf.mxu1  ;;  %9157 = vmatprep.mubr.msk.f32.mxu1 %vm9981_vm1, %v14630_v59 }
 0x374   :  { %v2272_v56 = vadd.f32 %v11718_v46, %v2102_v61  ;;  %3068 = vmatprep.subr.mxu1 %v14630_v59  ;;  %3311 = vmatmul.mubr.f32.gmra.mxu0 %v2910_v53  ;;  %v7940_v14 = vld [vmem:[%s14452_s2 + $0x404] sm:$0xff]  ;;  %v2920_v53 = vunpack.c.l.bf16 %v7937_v51 }
 0x375   :  { %3069 = vmatpush1.msra.mxu1 %v14735_v33  ;;  %v2106_v52 = vpop.f32.mrf.mxu1  ;;  %3315 = vmatprep.mubr.f32.mxu0 %v2916_v8  ;;  %v14737_v46 = vld [vmem:[#allocation17_spill] sm:$0xff]  ;;  %v14738_v8 = vld [vmem:[#allocation18_spill] sm:$0xff] }
 0x376   :  { %v2107_v7 = vadd.f32 %v2106_v52, %v14736_v60  ;;  %3070 = vmatprep.subr.mxu1 %v14630_v59  ;;  %9158 = vmatmul.mubr.msk.f32.gmra.mxu1 %vm2347_vm5, %v2272_v56  ;;  %v2926_v56 = vunpack.c.h.bf16 %v7940_v14  ;;  %v14739_v60 = vld [vmem:[#allocation86_spill] sm:$0xff] }
 0x377   :  { %3071 = vmatpush1.msra.mxu1 %v14737_v46  ;;  %v2108_v61 = vpop.f32.mrf.mxu1  ;;  %9160 = vmatprep.mubr.msk.f32.mxu1 %vm9981_vm1, %v14630_v59 }
 0x378   :  { %v2277_v22 = vadd.f32 %v11729_v13, %v2107_v7  ;;  %3072 = vmatprep.subr.mxu1 %v14630_v59  ;;  %3316 = vmatmul.mubr.f32.gmra.mxu0 %v2915_v62  ;;  %v7943_v61 = vld [vmem:[%s14452_s2 + $0x418] sm:$0xff]  ;;  %v2925_v62 = vunpack.c.l.bf16 %v7940_v14 }
 0x379   :  { %3073 = vmatpush1.msra.mxu1 %v14738_v8  ;;  %v2111_v52 = vpop.f32.mrf.mxu1  ;;  %3320 = vmatprep.mubr.f32.mxu0 %v2921_v55  ;;  %v14740_v13 = vld [vmem:[#allocation19_spill] sm:$0xff]  ;;  %v14741_v55 = vld [vmem:[#allocation20_spill] sm:$0xff] }
 0x37a   :  { %v2112_v12 = vadd.f32 %v2111_v52, %v14739_v60  ;;  %3074 = vmatprep.subr.mxu1 %v14630_v59  ;;  %9161 = vmatmul.mubr.msk.f32.gmra.mxu1 %vm2347_vm5, %v2277_v22  ;;  %v2931_v22 = vunpack.c.h.bf16 %v7943_v61  ;;  %v14742_v60 = vld [vmem:[#allocation87_spill] sm:$0xff] }
 0x37b   :  { %3075 = vmatpush1.msra.mxu1 %v14740_v13  ;;  %v2113_v7 = vpop.f32.mrf.mxu1  ;;  %9163 = vmatprep.mubr.msk.f32.mxu1 %vm9981_vm1, %v14630_v59 }
 0x37c   :  { %v2282_v51 = vadd.f32 %v11740_v39, %v2112_v12  ;;  %3076 = vmatprep.subr.mxu1 %v14630_v59  ;;  %3321 = vmatmul.mubr.f32.gmra.mxu0 %v2920_v53  ;;  %v7946_v7 = vld [vmem:[%s14452_s2 + $0x42c] sm:$0xff]  ;;  %v2930_v53 = vunpack.c.l.bf16 %v7943_v61 }
 0x37d   :  { %3077 = vmatpush1.msra.mxu1 %v14741_v55  ;;  %v2116_v52 = vpop.f32.mrf.mxu1  ;;  %3325 = vmatprep.mubr.f32.mxu0 %v2926_v56  ;;  %v14743_v39 = vld [vmem:[#allocation21_spill] sm:$0xff]  ;;  %v14744_v56 = vld [vmem:[#allocation22_spill] sm:$0xff] }
 0x37e   :  { %v2117_v41 = vadd.f32 %v2116_v52, %v14742_v60  ;;  %3078 = vmatprep.subr.mxu1 %v14630_v59  ;;  %9164 = vmatmul.mubr.msk.f32.gmra.mxu1 %vm2347_vm5, %v2282_v51  ;;  %v2936_v51 = vunpack.c.h.bf16 %v7946_v7  ;;  %v14745_v60 = vld [vmem:[#allocation88_spill] sm:$0xff] }
 0x37f   :  { %3079 = vmatpush2.msra.mxu1 %v14743_v39  ;;  %v2118_v12 = vpop.f32.mrf.mxu1  ;;  %9166 = vmatprep.mubr.msk.f32.mxu1 %vm9981_vm1, %v14630_v59 }
 0x380   :  { %v2287_v14 = vadd.f32 %v11751_v43, %v2117_v41  ;;  %3080 = vmatprep.subr.mxu1 %v14630_v59  ;;  %3326 = vmatmul.mubr.f32.gmra.mxu0 %v2925_v62  ;;  %v7949_v12 = vld [vmem:[%s14452_s2 + $0x440] sm:$0xff]  ;;  %v14746_v43 = vld [vmem:[#allocation23_spill] sm:$0xff]  ;;  %v2935_v62 = vunpack.c.l.bf16 %v7946_v7 }
 0x381   :  { %3081 = vmatpush2.msra.mxu1 %v14744_v56  ;;  %v2121_v52 = vpop.f32.mrf.mxu1  ;;  %3330 = vmatprep.mubr.f32.mxu0 %v2931_v22  ;;  %v14747_v22 = vld [vmem:[#allocation24_spill] sm:$0xff] }
 0x382   :  { %v2122_v30 = vadd.f32 %v2121_v52, %v14745_v60  ;;  %3082 = vmatprep.subr.mxu1 %v14630_v59  ;;  %9167 = vmatmul.mubr.msk.f32.gmra.mxu1 %vm2347_vm5, %v2287_v14  ;;  %v2941_v14 = vunpack.c.h.bf16 %v7949_v12  ;;  %v14748_v60 = vld [vmem:[#allocation89_spill] sm:$0xff] }
 0x383   :  { %3083 = vmatpush2.msra.mxu1 %v14746_v43  ;;  %v2123_v41 = vpop.f32.mrf.mxu1  ;;  %9169 = vmatprep.mubr.msk.f32.mxu1 %vm9981_vm1, %v14630_v59 }
 0x384   :  { %v2292_v61 = vadd.f32 %v11762_v0, %v2122_v30  ;;  %3084 = vmatprep.subr.mxu1 %v14630_v59  ;;  %3331 = vmatmul.mubr.f32.gmra.mxu0 %v2930_v53  ;;  %v7952_v41 = vld [vmem:[%s14452_s2 + $0x454] sm:$0xff]  ;;  %v14749_v0 = vld [vmem:[#allocation25_spill] sm:$0xff]  ;;  %v2940_v53 = vunpack.c.l.bf16 %v7949_v12 }
 0x385   :  { %3085 = vmatpush2.msra.mxu1 %v14747_v22  ;;  %v2126_v52 = vpop.f32.mrf.mxu1  ;;  %3335 = vmatprep.mubr.f32.mxu0 %v2936_v51  ;;  %v14750_v51 = vld [vmem:[#allocation26_spill] sm:$0xff] }
 0x386   :  { %v2127_v20 = vadd.f32 %v2126_v52, %v14748_v60  ;;  %3086 = vmatprep.subr.mxu1 %v14630_v59  ;;  %9170 = vmatmul.mubr.msk.f32.gmra.mxu1 %vm2347_vm5, %v2292_v61  ;;  %v2946_v61 = vunpack.c.h.bf16 %v7952_v41  ;;  %v14751_v60 = vld [vmem:[#allocation90_spill] sm:$0xff] }
 0x387   :  { %3087 = vmatpush2.msra.mxu1 %v14749_v0  ;;  %v2128_v30 = vpop.f32.mrf.mxu1  ;;  %9172 = vmatprep.mubr.msk.f32.mxu1 %vm9981_vm1, %v14630_v59 }
 0x388   :  { %v2297_v7 = vadd.f32 %v11773_v5, %v2127_v20  ;;  %3088 = vmatprep.subr.mxu1 %v14630_v59  ;;  %3336 = vmatmul.mubr.f32.gmra.mxu0 %v2935_v62  ;;  %v7955_v30 = vld [vmem:[%s14452_s2 + $0x468] sm:$0xff]  ;;  %v14752_v20 = vld [vmem:[#allocation27_spill] sm:$0xff]  ;;  %v2945_v62 = vunpack.c.l.bf16 %v7952_v41 }
 0x389   :  { %3089 = vmatpush2.msra.mxu1 %v14750_v51  ;;  %v2131_v52 = vpop.f32.mrf.mxu1  ;;  %3340 = vmatprep.mubr.f32.mxu0 %v2941_v14  ;;  %v14753_v14 = vld [vmem:[#allocation28_spill] sm:$0xff] }
 0x38a   :  { %v2132_v4 = vadd.f32 %v2131_v52, %v14751_v60  ;;  %3090 = vmatprep.subr.mxu1 %v14630_v59  ;;  %9173 = vmatmul.mubr.msk.f32.gmra.mxu1 %vm2347_vm5, %v2297_v7  ;;  %v2951_v7 = vunpack.c.h.bf16 %v7955_v30  ;;  %v14754_v60 = vld [vmem:[#allocation91_spill] sm:$0xff] }
 0x38b   :  { %3091 = vmatpush2.msra.mxu1 %v14752_v20  ;;  %v2133_v5 = vpop.f32.mrf.mxu1  ;;  %9175 = vmatprep.mubr.msk.f32.mxu1 %vm9981_vm1, %v14630_v59 }
 0x38c   :  { %v2302_v12 = vadd.f32 %v11784_v38, %v2132_v4  ;;  %3092 = vmatprep.subr.mxu1 %v14630_v59  ;;  %3341 = vmatmul.mubr.f32.gmra.mxu0 %v2940_v53  ;;  %v7958_v5 = vld [vmem:[%s14452_s2 + $0x47c] sm:$0xff]  ;;  %v14755_v4 = vld [vmem:[#allocation29_spill] sm:$0xff]  ;;  %v2950_v53 = vunpack.c.l.bf16 %v7955_v30 }
 0x38d   :  { %3093 = vmatpush2.msra.mxu1 %v14753_v14  ;;  %v2136_v52 = vpop.f32.mrf.mxu1  ;;  %3345 = vmatprep.mubr.f32.mxu0 %v2946_v61  ;;  %v14756_v61 = vld [vmem:[#allocation30_spill] sm:$0xff] }
 0x38e   :  { %v2137_v57 = vadd.f32 %v2136_v52, %v14754_v60  ;;  %3094 = vmatprep.subr.mxu1 %v14630_v59  ;;  %9176 = vmatmul.mubr.msk.f32.gmra.mxu1 %vm2347_vm5, %v2302_v12  ;;  %v2956_v12 = vunpack.c.h.bf16 %v7958_v5  ;;  %v14757_v60 = vld [vmem:[#allocation92_spill] sm:$0xff] }
 0x38f   :  { %3095 = vmatpush2.msra.mxu1 %v14755_v4  ;;  %v2138_v38 = vpop.f32.mrf.mxu1  ;;  %9178 = vmatprep.mubr.msk.f32.mxu1 %vm9981_vm1, %v14630_v59 }
 0x390   :  { %v2307_v41 = vadd.f32 %v11795_v2, %v2137_v57  ;;  %3096 = vmatprep.subr.mxu1 %v14630_v59  ;;  %3346 = vmatmul.mubr.f32.gmra.mxu0 %v2945_v62  ;;  %v7961_v38 = vld [vmem:[%s14452_s2 + $0x490] sm:$0xff]  ;;  %v14758_v57 = vld [vmem:[#allocation31_spill] sm:$0xff]  ;;  %v2955_v62 = vunpack.c.l.bf16 %v7958_v5 }
 0x391   :  { %3097 = vmatpush2.msra.mxu1 %v14756_v61  ;;  %v2141_v52 = vpop.f32.mrf.mxu1  ;;  %3350 = vmatprep.mubr.f32.mxu0 %v2951_v7  ;;  %v14759_v7 = vld [vmem:[#allocation32_spill] sm:$0xff] }
 0x392   :  { %v2142_v34 = vadd.f32 %v2141_v52, %v14757_v60  ;;  %3098 = vmatprep.subr.mxu1 %v14630_v59  ;;  %9179 = vmatmul.mubr.msk.f32.gmra.mxu1 %vm2347_vm5, %v2307_v41  ;;  %v2961_v41 = vunpack.c.h.bf16 %v7961_v38  ;;  %v14760_v60 = vld [vmem:[#allocation93_spill] sm:$0xff] }
 0x393   :  { %3099 = vmatpush2.msra.mxu1 %v14758_v57  ;;  %v2143_v2 = vpop.f32.mrf.mxu1  ;;  %9181 = vmatprep.mubr.msk.f32.mxu1 %vm9981_vm1, %v14630_v59 }
 0x394   :  { %v2312_v30 = vadd.f32 %v11806_v35, %v2142_v34  ;;  %3100 = vmatprep.subr.mxu1 %v14630_v59  ;;  %3351 = vmatmul.mubr.f32.gmra.mxu0 %v2950_v53  ;;  %v7964_v2 = vld [vmem:[%s14452_s2 + $0x4a4] sm:$0xff]  ;;  %v2960_v53 = vunpack.c.l.bf16 %v7961_v38 }
 0x395   :  { %3101 = vmatpush2.msra.mxu1 %v14759_v7  ;;  %v2146_v52 = vpop.f32.mrf.mxu1  ;;  %3355 = vmatprep.mubr.f32.mxu0 %v2956_v12  ;;  %v14761_v34 = vld [vmem:[#allocation33_spill] sm:$0xff]  ;;  %v14762_v12 = vld [vmem:[#allocation34_spill] sm:$0xff] }
 0x396   :  { %v2147_v6 = vadd.f32 %v2146_v52, %v14760_v60  ;;  %3102 = vmatprep.subr.mxu1 %v14630_v59  ;;  %9182 = vmatmul.mubr.msk.f32.gmra.mxu1 %vm2347_vm5, %v2312_v30  ;;  %v2966_v30 = vunpack.c.h.bf16 %v7964_v2  ;;  %v14763_v60 = vld [vmem:[#allocation94_spill] sm:$0xff] }
 0x397   :  { %3103 = vmatpush2.msra.mxu1 %v14761_v34  ;;  %v2148_v35 = vpop.f32.mrf.mxu1  ;;  %9184 = vmatprep.mubr.msk.f32.mxu1 %vm9981_vm1, %v14630_v59 }
 0x398   :  { %v2317_v5 = vadd.f32 %v11817_v1, %v2147_v6  ;;  %3104 = vmatprep.subr.mxu1 %v14630_v59  ;;  %3356 = vmatmul.mubr.f32.gmra.mxu0 %v2955_v62  ;;  %v7967_v35 = vld [vmem:[%s14452_s2 + $0x4b8] sm:$0xff]  ;;  %v2965_v62 = vunpack.c.l.bf16 %v7964_v2 }
 0x399   :  { %3105 = vmatpush2.msra.mxu1 %v14762_v12  ;;  %v2151_v52 = vpop.f32.mrf.mxu1  ;;  %3360 = vmatprep.mubr.f32.mxu0 %v2961_v41  ;;  %v14764_v6 = vld [vmem:[#allocation35_spill] sm:$0xff]  ;;  %v14765_v41 = vld [vmem:[#allocation36_spill] sm:$0xff]  ;;  %v2970_v2 = vunpack.c.l.bf16 %v7967_v35 }
 0x39a   :  { %v2152_v45 = vadd.f32 %v2151_v52, %v14763_v60  ;;  %3106 = vmatprep.subr.mxu1 %v14630_v59  ;;  %9185 = vmatmul.mubr.msk.f32.gmra.mxu1 %vm2347_vm5, %v2317_v5  ;;  %v2971_v5 = vunpack.c.h.bf16 %v7967_v35  ;;  %v14766_v60 = vld [vmem:[#allocation95_spill] sm:$0xff] }
 0x39b   :  { %3107 = vmatpush2.msra.mxu1 %v14764_v6  ;;  %v2153_v1 = vpop.f32.mrf.mxu1  ;;  %9187 = vmatprep.mubr.msk.f32.mxu1 %vm9981_vm1, %v14630_v59 }
 0x39c   :  { %v2322_v38 = vadd.f32 %v11828_v3, %v2152_v45  ;;  %3108 = vmatprep.subr.mxu1 %v14630_v59  ;;  %3361 = vmatmul.mubr.f32.gmra.mxu0 %v2960_v53  ;;  %v7970_v1 = vld [vmem:[%s14452_s2 + $0x4cc] sm:$0xff] }
 0x39d   :  { %3109 = vmatpush2.msra.mxu1 %v14765_v41  ;;  %v2156_v52 = vpop.f32.mrf.mxu1  ;;  %3365 = vmatprep.mubr.f32.mxu0 %v2966_v30  ;;  %v2976_v30 = vunpack.c.h.bf16 %v7970_v1 }
 0x39e   :  { %v2157_v17 = vadd.f32 %v2156_v52, %v14766_v60  ;;  %9188 = vmatmul.mubr.msk.f32.gmra.mxu1 %vm2347_vm5, %v2322_v38  ;;  %9267 = vmatprep.subr.mxu1 %v14630_v59  ;;  %v14767_v52 = vld [vmem:[#allocation96_spill] sm:$0xff] }
 0x39f   :  { %v2158_v45 = vpop.f32.mrf.mxu1  ;;  %9190 = vmatprep.mubr.msk.f32.mxu1 %vm9981_vm1, %v14630_v59  ;;  %v7973_v38 = vld [vmem:[%s14452_s2 + $0x4e0] sm:$0x11] }
 0x3a0   :  { %v2327_v3 = vadd.f32 %v11839_v24, %v2157_v17  ;;  %3366 = vmatmul.mubr.f32.gmra.mxu0 %v2965_v62  ;;  %v2975_v17 = vunpack.c.l.bf16 %v7970_v1  ;;  %v2981_v35 = vunpack.c.h.bf16 %v7973_v38  ;;  %v14768_v62 = vld [vmem:[#allocation97_spill] sm:$0xff] }
 0x3a1   :  { %v2161_v53 = vpop.f32.mrf.mxu1  ;;  %3370 = vmatprep.mubr.f32.mxu0 %v2971_v5 }
 0x3a2   :  { %v2162_v60 = vadd.f32 %v2161_v53, %v14767_v52  ;;  %9191 = vmatmul.mubr.msk.f32.gmra.mxu1 %vm2347_vm5, %v2327_v3  ;;  %v2980_v53 = vunpack.c.l.bf16 %v7973_v38  ;;  %v7915_v38 = vld [vmem:[%s14452_s2 + $0x35c] sm:$0xff] }
 0x3a3   :  { %v2163_v28 = vpop.f32.mrf.mxu1  ;;  %9193 = vmatprep.mubr.msk.f32.mxu1 %vm9981_vm1, %v14630_v59 }
 0x3a4   :  { %v2332_v45 = vadd.f32 %v11850_v50, %v2162_v60  ;;  %3371 = vmatmul.mubr.f32.gmra.mxu0 %v2970_v2  ;;  %v7912_v50 = vld [vmem:[%s14452_s2 + $0x348] sm:$0xff]  ;;  %v14769_v2 = vld [vmem:[#allocation99_spill] sm:$0xff] }
 0x3a5   :  { %v2166_v24 = vpop.f32.mrf.mxu1  ;;  %3375 = vmatprep.mubr.f32.mxu0 %v2976_v30 }
 0x3a6   :  { %v2167_v5 = vadd.f32 %v2166_v24, %v14768_v62  ;;  %9194 = vmatmul.mubr.msk.f32.gmra.mxu1 %vm2347_vm5, %v2332_v45  ;;  %v2879_v45 = vunpack.c.h.bf16 %v7912_v50  ;;  %v2878_v24 = vunpack.c.l.bf16 %v7912_v50  ;;  %v7918_v62 = vld [vmem:[%s14452_s2 + $0x370] sm:$0xff] }
 0x3a7   :  { %v2168_v3 = vpop.f32.mrf.mxu1  ;;  %9196 = vmatprep.mubr.msk.f32.mxu1 %vm9981_vm1, %v14630_v59  ;;  %v2888_v50 = vunpack.c.l.bf16 %v7918_v62 }
 0x3a8   :  { %v2337_v28 = vadd.f32 %v11861_v36, %v2167_v5  ;;  %3376 = vmatmul.mubr.f32.gmra.mxu0 %v2975_v17  ;;  %v2883_v5 = vunpack.c.l.bf16 %v7915_v38  ;;  %v14770_v3 = vld [vmem:[#allocation62_spill] sm:$0xff] }
 0x3a9   :  { %v2171_v52 = vpop.f32.mrf.mxu1  ;;  %3380 = vmatprep.mubr.f32.mxu0 %v2981_v35  ;;  %v2884_v35 = vunpack.c.h.bf16 %v7915_v38 }
 0x3aa   :  { %9197 = vmatmul.mubr.msk.f32.gmra.mxu1 %vm2347_vm5, %v2337_v28  ;;  %v2172_v30 = vadd.f32 %v2171_v52, %v14769_v2  ;;  %v2889_v28 = vunpack.c.h.bf16 %v7918_v62  ;;  %v14771_v52 = vld [vmem:[#allocation61_spill] sm:$0xff]  ;;  %v14776_v62 = vld [vmem:[#allocation67_spill] sm:$0xff] }
 0x3ab   :  { %v2173_v1 = vpop.f32.mrf.mxu1  ;;  %9199 = vmatprep.mubr.msk.f32.mxu1 %vm9981_vm1, %v14630_v59 }
 0x3ac   :  { %3381 = vmatmul.mubr.f32.gmra.mxu0 %v2980_v53  ;;  %v7921_v53 = vld [vmem:[%s14452_s2 + $0x384] sm:$0xff]  ;;  %v14772_v1 = vld [vmem:[#allocation63_spill] sm:$0xff] }
 0x3ad   :  { %v2341_v60 = vpop.f32.mrf.mxu1  ;;  %9350 = vmatprep.mubr.msk.f32.mxu0 %vm9981_vm1, %v14630_v59  ;;  %v2894_v2 = vunpack.c.h.bf16 %v7921_v53 }
 0x3ae   :  { %v2342_v36 = vadd.f32 %v2341_v60, %v2172_v30  ;;  %v7924_v30 = vld [vmem:[%s14452_s2 + $0x398] sm:$0xff]  ;;  %v14773_v60 = vld [vmem:[#allocation64_spill] sm:$0xff] }
 0x3af   :  { %v9136_v17 = vpop.f32.mrf.mxu1  ;;  %v2899_v38 = vunpack.c.h.bf16 %v7924_v30 }
 0x3b0   :  { %9200 = vmatmul.mubr.msk.f32.gmra.mxu1 %vm2347_vm5, %v2342_v36  ;;  %v14774_v36 = vld [vmem:[#allocation65_spill] sm:$0xff] }
 0x3b1   :  { %3110 = vmatprep.mubr.f32.mxu1 %v2879_v45  ;;  %v2893_v45 = vunpack.c.l.bf16 %v7921_v53  ;;  %v7927_v17 = vld [vmem:[%s14452_s2 + $0x3ac] sm:$0xff]  ;;  %v14777_v53 = vld [vmem:[#allocation68_spill] sm:$0xff] }
 0x3b4   :  { %3111 = vmatmul.mubr.f32.vlgmr.msra.gmra.mxu1 %v2878_v24  ;;  %v14775_v24 = vld [vmem:[#allocation66_spill] sm:$0xff] }
 0x3b5   :  { %9268 = vmatpush3.msk.msra.mxu1 %vm1088_vm3, %v14770_v3  ;;  %3115 = vmatprep.mubr.f32.mxu1 %v2884_v35  ;;  %v2898_v35 = vunpack.c.l.bf16 %v7924_v30 }
 0x3b6   :  { %9269 = vmatprep.subr.mxu1 %v14630_v59 }
 0x3b7   :  { %9270 = vmatpush3.msra.mxu1 %v14771_v52 }
 0x3b8   :  { %9271 = vmatprep.subr.mxu1 %v14630_v59  ;;  %3116 = vmatmul.mubr.f32.gmra.mxu1 %v2883_v5  ;;  %v2904_v5 = vunpack.c.h.bf16 %v7927_v17 }
 0x3b9   :  { %9272 = vmatpush3.msra.mxu1 %v14772_v1  ;;  %3120 = vmatprep.mubr.f32.mxu1 %v2889_v28  ;;  %v7930_v28 = vld [vmem:[%s14452_s2 + $0x3c0] sm:$0xff] }
 0x3ba   :  { %9273 = vmatprep.subr.mxu1 %v14630_v59  ;;  %v2909_v30 = vunpack.c.h.bf16 %v7930_v28  ;;  %v2908_v23 = vunpack.c.l.bf16 %v7930_v28 }
 0x3bb   :  { %9274 = vmatpush3.msra.mxu1 %v14773_v60 }
 0x3bc   :  { %9275 = vmatprep.subr.mxu1 %v14630_v59  ;;  %3121 = vmatmul.mubr.f32.gmra.mxu1 %v2888_v50  ;;  %v2903_v50 = vunpack.c.l.bf16 %v7927_v17  ;;  %v7936_v17 = vld [vmem:[%s14452_s2 + $0x3e8] sm:$0xff] }
 0x3bd   :  { %9276 = vmatpush3.msra.mxu1 %v14774_v36  ;;  %3125 = vmatprep.mubr.f32.mxu1 %v2894_v2  ;;  %v14778_v2 = vld [vmem:[#allocation69_spill] sm:$0xff]  ;;  %v2919_v27 = vunpack.c.h.bf16 %v7936_v17  ;;  %v2918_v28 = vunpack.c.l.bf16 %v7936_v17 }
 0x3be   :  { %9277 = vmatprep.subr.mxu1 %v14630_v59 }
 0x3bf   :  { %9278 = vmatpush3.msra.mxu1 %v14775_v24 }
 0x3c0   :  { %9279 = vmatprep.subr.mxu1 %v14630_v59  ;;  %3126 = vmatmul.mubr.f32.gmra.mxu1 %v2893_v45  ;;  %v7933_v45 = vld [vmem:[%s14452_s2 + $0x3d4] sm:$0xff] }
 0x3c1   :  { %9280 = vmatpush3.msra.mxu1 %v14776_v62  ;;  %3130 = vmatprep.mubr.f32.mxu1 %v2899_v38  ;;  %v2914_v44 = vunpack.c.h.bf16 %v7933_v45 }
 0x3c2   :  { %9281 = vmatprep.subr.mxu1 %v14630_v59 }
 0x3c3   :  { %9282 = vmatpush3.msra.mxu1 %v14777_v53 }
 0x3c4   :  { %9283 = vmatprep.subr.mxu1 %v14630_v59  ;;  %3131 = vmatmul.mubr.f32.gmra.mxu1 %v2898_v35 }
 0x3c5   :  { %9284 = vmatpush3.msra.mxu1 %v14778_v2  ;;  %3135 = vmatprep.mubr.f32.mxu1 %v2904_v5  ;;  %v2913_v5 = vunpack.c.l.bf16 %v7933_v45 }
 0x3c6   :  { %4044 = vmatprep.subr.mxu1 %v14630_v59 }
 0x3c8   :  { %v12182_v38 = vpop.f32.mrf.mxu0  ;;  %3136 = vmatmul.mubr.f32.gmra.mxu1 %v2903_v50 }
 0x3c9   :  { %14779 = vst [vmem:[#allocation70_spill] sm:$0xff] %v12182_v38  ;;  %3140 = vmatprep.mubr.f32.mxu1 %v2909_v30  ;;  %v7939_v38 = vld [vmem:[%s14452_s2 + $0x3fc] sm:$0xff] }
 0x3ca   :  { %v9206_v47 = vpop.f32.mrf.mxu0 }
 0x3cb   :  { %v2924_v47 = vunpack.c.h.bf16 %v7939_v38 }
 0x3cc   :  { %v12187_v35 = vpop.f32.mrf.mxu0  ;;  %3141 = vmatmul.mubr.f32.gmra.mxu1 %v2908_v23 }
 0x3cd   :  { %14780 = vst [vmem:[#allocation71_spill] sm:$0xff] %v12187_v35  ;;  %3145 = vmatprep.mubr.f32.mxu1 %v2914_v44  ;;  %v7942_v35 = vld [vmem:[%s14452_s2 + $0x410] sm:$0xff]  ;;  %v2923_v44 = vunpack.c.l.bf16 %v7939_v38 }
 0x3ce   :  { %v9209_v18 = vpop.f32.mrf.mxu0 }
 0x3cf   :  { %v2929_v18 = vunpack.c.h.bf16 %v7942_v35 }
 0x3d0   :  { %v12192_v50 = vpop.f32.mrf.mxu0  ;;  %3146 = vmatmul.mubr.f32.gmra.mxu1 %v2913_v5 }
 0x3d1   :  { %14781 = vst [vmem:[#allocation98_spill] sm:$0xff] %v12192_v50  ;;  %3150 = vmatprep.mubr.f32.mxu1 %v2919_v27  ;;  %v7945_v50 = vld [vmem:[%s14452_s2 + $0x424] sm:$0xff]  ;;  %v2928_v27 = vunpack.c.l.bf16 %v7942_v35 }
 0x3d2   :  { %v9212_v30 = vpop.f32.mrf.mxu0  ;;  %v2934_v17 = vunpack.c.h.bf16 %v7945_v50  ;;  %v2933_v38 = vunpack.c.l.bf16 %v7945_v50 }
 0x3d4   :  { %v12197_v23 = vpop.f32.mrf.mxu0  ;;  %3151 = vmatmul.mubr.f32.gmra.mxu1 %v2918_v28 }
 0x3d5   :  { %14782 = vst [vmem:[#allocation72_spill] sm:$0xff] %v12197_v23  ;;  %3155 = vmatprep.mubr.f32.mxu1 %v2924_v47  ;;  %v7948_v23 = vld [vmem:[%s14452_s2 + $0x438] sm:$0xff] }
 0x3d6   :  { %v9215_v45 = vpop.f32.mrf.mxu0  ;;  %v2939_v47 = vunpack.c.h.bf16 %v7948_v23  ;;  %v2938_v35 = vunpack.c.l.bf16 %v7948_v23 }
 0x3d8   :  { %v12202_v5 = vpop.f32.mrf.mxu0  ;;  %3156 = vmatmul.mubr.f32.gmra.mxu1 %v2923_v44 }
 0x3d9   :  { %14783 = vst [vmem:[#allocation100_spill] sm:$0xff] %v12202_v5  ;;  %3160 = vmatprep.mubr.f32.mxu1 %v2929_v18  ;;  %v7951_v5 = vld [vmem:[%s14452_s2 + $0x44c] sm:$0xff] }
 0x3da   :  { %v9218_v30 = vpop.f32.mrf.mxu0  ;;  %v2944_v18 = vunpack.c.h.bf16 %v7951_v5  ;;  %v2943_v50 = vunpack.c.l.bf16 %v7951_v5 }
 0x3dc   :  { %v12207_v28 = vpop.f32.mrf.mxu0  ;;  %3161 = vmatmul.mubr.f32.gmra.mxu1 %v2928_v27 }
 0x3dd   :  { %14784 = vst [vmem:[#allocation73_spill] sm:$0xff] %v12207_v28  ;;  %3165 = vmatprep.mubr.f32.mxu1 %v2934_v17  ;;  %v7954_v28 = vld [vmem:[%s14452_s2 + $0x460] sm:$0xff] }
 0x3de   :  { %v9221_v45 = vpop.f32.mrf.mxu0  ;;  %v2949_v17 = vunpack.c.h.bf16 %v7954_v28  ;;  %v2948_v23 = vunpack.c.l.bf16 %v7954_v28 }
 0x3e0   :  { %v12212_v44 = vpop.f32.mrf.mxu0  ;;  %3166 = vmatmul.mubr.f32.gmra.mxu1 %v2933_v38 }
 0x3e1   :  { %14785 = vst [vmem:[#allocation102_spill] sm:$0xff] %v12212_v44  ;;  %3170 = vmatprep.mubr.f32.mxu1 %v2939_v47  ;;  %v7957_v44 = vld [vmem:[%s14452_s2 + $0x474] sm:$0xff] }
 0x3e2   :  { %v9224_v30 = vpop.f32.mrf.mxu0  ;;  %v2954_v47 = vunpack.c.h.bf16 %v7957_v44  ;;  %v2953_v5 = vunpack.c.l.bf16 %v7957_v44 }
 0x3e4   :  { %v12217_v27 = vpop.f32.mrf.mxu0  ;;  %3171 = vmatmul.mubr.f32.gmra.mxu1 %v2938_v35 }
 0x3e5   :  { %14786 = vst [vmem:[#allocation74_spill] sm:$0xff] %v12217_v27  ;;  %3175 = vmatprep.mubr.f32.mxu1 %v2944_v18  ;;  %v7960_v27 = vld [vmem:[%s14452_s2 + $0x488] sm:$0xff] }
 0x3e6   :  { %v9227_v45 = vpop.f32.mrf.mxu0  ;;  %v2959_v18 = vunpack.c.h.bf16 %v7960_v27  ;;  %v2958_v28 = vunpack.c.l.bf16 %v7960_v27 }
 0x3e8   :  { %v12222_v38 = vpop.f32.mrf.mxu0  ;;  %3176 = vmatmul.mubr.f32.gmra.mxu1 %v2943_v50 }
 0x3e9   :  { %14787 = vst [vmem:[#allocation104_spill] sm:$0xff] %v12222_v38  ;;  %3180 = vmatprep.mubr.f32.mxu1 %v2949_v17  ;;  %v7963_v38 = vld [vmem:[%s14452_s2 + $0x49c] sm:$0xff] }
 0x3ea   :  { %v9230_v30 = vpop.f32.mrf.mxu0  ;;  %v2964_v17 = vunpack.c.h.bf16 %v7963_v38  ;;  %v2963_v44 = vunpack.c.l.bf16 %v7963_v38 }
 0x3ec   :  { %v12227_v35 = vpop.f32.mrf.mxu0  ;;  %3181 = vmatmul.mubr.f32.gmra.mxu1 %v2948_v23 }
 0x3ed   :  { %14788 = vst [vmem:[#allocation75_spill] sm:$0xff] %v12227_v35  ;;  %3185 = vmatprep.mubr.f32.mxu1 %v2954_v47  ;;  %v7966_v35 = vld [vmem:[%s14452_s2 + $0x4b0] sm:$0xff] }
 0x3ee   :  { %v9233_v45 = vpop.f32.mrf.mxu0  ;;  %v2969_v47 = vunpack.c.h.bf16 %v7966_v35  ;;  %v2968_v27 = vunpack.c.l.bf16 %v7966_v35  ;;  %v7914_v35 = vld [vmem:[%s14452_s2 + $0x358] ss:$20 sps:$4 sm:$0xff]  }
 0x3f0   :  { %v12232_v50 = vpop.f32.mrf.mxu0  ;;  %3186 = vmatmul.mubr.f32.gmra.mxu1 %v2953_v5 }
 0x3f1   :  { %14789 = vst [vmem:[#allocation76_spill] sm:$0xff] %v12232_v50  ;;  %3190 = vmatprep.mubr.f32.mxu1 %v2959_v18  ;;  %v7969_v50 = vld [vmem:[%s14452_s2 + $0x4c4] sm:$0xff] }
 0x3f2   :  { %v9236_v30 = vpop.f32.mrf.mxu0  ;;  %v2974_v18 = vunpack.c.h.bf16 %v7969_v50  ;;  %v2973_v38 = vunpack.c.l.bf16 %v7969_v50 }
 0x3f4   :  { %v12237_v23 = vpop.f32.mrf.mxu0  ;;  %3191 = vmatmul.mubr.f32.gmra.mxu1 %v2958_v28 }
 0x3f5   :  { %14790 = vst [vmem:[#allocation77_spill] sm:$0xff] %v12237_v23  ;;  %3195 = vmatprep.mubr.f32.mxu1 %v2964_v17  ;;  %v7972_v23 = vld [vmem:[%s14452_s2 + $0x4d8] sm:$0x11] }
 0x3f6   :  { %v9239_v45 = vpop.f32.mrf.mxu0  ;;  %v2979_v17 = vunpack.c.h.bf16 %v7972_v23 }
 0x3f8   :  { %v12242_v5 = vpop.f32.mrf.mxu0  ;;  %3196 = vmatmul.mubr.f32.gmra.mxu1 %v2963_v44 }
 0x3f9   :  { %14791 = vst [vmem:[#allocation78_spill] sm:$0xff] %v12242_v5  ;;  %3200 = vmatprep.mubr.f32.mxu1 %v2969_v47  ;;  %v2978_v5 = vunpack.c.l.bf16 %v7972_v23  ;;  %v7920_v23 = vld [vmem:[%s14452_s2 + $0x380] ss:$20 sps:$4 sm:$0xff]  }
 0x3fa   :  { %v9242_v30 = vpop.f32.mrf.mxu0 }
 0x3fb   :  { %v2882_v30 = vunpack.c.l.bf16 %v7914_v35 }
 0x3fc   :  { %v12247_v28 = vpop.f32.mrf.mxu0  ;;  %3201 = vmatmul.mubr.f32.gmra.mxu1 %v2968_v27 }
 0x3fd   :  { %14792 = vst [vmem:[#allocation101_spill] sm:$0xff] %v12247_v28  ;;  %3205 = vmatprep.mubr.f32.mxu1 %v2974_v18  ;;  %v2887_v18 = vunpack.c.h.bf16 %v7914_v35  ;;  %v8067_v28 = vld [vmem:[%s14452_s2 + $0x62c] sm:$0xff] }
 0x3fe   :  { %v9245_v45 = vpop.f32.mrf.mxu0 }
 0x3ff   :  { %v2897_v45 = vunpack.c.h.bf16 %v7920_v23 }
 0x400   :  { %v12249_v16 = vpop.f32.mrf.mxu0  ;;  %3206 = vmatmul.mubr.f32.gmra.mxu1 %v2973_v38 }
 0x401   :  { %14793 = vst [vmem:[#allocation79_spill] sm:$0xff] %v12249_v16  ;;  %3210 = vmatprep.mubr.f32.mxu1 %v2979_v17  ;;  %v2892_v17 = vunpack.c.l.bf16 %v7920_v23  ;;  %v8061_v16 = vld [vmem:[%s14452_s2 + $0x604] sm:$0xff] }
 0x402   :  { %v9248_v44 = vpop.f32.mrf.mxu0 }
 0x404   :  { %v12254_v47 = vpop.f32.mrf.mxu0  ;;  %3211 = vmatmul.mubr.f32.gmra.mxu1 %v2978_v5 }
 0x405   :  { %14794 = vst [vmem:[#allocation5_spill] sm:$0xff] %v12254_v47  ;;  %9285 = vmatprep.mubr.msk.f32.mxu1 %vm9981_vm1, %v14630_v59 }
 0x406   :  { %v9251_v50 = vpop.f32.mrf.mxu0 }
 0x408   :  { %v12258_v27 = vpop.f32.mrf.mxu0  ;;  %9286 = vmatmul.mubr.msk.f32.vlgmr.msra.gmra.mxu1 %vm1024_vm4, %v2882_v30 }
 0x409   :  { %14795 = vst [vmem:[#allocation103_spill] sm:$0xff] %v12258_v27  ;;  %4045 = vmatpush1.msra.mxu1 %v14716_v31  ;;  %9288 = vmatprep.mubr.msk.f32.mxu1 %vm9981_vm1, %v14630_v59 }
 0x40a   :  { %4046 = vmatprep.subr.mxu1 %v14630_v59  ;;  %v9254_v5 = vpop.f32.mrf.mxu0 }
 0x40b   :  { %4047 = vmatpush1.msra.mxu1 %v14718_v19 }
 0x40c   :  { %4048 = vmatprep.subr.mxu1 %v14630_v59  ;;  %v12270_v38 = vpop.f32.mrf.mxu0  ;;  %9289 = vmatmul.mubr.msk.f32.gmra.mxu1 %vm1024_vm4, %v2887_v18 }
 0x40d   :  { %14796 = vst [vmem:[#allocation6_spill] sm:$0xff] %v12270_v38  ;;  %4049 = vmatpush1.msra.mxu1 %v14720_v49  ;;  %9291 = vmatprep.mubr.msk.f32.mxu1 %vm9981_vm1, %v14630_v59  ;;  %v7926_v49 = vld [vmem:[%s14452_s2 + $0x3a8] ss:$20 sps:$4 sm:$0xff]   ;;  %v8025_v38 = vld [vmem:[%s14452_s2 + $0x514] sm:$0xff] }
 0x40e   :  { %4050 = vmatprep.subr.mxu1 %v14630_v59  ;;  %v9257_v31 = vpop.f32.mrf.mxu0  ;;  %v2902_v44 = vunpack.c.l.bf16 %v7926_v49  ;;  %v2907_v30 = vunpack.c.h.bf16 %v7926_v49 }
 0x40f   :  { %4051 = vmatpush1.msra.mxu1 %v14722_v29 }
 0x410   :  { %4052 = vmatprep.subr.mxu1 %v14630_v59  ;;  %v12279_v19 = vpop.f32.mrf.mxu0  ;;  %9292 = vmatmul.mubr.msk.f32.gmra.mxu1 %vm1024_vm4, %v2892_v17 }
 0x411   :  { %14797 = vst [vmem:[#allocation80_spill] sm:$0xff] %v12279_v19  ;;  %4053 = vmatpush1.msra.mxu1 %v14724_v42  ;;  %9294 = vmatprep.mubr.msk.f32.mxu1 %vm9981_vm1, %v14630_v59 }
 0x412   :  { %4054 = vmatprep.subr.mxu1 %v14630_v59  ;;  %v9260_v35 = vpop.f32.mrf.mxu0 }
 0x413   :  { %4055 = vmatpush1.msra.mxu1 %v14726_v63 }
 0x414   :  { %4056 = vmatprep.subr.mxu1 %v14630_v59  ;;  %v12291_v29 = vpop.f32.mrf.mxu0  ;;  %9295 = vmatmul.mubr.msk.f32.gmra.mxu1 %vm1024_vm4, %v2897_v45 }
 0x415   :  { %14798 = vst [vmem:[#allocation7_spill] sm:$0xff] %v12291_v29  ;;  %4057 = vmatpush1.msra.mxu1 %v14728_v54  ;;  %9297 = vmatprep.mubr.msk.f32.mxu1 %vm9981_vm1, %v14630_v59  ;;  %v7932_v54 = vld [vmem:[%s14452_s2 + $0x3d0] ss:$20 sps:$4 sm:$0xff]  }
 0x416   :  { %4058 = vmatprep.subr.mxu1 %v14630_v59  ;;  %v9263_v42 = vpop.f32.mrf.mxu0  ;;  %v2917_v5 = vunpack.c.h.bf16 %v7932_v54 }
 0x417   :  { %4059 = vmatpush1.msra.mxu1 %v14729_v10  ;;  %v2912_v10 = vunpack.c.l.bf16 %v7932_v54 }
 0x418   :  { %4060 = vmatprep.subr.mxu1 %v14630_v59  ;;  %v12300_v63 = vpop.f32.mrf.mxu0  ;;  %9298 = vmatmul.mubr.msk.f32.gmra.mxu1 %vm1024_vm4, %v2902_v44 }
 0x419   :  { %14799 = vst [vmem:[#allocation105_spill] sm:$0xff] %v12300_v63  ;;  %4061 = vmatpush1.msra.mxu1 %v14731_v11  ;;  %9300 = vmatprep.mubr.msk.f32.mxu1 %vm9981_vm1, %v14630_v59  ;;  %v8022_v63 = vld [vmem:[%s14452_s2 + $0x500] sm:$0xff] }
 0x41a   :  { %4062 = vmatprep.subr.mxu1 %v14630_v59  ;;  %v9266_v50 = vpop.f32.mrf.mxu0  ;;  %v3881_v47 = vunpack.c.l.bf16 %v8022_v63 }
 0x41b   :  { %4063 = vmatpush1.msra.mxu1 %v14732_v9 }
 0x41c   :  { %4064 = vmatprep.subr.mxu1 %v14630_v59  ;;  %9301 = vmatmul.mubr.msk.f32.gmra.mxu1 %vm1024_vm4, %v2907_v30  ;;  %v12313_v18 = vpop.f32.mrf.mxu0 }
 0x41d   :  { %4065 = vmatpush1.msra.mxu1 %v14734_v40  ;;  %9303 = vmatprep.mubr.msk.f32.mxu1 %vm9981_vm1, %v14630_v59  ;;  %v7938_v40 = vld [vmem:[%s14452_s2 + $0x3f8] ss:$20 sps:$4 sm:$0xff]  }
 0x41e   :  { %4066 = vmatprep.subr.mxu1 %v14630_v59  ;;  %v12319_v11 = vpop.f32.mrf.mxu1  ;;  %v3284_v23 = vpop.f32.mrf.mxu0  ;;  %v2922_v49 = vunpack.c.l.bf16 %v7938_v40  ;;  %v2927_v30 = vunpack.c.h.bf16 %v7938_v40 }
 0x41f   :  { %4067 = vmatpush1.msra.mxu1 %v14735_v33  ;;  %v7997_v33 = vld [vmem:[%s14453_s3 + $0x10] sm:$0xff] }
 0x420   :  { %4068 = vmatprep.subr.mxu1 %v14630_v59  ;;  %v9141_v9 = vpop.f32.mrf.mxu1  ;;  %9304 = vmatmul.mubr.msk.f32.gmra.mxu1 %vm1024_vm4, %v2912_v10  ;;  %v12324_v17 = vpop.f32.mrf.mxu0 }
 0x421   :  { %4069 = vmatpush1.msra.mxu1 %v14737_v46  ;;  %9306 = vmatprep.mubr.msk.f32.mxu1 %vm9981_vm1, %v14630_v59 }
 0x422   :  { %4070 = vmatprep.subr.mxu1 %v14630_v59  ;;  %v12336_v31 = vpop.f32.mrf.mxu1  ;;  %v3289_v45 = vpop.f32.mrf.mxu0  ;;  %9349 = vmatpush3.msra.mxu0 %v7997_v33 }
 0x423   :  { %4071 = vmatpush1.msra.mxu1 %v14738_v8  ;;  %4214 = vmatprep.subr.mxu0 %v14630_v59 }
 0x424   :  { %4072 = vmatprep.subr.mxu1 %v14630_v59  ;;  %v9144_v46 = vpop.f32.mrf.mxu1  ;;  %9307 = vmatmul.mubr.msk.f32.gmra.mxu1 %vm1024_vm4, %v2917_v5  ;;  %v12342_v35 = vpop.f32.mrf.mxu0 }
 0x425   :  { %4073 = vmatpush1.msra.mxu1 %v14740_v13  ;;  %9309 = vmatprep.mubr.msk.f32.mxu1 %vm9981_vm1, %v14630_v59  ;;  %v7944_v13 = vld [vmem:[%s14452_s2 + $0x420] ss:$20 sps:$4 sm:$0xff]  }
 0x426   :  { %4074 = vmatprep.subr.mxu1 %v14630_v59  ;;  %v12348_v44 = vpop.f32.mrf.mxu1  ;;  %v3294_v8 = vpop.f32.mrf.mxu0  ;;  %v2937_v40 = vunpack.c.h.bf16 %v7944_v13 }
 0x427   :  { %4075 = vmatpush1.msra.mxu1 %v14741_v55 }
 0x428   :  { %4076 = vmatprep.subr.mxu1 %v14630_v59  ;;  %v9147_v42 = vpop.f32.mrf.mxu1  ;;  %9310 = vmatmul.mubr.msk.f32.gmra.mxu1 %vm1024_vm4, %v2922_v49  ;;  %v12353_v54 = vpop.f32.mrf.mxu0 }
 0x429   :  { %4077 = vmatpush2.msra.mxu1 %v14743_v39  ;;  %9312 = vmatprep.mubr.msk.f32.mxu1 %vm9981_vm1, %v14630_v59  ;;  %v2932_v39 = vunpack.c.l.bf16 %v7944_v13 }
 0x42a   :  { %4078 = vmatprep.subr.mxu1 %v14630_v59  ;;  %v12362_v55 = vpop.f32.mrf.mxu1  ;;  %v3299_v50 = vpop.f32.mrf.mxu0 }
 0x42b   :  { %14800 = vst [vmem:[#allocation8_spill] sm:$0xff] %v12362_v55  ;;  %4079 = vmatpush2.msra.mxu1 %v14744_v56 }
 0x42c   :  { %4080 = vmatprep.subr.mxu1 %v14630_v59  ;;  %v9150_v10 = vpop.f32.mrf.mxu1  ;;  %9313 = vmatmul.mubr.msk.f32.gmra.mxu1 %vm1024_vm4, %v2927_v30  ;;  %v12367_v23 = vpop.f32.mrf.mxu0 }
 0x42d   :  { %4081 = vmatpush2.msra.mxu1 %v14746_v43  ;;  %9315 = vmatprep.mubr.msk.f32.mxu1 %vm9981_vm1, %v14630_v59  ;;  %v7950_v43 = vld [vmem:[%s14452_s2 + $0x448] ss:$20 sps:$4 sm:$0xff]  }
 0x42e   :  { %4082 = vmatprep.subr.mxu1 %v14630_v59  ;;  %v12373_v9 = vpop.f32.mrf.mxu1  ;;  %v3304_v5 = vpop.f32.mrf.mxu0  ;;  %v2947_v30 = vunpack.c.h.bf16 %v7950_v43 }
 0x42f   :  { %14801 = vst [vmem:[#allocation81_spill] sm:$0xff] %v12373_v9  ;;  %4083 = vmatpush2.msra.mxu1 %v14747_v22 }
 0x430   :  { %4084 = vmatprep.subr.mxu1 %v14630_v59  ;;  %v9153_v56 = vpop.f32.mrf.mxu1  ;;  %9316 = vmatmul.mubr.msk.f32.gmra.mxu1 %vm1024_vm4, %v2932_v39  ;;  %v12378_v33 = vpop.f32.mrf.mxu0 }
 0x431   :  { %4085 = vmatpush2.msra.mxu1 %v14749_v0  ;;  %9318 = vmatprep.mubr.msk.f32.mxu1 %vm9981_vm1, %v14630_v59  ;;  %v2942_v0 = vunpack.c.l.bf16 %v7950_v43 }
 0x432   :  { %4086 = vmatprep.subr.mxu1 %v14630_v59  ;;  %v12387_v22 = vpop.f32.mrf.mxu1  ;;  %v3309_v45 = vpop.f32.mrf.mxu0 }
 0x433   :  { %14802 = vst [vmem:[#allocation9_spill] sm:$0xff] %v12387_v22  ;;  %4087 = vmatpush2.msra.mxu1 %v14750_v51 }
 0x434   :  { %4088 = vmatprep.subr.mxu1 %v14630_v59  ;;  %v9156_v46 = vpop.f32.mrf.mxu1  ;;  %9319 = vmatmul.mubr.msk.f32.gmra.mxu1 %vm1024_vm4, %v2937_v40  ;;  %v12392_v49 = vpop.f32.mrf.mxu0 }
 0x435   :  { %4089 = vmatpush2.msra.mxu1 %v14752_v20  ;;  %9321 = vmatprep.mubr.msk.f32.mxu1 %vm9981_vm1, %v14630_v59  ;;  %v7956_v20 = vld [vmem:[%s14452_s2 + $0x470] ss:$20 sps:$4 sm:$0xff]  }
 0x436   :  { %4090 = vmatprep.subr.mxu1 %v14630_v59  ;;  %v12398_v8 = vpop.f32.mrf.mxu1  ;;  %v3314_v42 = vpop.f32.mrf.mxu0  ;;  %v2957_v40 = vunpack.c.h.bf16 %v7956_v20 }
 0x437   :  { %14803 = vst [vmem:[#allocation106_spill] sm:$0xff] %v12398_v8  ;;  %4091 = vmatpush2.msra.mxu1 %v14753_v14 }
 0x438   :  { %4092 = vmatprep.subr.mxu1 %v14630_v59  ;;  %v9159_v51 = vpop.f32.mrf.mxu1  ;;  %9322 = vmatmul.mubr.msk.f32.gmra.mxu1 %vm1024_vm4, %v2942_v0  ;;  %v12403_v13 = vpop.f32.mrf.mxu0 }
 0x439   :  { %4093 = vmatpush2.msra.mxu1 %v14755_v4  ;;  %9324 = vmatprep.mubr.msk.f32.mxu1 %vm9981_vm1, %v14630_v59  ;;  %v2952_v4 = vunpack.c.l.bf16 %v7956_v20 }
 0x43a   :  { %4094 = vmatprep.subr.mxu1 %v14630_v59  ;;  %v12412_v14 = vpop.f32.mrf.mxu1  ;;  %v3319_v50 = vpop.f32.mrf.mxu0 }
 0x43b   :  { %14804 = vst [vmem:[#allocation10_spill] sm:$0xff] %v12412_v14  ;;  %4095 = vmatpush2.msra.mxu1 %v14756_v61 }
 0x43c   :  { %4096 = vmatprep.subr.mxu1 %v14630_v59  ;;  %v9162_v10 = vpop.f32.mrf.mxu1  ;;  %9325 = vmatmul.mubr.msk.f32.gmra.mxu1 %vm1024_vm4, %v2947_v30  ;;  %v12417_v39 = vpop.f32.mrf.mxu0 }
 0x43d   :  { %4097 = vmatpush2.msra.mxu1 %v14758_v57  ;;  %9327 = vmatprep.mubr.msk.f32.mxu1 %vm9981_vm1, %v14630_v59  ;;  %v7962_v57 = vld [vmem:[%s14452_s2 + $0x498] ss:$20 sps:$4 sm:$0xff]  }
 0x43e   :  { %4098 = vmatprep.subr.mxu1 %v14630_v59  ;;  %v12423_v5 = vpop.f32.mrf.mxu1  ;;  %v3324_v56 = vpop.f32.mrf.mxu0  ;;  %v2967_v30 = vunpack.c.h.bf16 %v7962_v57 }
 0x43f   :  { %14805 = vst [vmem:[#allocation82_spill] sm:$0xff] %v12423_v5  ;;  %4099 = vmatpush2.msra.mxu1 %v14759_v7 }
 0x440   :  { %4100 = vmatprep.subr.mxu1 %v14630_v59  ;;  %v9165_v61 = vpop.f32.mrf.mxu1  ;;  %9328 = vmatmul.mubr.msk.f32.gmra.mxu1 %vm1024_vm4, %v2952_v4  ;;  %v12428_v43 = vpop.f32.mrf.mxu0 }
 0x441   :  { %4101 = vmatpush2.msra.mxu1 %v14761_v34  ;;  %9330 = vmatprep.mubr.msk.f32.mxu1 %vm9981_vm1, %v14630_v59  ;;  %v2962_v34 = vunpack.c.l.bf16 %v7962_v57 }
 0x442   :  { %4102 = vmatprep.subr.mxu1 %v14630_v59  ;;  %v12437_v7 = vpop.f32.mrf.mxu1  ;;  %v3329_v45 = vpop.f32.mrf.mxu0 }
 0x443   :  { %14806 = vst [vmem:[#allocation11_spill] sm:$0xff] %v12437_v7  ;;  %4103 = vmatpush2.msra.mxu1 %v14762_v12 }
 0x444   :  { %4104 = vmatprep.subr.mxu1 %v14630_v59  ;;  %v9168_v46 = vpop.f32.mrf.mxu1  ;;  %9331 = vmatmul.mubr.msk.f32.gmra.mxu1 %vm1024_vm4, %v2957_v40  ;;  %v12442_v0 = vpop.f32.mrf.mxu0 }
 0x445   :  { %4105 = vmatpush2.msra.mxu1 %v14764_v6  ;;  %9333 = vmatprep.mubr.msk.f32.mxu1 %vm9981_vm1, %v14630_v59  ;;  %v7968_v6 = vld [vmem:[%s14452_s2 + $0x4c0] ss:$20 sps:$4 sm:$0xff]  }
 0x446   :  { %4106 = vmatprep.subr.mxu1 %v14630_v59  ;;  %v12448_v42 = vpop.f32.mrf.mxu1  ;;  %v3334_v51 = vpop.f32.mrf.mxu0  ;;  %v2977_v45 = vunpack.c.h.bf16 %v7968_v6 }
 0x447   :  { %14807 = vst [vmem:[#allocation12_spill] sm:$0xff] %v12448_v42  ;;  %4107 = vmatpush2.msra.mxu1 %v14765_v41  ;;  %v2972_v41 = vunpack.c.l.bf16 %v7968_v6  ;;  %v8079_v42 = vld [vmem:[%s14452_s2 + $0x67c] sm:$0x11] }
 0x448   :  { %v9171_v12 = vpop.f32.mrf.mxu1  ;;  %9334 = vmatmul.mubr.msk.f32.gmra.mxu1 %vm1024_vm4, %v2962_v34  ;;  %9413 = vmatprep.subr.mxu1 %v14630_v59  ;;  %v12453_v20 = vpop.f32.mrf.mxu0  ;;  %v7974_v34 = vld [vmem:[%s14452_s2 + $0x4e8] sm:$0x1]  ;;  %v3976_v5 = vunpack.c.l.bf16 %v8079_v42 }
 0x449   :  { %9336 = vmatprep.mubr.msk.f32.mxu1 %vm9981_vm1, %v14630_v59  ;;  %v8019_v12 = vld [vmem:[%s14452_s2 + $0x4ec] sm:$0xff]  ;;  %v2982_v6 = vunpack.c.l.bf16 %v7974_v34 }
 0x44a   :  { %v12460_v50 = vpop.f32.mrf.mxu1  ;;  %v3339_v10 = vpop.f32.mrf.mxu0 }
 0x44b   :  { %14808 = vst [vmem:[#allocation83_spill] sm:$0xff] %v12460_v50  ;;  %v8076_v50 = vld [vmem:[%s14452_s2 + $0x668] sm:$0xff] }
 0x44c   :  { %v9174_v4 = vpop.f32.mrf.mxu1  ;;  %9337 = vmatmul.mubr.msk.f32.gmra.mxu1 %vm1024_vm4, %v2967_v30  ;;  %v12463_v56 = vpop.f32.mrf.mxu0 }
 0x44d   :  { %9339 = vmatprep.mubr.msk.f32.mxu1 %vm9981_vm1, %v14630_v59 }
 0x44e   :  { %v12467_v61 = vpop.f32.mrf.mxu1  ;;  %v3344_v40 = vpop.f32.mrf.mxu0 }
 0x44f   :  { %14809 = vst [vmem:[#allocation13_spill] sm:$0xff] %v12467_v61  ;;  %v8073_v61 = vld [vmem:[%s14452_s2 + $0x654] sm:$0xff] }
 0x450   :  { %v9177_v57 = vpop.f32.mrf.mxu1  ;;  %9340 = vmatmul.mubr.msk.f32.gmra.mxu1 %vm1024_vm4, %v2972_v41  ;;  %v12470_v46 = vpop.f32.mrf.mxu0  ;;  %v3877_v41 = vunpack.c.h.bf16 %v8019_v12 }
 0x451   :  { %9342 = vmatprep.mubr.msk.f32.mxu1 %vm9981_vm1, %v14630_v59 }
 0x452   :  { %v12477_v51 = vpop.f32.mrf.mxu1  ;;  %v3349_v30 = vpop.f32.mrf.mxu0 }
 0x453   :  { %14810 = vst [vmem:[#allocation14_spill] sm:$0xff] %v12477_v51  ;;  %v3876_v30 = vunpack.c.l.bf16 %v8019_v12  ;;  %v8070_v51 = vld [vmem:[%s14452_s2 + $0x640] sm:$0xff] }
 0x454   :  { %v9180_v10 = vpop.f32.mrf.mxu1  ;;  %9343 = vmatmul.mubr.msk.f32.gmra.mxu1 %vm1024_vm4, %v2977_v45  ;;  %v12483_v4 = vpop.f32.mrf.mxu0  ;;  %v3882_v45 = vunpack.c.h.bf16 %v8022_v63 }
 0x455   :  { %9345 = vmatprep.mubr.msk.f32.mxu1 %vm9981_vm1, %v14630_v59 }
 0x456   :  { %v12487_v40 = vpop.f32.mrf.mxu1  ;;  %v3354_v57 = vpop.f32.mrf.mxu0 }
 0x457   :  { %14811 = vst [vmem:[#allocation84_spill] sm:$0xff] %v12487_v40  ;;  %v8064_v40 = vld [vmem:[%s14452_s2 + $0x618] sm:$0xff] }
 0x458   :  { %v9183_v29 = vpop.f32.mrf.mxu1  ;;  %9346 = vmatmul.mubr.msk.f32.gmra.mxu1 %vm1024_vm4, %v2982_v6  ;;  %v12493_v10 = vpop.f32.mrf.mxu0 }
 0x459   :  { %4108 = vmatprep.mubr.f32.mxu1 %v3877_v41  ;;  %v3887_v29 = vunpack.c.h.bf16 %v8025_v38 }
 0x45a   :  { %v12495_v34 = vpop.f32.mrf.mxu1  ;;  %v3359_v19 = vpop.f32.mrf.mxu0 }
 0x45b   :  { %14812 = vst [vmem:[#allocation15_spill] sm:$0xff] %v12495_v34  ;;  %v8028_v19 = vld [vmem:[%s14452_s2 + $0x528] sm:$0xff]  ;;  %v8058_v34 = vld [vmem:[%s14452_s2 + $0x5f0] sm:$0xff] }
 0x45c   :  { %v9186_v57 = vpop.f32.mrf.mxu1  ;;  %4109 = vmatmul.mubr.f32.vlgmr.msra.gmra.mxu1 %v3876_v30  ;;  %v12500_v27 = vpop.f32.mrf.mxu0  ;;  %v3892_v30 = vunpack.c.h.bf16 %v8028_v19 }
 0x45d   :  { %9414 = vmatpush3.msk.msra.mxu1 %vm1088_vm3, %v14770_v3  ;;  %4113 = vmatprep.mubr.f32.mxu1 %v3882_v45  ;;  %v3886_v3 = vunpack.c.l.bf16 %v8025_v38 }
 0x45e   :  { %9415 = vmatprep.subr.mxu1 %v14630_v59  ;;  %v12505_v12 = vpop.f32.mrf.mxu1  ;;  %v3364_v6 = vpop.f32.mrf.mxu0 }
 0x45f   :  { %14813 = vst [vmem:[#allocation16_spill] sm:$0xff] %v12505_v12  ;;  %9416 = vmatpush3.msra.mxu1 %v14771_v52  ;;  %v8031_v52 = vld [vmem:[%s14452_s2 + $0x53c] sm:$0xff] }
 0x460   :  { %9417 = vmatprep.subr.mxu1 %v14630_v59  ;;  %v9189_v41 = vpop.f32.mrf.mxu1  ;;  %v12512_v63 = vpop.f32.mrf.mxu0  ;;  %4114 = vmatmul.mubr.f32.gmra.mxu1 %v3881_v47  ;;  %v3897_v38 = vunpack.c.h.bf16 %v8031_v52  ;;  %v8055_v12 = vld [vmem:[%s14452_s2 + $0x5dc] sm:$0xff] }
 0x461   :  { %9418 = vmatpush3.msra.mxu1 %v14772_v1  ;;  %4118 = vmatprep.mubr.f32.mxu1 %v3887_v29  ;;  %v3891_v1 = vunpack.c.l.bf16 %v8028_v19 }
 0x462   :  { %9419 = vmatprep.subr.mxu1 %v14630_v59  ;;  %v12516_v45 = vpop.f32.mrf.mxu1  ;;  %v3369_v57 = vpop.f32.mrf.mxu0 }
 0x463   :  { %14814 = vst [vmem:[#allocation85_spill] sm:$0xff] %v12516_v45  ;;  %9420 = vmatpush3.msra.mxu1 %v14773_v60  ;;  %v8034_v60 = vld [vmem:[%s14452_s2 + $0x550] sm:$0xff]  ;;  %v8052_v45 = vld [vmem:[%s14452_s2 + $0x5c8] sm:$0xff] }
 0x464   :  { %9421 = vmatprep.subr.mxu1 %v14630_v59  ;;  %v9192_v6 = vpop.f32.mrf.mxu1  ;;  %v12523_v47 = vpop.f32.mrf.mxu0  ;;  %4119 = vmatmul.mubr.f32.gmra.mxu1 %v3886_v3  ;;  %v3902_v19 = vunpack.c.h.bf16 %v8034_v60 }
 0x465   :  { %9422 = vmatpush3.msra.mxu1 %v14774_v36  ;;  %4123 = vmatprep.mubr.f32.mxu1 %v3892_v30  ;;  %v3896_v36 = vunpack.c.l.bf16 %v8031_v52 }
 0x466   :  { %9423 = vmatprep.subr.mxu1 %v14630_v59  ;;  %v12527_v29 = vpop.f32.mrf.mxu1  ;;  %v3374_v41 = vpop.f32.mrf.mxu0 }
 0x467   :  { %14815 = vst [vmem:[#allocation17_spill] sm:$0xff] %v12527_v29  ;;  %9424 = vmatpush3.msra.mxu1 %v14775_v24  ;;  %v8037_v24 = vld [vmem:[%s14452_s2 + $0x564] sm:$0xff]  ;;  %v8049_v29 = vld [vmem:[%s14452_s2 + $0x5b4] sm:$0xff] }
 0x468   :  { %9425 = vmatprep.subr.mxu1 %v14630_v59  ;;  %v9195_v57 = vpop.f32.mrf.mxu1  ;;  %v12534_v3 = vpop.f32.mrf.mxu0  ;;  %4124 = vmatmul.mubr.f32.gmra.mxu1 %v3891_v1  ;;  %v3907_v52 = vunpack.c.h.bf16 %v8037_v24 }
 0x469   :  { %9426 = vmatpush3.msra.mxu1 %v14776_v62  ;;  %4128 = vmatprep.mubr.f32.mxu1 %v3897_v38  ;;  %v3901_v62 = vunpack.c.l.bf16 %v8034_v60  ;;  %v8040_v38 = vld [vmem:[%s14452_s2 + $0x578] sm:$0xff] }
 0x46a   :  { %9427 = vmatprep.subr.mxu1 %v14630_v59  ;;  %v12538_v30 = vpop.f32.mrf.mxu1  ;;  %v3379_v6 = vpop.f32.mrf.mxu0 }
 0x46b   :  { %14816 = vst [vmem:[#allocation18_spill] sm:$0xff] %v12538_v30  ;;  %9428 = vmatpush3.msra.mxu1 %v14777_v53  ;;  %v3906_v53 = vunpack.c.l.bf16 %v8037_v24 }
 0x46c   :  { %9429 = vmatprep.subr.mxu1 %v14630_v59  ;;  %v9198_v41 = vpop.f32.mrf.mxu1  ;;  %v12545_v1 = vpop.f32.mrf.mxu0  ;;  %4129 = vmatmul.mubr.f32.gmra.mxu1 %v3896_v36  ;;  %v3911_v36 = vunpack.c.l.bf16 %v8040_v38 }
 0x46d   :  { %9430 = vmatpush3.msra.mxu1 %v14778_v2  ;;  %4133 = vmatprep.mubr.f32.mxu1 %v3902_v19  ;;  %v3912_v41 = vunpack.c.h.bf16 %v8040_v38  ;;  %v8043_v2 = vld [vmem:[%s14452_s2 + $0x58c] sm:$0xff] }
 0x46e   :  { %v3384_v57 = vpop.f32.mrf.mxu0  ;;  %5077 = vmatprep.subr.mxu1 %v14630_v59  ;;  %v3917_v19 = vunpack.c.h.bf16 %v8043_v2  ;;  %v3916_v24 = vunpack.c.l.bf16 %v8043_v2  ;;  %v3926_v2 = vunpack.c.l.bf16 %v8049_v29 }
 0x470   :  { %v12552_v6 = vpop.f32.mrf.mxu1  ;;  %4134 = vmatmul.mubr.f32.gmra.mxu1 %v3901_v62 }
 0x471   :  { %14817 = vst [vmem:[#allocation86_spill] sm:$0xff] %v12552_v6  ;;  %4138 = vmatprep.mubr.f32.mxu1 %v3907_v52  ;;  %v8046_v6 = vld [vmem:[%s14452_s2 + $0x5a0] sm:$0xff] }
 0x472   :  { %v9201_v30 = vpop.f32.mrf.mxu1  ;;  %v3921_v38 = vunpack.c.l.bf16 %v8046_v6 }
 0x473   :  { %v3922_v30 = vunpack.c.h.bf16 %v8046_v6  ;;  %v3931_v6 = vunpack.c.l.bf16 %v8052_v45 }
 0x474   :  { %v12557_v60 = vpop.f32.mrf.mxu1  ;;  %4139 = vmatmul.mubr.f32.gmra.mxu1 %v3906_v53 }
 0x475   :  { %4143 = vmatprep.mubr.f32.mxu1 %v3912_v41  ;;  %v3927_v41 = vunpack.c.h.bf16 %v8049_v29  ;;  %v3936_v29 = vunpack.c.l.bf16 %v8055_v12 }
 0x476   :  { %v3114_v57 = vpop.f32.mrf.mxu1 }
 0x478   :  { %v12562_v62 = vpop.f32.mrf.mxu1  ;;  %4144 = vmatmul.mubr.f32.gmra.mxu1 %v3911_v36 }
 0x479   :  { %4148 = vmatprep.mubr.f32.mxu1 %v3917_v19  ;;  %v3932_v19 = vunpack.c.h.bf16 %v8052_v45  ;;  %v3941_v45 = vunpack.c.l.bf16 %v8058_v34  ;;  %v3288_v55 = vadd.f32 %v12324_v17, %v12562_v62 }
 0x47a   :  { %v3119_v52 = vpop.f32.mrf.mxu1 }
 0x47c   :  { %v12567_v53 = vpop.f32.mrf.mxu1  ;;  %4149 = vmatmul.mubr.f32.gmra.mxu1 %v3916_v24 }
 0x47d   :  { %4153 = vmatprep.mubr.f32.mxu1 %v3922_v30  ;;  %v3937_v30 = vunpack.c.h.bf16 %v8055_v12  ;;  %v3946_v12 = vunpack.c.l.bf16 %v8061_v16  ;;  %v3293_v17 = vadd.f32 %v12342_v35, %v12567_v53 }
 0x47e   :  { %v3124_v57 = vpop.f32.mrf.mxu1 }
 0x480   :  { %v12572_v36 = vpop.f32.mrf.mxu1  ;;  %4154 = vmatmul.mubr.f32.gmra.mxu1 %v3921_v38 }
 0x481   :  { %4158 = vmatprep.mubr.f32.mxu1 %v3927_v41  ;;  %v3942_v41 = vunpack.c.h.bf16 %v8058_v34  ;;  %v3951_v34 = vunpack.c.l.bf16 %v8064_v40  ;;  %v3298_v35 = vadd.f32 %v12353_v54, %v12572_v36 }
 0x482   :  { %v3129_v52 = vpop.f32.mrf.mxu1 }
 0x484   :  { %v12577_v24 = vpop.f32.mrf.mxu1  ;;  %4159 = vmatmul.mubr.f32.gmra.mxu1 %v3926_v2 }
 0x485   :  { %4163 = vmatprep.mubr.f32.mxu1 %v3932_v19  ;;  %v3947_v19 = vunpack.c.h.bf16 %v8061_v16  ;;  %v3956_v16 = vunpack.c.l.bf16 %v8067_v28  ;;  %v3303_v54 = vadd.f32 %v12367_v23, %v12577_v24  ;;  %v14818_v24 = vld [vmem:[#allocation37_spill] sm:$0xff] }
 0x486   :  { %v3134_v57 = vpop.f32.mrf.mxu1 }
 0x488   :  { %v12582_v38 = vpop.f32.mrf.mxu1  ;;  %4164 = vmatmul.mubr.f32.gmra.mxu1 %v3931_v6 }
 0x489   :  { %4168 = vmatprep.mubr.f32.mxu1 %v3937_v30  ;;  %v3952_v30 = vunpack.c.h.bf16 %v8064_v40  ;;  %v3961_v40 = vunpack.c.l.bf16 %v8070_v51  ;;  %v3308_v23 = vadd.f32 %v12378_v33, %v12582_v38  ;;  %v14820_v38 = vld [vmem:[#allocation39_spill] sm:$0xff] }
 0x48a   :  { %v3139_v52 = vpop.f32.mrf.mxu1 }
 0x48c   :  { %v12587_v2 = vpop.f32.mrf.mxu1  ;;  %4169 = vmatmul.mubr.f32.gmra.mxu1 %v3936_v29 }
 0x48d   :  { %4173 = vmatprep.mubr.f32.mxu1 %v3942_v41  ;;  %v3957_v41 = vunpack.c.h.bf16 %v8067_v28  ;;  %v3966_v28 = vunpack.c.l.bf16 %v8073_v61  ;;  %v3313_v33 = vadd.f32 %v12392_v49, %v12587_v2  ;;  %v8063_v49 = vld [vmem:[%s14452_s2 + $0x614] ss:$20 sps:$4 sm:$0xff]  }
 0x48e   :  { %v3144_v57 = vpop.f32.mrf.mxu1 }
 0x490   :  { %v12592_v6 = vpop.f32.mrf.mxu1  ;;  %4174 = vmatmul.mubr.f32.gmra.mxu1 %v3941_v45 }
 0x491   :  { %4178 = vmatprep.mubr.f32.mxu1 %v3947_v19  ;;  %v3962_v19 = vunpack.c.h.bf16 %v8070_v51  ;;  %v3971_v51 = vunpack.c.l.bf16 %v8076_v50  ;;  %v3318_v2 = vadd.f32 %v12403_v13, %v12592_v6  ;;  %v14824_v6 = vld [vmem:[#allocation43_spill] sm:$0xff] }
 0x492   :  { %v3149_v52 = vpop.f32.mrf.mxu1 }
 0x494   :  { %v12597_v29 = vpop.f32.mrf.mxu1  ;;  %4179 = vmatmul.mubr.f32.gmra.mxu1 %v3946_v12 }
 0x495   :  { %4183 = vmatprep.mubr.f32.mxu1 %v3952_v30  ;;  %v3967_v30 = vunpack.c.h.bf16 %v8073_v61  ;;  %v8021_v61 = vld [vmem:[%s14452_s2 + $0x4fc] ss:$20 sps:$4 sm:$0xff]   ;;  %v3323_v13 = vadd.f32 %v12417_v39, %v12597_v29 }
 0x496   :  { %v3154_v57 = vpop.f32.mrf.mxu1  ;;  %v8069_v39 = vld [vmem:[%s14452_s2 + $0x63c] ss:$20 sps:$4 sm:$0xff]  }
 0x498   :  { %v12602_v45 = vpop.f32.mrf.mxu1  ;;  %4184 = vmatmul.mubr.f32.gmra.mxu1 %v3951_v34 }
 0x499   :  { %4188 = vmatprep.mubr.f32.mxu1 %v3957_v41  ;;  %v3972_v41 = vunpack.c.h.bf16 %v8076_v50  ;;  %v3328_v29 = vadd.f32 %v12428_v43, %v12602_v45  ;;  %v14828_v45 = vld [vmem:[#allocation47_spill] sm:$0xff] }
 0x49a   :  { %v3159_v52 = vpop.f32.mrf.mxu1 }
 0x49c   :  { %v12607_v12 = vpop.f32.mrf.mxu1  ;;  %4189 = vmatmul.mubr.f32.gmra.mxu1 %v3956_v16 }
 0x49d   :  { %4193 = vmatprep.mubr.f32.mxu1 %v3962_v19  ;;  %v3977_v19 = vunpack.c.h.bf16 %v8079_v42  ;;  %v8027_v42 = vld [vmem:[%s14452_s2 + $0x524] ss:$20 sps:$4 sm:$0xff]   ;;  %v3333_v43 = vadd.f32 %v12442_v0, %v12607_v12 }
 0x49e   :  { %v3164_v57 = vpop.f32.mrf.mxu1  ;;  %v8075_v0 = vld [vmem:[%s14452_s2 + $0x664] ss:$20 sps:$4 sm:$0xff]  }
 0x4a0   :  { %v12612_v34 = vpop.f32.mrf.mxu1  ;;  %4194 = vmatmul.mubr.f32.gmra.mxu1 %v3961_v40 }
 0x4a1   :  { %4198 = vmatprep.mubr.f32.mxu1 %v3967_v30  ;;  %v3338_v12 = vadd.f32 %v12453_v20, %v12612_v34  ;;  %v14832_v34 = vld [vmem:[#allocation51_spill] sm:$0xff] }
 0x4a2   :  { %v3169_v52 = vpop.f32.mrf.mxu1 }
 0x4a3   :  { %v3880_v52 = vunpack.c.l.bf16 %v8021_v61 }
 0x4a4   :  { %v12617_v16 = vpop.f32.mrf.mxu1  ;;  %4199 = vmatmul.mubr.f32.gmra.mxu1 %v3966_v28 }
 0x4a5   :  { %4203 = vmatprep.mubr.f32.mxu1 %v3972_v41  ;;  %v3885_v41 = vunpack.c.h.bf16 %v8021_v61  ;;  %v3895_v61 = vunpack.c.h.bf16 %v8027_v42  ;;  %v3343_v20 = vadd.f32 %v12463_v56, %v12617_v16  ;;  %v8081_v56 = vld [vmem:[%s14452_s2 + $0x68c] sm:$0x1] }
 0x4a6   :  { %v3174_v57 = vpop.f32.mrf.mxu1 }
 0x4a8   :  { %v12619_v7 = vpop.f32.mrf.mxu1  ;;  %4204 = vmatmul.mubr.f32.gmra.mxu1 %v3971_v51 }
 0x4a9   :  { %4208 = vmatprep.mubr.f32.mxu1 %v3977_v19  ;;  %v3348_v16 = vadd.f32 %v12470_v46, %v12619_v7  ;;  %v14836_v46 = vld [vmem:[#allocation55_spill] sm:$0xff] }
 0x4aa   :  { %v3179_v40 = vpop.f32.mrf.mxu1 }
 0x4ac   :  { %v12624_v30 = vpop.f32.mrf.mxu1  ;;  %4209 = vmatmul.mubr.f32.gmra.mxu1 %v3976_v5  ;;  %v3890_v5 = vunpack.c.l.bf16 %v8027_v42 }
 0x4ad   :  { %9431 = vmatprep.mubr.msk.f32.mxu1 %vm9981_vm1, %v14630_v59  ;;  %v3353_v7 = vadd.f32 %v12483_v4, %v12624_v30  ;;  %v14838_v30 = vld [vmem:[#allocation57_spill] sm:$0xff] }
 0x4ae   :  { %v3184_v50 = vpop.f32.mrf.mxu1 }
 0x4b0   :  { %v12628_v28 = vpop.f32.mrf.mxu1  ;;  %9432 = vmatmul.mubr.msk.f32.vlgmr.msra.gmra.mxu1 %vm1024_vm4, %v3880_v52  ;;  %v8033_v52 = vld [vmem:[%s14452_s2 + $0x54c] ss:$20 sps:$4 sm:$0xff]  }
 0x4b1   :  { %9434 = vmatprep.mubr.msk.f32.mxu1 %vm9981_vm1, %v14630_v59  ;;  %v3905_v42 = vunpack.c.h.bf16 %v8033_v52  ;;  %v3358_v4 = vadd.f32 %v12493_v10, %v12628_v28  ;;  %v14840_v10 = vld [vmem:[#allocation59_spill] sm:$0xff] }
 0x4b2   :  { %v3189_v51 = vpop.f32.mrf.mxu1 }
 0x4b4   :  { %v12636_v19 = vpop.f32.mrf.mxu1  ;;  %9435 = vmatmul.mubr.msk.f32.gmra.mxu1 %vm1024_vm4, %v3885_v41  ;;  %v3900_v41 = vunpack.c.l.bf16 %v8033_v52  ;;  %v3283_v52 = vadd.f32 %v12313_v18, %v12557_v60 }
 0x4b5   :  { %9437 = vmatprep.mubr.msk.f32.mxu1 %vm9981_vm1, %v14630_v59 }
 0x4b6   :  { %v3194_v57 = vpop.f32.mrf.mxu1 }
 0x4b8   :  { %v12641_v40 = vpop.f32.mrf.mxu1  ;;  %9438 = vmatmul.mubr.msk.f32.gmra.mxu1 %vm1024_vm4, %v3890_v5  ;;  %v8039_v5 = vld [vmem:[%s14452_s2 + $0x574] ss:$20 sps:$4 sm:$0xff]  }
 0x4b9   :  { %9440 = vmatprep.mubr.msk.f32.mxu1 %vm9981_vm1, %v14630_v59 }
 0x4ba   :  { %v3199_v50 = vpop.f32.mrf.mxu1 }
 0x4bc   :  { %v12649_v51 = vpop.f32.mrf.mxu1  ;;  %9441 = vmatmul.mubr.msk.f32.gmra.mxu1 %vm1024_vm4, %v3895_v61  ;;  %v3910_v61 = vunpack.c.l.bf16 %v8039_v5 }
 0x4bd   :  { %9443 = vmatprep.mubr.msk.f32.mxu1 %vm9981_vm1, %v14630_v59 }
 0x4be   :  { %v3204_v57 = vpop.f32.mrf.mxu1 }
 0x4c0   :  { %v12654_v14 = vpop.f32.mrf.mxu1  ;;  %9444 = vmatmul.mubr.msk.f32.gmra.mxu1 %vm1024_vm4, %v3900_v41 }
 0x4c1   :  { %9446 = vmatprep.mubr.msk.f32.mxu1 %vm9981_vm1, %v14630_v59 }
 0x4c2   :  { %v3209_v50 = vpop.f32.mrf.mxu1 }
 0x4c3   :  { %v3915_v50 = vunpack.c.h.bf16 %v8039_v5 }
 0x4c4   :  { %v12662_v8 = vpop.f32.mrf.mxu1  ;;  %9447 = vmatmul.mubr.msk.f32.gmra.mxu1 %vm1024_vm4, %v3905_v42  ;;  %v8045_v42 = vld [vmem:[%s14452_s2 + $0x59c] ss:$20 sps:$4 sm:$0xff]  }
 0x4c5   :  { %9449 = vmatprep.mubr.msk.f32.mxu1 %vm9981_vm1, %v14630_v59 }
 0x4c6   :  { %v3214_v57 = vpop.f32.mrf.mxu1 }
 0x4c8   :  { %v3452_v41 = vpop.f32.mrf.mxu1  ;;  %9450 = vmatmul.mubr.msk.f32.gmra.mxu1 %vm1024_vm4, %v3910_v61 }
 0x4c9   :  { %v3453_v22 = vadd.f32 %v3452_v41, %v3283_v52  ;;  %9452 = vmatprep.mubr.msk.f32.mxu1 %vm9981_vm1, %v14630_v59 }
 0x4ca   :  { %v9287_v9 = vpop.f32.mrf.mxu1 }
 0x4cb   :  { %9351 = vmatmul.mubr.msk.f32.vlgmr.msra.gmra.mxu0 %vm2347_vm5, %v3453_v22  ;;  %v3920_v9 = vunpack.c.l.bf16 %v8045_v42 }
 0x4cc   :  { %4215 = vmatpush1.msra.mxu0 %v10827_v15  ;;  %v3457_v18 = vpop.f32.mrf.mxu1  ;;  %9353 = vmatprep.mubr.msk.f32.mxu0 %vm9981_vm1, %v14630_v59 }
 0x4cd   :  { %v3458_v60 = vadd.f32 %v3457_v18, %v3288_v55  ;;  %4216 = vmatprep.subr.mxu0 %v14630_v59  ;;  %9453 = vmatmul.mubr.msk.f32.gmra.mxu1 %vm1024_vm4, %v3915_v50  ;;  %v14819_v50 = vld [vmem:[#allocation38_spill] sm:$0xff] }
 0x4ce   :  { %4217 = vmatpush1.msra.mxu0 %v10829_v26  ;;  %v9290_v5 = vpop.f32.mrf.mxu1  ;;  %9455 = vmatprep.mubr.msk.f32.mxu1 %vm9981_vm1, %v14630_v59  ;;  %v3925_v26 = vunpack.c.h.bf16 %v8045_v42 }
 0x4cf   :  { %4218 = vmatprep.subr.mxu0 %v14630_v59  ;;  %9354 = vmatmul.mubr.msk.f32.gmra.mxu0 %vm2347_vm5, %v3458_v60  ;;  %v14821_v5 = vld [vmem:[#allocation40_spill] sm:$0xff] }
 0x4d0   :  { %4219 = vmatpush1.msra.mxu0 %v10838_v37  ;;  %v3462_v15 = vpop.f32.mrf.mxu1  ;;  %9356 = vmatprep.mubr.msk.f32.mxu0 %vm9981_vm1, %v14630_v59  ;;  %v8051_v37 = vld [vmem:[%s14452_s2 + $0x5c4] ss:$20 sps:$4 sm:$0xff]  }
 0x4d1   :  { %v3463_v55 = vadd.f32 %v3462_v15, %v3293_v17  ;;  %4220 = vmatprep.subr.mxu0 %v14630_v59  ;;  %9456 = vmatmul.mubr.msk.f32.gmra.mxu1 %vm1024_vm4, %v3920_v9  ;;  %v3930_v53 = vunpack.c.l.bf16 %v8051_v37  ;;  %v14822_v15 = vld [vmem:[#allocation41_spill] sm:$0xff] }
 0x4d2   :  { %4221 = vmatpush1.msra.mxu0 %v10842_v58  ;;  %v9293_v22 = vpop.f32.mrf.mxu1  ;;  %9458 = vmatprep.mubr.msk.f32.mxu1 %vm9981_vm1, %v14630_v59 }
 0x4d3   :  { %4222 = vmatprep.subr.mxu0 %v14630_v59  ;;  %9357 = vmatmul.mubr.msk.f32.gmra.mxu0 %vm2347_vm5, %v3463_v55  ;;  %v3950_v22 = vunpack.c.l.bf16 %v8063_v49 }
 0x4d4   :  { %4223 = vmatpush1.msra.mxu0 %v10851_v48  ;;  %v3467_v62 = vpop.f32.mrf.mxu1  ;;  %9359 = vmatprep.mubr.msk.f32.mxu0 %vm9981_vm1, %v14630_v59 }
 0x4d5   :  { %v3468_v58 = vadd.f32 %v3467_v62, %v3298_v35  ;;  %4224 = vmatprep.subr.mxu0 %v14630_v59  ;;  %9459 = vmatmul.mubr.msk.f32.gmra.mxu1 %vm1024_vm4, %v3925_v26 }
 0x4d6   :  { %4225 = vmatpush1.msra.mxu0 %v10856_v21  ;;  %v9296_v61 = vpop.f32.mrf.mxu1  ;;  %9461 = vmatprep.mubr.msk.f32.mxu1 %vm9981_vm1, %v14630_v59  ;;  %v3935_v21 = vunpack.c.h.bf16 %v8051_v37  ;;  %v14823_v37 = vld [vmem:[#allocation42_spill] sm:$0xff] }
 0x4d7   :  { %4226 = vmatprep.subr.mxu0 %v14630_v59  ;;  %9360 = vmatmul.mubr.msk.f32.gmra.mxu0 %vm2347_vm5, %v3468_v58  ;;  %v14825_v61 = vld [vmem:[#allocation44_spill] sm:$0xff] }
 0x4d8   :  { %4227 = vmatpush1.msra.mxu0 %v10866_v25  ;;  %v3472_v48 = vpop.f32.mrf.mxu1  ;;  %9362 = vmatprep.mubr.msk.f32.mxu0 %vm9981_vm1, %v14630_v59  ;;  %v8057_v25 = vld [vmem:[%s14452_s2 + $0x5ec] ss:$20 sps:$4 sm:$0xff]  }
 0x4d9   :  { %v3473_v36 = vadd.f32 %v3472_v48, %v3303_v54  ;;  %4228 = vmatprep.subr.mxu0 %v14630_v59  ;;  %9462 = vmatmul.mubr.msk.f32.gmra.mxu1 %vm1024_vm4, %v3930_v53  ;;  %v3940_v41 = vunpack.c.l.bf16 %v8057_v25  ;;  %v3945_v9 = vunpack.c.h.bf16 %v8057_v25  ;;  %v3955_v53 = vunpack.c.h.bf16 %v8063_v49  ;;  %v14826_v48 = vld [vmem:[#allocation45_spill] sm:$0xff]  ;;  %v14827_v25 = vld [vmem:[#allocation46_spill] sm:$0xff] }
 0x4da   :  { %4229 = vmatpush1.msra.mxu0 %v10871_v32  ;;  %v9299_v57 = vpop.f32.mrf.mxu1  ;;  %9464 = vmatprep.mubr.msk.f32.mxu1 %vm9981_vm1, %v14630_v59  ;;  %v3975_v49 = vunpack.c.h.bf16 %v8075_v0 }
 0x4db   :  { %4230 = vmatprep.subr.mxu0 %v14630_v59  ;;  %9363 = vmatmul.mubr.msk.f32.gmra.mxu0 %vm2347_vm5, %v3473_v36  ;;  %v3960_v57 = vunpack.c.l.bf16 %v8069_v39 }
 0x4dc   :  { %4231 = vmatpush1.msra.mxu0 %v14818_v24  ;;  %v3477_v52 = vpop.f32.mrf.mxu1  ;;  %9365 = vmatprep.mubr.msk.f32.mxu0 %vm9981_vm1, %v14630_v59 }
 0x4dd   :  { %v3478_v32 = vadd.f32 %v3477_v52, %v3308_v23  ;;  %4232 = vmatprep.subr.mxu0 %v14630_v59  ;;  %9465 = vmatmul.mubr.msk.f32.gmra.mxu1 %vm1024_vm4, %v3935_v21 }
 0x4de   :  { %4233 = vmatpush1.msra.mxu0 %v14819_v50  ;;  %v9302_v42 = vpop.f32.mrf.mxu1  ;;  %9467 = vmatprep.mubr.msk.f32.mxu1 %vm9981_vm1, %v14630_v59 }
 0x4df   :  { %4234 = vmatprep.subr.mxu0 %v14630_v59  ;;  %9366 = vmatmul.mubr.msk.f32.gmra.mxu0 %vm2347_vm5, %v3478_v32  ;;  %v3965_v32 = vunpack.c.h.bf16 %v8069_v39  ;;  %v14830_v42 = vld [vmem:[#allocation49_spill] sm:$0xff]  ;;  %v14839_v39 = vld [vmem:[#allocation58_spill] sm:$0xff] }
 0x4e0   :  { %4235 = vmatpush1.msra.mxu0 %v14820_v38  ;;  %v3482_v18 = vpop.f32.mrf.mxu1  ;;  %9368 = vmatprep.mubr.msk.f32.mxu0 %vm9981_vm1, %v14630_v59 }
 0x4e1   :  { %v3483_v60 = vadd.f32 %v3482_v18, %v3313_v33  ;;  %4236 = vmatprep.subr.mxu0 %v14630_v59  ;;  %9468 = vmatmul.mubr.msk.f32.gmra.mxu1 %vm1024_vm4, %v3940_v41  ;;  %v14829_v41 = vld [vmem:[#allocation48_spill] sm:$0xff]  ;;  %v3970_v18 = vunpack.c.l.bf16 %v8075_v0  ;;  %v8023_v0 = vld [vmem:[%s14452_s2 + $0x508] sm:$0xff] }
 0x4e2   :  { %4237 = vmatpush1.msra.mxu0 %v14821_v5  ;;  %v9305_v17 = vpop.f32.mrf.mxu1  ;;  %9470 = vmatprep.mubr.msk.f32.mxu1 %vm9981_vm1, %v14630_v59 }
 0x4e3   :  { %4238 = vmatprep.subr.mxu0 %v14630_v59  ;;  %9369 = vmatmul.mubr.msk.f32.gmra.mxu0 %vm2347_vm5, %v3483_v60  ;;  %v14831_v60 = vld [vmem:[#allocation50_spill] sm:$0xff] }
 0x4e4   :  { %4239 = vmatpush1.msra.mxu0 %v14822_v15  ;;  %v3487_v55 = vpop.f32.mrf.mxu1  ;;  %9371 = vmatprep.mubr.msk.f32.mxu0 %vm9981_vm1, %v14630_v59 }
 0x4e5   :  { %v3488_v26 = vadd.f32 %v3487_v55, %v3318_v2  ;;  %4240 = vmatprep.subr.mxu0 %v14630_v59  ;;  %9471 = vmatmul.mubr.msk.f32.gmra.mxu1 %vm1024_vm4, %v3945_v9  ;;  %v14833_v2 = vld [vmem:[#allocation52_spill] sm:$0xff]  ;;  %v14834_v55 = vld [vmem:[#allocation53_spill] sm:$0xff] }
 0x4e6   :  { %4241 = vmatpush1.msra.mxu0 %v14823_v37  ;;  %v9308_v35 = vpop.f32.mrf.mxu1  ;;  %9473 = vmatprep.mubr.msk.f32.mxu1 %vm9981_vm1, %v14630_v59  ;;  %v3980_v37 = vunpack.c.l.bf16 %v8081_v56 }
 0x4e7   :  { %4242 = vmatprep.subr.mxu0 %v14630_v59  ;;  %9372 = vmatmul.mubr.msk.f32.gmra.mxu0 %vm2347_vm5, %v3488_v26  ;;  %v14835_v35 = vld [vmem:[#allocation54_spill] sm:$0xff] }
 0x4e8   :  { %4243 = vmatpush1.msra.mxu0 %v14824_v6  ;;  %v3492_v62 = vpop.f32.mrf.mxu1  ;;  %9374 = vmatprep.mubr.msk.f32.mxu0 %vm9981_vm1, %v14630_v59 }
 0x4e9   :  { %v3493_v58 = vadd.f32 %v3492_v62, %v3323_v13  ;;  %4244 = vmatprep.subr.mxu0 %v14630_v59  ;;  %9474 = vmatmul.mubr.msk.f32.gmra.mxu1 %vm1024_vm4, %v3950_v22 }
 0x4ea   :  { %4245 = vmatpush1.msra.mxu0 %v14825_v61  ;;  %v9311_v54 = vpop.f32.mrf.mxu1  ;;  %9476 = vmatprep.mubr.msk.f32.mxu1 %vm9981_vm1, %v14630_v59 }
 0x4eb   :  { %4246 = vmatprep.subr.mxu0 %v14630_v59  ;;  %9375 = vmatmul.mubr.msk.f32.gmra.mxu0 %vm2347_vm5, %v3493_v58  ;;  %v14837_v58 = vld [vmem:[#allocation56_spill] sm:$0xff] }
 0x4ec   :  { %4247 = vmatpush2.msra.mxu0 %v14826_v48  ;;  %v3497_v36 = vpop.f32.mrf.mxu1  ;;  %9377 = vmatprep.mubr.msk.f32.mxu0 %vm9981_vm1, %v14630_v59  ;;  %v3363_v48 = vadd.f32 %v12500_v27, %v12636_v19 }
 0x4ed   :  { %v3498_v21 = vadd.f32 %v3497_v36, %v3328_v29  ;;  %4248 = vmatprep.subr.mxu0 %v14630_v59  ;;  %9477 = vmatmul.mubr.msk.f32.gmra.mxu1 %vm1024_vm4, %v3955_v53 }
 0x4ee   :  { %4249 = vmatpush2.msra.mxu0 %v14827_v25  ;;  %v9314_v23 = vpop.f32.mrf.mxu1  ;;  %9479 = vmatprep.mubr.msk.f32.mxu1 %vm9981_vm1, %v14630_v59  ;;  %v3368_v25 = vadd.f32 %v12512_v63, %v12641_v40 }
 0x4ef   :  { %4250 = vmatprep.subr.mxu0 %v14630_v59  ;;  %9378 = vmatmul.mubr.msk.f32.gmra.mxu0 %vm2347_vm5, %v3498_v21  ;;  %v14841_v21 = vld [vmem:[#allocation60_spill] sm:$0xff] }
 0x4f0   :  { %4251 = vmatpush2.msra.mxu0 %v14828_v45  ;;  %v3502_v24 = vpop.f32.mrf.mxu1  ;;  %9380 = vmatprep.mubr.msk.f32.mxu0 %vm9981_vm1, %v14630_v59 }
 0x4f1   :  { %v3503_v52 = vadd.f32 %v3502_v24, %v3333_v43  ;;  %4252 = vmatprep.subr.mxu0 %v14630_v59  ;;  %9480 = vmatmul.mubr.msk.f32.gmra.mxu1 %vm1024_vm4, %v3960_v57  ;;  %v3373_v43 = vadd.f32 %v12523_v47, %v12649_v51  ;;  %v3378_v24 = vadd.f32 %v12534_v3, %v12654_v14  ;;  %v8020_v47 = vld [vmem:[%s14452_s2 + $0x4f4] sm:$0xff] }
 0x4f2   :  { %4253 = vmatpush2.msra.mxu0 %v14829_v41  ;;  %v9317_v50 = vpop.f32.mrf.mxu1  ;;  %9482 = vmatprep.mubr.msk.f32.mxu1 %vm9981_vm1, %v14630_v59  ;;  %v3383_v41 = vadd.f32 %v12545_v1, %v12662_v8  ;;  %v3879_v14 = vunpack.c.h.bf16 %v8020_v47  ;;  %v8026_v8 = vld [vmem:[%s14452_s2 + $0x51c] sm:$0xff] }
 0x4f3   :  { %4254 = vmatprep.subr.mxu0 %v14630_v59  ;;  %9381 = vmatmul.mubr.msk.f32.gmra.mxu0 %vm2347_vm5, %v3503_v52 }
 0x4f4   :  { %4255 = vmatpush2.msra.mxu0 %v14830_v42  ;;  %v3507_v33 = vpop.f32.mrf.mxu1  ;;  %9383 = vmatprep.mubr.msk.f32.mxu0 %vm9981_vm1, %v14630_v59  ;;  %v3878_v42 = vunpack.c.l.bf16 %v8020_v47 }
 0x4f5   :  { %v3508_v38 = vadd.f32 %v3507_v33, %v3338_v12  ;;  %4256 = vmatprep.subr.mxu0 %v14630_v59  ;;  %9483 = vmatmul.mubr.msk.f32.gmra.mxu1 %vm1024_vm4, %v3965_v32  ;;  %v3884_v33 = vunpack.c.h.bf16 %v8023_v0 }
 0x4f6   :  { %4257 = vmatpush2.msra.mxu0 %v14831_v60  ;;  %v9320_v9 = vpop.f32.mrf.mxu1  ;;  %9485 = vmatprep.mubr.msk.f32.mxu1 %vm9981_vm1, %v14630_v59  ;;  %v3889_v60 = vunpack.c.h.bf16 %v8026_v8 }
 0x4f7   :  { %4258 = vmatprep.subr.mxu0 %v14630_v59  ;;  %9384 = vmatmul.mubr.msk.f32.gmra.mxu0 %vm2347_vm5, %v3508_v38 }
 0x4f8   :  { %4259 = vmatpush2.msra.mxu0 %v14832_v34  ;;  %v3512_v5 = vpop.f32.mrf.mxu1  ;;  %9386 = vmatprep.mubr.msk.f32.mxu0 %vm9981_vm1, %v14630_v59 }
 0x4f9   :  { %v3513_v17 = vadd.f32 %v3512_v5, %v3343_v20  ;;  %4260 = vmatprep.subr.mxu0 %v14630_v59  ;;  %9486 = vmatmul.mubr.msk.f32.gmra.mxu1 %vm1024_vm4, %v3970_v18  ;;  %v3883_v18 = vunpack.c.l.bf16 %v8023_v0  ;;  %v8029_v20 = vld [vmem:[%s14452_s2 + $0x530] sm:$0xff]  ;;  %v3888_v5 = vunpack.c.l.bf16 %v8026_v8 }
 0x4fa   :  { %4261 = vmatpush2.msra.mxu0 %v14833_v2  ;;  %v9323_v15 = vpop.f32.mrf.mxu1  ;;  %9488 = vmatprep.mubr.msk.f32.mxu1 %vm9981_vm1, %v14630_v59  ;;  %v8032_v2 = vld [vmem:[%s14452_s2 + $0x544] sm:$0xff]  ;;  %v3893_v56 = vunpack.c.l.bf16 %v8029_v20 }
 0x4fb   :  { %4262 = vmatprep.subr.mxu0 %v14630_v59  ;;  %9387 = vmatmul.mubr.msk.f32.gmra.mxu0 %vm2347_vm5, %v3513_v17  ;;  %v3894_v17 = vunpack.c.h.bf16 %v8029_v20 }
 0x4fc   :  { %4263 = vmatpush2.msra.mxu0 %v14834_v55  ;;  %v3517_v26 = vpop.f32.mrf.mxu1  ;;  %9389 = vmatprep.mubr.msk.f32.mxu0 %vm9981_vm1, %v14630_v59 }
 0x4fd   :  { %v3518_v22 = vadd.f32 %v3517_v26, %v3348_v16  ;;  %4264 = vmatprep.subr.mxu0 %v14630_v59  ;;  %9489 = vmatmul.mubr.msk.f32.gmra.mxu1 %vm1024_vm4, %v3975_v49  ;;  %v3899_v16 = vunpack.c.h.bf16 %v8032_v2  ;;  %v8035_v26 = vld [vmem:[%s14452_s2 + $0x558] sm:$0xff] }
 0x4fe   :  { %4265 = vmatpush2.msra.mxu0 %v14835_v35  ;;  %v9326_v13 = vpop.f32.mrf.mxu1  ;;  %9491 = vmatprep.mubr.msk.f32.mxu1 %vm9981_vm1, %v14630_v59  ;;  %v3904_v35 = vunpack.c.h.bf16 %v8035_v26 }
 0x4ff   :  { %4266 = vmatprep.subr.mxu0 %v14630_v59  ;;  %9390 = vmatmul.mubr.msk.f32.gmra.mxu0 %vm2347_vm5, %v3518_v22 }
 0x500   :  { %4267 = vmatpush2.msra.mxu0 %v14836_v46  ;;  %v3522_v6 = vpop.f32.mrf.mxu1  ;;  %9392 = vmatprep.mubr.msk.f32.mxu0 %vm9981_vm1, %v14630_v59 }
 0x501   :  { %v3523_v62 = vadd.f32 %v3522_v6, %v3353_v7  ;;  %4268 = vmatprep.subr.mxu0 %v14630_v59  ;;  %9492 = vmatmul.mubr.msk.f32.gmra.mxu1 %vm1024_vm4, %v3980_v37  ;;  %v3898_v37 = vunpack.c.l.bf16 %v8032_v2  ;;  %v8038_v7 = vld [vmem:[%s14452_s2 + $0x56c] sm:$0xff]  ;;  %v3903_v6 = vunpack.c.l.bf16 %v8035_v26  ;;  %v8068_v26 = vld [vmem:[%s14452_s2 + $0x634] sm:$0xff] }
 0x502   :  { %4269 = vmatpush2.msra.mxu0 %v14837_v58  ;;  %v9329_v53 = vpop.f32.mrf.mxu1 }
 0x503   :  { %4270 = vmatprep.subr.mxu0 %v14630_v59  ;;  %9393 = vmatmul.mubr.msk.f32.gmra.mxu0 %vm2347_vm5, %v3523_v62  ;;  %v3909_v62 = vunpack.c.h.bf16 %v8038_v7  ;;  %v8041_v53 = vld [vmem:[%s14452_s2 + $0x580] sm:$0xff] }
 0x504   :  { %4271 = vmatpush2.msra.mxu0 %v14838_v30  ;;  %v3527_v61 = vpop.f32.mrf.mxu1  ;;  %9395 = vmatprep.mubr.msk.f32.mxu0 %vm9981_vm1, %v14630_v59  ;;  %v3908_v30 = vunpack.c.l.bf16 %v8038_v7 }
 0x505   :  { %v3528_v54 = vadd.f32 %v3527_v61, %v3358_v4  ;;  %4272 = vmatprep.subr.mxu0 %v14630_v59  ;;  %v3914_v61 = vunpack.c.h.bf16 %v8041_v53 }
 0x506   :  { %4273 = vmatpush2.msra.mxu0 %v14839_v39  ;;  %v9332_v29 = vpop.f32.mrf.mxu1  ;;  %v8044_v39 = vld [vmem:[%s14452_s2 + $0x594] sm:$0xff] }
 0x507   :  { %4274 = vmatprep.subr.mxu0 %v14630_v59  ;;  %9396 = vmatmul.mubr.msk.f32.gmra.mxu0 %vm2347_vm5, %v3528_v54 }
 0x508   :  { %4275 = vmatpush2.msra.mxu0 %v14840_v10  ;;  %v3532_v28 = vpop.f32.mrf.mxu1  ;;  %9398 = vmatprep.mubr.msk.f32.mxu0 %vm9981_vm1, %v14630_v59  ;;  %v3919_v10 = vunpack.c.h.bf16 %v8044_v39 }
 0x509   :  { %v3533_v36 = vadd.f32 %v3532_v28, %v3363_v48  ;;  %4276 = vmatprep.subr.mxu0 %v14630_v59  ;;  %v3913_v48 = vunpack.c.l.bf16 %v8041_v53 }
 0x50a   :  { %4277 = vmatpush2.msra.mxu0 %v14841_v21  ;;  %v9335_v57 = vpop.f32.mrf.mxu1  ;;  %v8104_v21 = vld [vmem:[%s14453_s3 + $0x18] sm:$0xff] }
 0x50b   :  { %9399 = vmatmul.mubr.msk.f32.gmra.mxu0 %vm2347_vm5, %v3533_v36  ;;  %9494 = vmatprep.subr.mxu0 %v14630_v59  ;;  %v8047_v36 = vld [vmem:[%s14452_s2 + $0x5a8] sm:$0xff] }
 0x50c   :  { %v3537_v27 = vpop.f32.mrf.mxu1  ;;  %9401 = vmatprep.mubr.msk.f32.mxu0 %vm9981_vm1, %v14630_v59 }
 0x50d   :  { %v3538_v19 = vadd.f32 %v3537_v27, %v3368_v25  ;;  %v3918_v25 = vunpack.c.l.bf16 %v8044_v39  ;;  %v3924_v27 = vunpack.c.h.bf16 %v8047_v36 }
 0x50e   :  { %v9338_v23 = vpop.f32.mrf.mxu1 }
 0x50f   :  { %9402 = vmatmul.mubr.msk.f32.gmra.mxu0 %vm2347_vm5, %v3538_v19  ;;  %v8050_v23 = vld [vmem:[%s14452_s2 + $0x5bc] sm:$0xff] }
 0x510   :  { %v3542_v45 = vpop.f32.mrf.mxu1  ;;  %9404 = vmatprep.mubr.msk.f32.mxu0 %vm9981_vm1, %v14630_v59 }
 0x511   :  { %v3543_v63 = vadd.f32 %v3542_v45, %v3373_v43  ;;  %v3923_v45 = vunpack.c.l.bf16 %v8047_v36 }
 0x512   :  { %v9341_v40 = vpop.f32.mrf.mxu1 }
 0x513   :  { %9405 = vmatmul.mubr.msk.f32.gmra.mxu0 %vm2347_vm5, %v3543_v63  ;;  %v3929_v63 = vunpack.c.h.bf16 %v8050_v23 }
 0x514   :  { %v3547_v52 = vpop.f32.mrf.mxu1  ;;  %9407 = vmatprep.mubr.msk.f32.mxu0 %vm9981_vm1, %v14630_v59 }
 0x515   :  { %v3548_v32 = vadd.f32 %v3547_v52, %v3378_v24  ;;  %v8053_v24 = vld [vmem:[%s14452_s2 + $0x5d0] sm:$0xff] }
 0x516   :  { %v9344_v51 = vpop.f32.mrf.mxu1  ;;  %v3934_v47 = vunpack.c.h.bf16 %v8053_v24 }
 0x517   :  { %9408 = vmatmul.mubr.msk.f32.gmra.mxu0 %vm2347_vm5, %v3548_v32  ;;  %v3928_v32 = vunpack.c.l.bf16 %v8050_v23 }
 0x518   :  { %v3552_v50 = vpop.f32.mrf.mxu1  ;;  %9410 = vmatprep.mubr.msk.f32.mxu0 %vm9981_vm1, %v14630_v59 }
 0x519   :  { %v3553_v3 = vadd.f32 %v3552_v50, %v3383_v41  ;;  %v8056_v41 = vld [vmem:[%s14452_s2 + $0x5e4] sm:$0xff] }
 0x51a   :  { %v9347_v12 = vpop.f32.mrf.mxu1 }
 0x51b   :  { %9411 = vmatmul.mubr.msk.f32.gmra.mxu0 %vm2347_vm5, %v3553_v3  ;;  %v3939_v3 = vunpack.c.h.bf16 %v8056_v41  ;;  %v8059_v12 = vld [vmem:[%s14452_s2 + $0x5f8] sm:$0xff] }
 0x51c   :  { %4278 = vmatprep.mubr.f32.mxu0 %v3879_v14  ;;  %v12904_v38 = vpop.f32.mrf.mxu1  ;;  %v3933_v14 = vunpack.c.l.bf16 %v8053_v24  ;;  %v3944_v8 = vunpack.c.h.bf16 %v8059_v12  ;;  %v3943_v20 = vunpack.c.l.bf16 %v8059_v12 }
 0x51e   :  { %v4112_v1 = vpop.f32.mrf.mxu1 }
 0x51f   :  { %4279 = vmatmul.mubr.f32.vlgmr.msra.gmra.mxu0 %v3878_v42 }
 0x520   :  { %4283 = vmatprep.mubr.f32.mxu0 %v3884_v33  ;;  %v12909_v9 = vpop.f32.mrf.mxu1  ;;  %9495 = vmatpush3.msra.mxu0 %v8104_v21  ;;  %v3938_v33 = vunpack.c.l.bf16 %v8056_v41 }
 0x521   :  { %9559 = vmatprep.subr.mxu0 %v14630_v59 }
 0x522   :  { %v4117_v34 = vpop.f32.mrf.mxu1 }
 0x523   :  { %4284 = vmatmul.mubr.f32.gmra.mxu0 %v3883_v18  ;;  %v8062_v18 = vld [vmem:[%s14452_s2 + $0x60c] sm:$0xff] }
 0x524   :  { %4288 = vmatprep.mubr.f32.mxu0 %v3889_v60  ;;  %v12914_v49 = vpop.f32.mrf.mxu1  ;;  %v3949_v34 = vunpack.c.h.bf16 %v8062_v18 }
 0x526   :  { %v4122_v15 = vpop.f32.mrf.mxu1 }
 0x527   :  { %4289 = vmatmul.mubr.f32.gmra.mxu0 %v3888_v5  ;;  %v3948_v15 = vunpack.c.l.bf16 %v8062_v18 }
 0x528   :  { %4293 = vmatprep.mubr.f32.mxu0 %v3894_v17  ;;  %v12919_v55 = vpop.f32.mrf.mxu1  ;;  %v8065_v17 = vld [vmem:[%s14452_s2 + $0x620] sm:$0xff] }
 0x52a   :  { %v4127_v22 = vpop.f32.mrf.mxu1 }
 0x52b   :  { %4294 = vmatmul.mubr.f32.gmra.mxu0 %v3893_v56  ;;  %v3954_v56 = vunpack.c.h.bf16 %v8065_v17 }
 0x52c   :  { %4298 = vmatprep.mubr.f32.mxu0 %v3899_v16  ;;  %v12924_v13 = vpop.f32.mrf.mxu1 }
 0x52e   :  { %v4132_v46 = vpop.f32.mrf.mxu1 }
 0x52f   :  { %4299 = vmatmul.mubr.f32.gmra.mxu0 %v3898_v37  ;;  %v3953_v37 = vunpack.c.l.bf16 %v8065_v17  ;;  %v8071_v46 = vld [vmem:[%s14452_s2 + $0x648] sm:$0xff] }
 0x530   :  { %4303 = vmatprep.mubr.f32.mxu0 %v3904_v35  ;;  %v12929_v58 = vpop.f32.mrf.mxu1  ;;  %v3959_v35 = vunpack.c.h.bf16 %v8068_v26  ;;  %v3964_v53 = vunpack.c.h.bf16 %v8071_v46  ;;  %v3963_v39 = vunpack.c.l.bf16 %v8071_v46  ;;  %v14843_v46 = vld [vmem:[#allocation71_spill] sm:$0xff] }
 0x532   :  { %v4137_v4 = vpop.f32.mrf.mxu1 }
 0x533   :  { %4304 = vmatmul.mubr.f32.gmra.mxu0 %v3903_v6 }
 0x534   :  { %4308 = vmatprep.mubr.f32.mxu0 %v3909_v62  ;;  %v12934_v54 = vpop.f32.mrf.mxu1  ;;  %v3958_v62 = vunpack.c.l.bf16 %v8068_v26 }
 0x536   :  { %v4142_v29 = vpop.f32.mrf.mxu1 }
 0x537   :  { %4309 = vmatmul.mubr.f32.gmra.mxu0 %v3908_v30  ;;  %v8074_v30 = vld [vmem:[%s14452_s2 + $0x65c] sm:$0xff] }
 0x538   :  { %4313 = vmatprep.mubr.f32.mxu0 %v3914_v61  ;;  %v12939_v28 = vpop.f32.mrf.mxu1  ;;  %v3969_v29 = vunpack.c.h.bf16 %v8074_v30  ;;  %v3968_v21 = vunpack.c.l.bf16 %v8074_v30 }
 0x53a   :  { %v4147_v57 = vpop.f32.mrf.mxu1 }
 0x53b   :  { %4314 = vmatmul.mubr.f32.gmra.mxu0 %v3913_v48 }
 0x53c   :  { %4318 = vmatprep.mubr.f32.mxu0 %v3919_v10  ;;  %v12948_v19 = vpop.f32.mrf.mxu1  ;;  %v8077_v10 = vld [vmem:[%s14452_s2 + $0x670] sm:$0xff] }
 0x53d   :  { %v3974_v57 = vunpack.c.h.bf16 %v8077_v10 }
 0x53e   :  { %v4152_v43 = vpop.f32.mrf.mxu1 }
 0x53f   :  { %4319 = vmatmul.mubr.f32.gmra.mxu0 %v3918_v25  ;;  %v3973_v43 = vunpack.c.l.bf16 %v8077_v10 }
 0x540   :  { %4323 = vmatprep.mubr.f32.mxu0 %v3924_v27  ;;  %v12953_v40 = vpop.f32.mrf.mxu1  ;;  %v8080_v27 = vld [vmem:[%s14452_s2 + $0x684] sm:$0x11] }
 0x542   :  { %v4157_v52 = vpop.f32.mrf.mxu1 }
 0x543   :  { %4324 = vmatmul.mubr.f32.gmra.mxu0 %v3923_v45  ;;  %v3979_v45 = vunpack.c.h.bf16 %v8080_v27  ;;  %v3978_v52 = vunpack.c.l.bf16 %v8080_v27 }
 0x544   :  { %4328 = vmatprep.mubr.f32.mxu0 %v3929_v63  ;;  %v12958_v51 = vpop.f32.mrf.mxu1 }
 0x546   :  { %v4162_v50 = vpop.f32.mrf.mxu1 }
 0x547   :  { %4329 = vmatmul.mubr.f32.gmra.mxu0 %v3928_v32 }
 0x548   :  { %4333 = vmatprep.mubr.f32.mxu0 %v3934_v47  ;;  %v12963_v0 = vpop.f32.mrf.mxu1 }
 0x54a   :  { %v4167_v42 = vpop.f32.mrf.mxu1 }
 0x54b   :  { %4334 = vmatmul.mubr.f32.gmra.mxu0 %v3933_v14 }
 0x54c   :  { %4338 = vmatprep.mubr.f32.mxu0 %v3939_v3  ;;  %v12968_v1 = vpop.f32.mrf.mxu1 }
 0x54e   :  { %v4172_v60 = vpop.f32.mrf.mxu1 }
 0x54f   :  { %4339 = vmatmul.mubr.f32.gmra.mxu0 %v3938_v33 }
 0x550   :  { %4343 = vmatprep.mubr.f32.mxu0 %v3944_v8  ;;  %v12973_v5 = vpop.f32.mrf.mxu1 }
 0x552   :  { %v4177_v2 = vpop.f32.mrf.mxu1 }
 0x553   :  { %4344 = vmatmul.mubr.f32.gmra.mxu0 %v3943_v20  ;;  %v14842_v2 = vld [vmem:[#allocation70_spill] sm:$0xff] }
 0x554   :  { %4348 = vmatprep.mubr.f32.mxu0 %v3949_v34  ;;  %v12978_v16 = vpop.f32.mrf.mxu1 }
 0x556   :  { %v4182_v22 = vpop.f32.mrf.mxu1 }
 0x557   :  { %4349 = vmatmul.mubr.f32.gmra.mxu0 %v3948_v15  ;;  %v2711_v15 = vadd.f32 %v14842_v2, %v12319_v11 }
 0x558   :  { %4353 = vmatprep.mubr.f32.mxu0 %v3954_v56  ;;  %v12983_v7 = vpop.f32.mrf.mxu1 }
 0x55a   :  { %v4187_v6 = vpop.f32.mrf.mxu1 }
 0x55b   :  { %4354 = vmatmul.mubr.f32.gmra.mxu0 %v3953_v37  ;;  %v2716_v6 = vadd.f32 %v14843_v46, %v12336_v31 }
 0x55c   :  { %4358 = vmatprep.mubr.f32.mxu0 %v3959_v35  ;;  %v12988_v4 = vpop.f32.mrf.mxu1 }
 0x55e   :  { %v4192_v61 = vpop.f32.mrf.mxu1 }
 0x55f   :  { %4359 = vmatmul.mubr.f32.gmra.mxu0 %v3958_v62 }
 0x560   :  { %4363 = vmatprep.mubr.f32.mxu0 %v3964_v53  ;;  %v12993_v48 = vpop.f32.mrf.mxu1 }
 0x562   :  { %v4197_v36 = vpop.f32.mrf.mxu1 }
 0x563   :  { %4364 = vmatmul.mubr.f32.gmra.mxu0 %v3963_v39 }
 0x564   :  { %4368 = vmatprep.mubr.f32.mxu0 %v3969_v29  ;;  %v12998_v25 = vpop.f32.mrf.mxu1  ;;  %v14844_v29 = vld [vmem:[#allocation98_spill] sm:$0xff] }
 0x565   :  { %v2721_v11 = vadd.f32 %v14844_v29, %v12348_v44  ;;  %v14855_v29 = vld [vmem:[#allocation106_spill] sm:$0xff] }
 0x566   :  { %v4202_v23 = vpop.f32.mrf.mxu1 }
 0x567   :  { %4369 = vmatmul.mubr.f32.gmra.mxu0 %v3968_v21  ;;  %v14846_v23 = vld [vmem:[#allocation8_spill] sm:$0xff] }
 0x568   :  { %4373 = vmatprep.mubr.f32.mxu0 %v3974_v57  ;;  %v13003_v63 = vpop.f32.mrf.mxu1 }
 0x56a   :  { %v4207_v24 = vpop.f32.mrf.mxu1 }
 0x56b   :  { %4374 = vmatmul.mubr.f32.gmra.mxu0 %v3973_v43  ;;  %v14847_v43 = vld [vmem:[#allocation72_spill] sm:$0xff] }
 0x56c   :  { %4378 = vmatprep.mubr.f32.mxu0 %v3979_v45  ;;  %v13005_v32 = vpop.f32.mrf.mxu1  ;;  %v2726_v31 = vadd.f32 %v14847_v43, %v14846_v23 }
 0x56e   :  { %v4212_v47 = vpop.f32.mrf.mxu1 }
 0x56f   :  { %4379 = vmatmul.mubr.f32.gmra.mxu0 %v3978_v52 }
 0x570   :  { %v13007_v41 = vpop.f32.mrf.mxu1  ;;  %9496 = vmatprep.mubr.msk.f32.mxu0 %vm9981_vm1, %v14630_v59 }
 0x572   :  { %v9433_v50 = vpop.f32.mrf.mxu1 }
 0x574   :  { %v13011_v14 = vpop.f32.mrf.mxu1 }
 0x576   :  { %v9436_v3 = vpop.f32.mrf.mxu1 }
 0x577   :  { %v14849_v3 = vld [vmem:[#allocation81_spill] sm:$0xff] }
 0x578   :  { %v13013_v12 = vpop.f32.mrf.mxu1 }
 0x57a   :  { %v9439_v42 = vpop.f32.mrf.mxu1 }
 0x57b   :  { %v14850_v42 = vld [vmem:[#allocation100_spill] sm:$0xff] }
 0x57c   :  { %v13015_v33 = vpop.f32.mrf.mxu1  ;;  %v2731_v44 = vadd.f32 %v14850_v42, %v14849_v3 }
 0x57e   :  { %v9442_v8 = vpop.f32.mrf.mxu1 }
 0x580   :  { %v13017_v18 = vpop.f32.mrf.mxu1 }
 0x582   :  { %v9445_v60 = vpop.f32.mrf.mxu1 }
 0x584   :  { %v13019_v20 = vpop.f32.mrf.mxu1 }
 0x586   :  { %v9448_v34 = vpop.f32.mrf.mxu1 }
 0x588   :  { %v13021_v17 = vpop.f32.mrf.mxu1 }
 0x58a   :  { %v9451_v56 = vpop.f32.mrf.mxu1 }
 0x58b   :  { %v3687_v26 = vpop.f32.mrf.mxu0  ;;  %v14852_v56 = vld [vmem:[#allocation9_spill] sm:$0xff] }
 0x58c   :  { %v13025_v22 = vadd.f32 %v3687_v26, %v2711_v15  ;;  %v14853_v26 = vld [vmem:[#allocation73_spill] sm:$0xff] }
 0x58d   :  { %v9352_v37 = vpop.f32.mrf.mxu0  ;;  %v13027_v35 = vpop.f32.mrf.mxu1 }
 0x58e   :  { %v2736_v37 = vadd.f32 %v14853_v26, %v14852_v56  ;;  %v14862_v56 = vld [vmem:[#allocation104_spill] sm:$0xff] }
 0x58f   :  { %v3692_v62 = vpop.f32.mrf.mxu0  ;;  %v9454_v53 = vpop.f32.mrf.mxu1 }
 0x590   :  { %v13031_v30 = vadd.f32 %v3692_v62, %v2716_v6 }
 0x591   :  { %v9355_v61 = vpop.f32.mrf.mxu0  ;;  %v13033_v39 = vpop.f32.mrf.mxu1 }
 0x593   :  { %v3697_v10 = vpop.f32.mrf.mxu0  ;;  %v9457_v36 = vpop.f32.mrf.mxu1 }
 0x594   :  { %v13037_v21 = vadd.f32 %v3697_v10, %v2721_v11  ;;  %v14856_v11 = vld [vmem:[#allocation102_spill] sm:$0xff] }
 0x595   :  { %v9358_v57 = vpop.f32.mrf.mxu0  ;;  %v13039_v27 = vpop.f32.mrf.mxu1  ;;  %v2741_v10 = vadd.f32 %v14856_v11, %v14855_v29  ;;  %v14864_v11 = vld [vmem:[#allocation11_spill] sm:$0xff] }
 0x596   :  { %14845 = vst [vmem:[#allocation19_spill] sm:$0xff] %v13037_v21 }
 0x597   :  { %v3702_v45 = vpop.f32.mrf.mxu0  ;;  %v9460_v24 = vpop.f32.mrf.mxu1 }
 0x598   :  { %v13043_v52 = vadd.f32 %v3702_v45, %v2726_v31  ;;  %v14858_v45 = vld [vmem:[#allocation10_spill] sm:$0xff] }
 0x599   :  { %v9361_v47 = vpop.f32.mrf.mxu0  ;;  %v13045_v50 = vpop.f32.mrf.mxu1  ;;  %v14859_v24 = vld [vmem:[#allocation74_spill] sm:$0xff] }
 0x59a   :  { %14848 = vst [vmem:[#allocation20_spill] sm:$0xff] %v13043_v52  ;;  %v2746_v47 = vadd.f32 %v14859_v24, %v14858_v45 }
 0x59b   :  { %v3707_v8 = vpop.f32.mrf.mxu0  ;;  %v9463_v60 = vpop.f32.mrf.mxu1 }
 0x59c   :  { %v13049_v34 = vadd.f32 %v3707_v8, %v2731_v44 }
 0x59d   :  { %v9364_v2 = vpop.f32.mrf.mxu0  ;;  %v13051_v15 = vpop.f32.mrf.mxu1 }
 0x59e   :  { %14851 = vst [vmem:[#allocation87_spill] sm:$0xff] %v13049_v34  ;;  %v14861_v2 = vld [vmem:[#allocation82_spill] sm:$0xff] }
 0x59f   :  { %v3712_v46 = vpop.f32.mrf.mxu0  ;;  %v9466_v6 = vpop.f32.mrf.mxu1  ;;  %v2751_v26 = vadd.f32 %v14862_v56, %v14861_v2 }
 0x5a0   :  { %v13055_v62 = vadd.f32 %v3712_v46, %v2736_v37 }
 0x5a1   :  { %v9367_v53 = vpop.f32.mrf.mxu0  ;;  %v13057_v61 = vpop.f32.mrf.mxu1 }
 0x5a2   :  { %14854 = vst [vmem:[#allocation21_spill] sm:$0xff] %v13055_v62  ;;  %v14880_v62 = vld [vmem:[#allocation79_spill] sm:$0xff] }
 0x5a3   :  { %v3717_v36 = vpop.f32.mrf.mxu0  ;;  %v9469_v57 = vpop.f32.mrf.mxu1 }
 0x5a4   :  { %v13061_v23 = vadd.f32 %v3717_v36, %v2741_v10  ;;  %v14865_v10 = vld [vmem:[#allocation75_spill] sm:$0xff] }
 0x5a5   :  { %v9370_v43 = vpop.f32.mrf.mxu0  ;;  %v13063_v31 = vpop.f32.mrf.mxu1  ;;  %v2756_v36 = vadd.f32 %v14865_v10, %v14864_v11 }
 0x5a6   :  { %14857 = vst [vmem:[#allocation22_spill] sm:$0xff] %v13061_v23  ;;  %v14877_v23 = vld [vmem:[#allocation101_spill] sm:$0xff] }
 0x5a7   :  { %v3722_v3 = vpop.f32.mrf.mxu0  ;;  %v9472_v42 = vpop.f32.mrf.mxu1 }
 0x5a8   :  { %v13067_v44 = vadd.f32 %v3722_v3, %v2746_v47  ;;  %v14867_v3 = vld [vmem:[#allocation12_spill] sm:$0xff] }
 0x5a9   :  { %v9373_v8 = vpop.f32.mrf.mxu0  ;;  %v13069_v60 = vpop.f32.mrf.mxu1  ;;  %v14868_v42 = vld [vmem:[#allocation76_spill] sm:$0xff] }
 0x5aa   :  { %14860 = vst [vmem:[#allocation88_spill] sm:$0xff] %v13067_v44  ;;  %v2761_v8 = vadd.f32 %v14868_v42, %v14867_v3  ;;  %v14874_v44 = vld [vmem:[#allocation78_spill] sm:$0xff] }
 0x5ab   :  { %v3727_v37 = vpop.f32.mrf.mxu0  ;;  %v9475_v46 = vpop.f32.mrf.mxu1 }
 0x5ac   :  { %v13073_v6 = vadd.f32 %v3727_v37, %v2751_v26 }
 0x5ad   :  { %v9376_v53 = vpop.f32.mrf.mxu0  ;;  %v13075_v29 = vpop.f32.mrf.mxu1 }
 0x5ae   :  { %14863 = vst [vmem:[#allocation23_spill] sm:$0xff] %v13073_v6  ;;  %v14870_v53 = vld [vmem:[#allocation83_spill] sm:$0xff]  ;;  %v14871_v6 = vld [vmem:[#allocation77_spill] sm:$0xff] }
 0x5af   :  { %v3732_v57 = vpop.f32.mrf.mxu0  ;;  %v9478_v43 = vpop.f32.mrf.mxu1  ;;  %v2766_v11 = vadd.f32 %v14871_v6, %v14870_v53 }
 0x5b0   :  { %v13079_v45 = vadd.f32 %v3732_v57, %v2756_v36 }
 0x5b1   :  { %v9379_v24 = vpop.f32.mrf.mxu0  ;;  %v13081_v47 = vpop.f32.mrf.mxu1 }
 0x5b2   :  { %14866 = vst [vmem:[#allocation24_spill] sm:$0xff] %v13079_v45  ;;  %v14873_v45 = vld [vmem:[#allocation13_spill] sm:$0xff] }
 0x5b3   :  { %v3737_v2 = vpop.f32.mrf.mxu0  ;;  %v9481_v56 = vpop.f32.mrf.mxu1  ;;  %v2771_v3 = vadd.f32 %v14874_v44, %v14873_v45 }
 0x5b4   :  { %v13085_v26 = vadd.f32 %v3737_v2, %v2761_v8 }
 0x5b5   :  { %v9382_v37 = vpop.f32.mrf.mxu0  ;;  %v13087_v46 = vpop.f32.mrf.mxu1 }
 0x5b6   :  { %14869 = vst [vmem:[#allocation89_spill] sm:$0xff] %v13085_v26  ;;  %v14876_v26 = vld [vmem:[#allocation14_spill] sm:$0xff] }
 0x5b7   :  { %v3742_v10 = vpop.f32.mrf.mxu0  ;;  %v9484_v43 = vpop.f32.mrf.mxu1  ;;  %v2776_v6 = vadd.f32 %v14877_v23, %v14876_v26 }
 0x5b8   :  { %v13091_v36 = vadd.f32 %v3742_v10, %v2766_v11 }
 0x5b9   :  { %v9385_v57 = vpop.f32.mrf.mxu0  ;;  %v13093_v24 = vpop.f32.mrf.mxu1 }
 0x5ba   :  { %14872 = vst [vmem:[#allocation25_spill] sm:$0xff] %v13091_v36  ;;  %v14879_v36 = vld [vmem:[#allocation84_spill] sm:$0xff] }
 0x5bb   :  { %v3747_v42 = vpop.f32.mrf.mxu0  ;;  %v9487_v56 = vpop.f32.mrf.mxu1  ;;  %v2781_v44 = vadd.f32 %v14880_v62, %v14879_v36  ;;  %v14888_v62 = vld [vmem:[#allocation85_spill] sm:$0xff]  ;;  %v14889_v36 = vld [vmem:[#allocation6_spill] sm:$0xff] }
 0x5bc   :  { %v13097_v8 = vadd.f32 %v3747_v42, %v2771_v3 }
 0x5bd   :  { %v9388_v2 = vpop.f32.mrf.mxu0  ;;  %v13099_v37 = vpop.f32.mrf.mxu1 }
 0x5be   :  { %14875 = vst [vmem:[#allocation26_spill] sm:$0xff] %v13097_v8  ;;  %v14882_v2 = vld [vmem:[#allocation15_spill] sm:$0xff]  ;;  %v14883_v8 = vld [vmem:[#allocation5_spill] sm:$0xff] }
 0x5bf   :  { %v3752_v53 = vpop.f32.mrf.mxu0  ;;  %v9490_v43 = vpop.f32.mrf.mxu1  ;;  %v2786_v34 = vadd.f32 %v14883_v8, %v14882_v2  ;;  %v14892_v8 = vld [vmem:[#allocation80_spill] sm:$0xff] }
 0x5c0   :  { %v13103_v11 = vadd.f32 %v3752_v53, %v2776_v6  ;;  %v14885_v6 = vld [vmem:[#allocation16_spill] sm:$0xff]  ;;  %v14886_v53 = vld [vmem:[#allocation103_spill] sm:$0xff] }
 0x5c1   :  { %v9391_v10 = vpop.f32.mrf.mxu0  ;;  %v13105_v57 = vpop.f32.mrf.mxu1  ;;  %v2791_v43 = vadd.f32 %v14886_v53, %v14885_v6  ;;  %v14894_v6 = vld [vmem:[#allocation7_spill] sm:$0xff] }
 0x5c2   :  { %14878 = vst [vmem:[#allocation90_spill] sm:$0xff] %v13103_v11 }
 0x5c3   :  { %v3757_v45 = vpop.f32.mrf.mxu0  ;;  %v9493_v56 = vpop.f32.mrf.mxu1 }
 0x5c4   :  { %v13109_v3 = vadd.f32 %v3757_v45, %v2781_v44  ;;  %v2796_v56 = vadd.f32 %v14889_v36, %v14888_v62  ;;  %v14896_v62 = vld [vmem:[#allocation105_spill] sm:$0xff] }
 0x5c5   :  { %v9394_v42 = vpop.f32.mrf.mxu0 }
 0x5c6   :  { %14881 = vst [vmem:[#allocation27_spill] sm:$0xff] %v13109_v3  ;;  %v14891_v3 = vld [vmem:[#allocation17_spill] sm:$0xff] }
 0x5c7   :  { %v3762_v52 = vpop.f32.mrf.mxu0  ;;  %v2801_v2 = vadd.f32 %v14892_v8, %v14891_v3 }
 0x5c8   :  { %v13113_v23 = vadd.f32 %v3762_v52, %v2786_v34 }
 0x5c9   :  { %v9397_v26 = vpop.f32.mrf.mxu0 }
 0x5ca   :  { %14884 = vst [vmem:[#allocation28_spill] sm:$0xff] %v13113_v23  ;;  %v14893_v23 = vld [vmem:[#allocation18_spill] sm:$0xff] }
 0x5cb   :  { %v3767_v10 = vpop.f32.mrf.mxu0  ;;  %v2806_v53 = vadd.f32 %v14894_v6, %v14893_v23 }
 0x5cc   :  { %v13117_v11 = vadd.f32 %v3767_v10, %v2791_v43 }
 0x5cd   :  { %v9400_v21 = vpop.f32.mrf.mxu0 }
 0x5ce   :  { %14887 = vst [vmem:[#allocation91_spill] sm:$0xff] %v13117_v11  ;;  %v14895_v11 = vld [vmem:[#allocation86_spill] sm:$0xff] }
 0x5cf   :  { %v3772_v44 = vpop.f32.mrf.mxu0  ;;  %v2811_v36 = vadd.f32 %v14896_v62, %v14895_v11 }
 0x5d0   :  { %v13121_v45 = vadd.f32 %v3772_v44, %v2796_v56 }
 0x5d1   :  { %v9403_v42 = vpop.f32.mrf.mxu0 }
 0x5d2   :  { %14890 = vst [vmem:[#allocation29_spill] sm:$0xff] %v13121_v45 }
 0x5d3   :  { %v3777_v52 = vpop.f32.mrf.mxu0 }
 0x5d4   :  { %v13125_v34 = vadd.f32 %v3777_v52, %v2801_v2 }
 0x5d5   :  { %v9406_v26 = vpop.f32.mrf.mxu0 }
 0x5d7   :  { %v3782_v43 = vpop.f32.mrf.mxu0 }
 0x5d8   :  { %v13129_v10 = vadd.f32 %v3782_v43, %v2806_v53 }
 0x5d9   :  { %v9409_v21 = vpop.f32.mrf.mxu0 }
 0x5db   :  { %v3787_v56 = vpop.f32.mrf.mxu0 }
 0x5dc   :  { %v13133_v44 = vadd.f32 %v3787_v56, %v2811_v36 }
 0x5dd   :  { %v9412_v42 = vpop.f32.mrf.mxu0 }
 0x5df   :  { %v4280_v45 = vpop.f32.mrf.mxu0 }
 0x5e0   :  { %v4281_v3 = vadd.f32 %v4280_v45, %v12904_v38 }
 0x5e1   :  { %v4282_v8 = vpop.f32.mrf.mxu0 }
 0x5e2   :  { %v4451_v2 = vadd.f32 %v13007_v41, %v4281_v3 }
 0x5e3   :  { %v4285_v52 = vpop.f32.mrf.mxu0 }
 0x5e4   :  { %v4286_v23 = vadd.f32 %v4285_v52, %v12909_v9  ;;  %9497 = vmatmul.mubr.msk.f32.vlgmr.msra.gmra.mxu0 %vm2347_vm5, %v4451_v2 }
 0x5e5   :  { %v4287_v26 = vpop.f32.mrf.mxu0  ;;  %9499 = vmatprep.mubr.msk.f32.mxu0 %vm9981_vm1, %v14630_v59 }
 0x5e6   :  { %v4456_v11 = vadd.f32 %v13011_v14, %v4286_v23 }
 0x5e7   :  { %v4290_v6 = vpop.f32.mrf.mxu0 }
 0x5e8   :  { %v4291_v53 = vadd.f32 %v4290_v6, %v12914_v49  ;;  %9500 = vmatmul.mubr.msk.f32.gmra.mxu0 %vm2347_vm5, %v4456_v11 }
 0x5e9   :  { %v4292_v38 = vpop.f32.mrf.mxu0  ;;  %9502 = vmatprep.mubr.msk.f32.mxu0 %vm9981_vm1, %v14630_v59 }
 0x5ea   :  { %v4461_v41 = vadd.f32 %v13013_v12, %v4291_v53 }
 0x5eb   :  { %v4295_v9 = vpop.f32.mrf.mxu0 }
 0x5ec   :  { %v4296_v45 = vadd.f32 %v4295_v9, %v12919_v55  ;;  %9503 = vmatmul.mubr.msk.f32.gmra.mxu0 %vm2347_vm5, %v4461_v41 }
 0x5ed   :  { %v4297_v43 = vpop.f32.mrf.mxu0  ;;  %9505 = vmatprep.mubr.msk.f32.mxu0 %vm9981_vm1, %v14630_v59 }
 0x5ee   :  { %v4466_v14 = vadd.f32 %v13015_v33, %v4296_v45 }
 0x5ef   :  { %v4300_v49 = vpop.f32.mrf.mxu0 }
 0x5f0   :  { %v4301_v21 = vadd.f32 %v4300_v49, %v12924_v13  ;;  %9506 = vmatmul.mubr.msk.f32.gmra.mxu0 %vm2347_vm5, %v4466_v14 }
 0x5f1   :  { %v4302_v62 = vpop.f32.mrf.mxu0  ;;  %9508 = vmatprep.mubr.msk.f32.mxu0 %vm9981_vm1, %v14630_v59 }
 0x5f2   :  { %v4471_v12 = vadd.f32 %v13017_v18, %v4301_v21 }
 0x5f3   :  { %v4305_v55 = vpop.f32.mrf.mxu0 }
 0x5f4   :  { %v4306_v36 = vadd.f32 %v4305_v55, %v12929_v58  ;;  %9509 = vmatmul.mubr.msk.f32.gmra.mxu0 %vm2347_vm5, %v4471_v12 }
 0x5f5   :  { %v4307_v56 = vpop.f32.mrf.mxu0  ;;  %9511 = vmatprep.mubr.msk.f32.mxu0 %vm9981_vm1, %v14630_v59 }
 0x5f6   :  { %v4476_v33 = vadd.f32 %v13019_v20, %v4306_v36 }
 0x5f7   :  { %v4310_v13 = vpop.f32.mrf.mxu0 }
 0x5f8   :  { %v4311_v42 = vadd.f32 %v4310_v13, %v12934_v54  ;;  %9512 = vmatmul.mubr.msk.f32.gmra.mxu0 %vm2347_vm5, %v4476_v33 }
 0x5f9   :  { %v4312_v3 = vpop.f32.mrf.mxu0  ;;  %9514 = vmatprep.mubr.msk.f32.mxu0 %vm9981_vm1, %v14630_v59 }
 0x5fa   :  { %v4481_v18 = vadd.f32 %v13021_v17, %v4311_v42 }
 0x5fb   :  { %v4315_v58 = vpop.f32.mrf.mxu0 }
 0x5fc   :  { %v4316_v8 = vadd.f32 %v4315_v58, %v12939_v28  ;;  %9515 = vmatmul.mubr.msk.f32.gmra.mxu0 %vm2347_vm5, %v4481_v18 }
 0x5fd   :  { %v4317_v2 = vpop.f32.mrf.mxu0  ;;  %9517 = vmatprep.mubr.msk.f32.mxu0 %vm9981_vm1, %v14630_v59 }
 0x5fe   :  { %v4486_v20 = vadd.f32 %v13027_v35, %v4316_v8 }
 0x5ff   :  { %v4320_v54 = vpop.f32.mrf.mxu0 }
 0x600   :  { %v4321_v52 = vadd.f32 %v4320_v54, %v12948_v19  ;;  %9518 = vmatmul.mubr.msk.f32.gmra.mxu0 %vm2347_vm5, %v4486_v20 }
 0x601   :  { %v4322_v23 = vpop.f32.mrf.mxu0  ;;  %9520 = vmatprep.mubr.msk.f32.mxu0 %vm9981_vm1, %v14630_v59 }
 0x602   :  { %v4491_v17 = vadd.f32 %v13033_v39, %v4321_v52 }
 0x603   :  { %v4325_v28 = vpop.f32.mrf.mxu0 }
 0x604   :  { %v4326_v26 = vadd.f32 %v4325_v28, %v12953_v40  ;;  %9521 = vmatmul.mubr.msk.f32.gmra.mxu0 %vm2347_vm5, %v4491_v17  ;;  %v14897_v28 = vld [vmem:[#allocation19_spill] sm:$0xff] }
 0x605   :  { %v4327_v11 = vpop.f32.mrf.mxu0  ;;  %9523 = vmatprep.mubr.msk.f32.mxu0 %vm9981_vm1, %v14630_v59 }
 0x606   :  { %v4496_v35 = vadd.f32 %v13039_v27, %v4326_v26 }
 0x607   :  { %v4330_v19 = vpop.f32.mrf.mxu0 }
 0x608   :  { %v4331_v6 = vadd.f32 %v4330_v19, %v12958_v51  ;;  %9524 = vmatmul.mubr.msk.f32.gmra.mxu0 %vm2347_vm5, %v4496_v35 }
 0x609   :  { %v4332_v53 = vpop.f32.mrf.mxu0  ;;  %9526 = vmatprep.mubr.msk.f32.mxu0 %vm9981_vm1, %v14630_v59 }
 0x60a   :  { %v4501_v39 = vadd.f32 %v13045_v50, %v4331_v6 }
 0x60b   :  { %v4335_v40 = vpop.f32.mrf.mxu0 }
 0x60c   :  { %v4336_v38 = vadd.f32 %v4335_v40, %v12963_v0  ;;  %9527 = vmatmul.mubr.msk.f32.gmra.mxu0 %vm2347_vm5, %v4501_v39 }
 0x60d   :  { %v4337_v41 = vpop.f32.mrf.mxu0  ;;  %9529 = vmatprep.mubr.msk.f32.mxu0 %vm9981_vm1, %v14630_v59 }
 0x60e   :  { %v4506_v27 = vadd.f32 %v13051_v15, %v4336_v38  ;;  %v14899_v41 = vld [vmem:[#allocation87_spill] sm:$0xff] }
 0x60f   :  { %v4340_v51 = vpop.f32.mrf.mxu0 }
 0x610   :  { %v4341_v9 = vadd.f32 %v4340_v51, %v12968_v1  ;;  %9530 = vmatmul.mubr.msk.f32.gmra.mxu0 %vm2347_vm5, %v4506_v27 }
 0x611   :  { %v4342_v45 = vpop.f32.mrf.mxu0  ;;  %9532 = vmatprep.mubr.msk.f32.mxu0 %vm9981_vm1, %v14630_v59 }
 0x612   :  { %v4511_v50 = vadd.f32 %v13057_v61, %v4341_v9 }
 0x613   :  { %v4345_v0 = vpop.f32.mrf.mxu0 }
 0x614   :  { %v4346_v43 = vadd.f32 %v4345_v0, %v12973_v5  ;;  %9533 = vmatmul.mubr.msk.f32.gmra.mxu0 %vm2347_vm5, %v4511_v50  ;;  %v14900_v0 = vld [vmem:[#allocation21_spill] sm:$0xff] }
 0x615   :  { %v4347_v14 = vpop.f32.mrf.mxu0  ;;  %9535 = vmatprep.mubr.msk.f32.mxu0 %vm9981_vm1, %v14630_v59 }
 0x616   :  { %v4516_v15 = vadd.f32 %v13063_v31, %v4346_v43 }
 0x617   :  { %v4350_v1 = vpop.f32.mrf.mxu0 }
 0x618   :  { %v4351_v49 = vadd.f32 %v4350_v1, %v12978_v16  ;;  %9536 = vmatmul.mubr.msk.f32.gmra.mxu0 %vm2347_vm5, %v4516_v15 }
 0x619   :  { %v4352_v21 = vpop.f32.mrf.mxu0  ;;  %9538 = vmatprep.mubr.msk.f32.mxu0 %vm9981_vm1, %v14630_v59 }
 0x61a   :  { %v4521_v61 = vadd.f32 %v13069_v60, %v4351_v49  ;;  %v14901_v21 = vld [vmem:[#allocation22_spill] sm:$0xff] }
 0x61b   :  { %v4355_v5 = vpop.f32.mrf.mxu0 }
 0x61c   :  { %v4356_v62 = vadd.f32 %v4355_v5, %v12983_v7  ;;  %9539 = vmatmul.mubr.msk.f32.gmra.mxu0 %vm2347_vm5, %v4521_v61 }
 0x61d   :  { %v4357_v12 = vpop.f32.mrf.mxu0  ;;  %9541 = vmatprep.mubr.msk.f32.mxu0 %vm9981_vm1, %v14630_v59 }
 0x61e   :  { %v4526_v31 = vadd.f32 %v13075_v29, %v4356_v62 }
 0x61f   :  { %v4360_v16 = vpop.f32.mrf.mxu0 }
 0x620   :  { %v4361_v55 = vadd.f32 %v4360_v16, %v12988_v4  ;;  %9542 = vmatmul.mubr.msk.f32.gmra.mxu0 %vm2347_vm5, %v4526_v31  ;;  %v14902_v16 = vld [vmem:[#allocation88_spill] sm:$0xff] }
 0x621   :  { %v4362_v36 = vpop.f32.mrf.mxu0  ;;  %9544 = vmatprep.mubr.msk.f32.mxu0 %vm9981_vm1, %v14630_v59 }
 0x622   :  { %v4531_v60 = vadd.f32 %v13081_v47, %v4361_v55 }
 0x623   :  { %v4365_v7 = vpop.f32.mrf.mxu0 }
 0x624   :  { %v4366_v56 = vadd.f32 %v4365_v7, %v12993_v48  ;;  %9545 = vmatmul.mubr.msk.f32.gmra.mxu0 %vm2347_vm5, %v4531_v60 }
 0x625   :  { %v4367_v33 = vpop.f32.mrf.mxu0  ;;  %9547 = vmatprep.mubr.msk.f32.mxu0 %vm9981_vm1, %v14630_v59 }
 0x626   :  { %v4536_v29 = vadd.f32 %v13087_v46, %v4366_v56  ;;  %v14903_v33 = vld [vmem:[#allocation23_spill] sm:$0xff] }
 0x627   :  { %v4370_v4 = vpop.f32.mrf.mxu0 }
 0x628   :  { %v4371_v13 = vadd.f32 %v4370_v4, %v12998_v25  ;;  %9548 = vmatmul.mubr.msk.f32.gmra.mxu0 %vm2347_vm5, %v4536_v29 }
 0x629   :  { %v4372_v42 = vpop.f32.mrf.mxu0  ;;  %9550 = vmatprep.mubr.msk.f32.mxu0 %vm9981_vm1, %v14630_v59 }
 0x62a   :  { %v4541_v47 = vadd.f32 %v13093_v24, %v4371_v13 }
 0x62b   :  { %v4375_v48 = vpop.f32.mrf.mxu0 }
 0x62c   :  { %v4376_v3 = vadd.f32 %v4375_v48, %v13003_v63  ;;  %9551 = vmatmul.mubr.msk.f32.gmra.mxu0 %vm2347_vm5, %v4541_v47  ;;  %v14904_v48 = vld [vmem:[#allocation24_spill] sm:$0xff] }
 0x62d   :  { %v4377_v18 = vpop.f32.mrf.mxu0  ;;  %9553 = vmatprep.mubr.msk.f32.mxu0 %vm9981_vm1, %v14630_v59 }
 0x62e   :  { %v4546_v46 = vadd.f32 %v13099_v37, %v4376_v3 }
 0x62f   :  { %v4380_v25 = vpop.f32.mrf.mxu0 }
 0x630   :  { %v4381_v58 = vadd.f32 %v4380_v25, %v13005_v32  ;;  %9554 = vmatmul.mubr.msk.f32.gmra.mxu0 %vm2347_vm5, %v4546_v46 }
 0x631   :  { %v4382_v8 = vpop.f32.mrf.mxu0  ;;  %9556 = vmatprep.mubr.msk.f32.mxu0 %vm9981_vm1, %v14630_v59 }
 0x632   :  { %v4551_v24 = vadd.f32 %v13105_v57, %v4381_v58  ;;  %v14905_v8 = vld [vmem:[#allocation89_spill] sm:$0xff] }
 0x634   :  { %9557 = vmatmul.mubr.msk.f32.gmra.mxu0 %vm2347_vm5, %v4551_v24 }
 0x635   :  { %9563 = vmatprep.mubr.msk.f32.mxu0 %vm9981_vm1, %v14630_v59 }
 0x6a4   :  { %v4685_v63 = vpop.f32.mrf.mxu0 }
 0x6a5   :  { %v13241_v37 = vadd.f32 %v4685_v63, %v13025_v22 }
 0x6a6   :  { %v9498_v2 = vpop.f32.mrf.mxu0 }
 0x6a7   :  { %v4811_v52 = vsel %vm4810_vm6, %v13241_v37, 0.0 }
 0x6a8   :  { %v4690_v32 = vpop.f32.mrf.mxu0 }
 0x6a9   :  { %v13244_v20 = vadd.f32 %v4690_v32, %v13031_v30  ;;  %v14898_v30 = vld [vmem:[#allocation20_spill] sm:$0xff] }
 0x6aa   :  { %v9501_v54 = vpop.f32.mrf.mxu0 }
 0x6ab   :  { %v4812_v57 = vsel %vm4810_vm6, %v13244_v20, 0.0 }
 0x6ac   :  { %v4813_v23 = vadd.f32 %v4812_v57, %v4811_v52  ;;  %v4695_v17 = vpop.f32.mrf.mxu0  ;;  %v14906_v52 = vld [vmem:[#allocation25_spill] sm:$0xff] }
 0x6ad   :  { %v13251_v26 = vadd.f32 %v4695_v17, %v14897_v28 }
 0x6ae   :  { %v9504_v11 = vpop.f32.mrf.mxu0 }
 0x6af   :  { %v4814_v22 = vsel %vm4810_vm6, %v13251_v26, 0.0 }
 0x6b0   :  { %v4815_v35 = vadd.f32 %v4814_v22, %v4813_v23  ;;  %v4700_v19 = vpop.f32.mrf.mxu0  ;;  %v14907_v22 = vld [vmem:[#allocation26_spill] sm:$0xff] }
 0x6b1   :  { %v13256_v6 = vadd.f32 %v4700_v19, %v14898_v30 }
 0x6b2   :  { %v9507_v53 = vpop.f32.mrf.mxu0 }
 0x6b3   :  { %v4816_v39 = vsel %vm4810_vm6, %v13256_v6, 0.0 }
 0x6b4   :  { %v4817_v40 = vadd.f32 %v4816_v39, %v4815_v35  ;;  %v4705_v38 = vpop.f32.mrf.mxu0 }
 0x6b5   :  { %v13261_v27 = vadd.f32 %v4705_v38, %v14899_v41 }
 0x6b6   :  { %v9510_v51 = vpop.f32.mrf.mxu0 }
 0x6b7   :  { %v4818_v9 = vsel %vm4810_vm6, %v13261_v27, 0.0 }
 0x6b8   :  { %v4819_v45 = vadd.f32 %v4818_v9, %v4817_v40  ;;  %v4710_v50 = vpop.f32.mrf.mxu0  ;;  %v14908_v40 = vld [vmem:[#allocation90_spill] sm:$0xff] }
 0x6b9   :  { %v13266_v43 = vadd.f32 %v4710_v50, %v14900_v0  ;;  %v14909_v50 = vld [vmem:[#allocation27_spill] sm:$0xff] }
 0x6ba   :  { %v9513_v14 = vpop.f32.mrf.mxu0 }
 0x6bb   :  { %v4820_v15 = vsel %vm4810_vm6, %v13266_v43, 0.0 }
 0x6bc   :  { %v4821_v1 = vadd.f32 %v4820_v15, %v4819_v45  ;;  %v4715_v49 = vpop.f32.mrf.mxu0 }
 0x6bd   :  { %v13271_v61 = vadd.f32 %v4715_v49, %v14901_v21  ;;  %v14910_v21 = vld [vmem:[#allocation28_spill] sm:$0xff] }
 0x6be   :  { %v9516_v5 = vpop.f32.mrf.mxu0 }
 0x6bf   :  { %v4822_v62 = vsel %vm4810_vm6, %v13271_v61, 0.0 }
 0x6c0   :  { %v4823_v12 = vadd.f32 %v4822_v62, %v4821_v1  ;;  %v4720_v31 = vpop.f32.mrf.mxu0 }
 0x6c1   :  { %v13276_v55 = vadd.f32 %v4720_v31, %v14902_v16 }
 0x6c2   :  { %v9519_v36 = vpop.f32.mrf.mxu0 }
 0x6c3   :  { %v4824_v60 = vsel %vm4810_vm6, %v13276_v55, 0.0  ;;  %v14911_v36 = vld [vmem:[#allocation91_spill] sm:$0xff] }
 0x6c4   :  { %v4825_v7 = vadd.f32 %v4824_v60, %v4823_v12  ;;  %v4725_v56 = vpop.f32.mrf.mxu0 }
 0x6c5   :  { %v13281_v29 = vadd.f32 %v4725_v56, %v14903_v33 }
 0x6c6   :  { %v9522_v4 = vpop.f32.mrf.mxu0 }
 0x6c7   :  { %v4826_v13 = vsel %vm4810_vm6, %v13281_v29, 0.0 }
 0x6c8   :  { %v4827_v42 = vadd.f32 %v4826_v13, %v4825_v7  ;;  %v4730_v47 = vpop.f32.mrf.mxu0  ;;  %v14912_v13 = vld [vmem:[#allocation29_spill] sm:$0xff] }
 0x6c9   :  { %v13286_v3 = vadd.f32 %v4730_v47, %v14904_v48 }
 0x6ca   :  { %v9525_v18 = vpop.f32.mrf.mxu0 }
 0x6cb   :  { %v4828_v46 = vsel %vm4810_vm6, %v13286_v3, 0.0 }
 0x6cc   :  { %v4829_v25 = vadd.f32 %v4828_v46, %v4827_v42  ;;  %v4735_v58 = vpop.f32.mrf.mxu0 }
 0x6cd   :  { %v13291_v24 = vadd.f32 %v4735_v58, %v14905_v8 }
 0x6ce   :  { %v9528_v63 = vpop.f32.mrf.mxu0 }
 0x6cf   :  { %v4830_v2 = vsel %vm4810_vm6, %v13291_v24, 0.0 }
 0x6d0   :  { %v4831_v32 = vadd.f32 %v4830_v2, %v4829_v25  ;;  %v4740_v54 = vpop.f32.mrf.mxu0 }
 0x6d1   :  { %v13296_v57 = vadd.f32 %v4740_v54, %v14906_v52 }
 0x6d2   :  { %v9531_v23 = vpop.f32.mrf.mxu0 }
 0x6d3   :  { %v4832_v17 = vsel %vm4810_vm6, %v13296_v57, 0.0 }
 0x6d4   :  { %v4833_v28 = vadd.f32 %v4832_v17, %v4831_v32  ;;  %v4745_v11 = vpop.f32.mrf.mxu0 }
 0x6d5   :  { %v13301_v35 = vadd.f32 %v4745_v11, %v14907_v22 }
 0x6d6   :  { %v9534_v19 = vpop.f32.mrf.mxu0 }
 0x6d7   :  { %v4834_v30 = vsel %vm4810_vm6, %v13301_v35, 0.0 }
 0x6d8   :  { %v4835_v53 = vadd.f32 %v4834_v30, %v4833_v28  ;;  %v4750_v39 = vpop.f32.mrf.mxu0 }
 0x6d9   :  { %v4802_v38 = vadd.f32 %v4750_v39, %v14908_v40 }
 0x6da   :  { %v9537_v41 = vpop.f32.mrf.mxu0 }
 0x6db   :  { %v4836_v51 = vsel %vm4810_vm6, %v4802_v38, 0.0 }
 0x6dc   :  { %v4837_v9 = vadd.f32 %v4836_v51, %v4835_v53  ;;  %v4755_v45 = vpop.f32.mrf.mxu0 }
 0x6dd   :  { %v4803_v0 = vadd.f32 %v4755_v45, %v14909_v50 }
 0x6de   :  { %v9540_v14 = vpop.f32.mrf.mxu0 }
 0x6df   :  { %v4838_v15 = vsel %vm4810_vm6, %v4803_v0, 0.0 }
 0x6e0   :  { %v4839_v1 = vadd.f32 %v4838_v15, %v4837_v9  ;;  %v4760_v49 = vpop.f32.mrf.mxu0 }
 0x6e1   :  { %v4804_v5 = vadd.f32 %v4760_v49, %v14910_v21 }
 0x6e2   :  { %v9543_v62 = vpop.f32.mrf.mxu0 }
 0x6e3   :  { %v4840_v12 = vsel %vm4810_vm6, %v4804_v5, 0.0 }
 0x6e4   :  { %v4841_v31 = vadd.f32 %v4840_v12, %v4839_v1  ;;  %v4765_v16 = vpop.f32.mrf.mxu0 }
 0x6e5   :  { %v4805_v60 = vadd.f32 %v4765_v16, %v14911_v36 }
 0x6e6   :  { %v9546_v7 = vpop.f32.mrf.mxu0 }
 0x6e7   :  { %v4842_v56 = vsel %vm4810_vm6, %v4805_v60, 0.0 }
 0x6e8   :  { %v4843_v33 = vadd.f32 %v4842_v56, %v4841_v31  ;;  %v4770_v4 = vpop.f32.mrf.mxu0 }
 0x6e9   :  { %v4806_v42 = vadd.f32 %v4770_v4, %v14912_v13 }
 0x6ea   :  { %v9549_v47 = vpop.f32.mrf.mxu0 }
 0x6eb   :  { %v4844_v48 = vsel %vm4810_vm6, %v4806_v42, 0.0 }
 0x6ec   :  { %v4845_v18 = vadd.f32 %v4844_v48, %v4843_v33  ;;  %v4775_v46 = vpop.f32.mrf.mxu0 }
 0x6ed   :  { %v4807_v25 = vadd.f32 %v4775_v46, %v13125_v34 }
 0x6ee   :  { %v9552_v58 = vpop.f32.mrf.mxu0 }
 0x6ef   :  { %v4846_v8 = vsel %vm4810_vm6, %v4807_v25, 0.0 }
 0x6f0   :  { %v4847_v63 = vadd.f32 %v4846_v8, %v4845_v18  ;;  %v4780_v2 = vpop.f32.mrf.mxu0 }
 0x6f1   :  { %v4808_v32 = vadd.f32 %v4780_v2, %v13129_v10 }
 0x6f2   :  { %v9555_v54 = vpop.f32.mrf.mxu0 }
 0x6f3   :  { %v4848_v52 = vsel %vm4810_vm6, %v4808_v32, 0.0 }
 0x6f4   :  { %v4849_v23 = vadd.f32 %v4848_v52, %v4847_v63  ;;  %v4785_v17 = vpop.f32.mrf.mxu0 }
 0x6f5   :  { %v4809_v28 = vadd.f32 %v4785_v17, %v13133_v44 }
 0x6f6   :  { %v9558_v11 = vpop.f32.mrf.mxu0 }
 0x6f7   :  { %v4851_v22 = vsel %vm4850_vm7, %v4809_v28, 0.0 }
 0x6f8   :  { %v4852_v19 = vadd.f32 %v4851_v22, %v4849_v23 }
 0x6fa   :  { %v4853_v34 = vrot.slane %v4852_v19, 4 }
 0x6fc   :  { %v4854_v30 = vadd.f32 %v4853_v34, %v4852_v19 }
 0x6fe   :  { %v4855_v53 = vrot.slane %v4854_v30, 2 }
 0x700   :  { %v4856_v39 = vadd.f32 %v4855_v53, %v4854_v30 }
 0x702   :  { %v4857_v40 = vrot.slane %v4856_v39, 1 }
 0x704   :  { %v4858_v41 = vadd.f32 %v4857_v40, %v4856_v39 }
 0x706   :  { %v4860_v51 = vmul.f32 0.0061728396, %v4858_v41 }
 0x708   :  { %v13322_v10 = vsub.f32 %v13241_v37, %v4860_v51  ;;  %v13325_v9 = vsub.f32 %v13244_v20, %v4860_v51  ;;  %v13328_v45 = vsub.f32 %v13251_v26, %v4860_v51  ;;  %v13331_v44 = vsub.f32 %v13256_v6, %v4860_v51 }
 0x709   :  { %v13334_v50 = vsub.f32 %v13261_v27, %v4860_v51  ;;  %v13337_v14 = vsub.f32 %v13266_v43, %v4860_v51  ;;  %v13340_v15 = vsub.f32 %v13271_v61, %v4860_v51  ;;  %v13343_v37 = vsub.f32 %v13276_v55, %v4860_v51 }
 0x70a   :  { %v13346_v20 = vsub.f32 %v13281_v29, %v4860_v51  ;;  %v13349_v26 = vsub.f32 %v13286_v3, %v4860_v51  ;;  %v13352_v6 = vsub.f32 %v13291_v24, %v4860_v51  ;;  %v13355_v27 = vsub.f32 %v13296_v57, %v4860_v51 }
 0x70b   :  { %v13358_v43 = vsub.f32 %v13301_v35, %v4860_v51  ;;  %v13360_v61 = vsub.f32 %v4802_v38, %v4860_v51  ;;  %v13362_v1 = vsub.f32 %v4803_v0, %v4860_v51  ;;  %v13364_v55 = vsub.f32 %v4804_v5, %v4860_v51 }
 0x70c   :  { %v13366_v29 = vsub.f32 %v4805_v60, %v4860_v51  ;;  %v13368_v49 = vsub.f32 %v4806_v42, %v4860_v51  ;;  %v13370_v3 = vsub.f32 %v4807_v25, %v4860_v51  ;;  %v13372_v24 = vsub.f32 %v4808_v32, %v4860_v51  ;;  %v13392_v60 = vld [vmem:[%s14456_s6] sm:$0xff] }
 0x70d   :  { %v13374_v21 = vsub.f32 %v4809_v28, %v4860_v51  ;;  %v4882_v57 = vmul.f32 %v13322_v10, %v13322_v10  ;;  %v4883_v35 = vmul.f32 %v13325_v9, %v13325_v9  ;;  %v4884_v38 = vmul.f32 %v13328_v45, %v13328_v45 }
 0x70e   :  { %v4885_v0 = vmul.f32 %v13331_v44, %v13331_v44  ;;  %v4886_v31 = vmul.f32 %v13334_v50, %v13334_v50  ;;  %v4887_v7 = vmul.f32 %v13337_v14, %v13337_v14  ;;  %v4888_v4 = vmul.f32 %v13340_v15, %v13340_v15 }
 0x70f   :  { %v4903_v5 = vsel %vm4810_vm6, %v4882_v57, 0.0  ;;  %v4904_v62 = vsel %vm4810_vm6, %v4883_v35, 0.0  ;;  %v4906_v16 = vsel %vm4810_vm6, %v4884_v38, 0.0  ;;  %v5039_v42 = vunpack.c.h.bf16 %v13392_v60 }
 0x710   :  { %v4905_v12 = vadd.f32 %v4904_v62, %v4903_v5  ;;  %v4908_v56 = vsel %vm4810_vm6, %v4885_v0, 0.0  ;;  %v4910_v13 = vsel %vm4810_vm6, %v4886_v31, 0.0  ;;  %v4889_v48 = vmul.f32 %v13343_v37, %v13343_v37 }
 0x711   :  { %v4912_v18 = vsel %vm4810_vm6, %v4887_v7, 0.0  ;;  %8128 = vmatprep.mubr.msk.f32.mxu1 %vm5052_vm8, %v5039_v42  ;;  %v4890_v25 = vmul.f32 %v13346_v20, %v13346_v20  ;;  %v4914_v58 = vsel %vm4810_vm6, %v4888_v4, 0.0  ;;  %v4891_v63 = vmul.f32 %v13349_v26, %v13349_v26 }
 0x712   :  { %v4907_v36 = vadd.f32 %v4906_v16, %v4905_v12  ;;  %v4916_v2 = vsel %vm4810_vm6, %v4889_v48, 0.0  ;;  %v4892_v54 = vmul.f32 %v13352_v6, %v13352_v6  ;;  %v4893_v17 = vmul.f32 %v13355_v27, %v13355_v27 }
 0x713   :  { %v4918_v52 = vsel %vm4810_vm6, %v4890_v25, 0.0  ;;  %v4920_v28 = vsel %vm4810_vm6, %v4891_v63, 0.0  ;;  %v4894_v22 = vmul.f32 %v13358_v43, %v13358_v43  ;;  %v4895_v30 = vmul.f32 %v13360_v61, %v13360_v61 }
 0x714   :  { %v4909_v33 = vadd.f32 %v4908_v56, %v4907_v36  ;;  %v4922_v19 = vsel %vm4810_vm6, %v4892_v54, 0.0  ;;  %v4924_v53 = vsel %vm4810_vm6, %v4893_v17, 0.0  ;;  %v4896_v40 = vmul.f32 %v13362_v1, %v13362_v1 }
 0x715   :  { %v4926_v41 = vsel %vm4810_vm6, %v4894_v22, 0.0  ;;  %v4897_v57 = vmul.f32 %v13364_v55, %v13364_v55  ;;  %v4928_v35 = vsel %vm4810_vm6, %v4895_v30, 0.0  ;;  %v4898_v0 = vmul.f32 %v13366_v29, %v13366_v29 }
 0x716   :  { %v4911_v47 = vadd.f32 %v4910_v13, %v4909_v33  ;;  %v4930_v5 = vsel %vm4810_vm6, %v4896_v40, 0.0  ;;  %v4899_v12 = vmul.f32 %v13368_v49, %v13368_v49  ;;  %v4900_v36 = vmul.f32 %v13370_v3, %v13370_v3  ;;  %v13461_v40 = vld [vmem:[%s14455_s5] ss:$0 sm:$0xff] }
 0x717   :  { %v4932_v31 = vsel %vm4810_vm6, %v4897_v57, 0.0  ;;  %v4934_v7 = vsel %vm4810_vm6, %v4898_v0, 0.0  ;;  %v4901_v33 = vmul.f32 %v13372_v24, %v13372_v24  ;;  %v4902_v42 = vmul.f32 %v13374_v21, %v13374_v21 }
 0x718   :  { %v4913_v46 = vadd.f32 %v4912_v18, %v4911_v47  ;;  %v4936_v4 = vsel %vm4810_vm6, %v4899_v12, 0.0  ;;  %v4938_v47 = vsel %vm4810_vm6, %v4900_v36, 0.0 }
 0x719   :  { %v4940_v18 = vsel %vm4810_vm6, %v4901_v33, 0.0  ;;  %v4942_v25 = vsel %vm4850_vm7, %v4902_v42, 0.0 }
 0x71a   :  { %v4915_v8 = vadd.f32 %v4914_v58, %v4913_v46 }
 0x71c   :  { %v4917_v32 = vadd.f32 %v4916_v2, %v4915_v8 }
 0x71e   :  { %v4919_v23 = vadd.f32 %v4918_v52, %v4917_v32 }
 0x720   :  { %v4921_v11 = vadd.f32 %v4920_v28, %v4919_v23  ;;  %v8151_v28 = vld [vmem:[%s14457_s7 + $0x18] sm:$0xff] }
 0x721   :  { %9560 = vmatpush3.msra.mxu0 %v8151_v28 }
 0x722   :  { %v4923_v34 = vadd.f32 %v4922_v19, %v4921_v11  ;;  %v4956_v11 = vlaneseq  ;;  %9561 = vmatprep.subr.mxu0 %v14630_v59  ;;  %v4951_v19 = vld [vmem:[%s14454_s4] sm:$0x1] }
 0x724   :  { %v4925_v39 = vadd.f32 %v4924_v53, %v4923_v34  ;;  %v4957_v22 = vshrl.u32 %v4956_v11, 7 }
 0x726   :  { %v4927_v51 = vadd.f32 %v4926_v41, %v4925_v39  ;;  %v13453_v34 = vsub.s32 0, %v4957_v22 }
 0x728   :  { %v4929_v38 = vadd.f32 %v4928_v35, %v4927_v51 }
 0x72a   :  { %v4931_v62 = vadd.f32 %v4930_v5, %v4929_v38 }
 0x72c   :  { %v4933_v16 = vadd.f32 %v4932_v31, %v4931_v62 }
 0x72e   :  { %v4935_v56 = vadd.f32 %v4934_v7, %v4933_v16 }
 0x730   :  { %v4937_v13 = vadd.f32 %v4936_v4, %v4935_v56 }
 0x732   :  { %v4939_v48 = vadd.f32 %v4938_v47, %v4937_v13 }
 0x734   :  { %v4941_v46 = vadd.f32 %v4940_v18, %v4939_v48 }
 0x736   :  { %v4943_v58 = vadd.f32 %v4942_v25, %v4941_v46 }
 0x738   :  { %v4944_v8 = vrot.slane %v4943_v58, 4 }
 0x73a   :  { %v4945_v63 = vadd.f32 %v4944_v8, %v4943_v58 }
 0x73c   :  { %v4946_v2 = vrot.slane %v4945_v63, 2 }
 0x73e   :  { %v4947_v32 = vadd.f32 %v4946_v2, %v4945_v63 }
 0x740   :  { %v4948_v54 = vrot.slane %v4947_v32, 1 }
 0x742   :  { %v4949_v52 = vadd.f32 %v4948_v54, %v4947_v32 }
 0x744   :  { %v4950_v23 = vmul.f32 0.0061728396, %v4949_v52 }
 0x746   :  { %v4952_v17 = vadd.f32 1e-05, %v4950_v23 }
 0x748   :  { %9952 = vrsqrt.f32 %v4952_v17 }
 0x755   :  { %v9953_v30 = vpop.eup %9952 }
 0x756   :  { %v4954_v53 = vmul.f32 %v9953_v30, %v4951_v19 }
 0x758   :  { %v13456_v39 = vrot.slane %v4954_v53, %v13453_v34 }
 0x75a   :  { %v4976_v41 = vmul.f32 %v13456_v39, %v13364_v55  ;;  %v4975_v51 = vmul.f32 %v13456_v39, %v13362_v1  ;;  %v4974_v57 = vmul.f32 %v13456_v39, %v13360_v61  ;;  %v4973_v35 = vmul.f32 %v13456_v39, %v13358_v43 }
 0x75b   :  { %v4972_v55 = vmul.f32 %v13456_v39, %v13355_v27  ;;  %v4971_v43 = vmul.f32 %v13456_v39, %v13352_v6  ;;  %v4970_v27 = vmul.f32 %v13456_v39, %v13349_v26  ;;  %v4969_v6 = vmul.f32 %v13456_v39, %v13346_v20 }
 0x75c   :  { %v5004_v38 = vadd.f32 %v13461_v40, %v4976_v41  ;;  %v5003_v0 = vadd.f32 %v13461_v40, %v4975_v51  ;;  %v5002_v62 = vadd.f32 %v13461_v40, %v4974_v57  ;;  %v5001_v61 = vadd.f32 %v13461_v40, %v4973_v35 }
 0x75d   :  { %v5000_v31 = vadd.f32 %v13461_v40, %v4972_v55  ;;  %v4999_v36 = vadd.f32 %v13461_v40, %v4971_v43  ;;  %v4998_v56 = vadd.f32 %v13461_v40, %v4970_v27  ;;  %v4968_v26 = vmul.f32 %v13456_v39, %v13343_v37  ;;  %v5034_v55 = vld [vmem:[%s14456_s6 + $0x18] sm:$0xff] }
 0x75e   :  { %v13473_v5 = vmax.f32 %v5004_v38, 0.0  ;;  %v13479_v1 = vmax.f32 %v5003_v0, 0.0  ;;  %v13486_v12 = vmax.f32 %v5002_v62, 0.0  ;;  %v13493_v16 = vmax.f32 %v5001_v61, 0.0 }
 0x75f   :  { %v13500_v7 = vmax.f32 %v5000_v31, 0.0  ;;  %v13507_v33 = vmax.f32 %v4999_v36, 0.0  ;;  %v4997_v4 = vadd.f32 %v13461_v40, %v4969_v6  ;;  %v4967_v20 = vmul.f32 %v13456_v39, %v13340_v15  ;;  %v5035_v31 = vld [vmem:[%s14456_s6 + $0x20] sm:$0xff]  ;;  %v5036_v6 = vld [vmem:[%s14456_s6 + $0x28] sm:$0xff] }
 0x760   :  { %5078 = vmatpush1.msra.mxu1 %v13473_v5  ;;  %v13514_v13 = vmax.f32 %v4998_v56, 0.0  ;;  %v4996_v42 = vadd.f32 %v13461_v40, %v4968_v26  ;;  %v4966_v37 = vmul.f32 %v13456_v39, %v13337_v14  ;;  %v4965_v15 = vmul.f32 %v13456_v39, %v13334_v50 }
 0x761   :  { %5079 = vmatprep.subr.mxu1 %v14630_v59  ;;  %v13521_v47 = vmax.f32 %v4997_v4, 0.0  ;;  %v4995_v48 = vadd.f32 %v13461_v40, %v4967_v20  ;;  %v4964_v14 = vmul.f32 %v13456_v39, %v13331_v44  ;;  %v4963_v50 = vmul.f32 %v13456_v39, %v13328_v45  ;;  %v5037_v4 = vld [vmem:[%s14456_s6 + $0x30] sm:$0x11] }
 0x762   :  { %5080 = vmatpush1.msra.mxu1 %v13479_v1  ;;  %v13528_v18 = vmax.f32 %v4996_v42, 0.0  ;;  %v4994_v46 = vadd.f32 %v13461_v40, %v4966_v37  ;;  %v4993_v58 = vadd.f32 %v13461_v40, %v4965_v15  ;;  %v4962_v44 = vmul.f32 %v13456_v39, %v13325_v9  ;;  %v8135_v37 = vld [vmem:[%s14456_s6 + $0x38] sm:$0xff] }
 0x763   :  { %5081 = vmatprep.subr.mxu1 %v14630_v59  ;;  %v13535_v25 = vmax.f32 %v4995_v48, 0.0  ;;  %v4992_v63 = vadd.f32 %v13461_v40, %v4964_v14  ;;  %v4991_v32 = vadd.f32 %v13461_v40, %v4963_v50  ;;  %v4961_v45 = vmul.f32 %v13456_v39, %v13322_v10  ;;  %v8137_v50 = vld [vmem:[%s14456_s6 + $0x48] sm:$0xff] }
 0x764   :  { %5082 = vmatpush1.msra.mxu1 %v13486_v12  ;;  %v13542_v8 = vmax.f32 %v4994_v46, 0.0  ;;  %v13549_v2 = vmax.f32 %v4993_v58, 0.0  ;;  %v4981_v54 = vmul.f32 %v13456_v39, %v13374_v21  ;;  %v4990_v9 = vadd.f32 %v13461_v40, %v4962_v44  ;;  %v8136_v46 = vld [vmem:[%s14456_s6 + $0x40] sm:$0xff] }
 0x765   :  { %5083 = vmatprep.subr.mxu1 %v14630_v59  ;;  %v13558_v52 = vmax.f32 %v4992_v63, 0.0  ;;  %v13563_v23 = vmax.f32 %v4991_v32, 0.0  ;;  %v4989_v17 = vadd.f32 %v13461_v40, %v4961_v45  ;;  %v4980_v10 = vmul.f32 %v13456_v39, %v13372_v24  ;;  %v8138_v32 = vld [vmem:[%s14456_s6 + $0x50] sm:$0xff] }
 0x766   :  { %5084 = vmatpush1.msra.mxu1 %v13493_v16  ;;  %v5009_v21 = vadd.f32 %v13461_v40, %v4981_v54  ;;  %v13571_v28 = vmax.f32 %v4990_v9, 0.0  ;;  %v4979_v11 = vmul.f32 %v13456_v39, %v13370_v3  ;;  %v4978_v24 = vmul.f32 %v13456_v39, %v13368_v49  ;;  %v8139_v9 = vld [vmem:[%s14456_s6 + $0x58] sm:$0xff] }
 0x767   :  { %5085 = vmatprep.subr.mxu1 %v14630_v59  ;;  %v13577_v22 = vmax.f32 %v4989_v17, 0.0  ;;  %v5008_v19 = vadd.f32 %v13461_v40, %v4980_v10  ;;  %v4977_v3 = vmul.f32 %v13456_v39, %v13366_v29  ;;  %v5032_v29 = vld [vmem:[%s14456_s6 + $0x8] sm:$0xff]  ;;  %v5038_v35 = vunpack.c.l.bf16 %v13392_v60 }
 0x768   :  { %5086 = vmatpush1.msra.mxu1 %v13500_v7  ;;  %v13583_v30 = vmax.f32 %v5009_v21, 0.0  ;;  %v5007_v53 = vadd.f32 %v13461_v40, %v4979_v11  ;;  %v5006_v49 = vadd.f32 %v13461_v40, %v4978_v24  ;;  %v5041_v0 = vunpack.c.h.bf16 %v5032_v29  ;;  %v8140_v21 = vld [vmem:[%s14456_s6 + $0x60] sm:$0xff]  ;;  %v8141_v24 = vld [vmem:[%s14456_s6 + $0x68] sm:$0x11] }
 0x769   :  { %5087 = vmatprep.subr.mxu1 %v14630_v59  ;;  %v13592_v41 = vmax.f32 %v5008_v19, 0.0  ;;  %v5005_v57 = vadd.f32 %v13461_v40, %v4977_v3  ;;  %v5033_v40 = vld [vmem:[%s14456_s6 + $0x10] sm:$0xff]  ;;  %v5040_v62 = vunpack.c.l.bf16 %v5032_v29  ;;  %v5045_v43 = vunpack.c.h.bf16 %v5034_v55  ;;  %v5177_v29 = vld [vmem:[%s14457_s7] sm:$0xff] }
 0x76a   :  { %5088 = vmatpush1.msra.mxu1 %v13507_v33  ;;  %v13597_v51 = vmax.f32 %v5007_v53, 0.0  ;;  %v13605_v39 = vmax.f32 %v5006_v49, 0.0  ;;  %v5043_v60 = vunpack.c.h.bf16 %v5033_v40  ;;  %v5042_v61 = vunpack.c.l.bf16 %v5033_v40 }
 0x76b   :  { %5089 = vmatprep.subr.mxu1 %v14630_v59  ;;  %v13610_v38 = vmax.f32 %v5005_v57, 0.0  ;;  %v5044_v27 = vunpack.c.l.bf16 %v5034_v55  ;;  %v5047_v36 = vunpack.c.h.bf16 %v5035_v31  ;;  %v5046_v56 = vunpack.c.l.bf16 %v5035_v31  ;;  %v5178_v57 = vld [vmem:[%s14457_s7 + $0x8] sm:$0xff] }
 0x76c   :  { %5090 = vmatpush1.msra.mxu1 %v13514_v13  ;;  %v5049_v26 = vunpack.c.h.bf16 %v5036_v6  ;;  %v5048_v20 = vunpack.c.l.bf16 %v5036_v6  ;;  %v5051_v42 = vunpack.c.h.bf16 %v5037_v4  ;;  %v5050_v48 = vunpack.c.l.bf16 %v5037_v4 }
 0x76d   :  { %5091 = vmatprep.subr.mxu1 %v14630_v59  ;;  %v5188_v15 = vunpack.c.h.bf16 %v8135_v37  ;;  %v5187_v14 = vunpack.c.l.bf16 %v8135_v37  ;;  %v5190_v58 = vunpack.c.h.bf16 %v8136_v46  ;;  %v5189_v63 = vunpack.c.l.bf16 %v8136_v46 }
 0x76e   :  { %5092 = vmatpush1.msra.mxu1 %v13521_v47  ;;  %v5192_v44 = vunpack.c.h.bf16 %v8137_v50  ;;  %v5191_v45 = vunpack.c.l.bf16 %v8137_v50  ;;  %v5194_v54 = vunpack.c.h.bf16 %v8138_v32  ;;  %v5193_v17 = vunpack.c.l.bf16 %v8138_v32 }
 0x76f   :  { %5093 = vmatprep.subr.mxu1 %v14630_v59  ;;  %v5196_v10 = vunpack.c.h.bf16 %v8139_v9  ;;  %v5195_v11 = vunpack.c.l.bf16 %v8139_v9  ;;  %v5198_v19 = vunpack.c.h.bf16 %v8140_v21  ;;  %v5197_v53 = vunpack.c.l.bf16 %v8140_v21 }
 0x770   :  { %5094 = vmatpush1.msra.mxu1 %v13528_v18  ;;  %v5200_v3 = vunpack.c.h.bf16 %v8141_v24  ;;  %v5199_v49 = vunpack.c.l.bf16 %v8141_v24 }
 0x771   :  { %5095 = vmatprep.subr.mxu1 %v14630_v59 }
 0x772   :  { %5096 = vmatpush1.msra.mxu1 %v13535_v25 }
 0x773   :  { %5097 = vmatprep.subr.mxu1 %v14630_v59 }
 0x774   :  { %5098 = vmatpush1.msra.mxu1 %v13542_v8 }
 0x775   :  { %5099 = vmatprep.subr.mxu1 %v14630_v59 }
 0x776   :  { %5100 = vmatpush1.msra.mxu1 %v13549_v2 }
 0x777   :  { %5101 = vmatprep.subr.mxu1 %v14630_v59 }
 0x778   :  { %5102 = vmatpush1.msra.mxu1 %v13558_v52 }
 0x779   :  { %5103 = vmatprep.subr.mxu1 %v14630_v59 }
 0x77a   :  { %5104 = vmatpush1.msra.mxu1 %v13563_v23 }
 0x77b   :  { %5105 = vmatprep.subr.mxu1 %v14630_v59 }
 0x77c   :  { %5106 = vmatpush1.msra.mxu1 %v13571_v28 }
 0x77d   :  { %5107 = vmatprep.subr.mxu1 %v14630_v59 }
 0x77e   :  { %5108 = vmatpush1.msra.mxu1 %v13577_v22 }
 0x77f   :  { %5131 = vmatprep.subr.mxu1 %v14630_v59 }
 0x780   :  { %8127 = vmatpush2.msk.msra.mxu1 %vm1088_vm3, %v13583_v30 }
 0x781   :  { %5133 = vmatprep.subr.mxu1 %v14630_v59 }
 0x782   :  { %5134 = vmatpush2.msra.mxu1 %v13592_v41 }
 0x783   :  { %5135 = vmatprep.subr.mxu1 %v14630_v59 }
 0x784   :  { %5136 = vmatpush2.msra.mxu1 %v13597_v51 }
 0x785   :  { %5137 = vmatprep.subr.mxu1 %v14630_v59 }
 0x786   :  { %5138 = vmatpush2.msra.mxu1 %v13605_v39 }
 0x787   :  { %5139 = vmatprep.subr.mxu1 %v14630_v59 }
 0x788   :  { %5140 = vmatpush2.msra.mxu1 %v13610_v38 }
 0x789   :  { %5222 = vmatprep.subr.mxu1 %v14630_v59  ;;  %5142 = vmatmul.mubr.f32.vlgmr.msra.gmra.mxu1 %v5038_v35  ;;  %v8150_v35 = vld [vmem:[%s14457_s7 + $0x10] sm:$0xff] }
 0x78a   :  { %5223 = vmatpush1.msra.mxu1 %v13473_v5  ;;  %8129 = vmatprep.mubr.msk.f32.mxu1 %vm5052_vm8, %v5041_v0 }
 0x78b   :  { %5224 = vmatprep.subr.mxu1 %v14630_v59  ;;  %9562 = vmatpush3.msra.mxu0 %v8150_v35 }
 0x78c   :  { %5225 = vmatpush1.msra.mxu1 %v13479_v1  ;;  %5610 = vmatprep.subr.mxu0 %v14630_v59 }
 0x78d   :  { %5226 = vmatprep.subr.mxu1 %v14630_v59  ;;  %5147 = vmatmul.mubr.f32.gmra.mxu1 %v5040_v62 }
 0x78e   :  { %5227 = vmatpush1.msra.mxu1 %v13486_v12  ;;  %8130 = vmatprep.mubr.msk.f32.mxu1 %vm5052_vm8, %v5043_v60 }
 0x78f   :  { %5228 = vmatprep.subr.mxu1 %v14630_v59 }
 0x790   :  { %5229 = vmatpush1.msra.mxu1 %v13493_v16 }
 0x791   :  { %5230 = vmatprep.subr.mxu1 %v14630_v59  ;;  %5152 = vmatmul.mubr.f32.gmra.mxu1 %v5042_v61 }
 0x792   :  { %5231 = vmatpush1.msra.mxu1 %v13500_v7  ;;  %8131 = vmatprep.mubr.msk.f32.mxu1 %vm5052_vm8, %v5045_v43 }
 0x793   :  { %5232 = vmatprep.subr.mxu1 %v14630_v59 }
 0x794   :  { %5233 = vmatpush1.msra.mxu1 %v13507_v33 }
 0x795   :  { %5234 = vmatprep.subr.mxu1 %v14630_v59  ;;  %5157 = vmatmul.mubr.f32.gmra.mxu1 %v5044_v27 }
 0x796   :  { %5235 = vmatpush1.msra.mxu1 %v13514_v13  ;;  %8132 = vmatprep.mubr.msk.f32.mxu1 %vm5052_vm8, %v5047_v36 }
 0x797   :  { %5236 = vmatprep.subr.mxu1 %v14630_v59 }
 0x798   :  { %5237 = vmatpush1.msra.mxu1 %v13521_v47 }
 0x799   :  { %5238 = vmatprep.subr.mxu1 %v14630_v59  ;;  %5162 = vmatmul.mubr.f32.gmra.mxu1 %v5046_v56 }
 0x79a   :  { %5239 = vmatpush1.msra.mxu1 %v13528_v18  ;;  %8133 = vmatprep.mubr.msk.f32.mxu1 %vm5052_vm8, %v5049_v26 }
 0x79b   :  { %5240 = vmatprep.subr.mxu1 %v14630_v59 }
 0x79c   :  { %5241 = vmatpush1.msra.mxu1 %v13535_v25 }
 0x79d   :  { %5242 = vmatprep.subr.mxu1 %v14630_v59  ;;  %5167 = vmatmul.mubr.f32.gmra.mxu1 %v5048_v20 }
 0x79e   :  { %5243 = vmatpush1.msra.mxu1 %v13542_v8  ;;  %8134 = vmatprep.mubr.msk.f32.mxu1 %vm5052_vm8, %v5051_v42 }
 0x79f   :  { %5244 = vmatprep.subr.mxu1 %v14630_v59 }
 0x7a0   :  { %5245 = vmatpush1.msra.mxu1 %v13549_v2 }
 0x7a1   :  { %5246 = vmatprep.subr.mxu1 %v14630_v59  ;;  %5172 = vmatmul.mubr.f32.gmra.mxu1 %v5050_v48 }
 0x7a2   :  { %5247 = vmatpush1.msra.mxu1 %v13558_v52  ;;  %8143 = vmatprep.mubr.msk.f32.mxu1 %vm5052_vm8, %v5188_v15 }
 0x7a3   :  { %5248 = vmatprep.subr.mxu1 %v14630_v59 }
 0x7a4   :  { %5249 = vmatpush1.msra.mxu1 %v13563_v23 }
 0x7a5   :  { %5250 = vmatprep.subr.mxu1 %v14630_v59 }
 0x7a6   :  { %5251 = vmatpush1.msra.mxu1 %v13571_v28 }
 0x7a7   :  { %5252 = vmatprep.subr.mxu1 %v14630_v59 }
 0x7a8   :  { %5253 = vmatpush1.msra.mxu1 %v13577_v22 }
 0x7a9   :  { %5276 = vmatprep.subr.mxu1 %v14630_v59 }
 0x7aa   :  { %8142 = vmatpush2.msk.msra.mxu1 %vm1088_vm3, %v13583_v30 }
 0x7ab   :  { %5278 = vmatprep.subr.mxu1 %v14630_v59 }
 0x7ac   :  { %5279 = vmatpush2.msra.mxu1 %v13592_v41 }
 0x7ad   :  { %5280 = vmatprep.subr.mxu1 %v14630_v59 }
 0x7ae   :  { %5281 = vmatpush2.msra.mxu1 %v13597_v51 }
 0x7af   :  { %5282 = vmatprep.subr.mxu1 %v14630_v59 }
 0x7b0   :  { %5283 = vmatpush2.msra.mxu1 %v13605_v39 }
 0x7b1   :  { %5284 = vmatprep.subr.mxu1 %v14630_v59 }
 0x7b2   :  { %5285 = vmatpush2.msra.mxu1 %v13610_v38 }
 0x7b3   :  { %5287 = vmatmul.mubr.f32.vlgmr.msra.gmra.mxu1 %v5187_v14  ;;  %9584 = vmatprep.subr.mxu1 %v14630_v59 }
 0x7b4   :  { %8144 = vmatprep.mubr.msk.f32.mxu1 %vm5052_vm8, %v5190_v58  ;;  %9585 = vmatpush3.msra.mxu1 %v5178_v57 }
 0x7b5   :  { %9586 = vmatprep.subr.mxu1 %v14630_v59 }
 0x7b6   :  { %9587 = vmatpush3.msra.mxu1 %v5177_v29  ;;  %v8170_v29 = vld [vmem:[%s14456_s6 + $0x90] sm:$0xff] }
 0x7b7   :  { %5292 = vmatmul.mubr.f32.gmra.mxu1 %v5189_v63  ;;  %9609 = vmatprep.subr.mxu1 %v14630_v59 }
 0x7b8   :  { %8145 = vmatprep.mubr.msk.f32.mxu1 %vm5052_vm8, %v5192_v44  ;;  %v8166_v44 = vld [vmem:[%s14456_s6 + $0x70] sm:$0xff] }
 0x7b9   :  { %v5575_v21 = vunpack.c.l.bf16 %v8166_v44 }
 0x7bb   :  { %5297 = vmatmul.mubr.f32.gmra.mxu1 %v5191_v45 }
 0x7bc   :  { %8146 = vmatprep.mubr.msk.f32.mxu1 %vm5052_vm8, %v5194_v54  ;;  %v5576_v54 = vunpack.c.h.bf16 %v8166_v44 }
 0x7bf   :  { %5302 = vmatmul.mubr.f32.gmra.mxu1 %v5193_v17 }
 0x7c0   :  { %8147 = vmatprep.mubr.msk.f32.mxu1 %vm5052_vm8, %v5196_v10  ;;  %v8167_v10 = vld [vmem:[%s14456_s6 + $0x78] sm:$0xff] }
 0x7c1   :  { %v5577_v24 = vunpack.c.l.bf16 %v8167_v10 }
 0x7c3   :  { %5307 = vmatmul.mubr.f32.gmra.mxu1 %v5195_v11  ;;  %v5578_v11 = vunpack.c.h.bf16 %v8167_v10 }
 0x7c4   :  { %8148 = vmatprep.mubr.msk.f32.mxu1 %vm5052_vm8, %v5198_v19  ;;  %v8168_v19 = vld [vmem:[%s14456_s6 + $0x80] sm:$0xff] }
 0x7c7   :  { %5312 = vmatmul.mubr.f32.gmra.mxu1 %v5197_v53  ;;  %v5580_v53 = vunpack.c.h.bf16 %v8168_v19 }
 0x7c8   :  { %8149 = vmatprep.mubr.msk.f32.mxu1 %vm5052_vm8, %v5200_v3  ;;  %v8169_v3 = vld [vmem:[%s14456_s6 + $0x88] sm:$0xff] }
 0x7c9   :  { %v5582_v57 = vunpack.c.h.bf16 %v8169_v3  ;;  %v5581_v35 = vunpack.c.l.bf16 %v8169_v3 }
 0x7cb   :  { %5317 = vmatmul.mubr.f32.gmra.mxu1 %v5199_v49  ;;  %v5579_v49 = vunpack.c.l.bf16 %v8168_v19 }
 0x7cc   :  { %9588 = vmatprep.mubr.msk.f32.mxu1 %vm9981_vm1, %v14630_v59 }
 0x849   :  { %v5143_v0 = vpop.f32.mrf.mxu1 }
 0x84a   :  { %9589 = vmatmul.mubr.msk.f32.vlgmr.msra.gmra.mxu1 %vm4810_vm6, %v5143_v0  ;;  %v5584_v0 = vunpack.c.h.bf16 %v8170_v29 }
 0x84b   :  { %v5145_v40 = vpop.f32.mrf.mxu1  ;;  %9591 = vmatprep.mubr.msk.f32.mxu1 %vm9981_vm1, %v14630_v59 }
 0x84c   :  { %v8171_v40 = vld [vmem:[%s14456_s6 + $0x98] sm:$0xff] }
 0x84d   :  { %v5148_v62 = vpop.f32.mrf.mxu1 }
 0x84e   :  { %9592 = vmatmul.mubr.msk.f32.gmra.mxu1 %vm4810_vm6, %v5148_v62  ;;  %v5583_v62 = vunpack.c.l.bf16 %v8170_v29 }
 0x84f   :  { %v5150_v60 = vpop.f32.mrf.mxu1  ;;  %9594 = vmatprep.mubr.msk.f32.mxu1 %vm9981_vm1, %v14630_v59 }
 0x850   :  { %v5586_v60 = vunpack.c.h.bf16 %v8171_v40 }
 0x851   :  { %v5153_v55 = vpop.f32.mrf.mxu1 }
 0x852   :  { %9595 = vmatmul.mubr.msk.f32.gmra.mxu1 %vm4810_vm6, %v5153_v55  ;;  %v8172_v55 = vld [vmem:[%s14456_s6 + $0xa0] sm:$0x11] }
 0x853   :  { %v5155_v61 = vpop.f32.mrf.mxu1  ;;  %9597 = vmatprep.mubr.msk.f32.mxu1 %vm9981_vm1, %v14630_v59 }
 0x854   :  { %v5585_v61 = vunpack.c.l.bf16 %v8171_v40 }
 0x855   :  { %v5158_v43 = vpop.f32.mrf.mxu1 }
 0x856   :  { %9598 = vmatmul.mubr.msk.f32.gmra.mxu1 %vm4810_vm6, %v5158_v43  ;;  %v5588_v43 = vunpack.c.h.bf16 %v8172_v55 }
 0x857   :  { %v5160_v31 = vpop.f32.mrf.mxu1  ;;  %9600 = vmatprep.mubr.msk.f32.mxu1 %vm9981_vm1, %v14630_v59 }
 0x858   :  { %v5587_v31 = vunpack.c.l.bf16 %v8172_v55 }
 0x859   :  { %v5163_v27 = vpop.f32.mrf.mxu1 }
 0x85a   :  { %9601 = vmatmul.mubr.msk.f32.gmra.mxu1 %vm4810_vm6, %v5163_v27  ;;  %v8182_v27 = vld [vmem:[%s14457_s7 + $0x28] sm:$0xff] }
 0x85b   :  { %v5165_v36 = vpop.f32.mrf.mxu1  ;;  %9603 = vmatprep.mubr.msk.f32.mxu1 %vm9981_vm1, %v14630_v59  ;;  %9610 = vmatpush3.msra.mxu1 %v8182_v27 }
 0x85c   :  { %v8181_v36 = vld [vmem:[%s14457_s7 + $0x20] sm:$0xff]  ;;  %9611 = vmatprep.subr.mxu1 %v14630_v59 }
 0x85d   :  { %v5168_v6 = vpop.f32.mrf.mxu1  ;;  %9612 = vmatpush3.msra.mxu1 %v8181_v36 }
 0x85e   :  { %9604 = vmatmul.mubr.msk.f32.gmra.mxu1 %vm4810_vm6, %v5168_v6  ;;  %5884 = vmatprep.subr.mxu1 %v14630_v59 }
 0x85f   :  { %v5170_v56 = vpop.f32.mrf.mxu1  ;;  %9606 = vmatprep.mubr.msk.f32.mxu1 %vm9981_vm1, %v14630_v59 }
 0x861   :  { %v5173_v26 = vpop.f32.mrf.mxu1 }
 0x862   :  { %9607 = vmatmul.mubr.msk.f32.gmra.mxu1 %vm4810_vm6, %v5173_v26 }
 0x863   :  { %v5175_v4 = vpop.f32.mrf.mxu1  ;;  %9613 = vmatprep.mubr.msk.f32.mxu1 %vm9981_vm1, %v14630_v59 }
 0x873   :  { %v5288_v20 = vpop.f32.mrf.mxu1 }
 0x874   :  { %9564 = vmatmul.mubr.msk.f32.vlgmr.msra.gmra.mxu0 %vm4810_vm6, %v5288_v20 }
 0x875   :  { %5611 = vmatpush1.msra.mxu0 %v13473_v5  ;;  %v5290_v42 = vpop.f32.mrf.mxu1  ;;  %9566 = vmatprep.mubr.msk.f32.mxu0 %vm9981_vm1, %v14630_v59 }
 0x876   :  { %5612 = vmatprep.subr.mxu0 %v14630_v59 }
 0x877   :  { %5613 = vmatpush1.msra.mxu0 %v13479_v1  ;;  %v5293_v37 = vpop.f32.mrf.mxu1 }
 0x878   :  { %5614 = vmatprep.subr.mxu0 %v14630_v59  ;;  %9567 = vmatmul.mubr.msk.f32.gmra.mxu0 %vm4810_vm6, %v5293_v37 }
 0x879   :  { %5615 = vmatpush1.msra.mxu0 %v13486_v12  ;;  %v5295_v48 = vpop.f32.mrf.mxu1  ;;  %9569 = vmatprep.mubr.msk.f32.mxu0 %vm9981_vm1, %v14630_v59 }
 0x87a   :  { %5616 = vmatprep.subr.mxu0 %v14630_v59 }
 0x87b   :  { %5617 = vmatpush1.msra.mxu0 %v13493_v16  ;;  %v5298_v15 = vpop.f32.mrf.mxu1 }
 0x87c   :  { %5618 = vmatprep.subr.mxu0 %v14630_v59  ;;  %9570 = vmatmul.mubr.msk.f32.gmra.mxu0 %vm4810_vm6, %v5298_v15 }
 0x87d   :  { %5619 = vmatpush1.msra.mxu0 %v13500_v7  ;;  %v5300_v46 = vpop.f32.mrf.mxu1  ;;  %9572 = vmatprep.mubr.msk.f32.mxu0 %vm9981_vm1, %v14630_v59 }
 0x87e   :  { %5620 = vmatprep.subr.mxu0 %v14630_v59 }
 0x87f   :  { %5621 = vmatpush1.msra.mxu0 %v13507_v33  ;;  %v5303_v14 = vpop.f32.mrf.mxu1 }
 0x880   :  { %5622 = vmatprep.subr.mxu0 %v14630_v59  ;;  %9573 = vmatmul.mubr.msk.f32.gmra.mxu0 %vm4810_vm6, %v5303_v14 }
 0x881   :  { %5623 = vmatpush1.msra.mxu0 %v13514_v13  ;;  %v5305_v58 = vpop.f32.mrf.mxu1  ;;  %9575 = vmatprep.mubr.msk.f32.mxu0 %vm9981_vm1, %v14630_v59 }
 0x882   :  { %5624 = vmatprep.subr.mxu0 %v14630_v59 }
 0x883   :  { %5625 = vmatpush1.msra.mxu0 %v13521_v47  ;;  %v5308_v50 = vpop.f32.mrf.mxu1 }
 0x884   :  { %5626 = vmatprep.subr.mxu0 %v14630_v59  ;;  %9576 = vmatmul.mubr.msk.f32.gmra.mxu0 %vm4810_vm6, %v5308_v50 }
 0x885   :  { %5627 = vmatpush1.msra.mxu0 %v13528_v18  ;;  %v5310_v63 = vpop.f32.mrf.mxu1  ;;  %9578 = vmatprep.mubr.msk.f32.mxu0 %vm9981_vm1, %v14630_v59 }
 0x886   :  { %5628 = vmatprep.subr.mxu0 %v14630_v59 }
 0x887   :  { %5629 = vmatpush1.msra.mxu0 %v13535_v25  ;;  %v5313_v32 = vpop.f32.mrf.mxu1 }
 0x888   :  { %5630 = vmatprep.subr.mxu0 %v14630_v59  ;;  %9579 = vmatmul.mubr.msk.f32.gmra.mxu0 %vm4810_vm6, %v5313_v32 }
 0x889   :  { %5631 = vmatpush1.msra.mxu0 %v13542_v8  ;;  %v5315_v45 = vpop.f32.mrf.mxu1  ;;  %9581 = vmatprep.mubr.msk.f32.mxu0 %vm9981_vm1, %v14630_v59 }
 0x88a   :  { %5632 = vmatprep.subr.mxu0 %v14630_v59 }
 0x88b   :  { %5633 = vmatpush1.msra.mxu0 %v13549_v2  ;;  %v5318_v9 = vpop.f32.mrf.mxu1 }
 0x88c   :  { %5634 = vmatprep.subr.mxu0 %v14630_v59  ;;  %9582 = vmatmul.mubr.msk.f32.gmra.mxu0 %vm4810_vm6, %v5318_v9 }
 0x88d   :  { %5635 = vmatpush1.msra.mxu0 %v13558_v52  ;;  %8174 = vmatprep.mubr.msk.f32.mxu0 %vm5052_vm8, %v5576_v54  ;;  %v5320_v17 = vpop.f32.mrf.mxu1 }
 0x88e   :  { %5636 = vmatprep.subr.mxu0 %v14630_v59 }
 0x88f   :  { %5637 = vmatpush1.msra.mxu0 %v13563_v23 }
 0x890   :  { %5638 = vmatprep.subr.mxu0 %v14630_v59 }
 0x891   :  { %5639 = vmatpush1.msra.mxu0 %v13571_v28 }
 0x892   :  { %5640 = vmatprep.subr.mxu0 %v14630_v59 }
 0x893   :  { %5641 = vmatpush1.msra.mxu0 %v13577_v22 }
 0x894   :  { %5664 = vmatprep.subr.mxu0 %v14630_v59 }
 0x895   :  { %8173 = vmatpush2.msk.msra.mxu0 %vm1088_vm3, %v13583_v30 }
 0x896   :  { %5666 = vmatprep.subr.mxu0 %v14630_v59 }
 0x897   :  { %5667 = vmatpush2.msra.mxu0 %v13592_v41 }
 0x898   :  { %5668 = vmatprep.subr.mxu0 %v14630_v59 }
 0x899   :  { %5669 = vmatpush2.msra.mxu0 %v13597_v51 }
 0x89a   :  { %5670 = vmatprep.subr.mxu0 %v14630_v59 }
 0x89b   :  { %5671 = vmatpush2.msra.mxu0 %v13605_v39 }
 0x89c   :  { %5672 = vmatprep.subr.mxu0 %v14630_v59 }
 0x89d   :  { %5673 = vmatpush2.msra.mxu0 %v13610_v38 }
 0x89e   :  { %5675 = vmatmul.mubr.f32.vlgmr.msra.gmra.mxu0 %v5575_v21  ;;  %9634 = vmatprep.subr.mxu0 %v14630_v59 }
 0x89f   :  { %8175 = vmatprep.mubr.msk.f32.mxu0 %vm5052_vm8, %v5578_v11 }
 0x8a2   :  { %5680 = vmatmul.mubr.f32.gmra.mxu0 %v5577_v24 }
 0x8a3   :  { %8176 = vmatprep.mubr.msk.f32.mxu0 %vm5052_vm8, %v5580_v53 }
 0x8a6   :  { %5685 = vmatmul.mubr.f32.gmra.mxu0 %v5579_v49 }
 0x8a7   :  { %8177 = vmatprep.mubr.msk.f32.mxu0 %vm5052_vm8, %v5582_v57 }
 0x8aa   :  { %5690 = vmatmul.mubr.f32.gmra.mxu0 %v5581_v35 }
 0x8ab   :  { %8178 = vmatprep.mubr.msk.f32.mxu0 %vm5052_vm8, %v5584_v0 }
 0x8ae   :  { %5695 = vmatmul.mubr.f32.gmra.mxu0 %v5583_v62 }
 0x8af   :  { %8179 = vmatprep.mubr.msk.f32.mxu0 %vm5052_vm8, %v5586_v60 }
 0x8b2   :  { %5700 = vmatmul.mubr.f32.gmra.mxu0 %v5585_v61 }
 0x8b3   :  { %8180 = vmatprep.mubr.msk.f32.mxu0 %vm5052_vm8, %v5588_v43 }
 0x8b6   :  { %5705 = vmatmul.mubr.f32.gmra.mxu0 %v5587_v31 }
 0x8b7   :  { %9638 = vmatprep.mubr.msk.f32.mxu0 %vm9981_vm1, %v14630_v59 }
 0x90a   :  { %v5533_v6 = vpop.f32.mrf.mxu1 }
 0x90c   :  { %v9590_v56 = vpop.f32.mrf.mxu1 }
 0x90d   :  { %v8195_v56 = vld [vmem:[%s14456_s6 + $0xd0] sm:$0xff] }
 0x90e   :  { %v5538_v26 = vpop.f32.mrf.mxu1 }
 0x910   :  { %v9593_v4 = vpop.f32.mrf.mxu1 }
 0x911   :  { %v5860_v4 = vunpack.c.h.bf16 %v8195_v56 }
 0x912   :  { %v5543_v20 = vpop.f32.mrf.mxu1 }
 0x914   :  { %v9596_v42 = vpop.f32.mrf.mxu1 }
 0x915   :  { %v5859_v42 = vunpack.c.l.bf16 %v8195_v56 }
 0x916   :  { %v5548_v37 = vpop.f32.mrf.mxu1 }
 0x918   :  { %v9599_v48 = vpop.f32.mrf.mxu1 }
 0x91a   :  { %v5553_v15 = vpop.f32.mrf.mxu1 }
 0x91c   :  { %v9602_v46 = vpop.f32.mrf.mxu1 }
 0x91d   :  { %v8205_v46 = vld [vmem:[%s14457_s7 + $0x30] sm:$0xff] }
 0x91e   :  { %v5558_v14 = vpop.f32.mrf.mxu1 }
 0x920   :  { %v9605_v58 = vpop.f32.mrf.mxu1 }
 0x922   :  { %v5563_v50 = vpop.f32.mrf.mxu1 }
 0x924   :  { %v9608_v63 = vpop.f32.mrf.mxu1 }
 0x934   :  { %v5412_v44 = vpop.f32.mrf.mxu0 }
 0x935   :  { %v13842_v32 = vadd.f32 %v5533_v6, %v5412_v44 }
 0x936   :  { %v9565_v45 = vpop.f32.mrf.mxu0 }
 0x938   :  { %v5417_v54 = vpop.f32.mrf.mxu0 }
 0x939   :  { %v13844_v9 = vadd.f32 %v5538_v26, %v5417_v54 }
 0x93a   :  { %v9568_v17 = vpop.f32.mrf.mxu0 }
 0x93c   :  { %v5422_v10 = vpop.f32.mrf.mxu0 }
 0x93d   :  { %v13846_v21 = vadd.f32 %v5543_v20, %v5422_v10  ;;  %v8196_v20 = vld [vmem:[%s14456_s6 + $0xd8] sm:$0x11] }
 0x93e   :  { %v9571_v11 = vpop.f32.mrf.mxu0  ;;  %v5861_v48 = vunpack.c.l.bf16 %v8196_v20 }
 0x940   :  { %v5427_v19 = vpop.f32.mrf.mxu0 }
 0x941   :  { %v13848_v24 = vadd.f32 %v5548_v37, %v5427_v19  ;;  %v5862_v37 = vunpack.c.h.bf16 %v8196_v20 }
 0x942   :  { %v9574_v53 = vpop.f32.mrf.mxu0 }
 0x944   :  { %v5432_v3 = vpop.f32.mrf.mxu0 }
 0x945   :  { %v13850_v49 = vadd.f32 %v5553_v15, %v5432_v3  ;;  %v8206_v15 = vld [vmem:[%s14457_s7 + $0x38] sm:$0xff] }
 0x946   :  { %v9577_v57 = vpop.f32.mrf.mxu0  ;;  %9635 = vmatpush3.msra.mxu0 %v8206_v15 }
 0x947   :  { %9636 = vmatprep.subr.mxu0 %v14630_v59 }
 0x948   :  { %v5437_v29 = vpop.f32.mrf.mxu0  ;;  %9637 = vmatpush3.msra.mxu0 %v8205_v46 }
 0x949   :  { %v13852_v35 = vadd.f32 %v5558_v14, %v5437_v29  ;;  %9659 = vmatprep.subr.mxu0 %v14630_v59 }
 0x94a   :  { %v9580_v0 = vpop.f32.mrf.mxu0 }
 0x94c   :  { %v5442_v40 = vpop.f32.mrf.mxu0 }
 0x94d   :  { %v13854_v62 = vadd.f32 %v5563_v50, %v5442_v40 }
 0x94e   :  { %v9583_v60 = vpop.f32.mrf.mxu0 }
 0x95e   :  { %v5676_v55 = vpop.f32.mrf.mxu0 }
 0x95f   :  { %9614 = vmatmul.mubr.msk.f32.vlgmr.msra.gmra.mxu1 %vm4810_vm6, %v5676_v55 }
 0x960   :  { %5885 = vmatpush1.msra.mxu1 %v13473_v5  ;;  %v5678_v61 = vpop.f32.mrf.mxu0  ;;  %9616 = vmatprep.mubr.msk.f32.mxu1 %vm9981_vm1, %v14630_v59 }
 0x961   :  { %5886 = vmatprep.subr.mxu1 %v14630_v59 }
 0x962   :  { %5887 = vmatpush1.msra.mxu1 %v13479_v1  ;;  %v5681_v43 = vpop.f32.mrf.mxu0 }
 0x963   :  { %5888 = vmatprep.subr.mxu1 %v14630_v59  ;;  %9617 = vmatmul.mubr.msk.f32.gmra.mxu1 %vm4810_vm6, %v5681_v43 }
 0x964   :  { %5889 = vmatpush1.msra.mxu1 %v13486_v12  ;;  %v5683_v31 = vpop.f32.mrf.mxu0  ;;  %9619 = vmatprep.mubr.msk.f32.mxu1 %vm9981_vm1, %v14630_v59 }
 0x965   :  { %5890 = vmatprep.subr.mxu1 %v14630_v59 }
 0x966   :  { %5891 = vmatpush1.msra.mxu1 %v13493_v16  ;;  %v5686_v5 = vpop.f32.mrf.mxu0 }
 0x967   :  { %5892 = vmatprep.subr.mxu1 %v14630_v59  ;;  %9620 = vmatmul.mubr.msk.f32.gmra.mxu1 %vm4810_vm6, %v5686_v5 }
 0x968   :  { %5893 = vmatpush1.msra.mxu1 %v13500_v7  ;;  %v5688_v1 = vpop.f32.mrf.mxu0  ;;  %9622 = vmatprep.mubr.msk.f32.mxu1 %vm9981_vm1, %v14630_v59 }
 0x969   :  { %5894 = vmatprep.subr.mxu1 %v14630_v59 }
 0x96a   :  { %5895 = vmatpush1.msra.mxu1 %v13507_v33  ;;  %v5691_v12 = vpop.f32.mrf.mxu0 }
 0x96b   :  { %5896 = vmatprep.subr.mxu1 %v14630_v59  ;;  %9623 = vmatmul.mubr.msk.f32.gmra.mxu1 %vm4810_vm6, %v5691_v12 }
 0x96c   :  { %5897 = vmatpush1.msra.mxu1 %v13514_v13  ;;  %v5693_v16 = vpop.f32.mrf.mxu0  ;;  %9625 = vmatprep.mubr.msk.f32.mxu1 %vm9981_vm1, %v14630_v59  ;;  %v8190_v13 = vld [vmem:[%s14456_s6 + $0xa8] sm:$0xff] }
 0x96d   :  { %5898 = vmatprep.subr.mxu1 %v14630_v59  ;;  %v5850_v27 = vunpack.c.h.bf16 %v8190_v13 }
 0x96e   :  { %5899 = vmatpush1.msra.mxu1 %v13521_v47  ;;  %v5696_v7 = vpop.f32.mrf.mxu0 }
 0x96f   :  { %5900 = vmatprep.subr.mxu1 %v14630_v59  ;;  %9626 = vmatmul.mubr.msk.f32.gmra.mxu1 %vm4810_vm6, %v5696_v7 }
 0x970   :  { %5901 = vmatpush1.msra.mxu1 %v13528_v18  ;;  %v5698_v33 = vpop.f32.mrf.mxu0  ;;  %9628 = vmatprep.mubr.msk.f32.mxu1 %vm9981_vm1, %v14630_v59 }
 0x971   :  { %5902 = vmatprep.subr.mxu1 %v14630_v59 }
 0x972   :  { %5903 = vmatpush1.msra.mxu1 %v13535_v25  ;;  %v5701_v47 = vpop.f32.mrf.mxu0 }
 0x973   :  { %5904 = vmatprep.subr.mxu1 %v14630_v59  ;;  %9629 = vmatmul.mubr.msk.f32.gmra.mxu1 %vm4810_vm6, %v5701_v47 }
 0x974   :  { %5905 = vmatpush1.msra.mxu1 %v13542_v8  ;;  %v5703_v18 = vpop.f32.mrf.mxu0  ;;  %9631 = vmatprep.mubr.msk.f32.mxu1 %vm9981_vm1, %v14630_v59  ;;  %v8191_v8 = vld [vmem:[%s14456_s6 + $0xb0] sm:$0xff] }
 0x975   :  { %5906 = vmatprep.subr.mxu1 %v14630_v59 }
 0x976   :  { %5907 = vmatpush1.msra.mxu1 %v13549_v2  ;;  %v5706_v36 = vpop.f32.mrf.mxu0  ;;  %v5849_v2 = vunpack.c.l.bf16 %v8190_v13 }
 0x977   :  { %5908 = vmatprep.subr.mxu1 %v14630_v59  ;;  %9632 = vmatmul.mubr.msk.f32.gmra.mxu1 %vm4810_vm6, %v5706_v36 }
 0x978   :  { %5909 = vmatpush1.msra.mxu1 %v13558_v52  ;;  %8198 = vmatprep.mubr.msk.f32.mxu1 %vm5052_vm8, %v5850_v27  ;;  %v5708_v25 = vpop.f32.mrf.mxu0  ;;  %v5852_v52 = vunpack.c.h.bf16 %v8191_v8 }
 0x979   :  { %5910 = vmatprep.subr.mxu1 %v14630_v59 }
 0x97a   :  { %5911 = vmatpush1.msra.mxu1 %v13563_v23  ;;  %v8192_v23 = vld [vmem:[%s14456_s6 + $0xb8] sm:$0xff] }
 0x97b   :  { %5912 = vmatprep.subr.mxu1 %v14630_v59 }
 0x97c   :  { %5913 = vmatpush1.msra.mxu1 %v13571_v28  ;;  %v5851_v28 = vunpack.c.l.bf16 %v8191_v8 }
 0x97d   :  { %5914 = vmatprep.subr.mxu1 %v14630_v59 }
 0x97e   :  { %5915 = vmatpush1.msra.mxu1 %v13577_v22  ;;  %v5854_v22 = vunpack.c.h.bf16 %v8192_v23 }
 0x97f   :  { %5938 = vmatprep.subr.mxu1 %v14630_v59 }
 0x980   :  { %8197 = vmatpush2.msk.msra.mxu1 %vm1088_vm3, %v13583_v30  ;;  %v8193_v30 = vld [vmem:[%s14456_s6 + $0xc0] sm:$0xff] }
 0x981   :  { %5940 = vmatprep.subr.mxu1 %v14630_v59 }
 0x982   :  { %5941 = vmatpush2.msra.mxu1 %v13592_v41  ;;  %v5853_v41 = vunpack.c.l.bf16 %v8192_v23 }
 0x983   :  { %5942 = vmatprep.subr.mxu1 %v14630_v59 }
 0x984   :  { %5943 = vmatpush2.msra.mxu1 %v13597_v51  ;;  %v5856_v51 = vunpack.c.h.bf16 %v8193_v30 }
 0x985   :  { %5944 = vmatprep.subr.mxu1 %v14630_v59 }
 0x986   :  { %5945 = vmatpush2.msra.mxu1 %v13605_v39  ;;  %v8194_v39 = vld [vmem:[%s14456_s6 + $0xc8] sm:$0xff] }
 0x987   :  { %5946 = vmatprep.subr.mxu1 %v14630_v59  ;;  %v5858_v6 = vunpack.c.h.bf16 %v8194_v39  ;;  %v5857_v26 = vunpack.c.l.bf16 %v8194_v39 }
 0x988   :  { %5947 = vmatpush2.msra.mxu1 %v13610_v38  ;;  %v5855_v38 = vunpack.c.l.bf16 %v8193_v30 }
 0x989   :  { %5949 = vmatmul.mubr.f32.vlgmr.msra.gmra.mxu1 %v5849_v2  ;;  %9682 = vmatprep.subr.mxu1 %v14630_v59 }
 0x98a   :  { %8199 = vmatprep.mubr.msk.f32.mxu1 %vm5052_vm8, %v5852_v52 }
 0x98d   :  { %5954 = vmatmul.mubr.f32.gmra.mxu1 %v5851_v28 }
 0x98e   :  { %8200 = vmatprep.mubr.msk.f32.mxu1 %vm5052_vm8, %v5854_v22 }
 0x991   :  { %5959 = vmatmul.mubr.f32.gmra.mxu1 %v5853_v41 }
 0x992   :  { %8201 = vmatprep.mubr.msk.f32.mxu1 %vm5052_vm8, %v5856_v51 }
 0x995   :  { %5964 = vmatmul.mubr.f32.gmra.mxu1 %v5855_v38 }
 0x996   :  { %8202 = vmatprep.mubr.msk.f32.mxu1 %vm5052_vm8, %v5858_v6 }
 0x999   :  { %5969 = vmatmul.mubr.f32.gmra.mxu1 %v5857_v26 }
 0x99a   :  { %8203 = vmatprep.mubr.msk.f32.mxu1 %vm5052_vm8, %v5860_v4 }
 0x99d   :  { %5974 = vmatmul.mubr.f32.gmra.mxu1 %v5859_v42 }
 0x99e   :  { %8204 = vmatprep.mubr.msk.f32.mxu1 %vm5052_vm8, %v5862_v37 }
 0x9a1   :  { %5979 = vmatmul.mubr.f32.gmra.mxu1 %v5861_v48 }
 0x9a2   :  { %9696 = vmatprep.mubr.msk.f32.mxu1 %vm9981_vm1, %v14630_v59 }
 0xa1f   :  { %v5800_v14 = vpop.f32.mrf.mxu1 }
 0xa20   :  { %v5834_v58 = vadd.f32 %v5800_v14, %v13842_v32 }
 0xa21   :  { %v9615_v50 = vpop.f32.mrf.mxu1 }
 0xa23   :  { %v5805_v63 = vpop.f32.mrf.mxu1 }
 0xa24   :  { %v5835_v44 = vadd.f32 %v5805_v63, %v13844_v9 }
 0xa25   :  { %v9618_v45 = vpop.f32.mrf.mxu1 }
 0xa27   :  { %v5810_v54 = vpop.f32.mrf.mxu1 }
 0xa28   :  { %v5836_v17 = vadd.f32 %v5810_v54, %v13846_v21 }
 0xa29   :  { %v9621_v10 = vpop.f32.mrf.mxu1 }
 0xa2b   :  { %v5815_v11 = vpop.f32.mrf.mxu1 }
 0xa2c   :  { %v5837_v19 = vadd.f32 %v5815_v11, %v13848_v24 }
 0xa2d   :  { %v9624_v53 = vpop.f32.mrf.mxu1 }
 0xa2f   :  { %v5820_v3 = vpop.f32.mrf.mxu1 }
 0xa30   :  { %v5838_v57 = vadd.f32 %v5820_v3, %v13850_v49 }
 0xa31   :  { %v9627_v29 = vpop.f32.mrf.mxu1 }
 0xa33   :  { %v5825_v0 = vpop.f32.mrf.mxu1 }
 0xa34   :  { %v5839_v32 = vadd.f32 %v5825_v0, %v13852_v35 }
 0xa35   :  { %v9630_v40 = vpop.f32.mrf.mxu1 }
 0xa37   :  { %v5830_v60 = vpop.f32.mrf.mxu1 }
 0xa38   :  { %v5840_v9 = vadd.f32 %v5830_v60, %v13854_v62 }
 0xa39   :  { %v9633_v55 = vpop.f32.mrf.mxu1 }
 0xa49   :  { %v5950_v61 = vpop.f32.mrf.mxu1 }
 0xa4a   :  { %9639 = vmatmul.mubr.msk.f32.vlgmr.msra.gmra.mxu0 %vm4810_vm6, %v5950_v61 }
 0xa4b   :  { %v5952_v21 = vpop.f32.mrf.mxu1  ;;  %9641 = vmatprep.mubr.msk.f32.mxu0 %vm9981_vm1, %v14630_v59 }
 0xa4d   :  { %v5955_v24 = vpop.f32.mrf.mxu1 }
 0xa4e   :  { %9642 = vmatmul.mubr.msk.f32.gmra.mxu0 %vm4810_vm6, %v5955_v24 }
 0xa4f   :  { %v5957_v49 = vpop.f32.mrf.mxu1  ;;  %9644 = vmatprep.mubr.msk.f32.mxu0 %vm9981_vm1, %v14630_v59 }
 0xa51   :  { %v5960_v35 = vpop.f32.mrf.mxu1 }
 0xa52   :  { %9645 = vmatmul.mubr.msk.f32.gmra.mxu0 %vm4810_vm6, %v5960_v35 }
 0xa53   :  { %v5962_v43 = vpop.f32.mrf.mxu1  ;;  %9647 = vmatprep.mubr.msk.f32.mxu0 %vm9981_vm1, %v14630_v59 }
 0xa55   :  { %v5965_v62 = vpop.f32.mrf.mxu1 }
 0xa56   :  { %9648 = vmatmul.mubr.msk.f32.gmra.mxu0 %vm4810_vm6, %v5965_v62 }
 0xa57   :  { %v5967_v31 = vpop.f32.mrf.mxu1  ;;  %9650 = vmatprep.mubr.msk.f32.mxu0 %vm9981_vm1, %v14630_v59 }
 0xa59   :  { %v5970_v5 = vpop.f32.mrf.mxu1 }
 0xa5a   :  { %9651 = vmatmul.mubr.msk.f32.gmra.mxu0 %vm4810_vm6, %v5970_v5 }
 0xa5b   :  { %v5972_v1 = vpop.f32.mrf.mxu1  ;;  %9653 = vmatprep.mubr.msk.f32.mxu0 %vm9981_vm1, %v14630_v59 }
 0xa5d   :  { %v5975_v12 = vpop.f32.mrf.mxu1 }
 0xa5e   :  { %9654 = vmatmul.mubr.msk.f32.gmra.mxu0 %vm4810_vm6, %v5975_v12 }
 0xa5f   :  { %v5977_v16 = vpop.f32.mrf.mxu1  ;;  %9656 = vmatprep.mubr.msk.f32.mxu0 %vm9981_vm1, %v14630_v59 }
 0xa61   :  { %v5980_v7 = vpop.f32.mrf.mxu1 }
 0xa62   :  { %9657 = vmatmul.mubr.msk.f32.gmra.mxu0 %vm4810_vm6, %v5980_v7 }
 0xa63   :  { %v5982_v33 = vpop.f32.mrf.mxu1  ;;  %9673 = vmatprep.mubr.msk.f32.mxu0 %vm9981_vm1, %v14630_v59 }
 0xb0a   :  { %v6074_v13 = vpop.f32.mrf.mxu0 }
 0xb0b   :  { %v6108_v18 = vadd.f32 %v6074_v13, %v5834_v58 }
 0xb0c   :  { %v9640_v47 = vpop.f32.mrf.mxu0 }
 0xb0d   :  { %v6116_v8 = vsel %vm6115_vm9, %v6108_v18, 0.0 }
 0xb0e   :  { %v6079_v27 = vpop.f32.mrf.mxu0 }
 0xb0f   :  { %v6109_v36 = vadd.f32 %v6079_v27, %v5835_v44 }
 0xb10   :  { %v9643_v25 = vpop.f32.mrf.mxu0 }
 0xb11   :  { %v6117_v2 = vsel %vm6115_vm9, %v6109_v36, 0.0 }
 0xb12   :  { %v6118_v52 = vadd.f32 %v6117_v2, %v6116_v8  ;;  %v6084_v23 = vpop.f32.mrf.mxu0 }
 0xb13   :  { %v6110_v28 = vadd.f32 %v6084_v23, %v5836_v17 }
 0xb14   :  { %v9646_v22 = vpop.f32.mrf.mxu0 }
 0xb15   :  { %v6119_v30 = vsel %vm6115_vm9, %v6110_v28, 0.0 }
 0xb16   :  { %v6120_v41 = vadd.f32 %v6119_v30, %v6118_v52  ;;  %v6089_v51 = vpop.f32.mrf.mxu0 }
 0xb17   :  { %v6111_v39 = vadd.f32 %v6089_v51, %v5837_v19  ;;  %v6172_v51 = vld [vmem:[%s14458_s8] sm:$0x1] }
 0xb18   :  { %v9649_v38 = vpop.f32.mrf.mxu0 }
 0xb19   :  { %v6121_v6 = vsel %vm6115_vm9, %v6111_v39, 0.0 }
 0xb1a   :  { %v6122_v56 = vadd.f32 %v6121_v6, %v6120_v41  ;;  %v6094_v26 = vpop.f32.mrf.mxu0 }
 0xb1b   :  { %v6112_v4 = vadd.f32 %v6094_v26, %v5838_v57 }
 0xb1c   :  { %v9652_v20 = vpop.f32.mrf.mxu0 }
 0xb1d   :  { %v6123_v42 = vsel %vm6115_vm9, %v6112_v4, 0.0 }
 0xb1e   :  { %v6124_v37 = vadd.f32 %v6123_v42, %v6122_v56  ;;  %v6099_v48 = vpop.f32.mrf.mxu0  ;;  %v8214_v56 = vld [vmem:[%s14459_s9] ss:$0 sm:$0xff] }
 0xb1f   :  { %v6113_v15 = vadd.f32 %v6099_v48, %v5839_v32 }
 0xb20   :  { %v9655_v46 = vpop.f32.mrf.mxu0 }
 0xb21   :  { %v6125_v14 = vsel %vm6115_vm9, %v6113_v15, 0.0 }
 0xb22   :  { %v6126_v58 = vadd.f32 %v6125_v14, %v6124_v37  ;;  %v6104_v50 = vpop.f32.mrf.mxu0 }
 0xb23   :  { %v6114_v63 = vadd.f32 %v6104_v50, %v5840_v9 }
 0xb24   :  { %v9658_v44 = vpop.f32.mrf.mxu0 }
 0xb25   :  { %v6128_v45 = vsel %vm6127_vm10, %v6114_v63, 0.0 }
 0xb26   :  { %v6129_v54 = vadd.f32 %v6128_v45, %v6126_v58 }
 0xb28   :  { %v6130_v17 = vrot.slane %v6129_v54, 4 }
 0xb2a   :  { %v6131_v10 = vadd.f32 %v6130_v17, %v6129_v54 }
 0xb2c   :  { %v6132_v11 = vrot.slane %v6131_v10, 2 }
 0xb2e   :  { %v6133_v19 = vadd.f32 %v6132_v11, %v6131_v10 }
 0xb30   :  { %v6134_v53 = vrot.slane %v6133_v19, 1 }
 0xb32   :  { %v6135_v3 = vadd.f32 %v6134_v53, %v6133_v19  ;;  %v8219_v53 = vld [vmem:[%s14460_s10 + $0xc] sm:$0xff]  }
 0xb34   :  { %v6137_v57 = vmul.f32 0.02, %v6135_v3  ;;  %v8305_v3 = vld [vmem:[%s14460_s10] sm:$0xff]  }
 0xb36   :  { %v6138_v29 = vsub.f32 %v6108_v18, %v6137_v57  ;;  %v6139_v0 = vsub.f32 %v6109_v36, %v6137_v57  ;;  %v6140_v32 = vsub.f32 %v6110_v28, %v6137_v57  ;;  %v6141_v40 = vsub.f32 %v6111_v39, %v6137_v57 }
 0xb37   :  { %v6142_v60 = vsub.f32 %v6112_v4, %v6137_v57  ;;  %v6143_v55 = vsub.f32 %v6113_v15, %v6137_v57  ;;  %v6144_v61 = vsub.f32 %v6114_v63, %v6137_v57 }
 0xb38   :  { %v6145_v21 = vmul.f32 %v6138_v29, %v6138_v29  ;;  %v6146_v9 = vmul.f32 %v6139_v0, %v6139_v0  ;;  %v6147_v24 = vmul.f32 %v6140_v32, %v6140_v32  ;;  %v6148_v49 = vmul.f32 %v6141_v40, %v6141_v40 }
 0xb39   :  { %v6149_v31 = vmul.f32 %v6142_v60, %v6142_v60  ;;  %v6150_v12 = vmul.f32 %v6143_v55, %v6143_v55  ;;  %v6151_v33 = vmul.f32 %v6144_v61, %v6144_v61 }
 0xb3a   :  { %v6152_v35 = vsel %vm6115_vm9, %v6145_v21, 0.0  ;;  %v6153_v43 = vsel %vm6115_vm9, %v6146_v9, 0.0  ;;  %v6155_v5 = vsel %vm6115_vm9, %v6147_v24, 0.0  ;;  %v6157_v16 = vsel %vm6115_vm9, %v6148_v49, 0.0  ;;  %v6212_v21 = vld [vmem:[%s14460_s10 + $0x8] sm:$0x1] }
 0xb3b   :  { %v6154_v62 = vadd.f32 %v6153_v43, %v6152_v35  ;;  %v6159_v13 = vsel %vm6115_vm9, %v6149_v31, 0.0  ;;  %v6161_v18 = vsel %vm6115_vm9, %v6150_v12, 0.0  ;;  %v6163_v36 = vsel %vm6127_vm10, %v6151_v33, 0.0  ;;  %v8228_v49 = vld [vmem:[%s14461_s11 + $0x30] sm:$0xff]  ;;  %v8227_v35 = vld [vmem:[%s14461_s11 + $0x28] sm:$0xff]  ;;  %v8226_v43 = vld [vmem:[%s14461_s11 + $0x20] sm:$0xff] }
 0xb3c   :  { %v6215_v24 = vunpack.c.l.bf16 %v6212_v21  ;;  %v6311_v31 = vld [vmem:[%s14461_s11 + $0x10] sm:$0xff] }
 0xb3d   :  { %v6156_v1 = vadd.f32 %v6155_v5, %v6154_v62  ;;  %v6312_v62 = vld [vmem:[%s14461_s11 + $0x18] sm:$0xff]  ;;  %v6310_v5 = vld [vmem:[%s14461_s11 + $0x8] sm:$0xff] }
 0xb3f   :  { %v6158_v7 = vadd.f32 %v6157_v16, %v6156_v1  ;;  %v6309_v1 = vld [vmem:[%s14461_s11] sm:$0xff] }
 0xb41   :  { %v6160_v47 = vadd.f32 %v6159_v13, %v6158_v7 }
 0xb43   :  { %v6162_v27 = vadd.f32 %v6161_v18, %v6160_v47 }
 0xb45   :  { %v6164_v25 = vadd.f32 %v6163_v36, %v6162_v27 }
 0xb47   :  { %v6165_v8 = vrot.slane %v6164_v25, 4 }
 0xb49   :  { %v6166_v2 = vadd.f32 %v6165_v8, %v6164_v25  ;;  %v8312_v25 = vld [vmem:[%s14460_s10 + $0x18] sm:$0xff]  }
 0xb4b   :  { %v6167_v52 = vrot.slane %v6166_v2, 2 }
 0xb4d   :  { %v6168_v23 = vadd.f32 %v6167_v52, %v6166_v2 }
 0xb4f   :  { %v6169_v28 = vrot.slane %v6168_v23, 1 }
 0xb51   :  { %v6170_v22 = vadd.f32 %v6169_v28, %v6168_v23  ;;  %v8310_v23 = vunpack.c.l.bf16 %v8312_v25  ;;  %v8311_v28 = vunpack.c.h.bf16 %v8312_v25 }
 0xb53   :  { %v6171_v30 = vmul.f32 0.02, %v6170_v22  ;;  %v8238_v22 = vld [vmem:[%s14460_s10 + $0x20] sm:$0x1] }
 0xb55   :  { %v6173_v41 = vadd.f32 1e-05, %v6171_v30  ;;  %v6598_v30 = vunpack.c.l.bf16 %v8238_v22 }
 0xb57   :  { %9954 = vrsqrt.f32 %v6173_v41  ;;  %v8250_v41 = vld [vmem:[%s14460_s10 + $0x24] sm:$0xff]  }
 0xb64   :  { %v9955_v39 = vpop.eup %9954 }
 0xb65   :  { %v6175_v38 = vmul.f32 %v9955_v39, %v6172_v51  ;;  %v6789_v51 = vunpack.c.l.bf16 %v8250_v41  ;;  %v6790_v39 = vunpack.c.h.bf16 %v8250_v41 }
 0xb67   :  { %v6180_v6 = vrot.slane %v6175_v38, %v13453_v34  ;;  %v8252_v38 = vld [vmem:[%s14460_s10 + $0x2c] sm:$0x1] }
 0xb69   :  { %v6188_v26 = vmul.f32 %v6180_v6, %v6144_v61  ;;  %v6187_v4 = vmul.f32 %v6180_v6, %v6143_v55  ;;  %v6186_v20 = vmul.f32 %v6180_v6, %v6142_v60  ;;  %v6185_v42 = vmul.f32 %v6180_v6, %v6141_v40  ;;  %v8229_v55 = vld [vmem:[%s14461_s11 + $0x38] sm:$0xff]  ;;  %v8221_v61 = vld [vmem:[%s14460_s10 + $0x14] sm:$0x1] }
 0xb6a   :  { %v6184_v37 = vmul.f32 %v6180_v6, %v6140_v32  ;;  %v6183_v48 = vmul.f32 %v6180_v6, %v6139_v0  ;;  %v6182_v15 = vmul.f32 %v6180_v6, %v6138_v29  ;;  %v6317_v29 = vunpack.c.l.bf16 %v8219_v53 }
 0xb6b   :  { %v6202_v46 = vadd.f32 %v8214_v56, %v6188_v26  ;;  %v6201_v14 = vadd.f32 %v8214_v56, %v6187_v4  ;;  %v6200_v50 = vadd.f32 %v8214_v56, %v6186_v20  ;;  %v6199_v44 = vadd.f32 %v8214_v56, %v6185_v42  ;;  %v8245_v26 = vld [vmem:[%s14461_s11 + $0x50] sm:$0xff]  ;;  %v8244_v4 = vld [vmem:[%s14461_s11 + $0x48] sm:$0xff]  ;;  %v8243_v20 = vld [vmem:[%s14461_s11 + $0x40] sm:$0xff] }
 0xb6c   :  { %v6198_v54 = vadd.f32 %v8214_v56, %v6184_v37  ;;  %v6197_v10 = vadd.f32 %v8214_v56, %v6183_v48  ;;  %v6196_v19 = vadd.f32 %v8214_v56, %v6182_v15  ;;  %v8306_v0 = vunpack.c.l.bf16 %v8305_v3  ;;  %v8246_v56 = vld [vmem:[%s14461_s11 + $0x58] sm:$0xff] }
 0xb6d   :  { %v14005_v58 = vmax.f32 %v6202_v46, 0.0  ;;  %v14011_v63 = vmax.f32 %v6201_v14, 0.0  ;;  %v14017_v45 = vmax.f32 %v6200_v50, 0.0  ;;  %v14023_v17 = vmax.f32 %v6199_v44, 0.0 }
 0xb6e   :  { %v14029_v11 = vmax.f32 %v6198_v54, 0.0  ;;  %v14041_v57 = vmax.f32 %v6197_v10, 0.0  ;;  %v14047_v32 = vmax.f32 %v6196_v19, 0.0  ;;  %v6318_v40 = vunpack.c.h.bf16 %v8219_v53  ;;  %v8260_v19 = vld [vmem:[%s14461_s11 + $0x78] sm:$0xff] }
 0xb6f   :  { %9660 = vmatpush3.msk.msra.mxu0 %vm1088_vm3, %v14005_v58  ;;  %9683 = vmatpush3.msk.msra.mxu1 %vm1088_vm3, %v14005_v58  ;;  %v8307_v60 = vunpack.c.h.bf16 %v8305_v3  ;;  %v6319_v9 = vunpack.c.l.bf16 %v8221_v61  ;;  %v6791_v6 = vunpack.c.l.bf16 %v8252_v38  ;;  %v8259_v3 = vld [vmem:[%s14461_s11 + $0x70] sm:$0xff] }
 0xb70   :  { %9661 = vmatprep.subr.mxu0 %v14630_v59  ;;  %9684 = vmatprep.subr.mxu1 %v14630_v59 }
 0xb71   :  { %9662 = vmatpush3.msra.mxu0 %v14011_v63  ;;  %9685 = vmatpush3.msra.mxu1 %v14011_v63 }
 0xb72   :  { %9663 = vmatprep.subr.mxu0 %v14630_v59  ;;  %9686 = vmatprep.subr.mxu1 %v14630_v59 }
 0xb73   :  { %9664 = vmatpush3.msra.mxu0 %v14017_v45  ;;  %9687 = vmatpush3.msra.mxu1 %v14017_v45 }
 0xb74   :  { %9665 = vmatprep.subr.mxu0 %v14630_v59  ;;  %9688 = vmatprep.subr.mxu1 %v14630_v59 }
 0xb75   :  { %9666 = vmatpush3.msra.mxu0 %v14023_v17  ;;  %9689 = vmatpush3.msra.mxu1 %v14023_v17 }
 0xb76   :  { %9667 = vmatprep.subr.mxu0 %v14630_v59  ;;  %9690 = vmatprep.subr.mxu1 %v14630_v59 }
 0xb77   :  { %9668 = vmatpush3.msra.mxu0 %v14029_v11  ;;  %9691 = vmatpush3.msra.mxu1 %v14029_v11 }
 0xb78   :  { %9669 = vmatprep.subr.mxu0 %v14630_v59  ;;  %9692 = vmatprep.subr.mxu1 %v14630_v59 }
 0xb79   :  { %9670 = vmatpush3.msra.mxu0 %v14041_v57  ;;  %9693 = vmatpush3.msra.mxu1 %v14041_v57 }
 0xb7a   :  { %9671 = vmatprep.subr.mxu0 %v14630_v59  ;;  %9694 = vmatprep.subr.mxu1 %v14630_v59 }
 0xb7b   :  { %9672 = vmatpush3.msra.mxu0 %v14047_v32  ;;  %9695 = vmatpush3.msra.mxu1 %v14047_v32 }
 0xb7c   :  { %9697 = vmatmul.mubr.msk.f32.vlgmr.msra.gmra.mxu1 %vm6216_vm11, %v6317_v29  ;;  %9674 = vmatmul.mubr.msk.f32.vlgmr.msra.gmra.mxu0 %vm6216_vm11, %v8306_v0  ;;  %v8258_v29 = vld [vmem:[%s14461_s11 + $0x68] sm:$0xff] }
 0xb7d   :  { %9699 = vmatprep.mubr.msk.f32.mxu1 %vm9981_vm1, %v14630_v59  ;;  %9676 = vmatprep.mubr.msk.f32.mxu0 %vm9981_vm1, %v14630_v59 }
 0xb7e   :  { %9705 = vmatprep.subr.mxu0 %v14630_v59  ;;  %9722 = vmatprep.subr.mxu1 %v14630_v59 }
 0xb7f   :  { %9706 = vmatpush3.msra.mxu0 %v8229_v55  ;;  %9723 = vmatpush3.msra.mxu1 %v6312_v62 }
 0xb80   :  { %9700 = vmatmul.mubr.msk.f32.gmra.mxu1 %vm6216_vm11, %v6318_v40  ;;  %9677 = vmatmul.mubr.msk.f32.gmra.mxu0 %vm6216_vm11, %v8307_v60 }
 0xb81   :  { %9702 = vmatprep.mubr.msk.f32.mxu1 %vm9981_vm1, %v14630_v59  ;;  %9679 = vmatprep.mubr.msk.f32.mxu0 %vm9981_vm1, %v14630_v59 }
 0xb82   :  { %9707 = vmatprep.subr.mxu0 %v14630_v59  ;;  %9724 = vmatprep.subr.mxu1 %v14630_v59 }
 0xb83   :  { %9708 = vmatpush3.msra.mxu0 %v8228_v49  ;;  %9725 = vmatpush3.msra.mxu1 %v6311_v31 }
 0xb84   :  { %9703 = vmatmul.mubr.msk.f32.gmra.mxu1 %vm6216_vm11, %v6319_v9  ;;  %9680 = vmatmul.mubr.msk.f32.gmra.mxu0 %vm6216_vm11, %v6215_v24 }
 0xb85   :  { %9709 = vmatprep.subr.mxu0 %v14630_v59  ;;  %9713 = vmatprep.mubr.msk.f32.mxu0 %vm9981_vm1, %v14630_v59 }
 0xb86   :  { %9710 = vmatpush3.msra.mxu0 %v8227_v35  ;;  %9730 = vmatprep.mubr.msk.f32.mxu1 %vm9981_vm1, %v14630_v59 }
 0xb87   :  { %9711 = vmatprep.subr.mxu0 %v14630_v59  ;;  %9726 = vmatprep.subr.mxu1 %v14630_v59 }
 0xb88   :  { %9712 = vmatpush3.msra.mxu0 %v8226_v43  ;;  %9727 = vmatpush3.msra.mxu1 %v6310_v5 }
 0xb89   :  { %9739 = vmatprep.subr.mxu0 %v14630_v59  ;;  %9728 = vmatprep.subr.mxu1 %v14630_v59 }
 0xb8a   :  { %9729 = vmatpush3.msra.mxu1 %v6309_v1 }
 0xb8b   :  { %9762 = vmatprep.subr.mxu1 %v14630_v59 }
 0xc3c   :  { %v6395_v12 = vpop.f32.mrf.mxu1  ;;  %v6295_v16 = vpop.f32.mrf.mxu0 }
 0xc3d   :  { %9714 = vmatmul.mubr.msk.f32.vlgmr.msra.gmra.mxu0 %vm6115_vm9, %v6395_v12  ;;  %9731 = vmatmul.mubr.msk.f32.vlgmr.msra.gmra.mxu1 %vm6115_vm9, %v6295_v16 }
 0xc3e   :  { %9740 = vmatpush3.msk.msra.mxu0 %vm1088_vm3, %v14005_v58  ;;  %v9698_v7 = vpop.f32.mrf.mxu1  ;;  %9716 = vmatprep.mubr.msk.f32.mxu0 %vm9981_vm1, %v14630_v59  ;;  %v9675_v33 = vpop.f32.mrf.mxu0 }
 0xc3f   :  { %9741 = vmatprep.subr.mxu0 %v14630_v59  ;;  %9733 = vmatprep.mubr.msk.f32.mxu1 %vm9981_vm1, %v14630_v59 }
 0xc40   :  { %9742 = vmatpush3.msra.mxu0 %v14011_v63  ;;  %v6400_v13 = vpop.f32.mrf.mxu1  ;;  %v6300_v47 = vpop.f32.mrf.mxu0  ;;  %9763 = vmatpush3.msra.mxu1 %v8246_v56 }
 0xc41   :  { %9743 = vmatprep.subr.mxu0 %v14630_v59  ;;  %9717 = vmatmul.mubr.msk.f32.gmra.mxu0 %vm6115_vm9, %v6400_v13 }
 0xc42   :  { %9744 = vmatpush3.msra.mxu0 %v14017_v45  ;;  %v9701_v18 = vpop.f32.mrf.mxu1  ;;  %9719 = vmatprep.mubr.msk.f32.mxu0 %vm9981_vm1, %v14630_v59  ;;  %v9678_v27 = vpop.f32.mrf.mxu0 }
 0xc43   :  { %9745 = vmatprep.subr.mxu0 %v14630_v59  ;;  %9734 = vmatmul.mubr.msk.f32.gmra.mxu1 %vm6115_vm9, %v6300_v47 }
 0xc44   :  { %9746 = vmatpush3.msra.mxu0 %v14023_v17  ;;  %v6405_v36 = vpop.f32.mrf.mxu1  ;;  %v6305_v8 = vpop.f32.mrf.mxu0  ;;  %9736 = vmatprep.mubr.msk.f32.mxu1 %vm9981_vm1, %v14630_v59 }
 0xc45   :  { %9747 = vmatprep.subr.mxu0 %v14630_v59  ;;  %9720 = vmatmul.mubr.msk.f32.gmra.mxu0 %vm6115_vm9, %v6405_v36 }
 0xc46   :  { %9748 = vmatpush3.msra.mxu0 %v14029_v11  ;;  %9753 = vmatprep.mubr.msk.f32.mxu0 %vm9981_vm1, %v14630_v59  ;;  %v9704_v2 = vpop.f32.mrf.mxu1  ;;  %v9681_v52 = vpop.f32.mrf.mxu0 }
 0xc47   :  { %9749 = vmatprep.subr.mxu0 %v14630_v59  ;;  %9737 = vmatmul.mubr.msk.f32.gmra.mxu1 %vm6115_vm9, %v6305_v8 }
 0xc48   :  { %9750 = vmatpush3.msra.mxu0 %v14041_v57  ;;  %9770 = vmatprep.mubr.msk.f32.mxu1 %vm9981_vm1, %v14630_v59 }
 0xc49   :  { %9751 = vmatprep.subr.mxu0 %v14630_v59  ;;  %9764 = vmatprep.subr.mxu1 %v14630_v59 }
 0xc4a   :  { %9752 = vmatpush3.msra.mxu0 %v14047_v32  ;;  %9765 = vmatpush3.msra.mxu1 %v8245_v26 }
 0xc4b   :  { %9754 = vmatmul.mubr.msk.f32.vlgmr.msra.gmra.mxu0 %vm6216_vm11, %v8310_v23  ;;  %9779 = vmatprep.subr.mxu0 %v14630_v59 }
 0xc4c   :  { %9780 = vmatpush3.msk.msra.mxu0 %vm1088_vm3, %v14005_v58  ;;  %9756 = vmatprep.mubr.msk.f32.mxu0 %vm9981_vm1, %v14630_v59 }
 0xc4d   :  { %9781 = vmatprep.subr.mxu0 %v14630_v59  ;;  %9766 = vmatprep.subr.mxu1 %v14630_v59 }
 0xc4e   :  { %9782 = vmatpush3.msra.mxu0 %v14011_v63  ;;  %9767 = vmatpush3.msra.mxu1 %v8244_v4 }
 0xc4f   :  { %9757 = vmatmul.mubr.msk.f32.gmra.mxu0 %vm6216_vm11, %v8311_v28  ;;  %9783 = vmatprep.subr.mxu0 %v14630_v59 }
 0xc50   :  { %9784 = vmatpush3.msra.mxu0 %v14017_v45  ;;  %9759 = vmatprep.mubr.msk.f32.mxu0 %vm9981_vm1, %v14630_v59 }
 0xc51   :  { %9785 = vmatprep.subr.mxu0 %v14630_v59  ;;  %9768 = vmatprep.subr.mxu1 %v14630_v59 }
 0xc52   :  { %9786 = vmatpush3.msra.mxu0 %v14023_v17  ;;  %9769 = vmatpush3.msra.mxu1 %v8243_v20 }
 0xc53   :  { %9760 = vmatmul.mubr.msk.f32.gmra.mxu0 %vm6216_vm11, %v6598_v30  ;;  %9787 = vmatprep.subr.mxu0 %v14630_v59 }
 0xc54   :  { %9788 = vmatpush3.msra.mxu0 %v14029_v11  ;;  %9793 = vmatprep.mubr.msk.f32.mxu0 %vm9981_vm1, %v14630_v59 }
 0xc55   :  { %9789 = vmatprep.subr.mxu0 %v14630_v59  ;;  %9802 = vmatprep.subr.mxu1 %v14630_v59 }
 0xc56   :  { %9790 = vmatpush3.msra.mxu0 %v14041_v57 }
 0xc57   :  { %9791 = vmatprep.subr.mxu0 %v14630_v59 }
 0xc58   :  { %9792 = vmatpush3.msra.mxu0 %v14047_v32  ;;  %v8257_v32 = vld [vmem:[%s14461_s11 + $0x60] sm:$0xff] }
 0xc59   :  { %9794 = vmatmul.mubr.msk.f32.vlgmr.msra.gmra.mxu0 %vm6216_vm11, %v6789_v51  ;;  %9819 = vmatprep.subr.mxu0 %v14630_v59 }
 0xc5a   :  { %9796 = vmatprep.mubr.msk.f32.mxu0 %vm9981_vm1, %v14630_v59 }
 0xc5d   :  { %9797 = vmatmul.mubr.msk.f32.gmra.mxu0 %vm6216_vm11, %v6790_v39 }
 0xc5e   :  { %9799 = vmatprep.mubr.msk.f32.mxu0 %vm9981_vm1, %v14630_v59 }
 0xc61   :  { %9800 = vmatmul.mubr.msk.f32.gmra.mxu0 %vm6216_vm11, %v6791_v6 }
 0xc62   :  { %9825 = vmatprep.mubr.msk.f32.mxu0 %vm9981_vm1, %v14630_v59 }
 0xcfd   :  { %v6489_v42 = vpop.f32.mrf.mxu0  ;;  %v6578_v37 = vpop.f32.mrf.mxu1 }
 0xcfe   :  { %v6579_v48 = vadd.f32 %v6578_v37, %v6489_v42 }
 0xcff   :  { %v9715_v15 = vpop.f32.mrf.mxu0  ;;  %v9732_v46 = vpop.f32.mrf.mxu1 }
 0xd01   :  { %v6494_v14 = vpop.f32.mrf.mxu0 }
 0xd03   :  { %v9718_v58 = vpop.f32.mrf.mxu0  ;;  %v6583_v50 = vpop.f32.mrf.mxu1 }
 0xd04   :  { %v6584_v63 = vadd.f32 %v6583_v50, %v6494_v14 }
 0xd05   :  { %v6499_v44 = vpop.f32.mrf.mxu0  ;;  %v9735_v45 = vpop.f32.mrf.mxu1 }
 0xd07   :  { %v9721_v54 = vpop.f32.mrf.mxu0  ;;  %v6588_v17 = vpop.f32.mrf.mxu1 }
 0xd08   :  { %v6589_v10 = vadd.f32 %v6588_v17, %v6499_v44 }
 0xd09   :  { %v9738_v11 = vpop.f32.mrf.mxu1 }
 0xd0b   :  { %v6674_v53 = vpop.f32.mrf.mxu0 }
 0xd0c   :  { %9771 = vmatmul.mubr.msk.f32.vlgmr.msra.gmra.mxu1 %vm6115_vm9, %v6674_v53 }
 0xd0d   :  { %v9755_v57 = vpop.f32.mrf.mxu0  ;;  %9773 = vmatprep.mubr.msk.f32.mxu1 %vm9981_vm1, %v14630_v59  ;;  %9803 = vmatpush3.msra.mxu1 %v8260_v19 }
 0xd0e   :  { %9804 = vmatprep.subr.mxu1 %v14630_v59  ;;  %v7011_v57 = vld [vmem:[%s14462_s12] sm:$0x1] }
 0xd0f   :  { %v6679_v0 = vpop.f32.mrf.mxu0  ;;  %9805 = vmatpush3.msra.mxu1 %v8259_v3 }
 0xd10   :  { %9774 = vmatmul.mubr.msk.f32.gmra.mxu1 %vm6115_vm9, %v6679_v0  ;;  %9806 = vmatprep.subr.mxu1 %v14630_v59 }
 0xd11   :  { %v9758_v40 = vpop.f32.mrf.mxu0  ;;  %9776 = vmatprep.mubr.msk.f32.mxu1 %vm9981_vm1, %v14630_v59  ;;  %9807 = vmatpush3.msra.mxu1 %v8258_v29 }
 0xd12   :  { %9808 = vmatprep.subr.mxu1 %v14630_v59  ;;  %v8264_v40 = vld [vmem:[%s14463_s13] ss:$0 sm:$0xff] }
 0xd13   :  { %v6684_v60 = vpop.f32.mrf.mxu0  ;;  %9809 = vmatpush3.msra.mxu1 %v8257_v32 }
 0xd14   :  { %9777 = vmatmul.mubr.msk.f32.gmra.mxu1 %vm6115_vm9, %v6684_v60  ;;  %9828 = vmatprep.subr.mxu1 %v14630_v59 }
 0xd15   :  { %v9761_v55 = vpop.f32.mrf.mxu0  ;;  %9810 = vmatprep.mubr.msk.f32.mxu1 %vm9981_vm1, %v14630_v59 }
 0xd19   :  { %v6867_v61 = vpop.f32.mrf.mxu0 }
 0xd1a   :  { %9811 = vmatmul.mubr.msk.f32.vlgmr.msra.gmra.mxu1 %vm6115_vm9, %v6867_v61 }
 0xd1b   :  { %v9795_v21 = vpop.f32.mrf.mxu0  ;;  %9813 = vmatprep.mubr.msk.f32.mxu1 %vm9981_vm1, %v14630_v59 }
 0xd1d   :  { %v6872_v9 = vpop.f32.mrf.mxu0 }
 0xd1e   :  { %9814 = vmatmul.mubr.msk.f32.gmra.mxu1 %vm6115_vm9, %v6872_v9 }
 0xd1f   :  { %v9798_v24 = vpop.f32.mrf.mxu0  ;;  %9816 = vmatprep.mubr.msk.f32.mxu1 %vm9981_vm1, %v14630_v59 }
 0xd21   :  { %v6877_v49 = vpop.f32.mrf.mxu0 }
 0xd22   :  { %9817 = vmatmul.mubr.msk.f32.gmra.mxu1 %vm6115_vm9, %v6877_v49 }
 0xd23   :  { %v9801_v35 = vpop.f32.mrf.mxu0  ;;  %9834 = vmatprep.mubr.msk.f32.mxu1 %vm9981_vm1, %v14630_v59 }
 0xd24   :  { %v14257_v35 = vld [vmem:[%s14464_s14 + $0x4] sm:$0xff]  }
 0xdcc   :  { %v6768_v43 = vpop.f32.mrf.mxu1 }
 0xdcd   :  { %v6782_v7 = vadd.f32 %v6768_v43, %v6579_v48 }
 0xdce   :  { %v9772_v62 = vpop.f32.mrf.mxu1 }
 0xdcf   :  { %v7126_v62 = vunpack.c.l.bf16 %v14257_v35 }
 0xdd0   :  { %v6773_v31 = vpop.f32.mrf.mxu1 }
 0xdd1   :  { %v6783_v13 = vadd.f32 %v6773_v31, %v6584_v63 }
 0xdd2   :  { %v9775_v5 = vpop.f32.mrf.mxu1 }
 0xdd4   :  { %v6778_v1 = vpop.f32.mrf.mxu1 }
 0xdd5   :  { %v6784_v25 = vadd.f32 %v6778_v1, %v6589_v10  ;;  %v8277_v1 = vld [vmem:[%s14465_s15 + $0x78] sm:$0xff] }
 0xdd6   :  { %v9778_v12 = vpop.f32.mrf.mxu1 }
 0xdd7   :  { %v8276_v12 = vld [vmem:[%s14465_s15 + $0x70] sm:$0xff] }
 0xdda   :  { %v6961_v16 = vpop.f32.mrf.mxu1 }
 0xddb   :  { %v6975_v47 = vadd.f32 %v6961_v16, %v6782_v7  ;;  %v8275_v16 = vld [vmem:[%s14465_s15 + $0x68] sm:$0xff]  ;;  %v8274_v7 = vld [vmem:[%s14465_s15 + $0x60] sm:$0xff] }
 0xddc   :  { %v9812_v33 = vpop.f32.mrf.mxu1 }
 0xddd   :  { %v6979_v8 = vsel %vm6978_vm12, %v6975_v47, 0.0  ;;  %v8273_v33 = vld [vmem:[%s14465_s15 + $0x58] sm:$0xff] }
 0xdde   :  { %v6966_v18 = vpop.f32.mrf.mxu1 }
 0xddf   :  { %v6976_v27 = vadd.f32 %v6966_v18, %v6783_v13  ;;  %v8272_v13 = vld [vmem:[%s14465_s15 + $0x50] sm:$0xff]  ;;  %v8270_v18 = vld [vmem:[%s14465_s15 + $0x40] sm:$0xff] }
 0xde0   :  { %v9815_v36 = vpop.f32.mrf.mxu1 }
 0xde1   :  { %v6980_v2 = vsel %vm6978_vm12, %v6976_v27, 0.0  ;;  %v7122_v36 = vld [vmem:[%s14465_s15 + $0x30] sm:$0xff] }
 0xde2   :  { %v6981_v52 = vadd.f32 %v6980_v2, %v6979_v8  ;;  %v6971_v23 = vpop.f32.mrf.mxu1  ;;  %v7120_v8 = vld [vmem:[%s14465_s15 + $0x20] sm:$0xff]  ;;  %v7119_v2 = vld [vmem:[%s14465_s15 + $0x18] sm:$0xff] }
 0xde3   :  { %v6977_v28 = vadd.f32 %v6971_v23, %v6784_v25  ;;  %v7121_v25 = vld [vmem:[%s14465_s15 + $0x28] sm:$0xff] }
 0xde4   :  { %v9818_v22 = vpop.f32.mrf.mxu1  ;;  %v7117_v23 = vld [vmem:[%s14465_s15 + $0x8] sm:$0xff] }
 0xde5   :  { %v6983_v30 = vsel %vm6982_vm13, %v6977_v28, 0.0 }
 0xde6   :  { %v6984_v41 = vadd.f32 %v6983_v30, %v6981_v52  ;;  %v7118_v52 = vld [vmem:[%s14465_s15 + $0x10] sm:$0xff] }
 0xde8   :  { %v6985_v51 = vrot.slane %v6984_v41, 4 }
 0xdea   :  { %v6986_v39 = vadd.f32 %v6985_v51, %v6984_v41  ;;  %v8290_v41 = vld [vmem:[%s14465_s15 + $0xb8] sm:$0xff] }
 0xdec   :  { %v6987_v38 = vrot.slane %v6986_v39, 2 }
 0xdee   :  { %v6988_v6 = vadd.f32 %v6987_v38, %v6986_v39  ;;  %v8289_v39 = vld [vmem:[%s14465_s15 + $0xb0] sm:$0xff] }
 0xdf0   :  { %v6989_v56 = vrot.slane %v6988_v6, 1 }
 0xdf2   :  { %v6990_v26 = vadd.f32 %v6989_v56, %v6988_v6  ;;  %v7357_v6 = vunpack.c.h.bf16 %v14257_v35  ;;  %v8288_v56 = vld [vmem:[%s14465_s15 + $0xa8] sm:$0xff] }
 0xdf4   :  { %v6992_v4 = vmul.f32 0.055555556, %v6990_v26  ;;  %v8287_v26 = vld [vmem:[%s14465_s15 + $0xa0] sm:$0xff] }
 0xdf6   :  { %v6993_v20 = vsub.f32 %v6975_v47, %v6992_v4  ;;  %v6994_v42 = vsub.f32 %v6976_v27, %v6992_v4  ;;  %v6995_v37 = vsub.f32 %v6977_v28, %v6992_v4  ;;  %v8271_v47 = vld [vmem:[%s14465_s15 + $0x48] sm:$0xff]  ;;  %v7123_v27 = vld [vmem:[%s14465_s15 + $0x38] sm:$0xff]  ;;  %v7116_v28 = vld [vmem:[%s14465_s15] sm:$0xff] }
 0xdf8   :  { %v6996_v48 = vmul.f32 %v6993_v20, %v6993_v20  ;;  %v6997_v15 = vmul.f32 %v6994_v42, %v6994_v42  ;;  %v6998_v46 = vmul.f32 %v6995_v37, %v6995_v37 }
 0xdfa   :  { %v6999_v14 = vsel %vm6978_vm12, %v6996_v48, 0.0  ;;  %v7000_v58 = vsel %vm6978_vm12, %v6997_v15, 0.0  ;;  %v7002_v63 = vsel %vm6982_vm13, %v6998_v46, 0.0  ;;  %v8285_v48 = vld [vmem:[%s14465_s15 + $0x90] sm:$0xff]  ;;  %v8300_v15 = vld [vmem:[%s14465_s15 + $0xe8] sm:$0xff] }
 0xdfb   :  { %v7001_v50 = vadd.f32 %v7000_v58, %v6999_v14  ;;  %v8284_v46 = vld [vmem:[%s14465_s15 + $0x88] sm:$0xff]  ;;  %v8299_v14 = vld [vmem:[%s14465_s15 + $0xe0] sm:$0xff] }
 0xdfc   :  { %v8283_v58 = vld [vmem:[%s14465_s15 + $0x80] sm:$0xff] }
 0xdfd   :  { %v7003_v44 = vadd.f32 %v7002_v63, %v7001_v50  ;;  %v8298_v50 = vld [vmem:[%s14465_s15 + $0xd8] sm:$0xff]  ;;  %v8297_v63 = vld [vmem:[%s14465_s15 + $0xd0] sm:$0xff] }
 0xdff   :  { %v7004_v45 = vrot.slane %v7003_v44, 4 }
 0xe01   :  { %v7005_v54 = vadd.f32 %v7004_v45, %v7003_v44  ;;  %v8296_v44 = vld [vmem:[%s14465_s15 + $0xc8] sm:$0xff]  ;;  %v8295_v45 = vld [vmem:[%s14465_s15 + $0xc0] sm:$0xff] }
 0xe03   :  { %v7006_v17 = vrot.slane %v7005_v54, 2 }
 0xe05   :  { %v7007_v10 = vadd.f32 %v7006_v17, %v7005_v54 }
 0xe07   :  { %v7008_v11 = vrot.slane %v7007_v10, 1 }
 0xe09   :  { %v7009_v19 = vadd.f32 %v7008_v11, %v7007_v10 }
 0xe0b   :  { %v7010_v53 = vmul.f32 0.055555556, %v7009_v19 }
 0xe0d   :  { %v7012_v3 = vadd.f32 1e-05, %v7010_v53 }
 0xe0f   :  { %9956 = vrsqrt.f32 %v7012_v3 }
 0xe1c   :  { %v9957_v29 = vpop.eup %9956 }
 0xe1d   :  { %v7014_v0 = vmul.f32 %v9957_v29, %v7011_v57 }
 0xe1f   :  { %v7019_v32 = vrot.slane %v7014_v0, %v13453_v34  ;;  %v14262_v34 = vld [vmem:[%s14464_s14] ss:$12 sps:$4 sm:$0xff]  }
 0xe20   :  { %v7038_v31 = vunpack.c.l.bf16 %v14262_v34  ;;  %v7516_v4 = vunpack.c.h.bf16 %v14262_v34 }
 0xe21   :  { %v7023_v60 = vmul.f32 %v7019_v32, %v6995_v37  ;;  %v7022_v55 = vmul.f32 %v7019_v32, %v6994_v42  ;;  %v7021_v61 = vmul.f32 %v7019_v32, %v6993_v20  ;;  %v8302_v20 = vld [vmem:[%s14465_s15 + $0xf8] sm:$0xff]  ;;  %v8301_v37 = vld [vmem:[%s14465_s15 + $0xf0] sm:$0xff] }
 0xe22   :  { %v8286_v42 = vld [vmem:[%s14465_s15 + $0x98] sm:$0xff]  ;;  %s9958_s15 = scalar_lea.vmem %s7681_s23, 128 }
 0xe23   :  { %v7033_v21 = vadd.f32 %v8264_v40, %v7023_v60  ;;  %v7032_v9 = vadd.f32 %v8264_v40, %v7022_v55  ;;  %v7031_v49 = vadd.f32 %v8264_v40, %v7021_v61  ;;  %p9959_p0 = scmp.ne.s32.totalorder %s7681_s23, %s9958_s15  ;;  %p9964_p2 = scmp.lt.s32.totalorder %s9958_s15, %s9958_s15 }
 0xe25   :  { %v14252_v24 = vmax.f32 %v7033_v21, 0.0  ;;  %v14268_v43 = vmax.f32 %v7032_v9, 0.0  ;;  %v14276_v5 = vmax.f32 %v7031_v49, 0.0  ;;  %p9965_p3 = por %p9964_p2, %p9963_p1 }
 0xe27   :  { %9820 = vmatpush3.msk.msra.mxu0 %vm1088_vm3, %v14252_v24  ;;  %9829 = vmatpush3.msk.msra.mxu1 %vm1088_vm3, %v14252_v24  ;;  %p9966_p4 = pnand %p9965_p3, %p9959_p0 }
 0xe28   :  { %9821 = vmatprep.subr.mxu0 %v14630_v59  ;;  %9830 = vmatprep.subr.mxu1 %v14630_v59 }
 0xe29   :  { %9822 = vmatpush3.msra.mxu0 %v14268_v43  ;;  %9831 = vmatpush3.msra.mxu1 %v14268_v43 }
 0xe2a   :  { %9823 = vmatprep.subr.mxu0 %v14630_v59  ;;  %9832 = vmatprep.subr.mxu1 %v14630_v59 }
 0xe2b   :  { %9824 = vmatpush3.msra.mxu0 %v14276_v5  ;;  %9833 = vmatpush3.msra.mxu1 %v14276_v5 }
 0xe2c   :  { %9835 = vmatmul.mubr.msk.f32.vlgmr.msra.gmra.mxu1 %vm7039_vm14, %v7126_v62  ;;  %9826 = vmatmul.mubr.msk.f32.vlgmr.msra.gmra.mxu0 %vm7039_vm14, %v7038_v31 }
 0xe2d   :  { %9837 = vmatprep.subr.mxu0 %v14630_v59  ;;  %9853 = vmatprep.mubr.msk.f32.mxu0 %vm9981_vm1, %v14630_v59 }
 0xe2e   :  { %9838 = vmatpush3.msra.mxu0 %v8277_v1  ;;  %9856 = vmatprep.subr.mxu1 %v14630_v59 }
 0xe2f   :  { %9839 = vmatprep.subr.mxu0 %v14630_v59  ;;  %9872 = vmatprep.mubr.msk.f32.mxu1 %vm9981_vm1, %v14630_v59 }
 0xe30   :  { %9840 = vmatpush3.msra.mxu0 %v8276_v12  ;;  %9857 = vmatpush3.msra.mxu1 %v7123_v27 }
 0xe31   :  { %9841 = vmatprep.subr.mxu0 %v14630_v59  ;;  %9858 = vmatprep.subr.mxu1 %v14630_v59 }
 0xe32   :  { %9842 = vmatpush3.msra.mxu0 %v8275_v16  ;;  %9859 = vmatpush3.msra.mxu1 %v7122_v36 }
 0xe33   :  { %9843 = vmatprep.subr.mxu0 %v14630_v59  ;;  %9860 = vmatprep.subr.mxu1 %v14630_v59 }
 0xe34   :  { %9844 = vmatpush3.msra.mxu0 %v8274_v7  ;;  %9861 = vmatpush3.msra.mxu1 %v7121_v25 }
 0xe35   :  { %9845 = vmatprep.subr.mxu0 %v14630_v59  ;;  %9862 = vmatprep.subr.mxu1 %v14630_v59 }
 0xe36   :  { %9846 = vmatpush3.msra.mxu0 %v8273_v33  ;;  %9863 = vmatpush3.msra.mxu1 %v7120_v8 }
 0xe37   :  { %9847 = vmatprep.subr.mxu0 %v14630_v59  ;;  %9864 = vmatprep.subr.mxu1 %v14630_v59 }
 0xe38   :  { %9848 = vmatpush3.msra.mxu0 %v8272_v13  ;;  %9865 = vmatpush3.msra.mxu1 %v7119_v2 }
 0xe39   :  { %9849 = vmatprep.subr.mxu0 %v14630_v59  ;;  %9866 = vmatprep.subr.mxu1 %v14630_v59 }
 0xe3a   :  { %9850 = vmatpush3.msra.mxu0 %v8271_v47  ;;  %9867 = vmatpush3.msra.mxu1 %v7118_v52 }
 0xe3b   :  { %9851 = vmatprep.subr.mxu0 %v14630_v59  ;;  %9868 = vmatprep.subr.mxu1 %v14630_v59 }
 0xe3c   :  { %9852 = vmatpush3.msra.mxu0 %v8270_v18  ;;  %9869 = vmatpush3.msra.mxu1 %v7117_v23 }
 0xe3d   :  { %9875 = vmatprep.subr.mxu0 %v14630_v59  ;;  %9870 = vmatprep.subr.mxu1 %v14630_v59 }
 0xe3e   :  { %9871 = vmatpush3.msra.mxu1 %v7116_v28 }
 0xe3f   :  { %9884 = vmatprep.subr.mxu1 %v14630_v59 }
 0xeec   :  { %v7196_v22 = vpop.f32.mrf.mxu1  ;;  %v7112_v30 = vpop.f32.mrf.mxu0 }
 0xeed   :  { %9854 = vmatmul.mubr.msk.f32.vlgmr.msra.gmra.mxu0 %vm6978_vm12, %v7196_v22  ;;  %9873 = vmatmul.mubr.msk.f32.vlgmr.msra.gmra.mxu1 %vm6978_vm12, %v7112_v30 }
 0xeee   :  { %9876 = vmatpush3.msk.msra.mxu0 %vm1088_vm3, %v14252_v24  ;;  %9881 = vmatprep.mubr.msk.f32.mxu0 %vm9981_vm1, %v14630_v59  ;;  %v9836_v51 = vpop.f32.mrf.mxu1  ;;  %v9827_v38 = vpop.f32.mrf.mxu0 }
 0xeef   :  { %9877 = vmatprep.subr.mxu0 %v14630_v59  ;;  %9885 = vmatpush3.msra.mxu1 %v8290_v41 }
 0xef0   :  { %9878 = vmatpush3.msra.mxu0 %v14268_v43  ;;  %9886 = vmatprep.subr.mxu1 %v14630_v59 }
 0xef1   :  { %9879 = vmatprep.subr.mxu0 %v14630_v59  ;;  %9887 = vmatpush3.msra.mxu1 %v8289_v39 }
 0xef2   :  { %9880 = vmatpush3.msra.mxu0 %v14276_v5  ;;  %9888 = vmatprep.subr.mxu1 %v14630_v59 }
 0xef3   :  { %9882 = vmatmul.mubr.msk.f32.vlgmr.msra.gmra.mxu0 %vm7039_vm14, %v7357_v6  ;;  %9903 = vmatprep.subr.mxu0 %v14630_v59 }
 0xef4   :  { %9904 = vmatpush3.msk.msra.mxu0 %vm1088_vm3, %v14252_v24  ;;  %9909 = vmatprep.mubr.msk.f32.mxu0 %vm9981_vm1, %v14630_v59 }
 0xef5   :  { %9905 = vmatprep.subr.mxu0 %v14630_v59  ;;  %9889 = vmatpush3.msra.mxu1 %v8288_v56 }
 0xef6   :  { %9906 = vmatpush3.msra.mxu0 %v14268_v43  ;;  %9890 = vmatprep.subr.mxu1 %v14630_v59 }
 0xef7   :  { %9907 = vmatprep.subr.mxu0 %v14630_v59  ;;  %9891 = vmatpush3.msra.mxu1 %v8287_v26 }
 0xef8   :  { %9908 = vmatpush3.msra.mxu0 %v14276_v5  ;;  %9892 = vmatprep.subr.mxu1 %v14630_v59 }
 0xef9   :  { %9910 = vmatmul.mubr.msk.f32.vlgmr.msra.gmra.mxu0 %vm7039_vm14, %v7516_v4  ;;  %9912 = vmatprep.subr.mxu0 %v14630_v59 }
 0xefa   :  { %9913 = vmatpush3.msra.mxu0 %v8302_v20  ;;  %9893 = vmatpush3.msra.mxu1 %v8286_v42 }
 0xefb   :  { %9914 = vmatprep.subr.mxu0 %v14630_v59  ;;  %9894 = vmatprep.subr.mxu1 %v14630_v59 }
 0xefc   :  { %9915 = vmatpush3.msra.mxu0 %v8301_v37  ;;  %9900 = vmatprep.mubr.msk.f32.mxu1 %vm9981_vm1, %v14630_v59 }
 0xefd   :  { %9916 = vmatprep.subr.mxu0 %v14630_v59  ;;  %9928 = vmatprep.mubr.msk.f32.mxu0 %vm9981_vm1, %v14630_v59 }
 0xefe   :  { %9895 = vmatpush3.msra.mxu1 %v8285_v48  ;;  %9917 = vmatpush3.msra.mxu0 %v8300_v15 }
 0xeff   :  { %9896 = vmatprep.subr.mxu1 %v14630_v59  ;;  %9918 = vmatprep.subr.mxu0 %v14630_v59 }
 0xf00   :  { %9897 = vmatpush3.msra.mxu1 %v8284_v46  ;;  %9919 = vmatpush3.msra.mxu0 %v8299_v14 }
 0xf01   :  { %9898 = vmatprep.subr.mxu1 %v14630_v59  ;;  %9920 = vmatprep.subr.mxu0 %v14630_v59 }
 0xf02   :  { %9899 = vmatpush3.msra.mxu1 %v8283_v58  ;;  %9921 = vmatpush3.msra.mxu0 %v8298_v50 }
 0xf03   :  { %9922 = vmatprep.subr.mxu0 %v14630_v59 }
 0xf04   :  { %9923 = vmatpush3.msra.mxu0 %v8297_v63 }
 0xf05   :  { %9924 = vmatprep.subr.mxu0 %v14630_v59 }
 0xf06   :  { %9925 = vmatpush3.msra.mxu0 %v8296_v44 }
 0xf07   :  { %9926 = vmatprep.subr.mxu0 %v14630_v59 }
 0xf08   :  { %9927 = vmatpush3.msra.mxu0 %v8295_v45 }
 0xfad   :  { %v7278_v54 = vpop.f32.mrf.mxu0  ;;  %v7351_v17 = vpop.f32.mrf.mxu1 }
 0xfae   :  { %v7352_v10 = vadd.f32 %v7351_v17, %v7278_v54 }
 0xfaf   :  { %v9855_v11 = vpop.f32.mrf.mxu0  ;;  %v9874_v19 = vpop.f32.mrf.mxu1 }
 0xfb3   :  { %v7427_v53 = vpop.f32.mrf.mxu0 }
 0xfb4   :  { %9901 = vmatmul.mubr.msk.f32.vlgmr.msra.gmra.mxu1 %vm6978_vm12, %v7427_v53 }
 0xfb5   :  { %v9883_v3 = vpop.f32.mrf.mxu0 }
 0xfb9   :  { %v7586_v57 = vpop.f32.mrf.mxu0 }
 0xfba   :  { %9929 = vmatmul.mubr.msk.f32.vlgmr.msra.gmra.mxu0 %vm6978_vm12, %v7586_v57 }
 0xfbb   :  { %v9911_v29 = vpop.f32.mrf.mxu0 }
0x1074   :  { %v7509_v0 = vpop.f32.mrf.mxu1 }
0x1075   :  { %v7513_v32 = vadd.f32 %v7509_v0, %v7352_v10 }
0x1076   :  { %v9902_v59 = vpop.f32.mrf.mxu1 }
0x107a   :  { %v7668_v40 = vpop.f32.mrf.mxu0 }
0x107b   :  { %v7672_v60 = vadd.f32 %v7668_v40, %v7513_v32 }
0x107c   :  { %v9930_v55 = vpop.f32.mrf.mxu0 }
0x107d   :  { %7673 = vst.msk [vmem:[#allocation2] sm:$0xff] %vm4810_vm6, %v7672_v60 }
0x107e   :  { %9969 = shalt.err (!%p9966_p4)
}
0x107f   :  { %7683 = dma.vmem_to_hbm [thread:$0]  %s7681_s23, 128, %s14466_s16, [#allocation3]  }
0x1080   :  { %9978 = dma.done.wait [#allocation3], 128  }
0x1081   :  { %9979 = vsyncadd [#allocation3], 4294967168 }
0x1082   :  { %7687 = vsyncpa [#allocation3], 1 }

</bundles_post_ra>
